<compile_context>
chip_gen: v6e
topology: v6e:2x2x1
jax: 0.10.0
libtpu: 0.0.40
codegen_flags: <defaults>
</compile_context>

<pallas_src>
import jax
import jax.numpy as jnp
from jax.experimental import pallas as pl
from jax.experimental.pallas import tpu as pltpu

S_DIM = 405
A_DIM = 1125
H1 = 512
H2 = 2048
HV = 128

LANE = 128
SUB = 8
S_PAD = 512      # round_up(405, 128)
A_PAD = 1152     # round_up(1125, 128)
NEG_BIG = -1e30  # bias for padded softmax columns -> exp() underflows to 0


def _round_up(n, m):
    return (n + m - 1) // m * m


def net_kernel(x_ref,
               w_pi1_ref, b_pi1_ref,
               w_pi2_ref, b_pi2_ref,
               w_d_ref, b_d_ref,
               w_v1_ref, b_v1_ref,
               w_v2_ref, b_v2_ref,
               logits_ref, values_ref):
    x = x_ref[...]                                   # [TB, S_PAD] f32
    x_bf = x.astype(jnp.bfloat16)

    # ---- policy head: bf16 weights on the MXU, f32 accumulation ----
    h1 = jnp.dot(x_bf, w_pi1_ref[...], preferred_element_type=jnp.float32) + b_pi1_ref[...]
    h1 = jnp.maximum(h1, 0.0)                        # ReLU
    h2 = jnp.dot(h1.astype(jnp.bfloat16), w_pi2_ref[...],
                 preferred_element_type=jnp.float32) + b_pi2_ref[...]
    z = jnp.dot(h2.astype(jnp.bfloat16), w_d_ref[...],
                preferred_element_type=jnp.float32) + b_d_ref[...]

    # softmax over dim=1 (numerically stable); padded columns have bias -1e30 -> prob 0
    z = z - jnp.max(z, axis=1, keepdims=True)
    e = jnp.exp(z)
    denom = jnp.sum(e, axis=1, keepdims=True)
    r = pl.reciprocal(denom, approx=True)
    r = r * (2.0 - denom * r)                        # one Newton step restores precision
    logits_ref[...] = e * r

    # ---- value head: small, kept in f32; v2 as a VPU reduce (no 1-wide MXU pass) ----
    v1 = jnp.dot(x, w_v1_ref[...], preferred_element_type=jnp.float32) + b_v1_ref[...]
    v = jnp.sum(v1 * w_v2_ref[...], axis=1, keepdims=True) + b_v2_ref[...]
    values_ref[...] = jnp.tanh(v)


def net_forward(x, kparams):
    """x: [B, S_DIM] f32.  kparams: output of prepare_kernel_params(). Returns (logits, values)."""
    B = x.shape[0]
    tb = 128 if B >= 128 else _round_up(max(B, 1), SUB)
    Bp = _round_up(B, tb)

    # Pad batch to a TB multiple and features to S_PAD (zero padding is exact for the matmuls).
    x_p = jnp.zeros((Bp, S_PAD), jnp.float32).at[:B, :S_DIM].set(x.astype(jnp.float32))

    def const_map(i):          # weights: same block every grid step -> DMA'd once, stay resident
        return (0, 0)

    w_specs = [pl.BlockSpec(p.shape, const_map) for p in kparams]

    logits_p, values_p = pl.pallas_call(
        net_kernel,
        out_shape=(jax.ShapeDtypeStruct((Bp, A_PAD), jnp.float32),
                   jax.ShapeDtypeStruct((Bp, 1), jnp.float32)),
        grid_spec=pltpu.PrefetchScalarGridSpec(
            num_scalar_prefetch=0,
            grid=(Bp // tb,),
            in_specs=[pl.BlockSpec((tb, S_PAD), lambda i: (i, 0))] + w_specs,
            out_specs=(pl.BlockSpec((tb, A_PAD), lambda i: (i, 0)),
                       pl.BlockSpec((tb, 1), lambda i: (i, 0))),
        ),
        compiler_params=pltpu.CompilerParams(
            # single core: avoids duplicating the resident-weight DMA across v7x's 2 TCs
            dimension_semantics=("arbitrary",),
            # actual footprint ~20 MiB; 48 MiB leaves headroom and fits v7x (64 MiB physical)
            vmem_limit_bytes=48 << 20,
        ),
    )(x_p, *kparams)

    return logits_p[:B, :A_DIM], values_p[:B]


# --------------------------- parameter construction ---------------------------

def init_linear(key, in_dim, out_dim):
    """Deterministic init mimicking torch.nn.Linear default (uniform +/- 1/sqrt(in))."""
    kw, kb = jax.random.split(key)
    bound = 1.0 / jnp.sqrt(jnp.float32(in_dim))
    # Stored pre-transposed: [in, out]  (PyTorch stores [out, in] and does x @ W.T)
    w = jax.random.uniform(kw, (in_dim, out_dim), jnp.float32, -bound, bound)
    b = jax.random.uniform(kb, (1, out_dim), jnp.float32, -bound, bound)
    return w, b


def make_params(key):
    k1, k2, k3, k4, k5 = jax.random.split(key, 5)
    w_pi1, b_pi1 = init_linear(k1, S_DIM, H1)
    w_pi2, b_pi2 = init_linear(k2, H1, H2)
    w_d, b_d = init_linear(k3, H2, A_DIM)
    w_v1, b_v1 = init_linear(k4, S_DIM, HV)
    w_v2, b_v2 = init_linear(k5, HV, 1)
    return (w_pi1, b_pi1, w_pi2, b_pi2, w_d, b_d, w_v1, b_v1, w_v2, b_v2)


def prepare_kernel_params(params):
    """Pad to 128-multiples and cast the big policy weights to bf16 (done once, off the hot path)."""
    (w_pi1, b_pi1, w_pi2, b_pi2, w_d, b_d, w_v1, b_v1, w_v2, b_v2) = params

    # Contraction dim S_DIM -> S_PAD: zero rows (exact).
    w_pi1_p = jnp.zeros((S_PAD, H1), jnp.float32).at[:S_DIM].set(w_pi1).astype(jnp.bfloat16)
    w_v1_p = jnp.zeros((S_PAD, HV), jnp.float32).at[:S_DIM].set(w_v1)          # f32 (small)

    # Output dim A_DIM -> A_PAD: zero weight cols + very negative bias so the padded
    # logits vanish under the in-kernel softmax; they are sliced off in the wrapper.
    w_d_p = jnp.zeros((H2, A_PAD), jnp.float32).at[:, :A_DIM].set(w_d).astype(jnp.bfloat16)
    b_d_p = jnp.full((1, A_PAD), NEG_BIG, jnp.float32).at[:, :A_DIM].set(b_d)

    w_pi2_bf = w_pi2.astype(jnp.bfloat16)
    w_v2_row = w_v2.reshape(1, HV)                                             # value head as VPU reduce

    return (w_pi1_p, b_pi1, w_pi2_bf, b_pi2, w_d_p, b_d_p,
            w_v1_p, b_v1, w_v2_row, b_v2)


# ------------------------------- pure-JAX reference -------------------------------

def reference_forward(x, params):
    (w_pi1, b_pi1, w_pi2, b_pi2, w_d, b_d, w_v1, b_v1, w_v2, b_v2) = params
    h1 = jnp.maximum(x @ w_pi1 + b_pi1, 0.0)
    h2 = h1 @ w_pi2 + b_pi2
    z = h2 @ w_d + b_d
    logits = jax.nn.softmax(z, axis=1)
    v1 = x @ w_v1 + b_v1
    values = jnp.tanh(v1 @ w_v2 + b_v2)
    return logits, values


# TODO(synk): torch.distributions.Categorical (sampling helper on the class) is not part of
# forward() and is not implemented here.

if __name__ == "__main__":
    key = jax.random.PRNGKey(0)
    kx, kp = jax.random.split(key)

    B = 16  # small batch; with TB=8 this exercises 2 grid steps with weights resident in VMEM
    x = jax.random.normal(kx, (B, S_DIM), jnp.float32)
    params = make_params(kp)
    kparams = prepare_kernel_params(params)

    logits, values = jax.jit(net_forward)(x, kparams)
    jax.block_until_ready((logits, values))

    # sanity check against pure-JAX f32 reference
    ref_logits, ref_values = reference_forward(x, params)
    assert logits.shape == (B, A_DIM) and values.shape == (B, 1)
    # policy head uses bf16 weights -> relaxed tolerance on softmax probabilities
    assert jnp.allclose(logits, ref_logits, atol=5e-3, rtol=5e-2)
    # value head kept in f32 -> tight tolerance
    assert jnp.allclose(values, ref_values, atol=1e-4, rtol=1e-4)
    assert jnp.allclose(jnp.sum(logits, axis=1), 1.0, atol=1e-4)

    print("KERNEL_OK")
</pallas_src>

<mosaic_0001>
module attributes {stable_mosaic.version = 11 : i64} {
  func.func @net_kernel(%arg0: i32, %arg1: memref<16x512xf32, #tpu.memory_space<vmem>>, %arg2: memref<512x512xbf16, #tpu.memory_space<vmem>>, %arg3: memref<1x512xf32, #tpu.memory_space<vmem>>, %arg4: memref<512x2048xbf16, #tpu.memory_space<vmem>>, %arg5: memref<1x2048xf32, #tpu.memory_space<vmem>>, %arg6: memref<2048x1152xbf16, #tpu.memory_space<vmem>>, %arg7: memref<1x1152xf32, #tpu.memory_space<vmem>>, %arg8: memref<512x128xf32, #tpu.memory_space<vmem>>, %arg9: memref<1x128xf32, #tpu.memory_space<vmem>>, %arg10: memref<1x128xf32, #tpu.memory_space<vmem>>, %arg11: memref<1x1xf32, #tpu.memory_space<vmem>>, %arg12: memref<16x1152xf32, #tpu.memory_space<vmem>>, %arg13: memref<16x1xf32, #tpu.memory_space<vmem>>) attributes {dimension_semantics = [#tpu.dimension_semantics<arbitrary>], iteration_bounds = array<i64: 1>, scalar_prefetch = 0 : i64, scratch_operands = 0 : i64, tpu.core_type = #tpu.core_type<tc>, window_params = [{transform_indices = @transform_0, window_bounds = array<i64: 16, 512>}, {pipeline_mode = #tpu.pipeline_mode<synchronous>, transform_indices = @transform_1, window_bounds = array<i64: 512, 512>}, {pipeline_mode = #tpu.pipeline_mode<synchronous>, transform_indices = @transform_2, window_bounds = array<i64: 1, 512>}, {pipeline_mode = #tpu.pipeline_mode<synchronous>, transform_indices = @transform_3, window_bounds = array<i64: 512, 2048>}, {pipeline_mode = #tpu.pipeline_mode<synchronous>, transform_indices = @transform_4, window_bounds = array<i64: 1, 2048>}, {pipeline_mode = #tpu.pipeline_mode<synchronous>, transform_indices = @transform_5, window_bounds = array<i64: 2048, 1152>}, {pipeline_mode = #tpu.pipeline_mode<synchronous>, transform_indices = @transform_6, window_bounds = array<i64: 1, 1152>}, {pipeline_mode = #tpu.pipeline_mode<synchronous>, transform_indices = @transform_7, window_bounds = array<i64: 512, 128>}, {pipeline_mode = #tpu.pipeline_mode<synchronous>, transform_indices = @transform_8, window_bounds = array<i64: 1, 128>}, {pipeline_mode = #tpu.pipeline_mode<synchronous>, transform_indices = @transform_9, window_bounds = array<i64: 1, 128>}, {pipeline_mode = #tpu.pipeline_mode<synchronous>, transform_indices = @transform_10, window_bounds = array<i64: 1, 1>}, {transform_indices = @transform_11, window_bounds = array<i64: 16, 1152>}, {transform_indices = @transform_12, window_bounds = array<i64: 16, 1>}]} {
    %c0 = arith.constant 0 : index
    %c0_0 = arith.constant 0 : index
    %0 = vector.load %arg1[%c0, %c0_0] : memref<16x512xf32, #tpu.memory_space<vmem>>, vector<16x512xf32>
    %1 = arith.truncf %0 : vector<16x512xf32> to vector<16x512xbf16>
    %c0_1 = arith.constant 0 : index
    %c0_2 = arith.constant 0 : index
    %2 = vector.load %arg2[%c0_1, %c0_2] : memref<512x512xbf16, #tpu.memory_space<vmem>>, vector<512x512xbf16>
    %cst = arith.constant dense<0.000000e+00> : vector<16x512xf32>
    %3 = tpu.matmul %1, %2, %cst {dimension_numbers = #tpu.dot_dimension_numbers<[1], [0], [0], [1], [0, 0, 1, 1], [], []>} : vector<16x512xbf16>, vector<512x512xbf16>, vector<16x512xf32> -> vector<16x512xf32>
    %c0_3 = arith.constant 0 : index
    %c0_4 = arith.constant 0 : index
    %4 = vector.load %arg3[%c0_3, %c0_4] : memref<1x512xf32, #tpu.memory_space<vmem>>, vector<1x512xf32>
    %5 = vector.broadcast %4 : vector<1x512xf32> to vector<16x512xf32>
    %6 = arith.addf %3, %5 : vector<16x512xf32>
    %cst_5 = arith.constant 0.000000e+00 : f32
    %7 = vector.broadcast %cst_5 : f32 to vector<16x512xf32>
    %8 = arith.maximumf %6, %7 : vector<16x512xf32>
    %9 = arith.truncf %8 : vector<16x512xf32> to vector<16x512xbf16>
    %c0_6 = arith.constant 0 : index
    %c0_7 = arith.constant 0 : index
    %10 = vector.load %arg4[%c0_6, %c0_7] : memref<512x2048xbf16, #tpu.memory_space<vmem>>, vector<512x2048xbf16>
    %cst_8 = arith.constant dense<0.000000e+00> : vector<16x2048xf32>
    %11 = tpu.matmul %9, %10, %cst_8 {dimension_numbers = #tpu.dot_dimension_numbers<[1], [0], [0], [1], [0, 0, 1, 1], [], []>} : vector<16x512xbf16>, vector<512x2048xbf16>, vector<16x2048xf32> -> vector<16x2048xf32>
    %c0_9 = arith.constant 0 : index
    %c0_10 = arith.constant 0 : index
    %12 = vector.load %arg5[%c0_9, %c0_10] : memref<1x2048xf32, #tpu.memory_space<vmem>>, vector<1x2048xf32>
    %13 = vector.broadcast %12 : vector<1x2048xf32> to vector<16x2048xf32>
    %14 = arith.addf %11, %13 : vector<16x2048xf32>
    %15 = arith.truncf %14 : vector<16x2048xf32> to vector<16x2048xbf16>
    %c0_11 = arith.constant 0 : index
    %c0_12 = arith.constant 0 : index
    %16 = vector.load %arg6[%c0_11, %c0_12] : memref<2048x1152xbf16, #tpu.memory_space<vmem>>, vector<2048x1152xbf16>
    %cst_13 = arith.constant dense<0.000000e+00> : vector<16x1152xf32>
    %17 = tpu.matmul %15, %16, %cst_13 {dimension_numbers = #tpu.dot_dimension_numbers<[1], [0], [0], [1], [0, 0, 1, 1], [], []>} : vector<16x2048xbf16>, vector<2048x1152xbf16>, vector<16x1152xf32> -> vector<16x1152xf32>
    %c0_14 = arith.constant 0 : index
    %c0_15 = arith.constant 0 : index
    %18 = vector.load %arg7[%c0_14, %c0_15] : memref<1x1152xf32, #tpu.memory_space<vmem>>, vector<1x1152xf32>
    %19 = vector.broadcast %18 : vector<1x1152xf32> to vector<16x1152xf32>
    %20 = arith.addf %17, %19 : vector<16x1152xf32>
    %cst_16 = arith.constant dense<0xFF800000> : vector<16xf32>
    %21 = vector.multi_reduction <maximumf>, %20, %cst_16 [1] : vector<16x1152xf32> to vector<16xf32>
    %22 = vector.shape_cast %21 : vector<16xf32> to vector<16x1xf32>
    %23 = vector.broadcast %22 : vector<16x1xf32> to vector<16x1152xf32>
    %24 = arith.subf %20, %23 : vector<16x1152xf32>
    %25 = math.exp %24 : vector<16x1152xf32>
    %cst_17 = arith.constant dense<0.000000e+00> : vector<16xf32>
    %26 = vector.multi_reduction <add>, %25, %cst_17 [1] : vector<16x1152xf32> to vector<16xf32>
    %27 = vector.shape_cast %26 : vector<16xf32> to vector<16x1xf32>
    %28 = tpu.reciprocal %27 {approx = true} : vector<16x1xf32> -> vector<16x1xf32>
    %29 = arith.mulf %27, %28 : vector<16x1xf32>
    %cst_18 = arith.constant 2.000000e+00 : f32
    %30 = vector.broadcast %cst_18 : f32 to vector<16x1xf32>
    %31 = arith.subf %30, %29 : vector<16x1xf32>
    %32 = arith.mulf %28, %31 : vector<16x1xf32>
    %33 = vector.broadcast %32 : vector<16x1xf32> to vector<16x1152xf32>
    %34 = arith.mulf %25, %33 : vector<16x1152xf32>
    %c0_19 = arith.constant 0 : index
    %c0_20 = arith.constant 0 : index
    %35 = vector.load %arg12[%c0_19, %c0_20] : memref<16x1152xf32, #tpu.memory_space<vmem>>, vector<16x1152xf32>
    tpu.vector_store %arg12[%c0_19, %c0_20], %34 {strides = array<i32>} : memref<16x1152xf32, #tpu.memory_space<vmem>>, vector<16x1152xf32>,
    %c0_21 = arith.constant 0 : index
    %c0_22 = arith.constant 0 : index
    %36 = vector.load %arg8[%c0_21, %c0_22] : memref<512x128xf32, #tpu.memory_space<vmem>>, vector<512x128xf32>
    %cst_23 = arith.constant dense<0.000000e+00> : vector<16x128xf32>
    %37 = tpu.matmul %0, %36, %cst_23 {dimension_numbers = #tpu.dot_dimension_numbers<[1], [0], [0], [1], [0, 0, 1, 1], [], []>} : vector<16x512xf32>, vector<512x128xf32>, vector<16x128xf32> -> vector<16x128xf32>
    %c0_24 = arith.constant 0 : index
    %c0_25 = arith.constant 0 : index
    %38 = vector.load %arg9[%c0_24, %c0_25] : memref<1x128xf32, #tpu.memory_space<vmem>>, vector<1x128xf32>
    %39 = vector.broadcast %38 : vector<1x128xf32> to vector<16x128xf32>
    %40 = arith.addf %37, %39 : vector<16x128xf32>
    %c0_26 = arith.constant 0 : index
    %c0_27 = arith.constant 0 : index
    %41 = vector.load %arg10[%c0_26, %c0_27] : memref<1x128xf32, #tpu.memory_space<vmem>>, vector<1x128xf32>
    %42 = vector.broadcast %41 : vector<1x128xf32> to vector<16x128xf32>
    %43 = arith.mulf %40, %42 : vector<16x128xf32>
    %cst_28 = arith.constant dense<0.000000e+00> : vector<16xf32>
    %44 = vector.multi_reduction <add>, %43, %cst_28 [1] : vector<16x128xf32> to vector<16xf32>
    %45 = vector.shape_cast %44 : vector<16xf32> to vector<16x1xf32>
    %c0_29 = arith.constant 0 : index
    %c0_30 = arith.constant 0 : index
    %46 = vector.load %arg11[%c0_29, %c0_30] : memref<1x1xf32, #tpu.memory_space<vmem>>, vector<1x1xf32>
    %47 = vector.broadcast %46 : vector<1x1xf32> to vector<16x1xf32>
    %48 = arith.addf %45, %47 : vector<16x1xf32>
    %49 = math.tanh %48 : vector<16x1xf32>
    %c0_31 = arith.constant 0 : index
    %c0_32 = arith.constant 0 : index
    %50 = vector.load %arg13[%c0_31, %c0_32] : memref<16x1xf32, #tpu.memory_space<vmem>>, vector<16x1xf32>
    tpu.vector_store %arg13[%c0_31, %c0_32], %49 {strides = array<i32>} : memref<16x1xf32, #tpu.memory_space<vmem>>, vector<16x1xf32>,
    return
  }
  func.func @transform_0(%arg0: i32) -> (i32, i32) {
    %c0_i32 = arith.constant 0 : i32
    %c0_i32_0 = arith.constant 0 : i32
    return %arg0, %c0_i32 : i32, i32
  }
  func.func @transform_1(%arg0: i32) -> (i32, i32) {
    %c0_i32 = arith.constant 0 : i32
    %c0_i32_0 = arith.constant 0 : i32
    %c0_i32_1 = arith.constant 0 : i32
    return %c0_i32, %c0_i32_0 : i32, i32
  }
  func.func @transform_2(%arg0: i32) -> (i32, i32) {
    %c0_i32 = arith.constant 0 : i32
    %c0_i32_0 = arith.constant 0 : i32
    %c0_i32_1 = arith.constant 0 : i32
    return %c0_i32, %c0_i32_0 : i32, i32
  }
  func.func @transform_3(%arg0: i32) -> (i32, i32) {
    %c0_i32 = arith.constant 0 : i32
    %c0_i32_0 = arith.constant 0 : i32
    %c0_i32_1 = arith.constant 0 : i32
    return %c0_i32, %c0_i32_0 : i32, i32
  }
  func.func @transform_4(%arg0: i32) -> (i32, i32) {
    %c0_i32 = arith.constant 0 : i32
    %c0_i32_0 = arith.constant 0 : i32
    %c0_i32_1 = arith.constant 0 : i32
    return %c0_i32, %c0_i32_0 : i32, i32
  }
  func.func @transform_5(%arg0: i32) -> (i32, i32) {
    %c0_i32 = arith.constant 0 : i32
    %c0_i32_0 = arith.constant 0 : i32
    %c0_i32_1 = arith.constant 0 : i32
    return %c0_i32, %c0_i32_0 : i32, i32
  }
  func.func @transform_6(%arg0: i32) -> (i32, i32) {
    %c0_i32 = arith.constant 0 : i32
    %c0_i32_0 = arith.constant 0 : i32
    %c0_i32_1 = arith.constant 0 : i32
    return %c0_i32, %c0_i32_0 : i32, i32
  }
  func.func @transform_7(%arg0: i32) -> (i32, i32) {
    %c0_i32 = arith.constant 0 : i32
    %c0_i32_0 = arith.constant 0 : i32
    %c0_i32_1 = arith.constant 0 : i32
    return %c0_i32, %c0_i32_0 : i32, i32
  }
  func.func @transform_8(%arg0: i32) -> (i32, i32) {
    %c0_i32 = arith.constant 0 : i32
    %c0_i32_0 = arith.constant 0 : i32
    %c0_i32_1 = arith.constant 0 : i32
    return %c0_i32, %c0_i32_0 : i32, i32
  }
  func.func @transform_9(%arg0: i32) -> (i32, i32) {
    %c0_i32 = arith.constant 0 : i32
    %c0_i32_0 = arith.constant 0 : i32
    %c0_i32_1 = arith.constant 0 : i32
    return %c0_i32, %c0_i32_0 : i32, i32
  }
  func.func @transform_10(%arg0: i32) -> (i32, i32) {
    %c0_i32 = arith.constant 0 : i32
    %c0_i32_0 = arith.constant 0 : i32
    %c0_i32_1 = arith.constant 0 : i32
    return %c0_i32, %c0_i32_0 : i32, i32
  }
  func.func @transform_11(%arg0: i32) -> (i32, i32) {
    %c0_i32 = arith.constant 0 : i32
    %c0_i32_0 = arith.constant 0 : i32
    return %arg0, %c0_i32 : i32, i32
  }
  func.func @transform_12(%arg0: i32) -> (i32, i32) {
    %c0_i32 = arith.constant 0 : i32
    %c0_i32_0 = arith.constant 0 : i32
    return %arg0, %c0_i32 : i32, i32
  }
}

</mosaic_0001>

<bundles_post_ra>
// kernel: net_forward.1
= control target key start
LH: loop header
LB: loop body
LE: loop exit
PB: predicated region body
PF: predicated region fallthrough
CT: control target
= control target key end

     0   :  { %s19344_s0 = inlined_call_operand.vmem [shape: f32[16,512], index: 0, kind: input, shape index: {}]   ;;  %s19345_s1 = inlined_call_operand.hbm [shape: bf16[512,512], index: 1, kind: input, shape index: {}]   ;;  %s19346_s2 = inlined_call_operand.hbm [shape: f32[1,512], index: 2, kind: input, shape index: {}]   ;;  %s19347_s3 = inlined_call_operand.hbm [shape: bf16[512,2048], index: 3, kind: input, shape index: {}]   ;;  %s19348_s4 = inlined_call_operand.hbm [shape: f32[1,2048], index: 4, kind: input, shape index: {}]   ;;  %s19349_s5 = inlined_call_operand.hbm [shape: bf16[2048,1152], index: 5, kind: input, shape index: {}]   ;;  %s19350_s6 = inlined_call_operand.hbm [shape: f32[1,1152], index: 6, kind: input, shape index: {}]   ;;  %s19351_s7 = inlined_call_operand.hbm [shape: f32[512,128], index: 7, kind: input, shape index: {}]   ;;  %s19352_s8 = inlined_call_operand.hbm [shape: f32[1,128], index: 8, kind: input, shape index: {}]   ;;  %s19353_s9 = inlined_call_operand.hbm [shape: f32[1,128], index: 9, kind: input, shape index: {}]   ;;  %s19354_s10 = inlined_call_operand.<no memory space> [shape: f32[1,1], index: 10, kind: input, shape index: {}]   ;;  %s19355_s11 = inlined_call_operand.hbm [shape: f32[16,1152], index: 11, kind: output, shape index: {0}]   ;;  %s19356_s12 = inlined_call_operand.vmem [shape: f32[16,1], index: 12, kind: output, shape index: {1}]  }
   0x1   :  { %v18_v0 = vstv %s19354_s10 }
   0x2   :  { %19 = vst [vmem:[#allocation2] sm:$0x1] %v18_v0 }
   0x3   :  { %20 = vsyncpa [#allocation4], 0 }
   0x4   :  { %21 = vsyncpa [#allocation7], 0 }
   0x5   :  { %22 = vsyncpa [#allocation10], 0 }
   0x6   :  { %23 = vsyncpa [#allocation13], 0 }
   0x7   :  { %24 = vsyncpa [#allocation16], 0 }
   0x8   :  { %25 = vsyncpa [#allocation5], 0  ;;  %s18528_s23 = smov [#allocation6]   ;;  %s18529_s25 = smov [#allocation9]  }
   0x9   :  { %s46_s24 = sshll.u32 %s18528_s23, 4  ;;  %s68_s26 = sshll.u32 %s18529_s25, 4  ;;  %s47_s24 = int_to_ptr.vmem [resolvable:$true] %s46_s24  ;;  %s69_s26 = int_to_ptr.vmem [resolvable:$true] %s68_s26 }
   0xa   :  { %s18324_s27 = scalar_lea.vmem %s47_s24, 64  ;;  %p18329_p1 = scmp.lt.s32.totalorder %s47_s24, %s47_s24 }
   0xb   :  { %p18325_p0 = scmp.ne.s32.totalorder %s47_s24, %s18324_s27  ;;  %p18330_p2 = scmp.lt.s32.totalorder %s18324_s27, %s18324_s27 }
   0xd   :  { %p18331_p3 = por %p18330_p2, %p18329_p1 }
   0xf   :  { %p18332_p4 = pnand %p18331_p3, %p18325_p0 }
  0x11   :  { %18335 = shalt.err (!%p18332_p4)
}
  0x12   :  { %49 = dma.hbm_to_vmem [thread:$0]  %s19346_s2, 64, %s47_s24, [#allocation7]  }
  0x13   :  { %s18344_s29 = scalar_lea.vmem %s69_s26, 256  ;;  %p18349_p6 = scmp.lt.s32.totalorder %s69_s26, %s69_s26 }
  0x14   :  { %p18345_p5 = scmp.ne.s32.totalorder %s69_s26, %s18344_s29  ;;  %p18350_p7 = scmp.lt.s32.totalorder %s18344_s29, %s18344_s29 }
  0x16   :  { %p18351_p8 = por %p18350_p7, %p18349_p6 }
  0x18   :  { %p18352_p9 = pnand %p18351_p8, %p18345_p5 }
  0x1a   :  { %18355 = shalt.err (!%p18352_p9)
}
  0x1b   :  { %71 = dma.hbm_to_vmem [thread:$0]  %s19348_s4, 256, %s69_s26, [#allocation10]  }
  0x1c   :  { %s18530_s14 = smov [#allocation12]   ;;  %s18531_s16 = smov [#allocation15]  }
  0x1d   :  { %s90_s15 = sshll.u32 %s18530_s14, 4  ;;  %s112_s17 = sshll.u32 %s18531_s16, 4  ;;  %s91_s15 = int_to_ptr.vmem [resolvable:$true] %s90_s15  ;;  %s113_s17 = int_to_ptr.vmem [resolvable:$true] %s112_s17 }
  0x1e   :  { %s18364_s18 = scalar_lea.vmem %s91_s15, 144  ;;  %s18368_s2 = scalar_lea.vmem %s91_s15, 160 }
  0x1f   :  { %p18365_p10 = scmp.ne.s32.totalorder %s91_s15, %s18364_s18  ;;  %p18369_p11 = scmp.lt.s32.totalorder %s91_s15, %s91_s15 }
  0x20   :  { %p18370_p12 = scmp.lt.s32.totalorder %s18368_s2, %s18364_s18 }
  0x22   :  { %p18371_p13 = por %p18370_p12, %p18369_p11 }
  0x24   :  { %p18372_p0 = pnand %p18371_p13, %p18365_p10 }
  0x26   :  { %18375 = shalt.err (!%p18372_p0)
}
  0x27   :  { %93 = dma.hbm_to_vmem [thread:$0]  %s19350_s6, 144, %s91_s15, [#allocation13]  }
  0x28   :  { %s18384_s21 = scalar_lea.vmem %s113_s17, 16  ;;  %s18388_s4 = scalar_lea.vmem %s113_s17, 32 }
  0x29   :  { %p18385_p1 = scmp.ne.s32.totalorder %s113_s17, %s18384_s21  ;;  %p18389_p2 = scmp.lt.s32.totalorder %s113_s17, %s113_s17 }
  0x2a   :  { %p18390_p3 = scmp.lt.s32.totalorder %s18388_s4, %s18384_s21 }
  0x2c   :  { %p18391_p4 = por %p18390_p3, %p18389_p2 }
  0x2e   :  { %p18392_p5 = pnand %p18391_p4, %p18385_p1 }
  0x30   :  { %18395 = shalt.err (!%p18392_p5)
}
  0x31   :  { %115 = dma.hbm_to_vmem [thread:$0]  %s19352_s8, 16, %s113_s17, [#allocation16]  }
  0x32   :  { %s18532_s24 = smov [#allocation3]  }
  0x33   :  { %s33_s25 = sshll.u32 %s18532_s24, 4  ;;  %s34_s25 = int_to_ptr.vmem [resolvable:$true] %s33_s25 }
  0x34   :  { %s18404_s26 = scalar_lea.vmem %s34_s25, 16384  ;;  %p18409_p7 = scmp.lt.s32.totalorder %s34_s25, %s34_s25 }
  0x35   :  { %p18405_p6 = scmp.ne.s32.totalorder %s34_s25, %s18404_s26  ;;  %p18410_p8 = scmp.lt.s32.totalorder %s18404_s26, %s18404_s26 }
  0x37   :  { %p18411_p9 = por %p18410_p8, %p18409_p7 }
  0x39   :  { %p18412_p10 = pnand %p18411_p9, %p18405_p6 }
  0x3b   :  { %18415 = shalt.err (!%p18412_p10)
}
  0x3c   :  { %s18533_s6 = smov 256   ;;  %s18534_s27 = smov 16  }
  0x3d   :  { %39 = dma.hbm_to_vmem [thread:$0]  %s19345_s1, 16384, %s34_s25, [#allocation4], %s18533_s6, %s18533_s6, %s18534_s27  }
  0x3e   :  { %s18535_s29 = smov [#allocation8]  }
  0x3f   :  { %s55_s30 = sshll.u32 %s18535_s29, 4  ;;  %s56_s30 = int_to_ptr.vmem [resolvable:$true] %s55_s30 }
  0x40   :  { %s18424_s8 = scalar_lea.vmem %s56_s30, 65536  ;;  %p18429_p12 = scmp.lt.s32.totalorder %s56_s30, %s56_s30 }
  0x41   :  { %p18425_p11 = scmp.ne.s32.totalorder %s56_s30, %s18424_s8  ;;  %p18430_p13 = scmp.lt.s32.totalorder %s18424_s8, %s18424_s8 }
  0x43   :  { %p18431_p0 = por %p18430_p13, %p18429_p12 }
  0x45   :  { %p18432_p1 = pnand %p18431_p0, %p18425_p11 }
  0x47   :  { %18435 = shalt.err (!%p18432_p1)
}
  0x48   :  { %s18536_s13 = smov 1024   ;;  %s18537_s14 = smov 64  }
  0x49   :  { %61 = dma.hbm_to_vmem [thread:$0]  %s19347_s3, 65536, %s56_s30, [#allocation7], %s18536_s13, %s18536_s13, %s18537_s14  }
  0x4a   :  { %s18538_s17 = smov [#allocation11]  }
  0x4b   :  { %s77_s18 = sshll.u32 %s18538_s17, 4  ;;  %s78_s18 = int_to_ptr.vmem [resolvable:$true] %s77_s18 }
  0x4c   :  { %s18444_s1 = scalar_lea.vmem %s78_s18, 147456  ;;  %p18449_p3 = scmp.lt.s32.totalorder %s78_s18, %s78_s18 }
  0x4d   :  { %p18445_p2 = scmp.ne.s32.totalorder %s78_s18, %s18444_s1  ;;  %p18450_p4 = scmp.lt.s32.totalorder %s18444_s1, %s18444_s1 }
  0x4f   :  { %p18451_p5 = por %p18450_p4, %p18449_p3 }
  0x51   :  { %p18452_p6 = pnand %p18451_p5, %p18445_p2 }
  0x53   :  { %18455 = shalt.err (!%p18452_p6)
}
  0x54   :  { %s18539_s2 = smov 576   ;;  %s18540_s19 = smov 36  }
  0x55   :  { %83 = dma.hbm_to_vmem [thread:$0]  %s19349_s5, 147456, %s78_s18, [#allocation10], %s18539_s2, %s18539_s2, %s18540_s19  }
  0x56   :  { %s18541_s4 = smov [#allocation14]  }
  0x57   :  { %s99_s22 = sshll.u32 %s18541_s4, 4  ;;  %s100_s22 = int_to_ptr.vmem [resolvable:$true] %s99_s22 }
  0x58   :  { %s18464_s3 = scalar_lea.vmem %s100_s22, 8192  ;;  %p18469_p8 = scmp.lt.s32.totalorder %s100_s22, %s100_s22 }
  0x59   :  { %p18465_p7 = scmp.ne.s32.totalorder %s100_s22, %s18464_s3  ;;  %p18470_p9 = scmp.lt.s32.totalorder %s18464_s3, %s18464_s3 }
  0x5b   :  { %p18471_p10 = por %p18470_p9, %p18469_p8 }
  0x5d   :  { %p18472_p11 = pnand %p18471_p10, %p18465_p7 }
  0x5f   :  { %18475 = shalt.err (!%p18472_p11)
}
  0x60   :  { %s18542_s23 = smov 128   ;;  %s18543_s24 = smov 8  }
  0x61   :  { %105 = dma.hbm_to_vmem [thread:$0]  %s19351_s7, 8192, %s100_s22, [#allocation13], %s18542_s23, %s18542_s23, %s18543_s24  }
  0x62   :  { %s18544_s6 = smov [#allocation17]  }
  0x63   :  { %s122_s27 = sshll.u32 %s18544_s6, 4  ;;  %s123_s27 = int_to_ptr.vmem [resolvable:$true] %s122_s27 }
  0x64   :  { %s18484_s5 = scalar_lea.vmem %s123_s27, 16  ;;  %s18488_s10 = scalar_lea.vmem %s123_s27, 32 }
  0x65   :  { %p18485_p12 = scmp.ne.s32.totalorder %s123_s27, %s18484_s5  ;;  %p18489_p13 = scmp.lt.s32.totalorder %s123_s27, %s123_s27 }
  0x66   :  { %p18490_p0 = scmp.lt.s32.totalorder %s18488_s10, %s18484_s5 }
  0x68   :  { %p18491_p1 = por %p18490_p0, %p18489_p13 }
  0x6a   :  { %p18492_p2 = pnand %p18491_p1, %p18485_p12 }
  0x6c   :  { %18495 = shalt.err (!%p18492_p2)
}
  0x6d   :  { %125 = dma.hbm_to_vmem [thread:$0]  %s19353_s9, 16, %s123_s27, [#allocation16]  }
  0x6e   :  { %18516 = dma.done.wait [#allocation4], 16384  }
  0x6f   :  { %18517 = vsyncadd [#allocation4], 4294950912 }
  0x70   :  { %18518 = dma.done.wait [#allocation7], 65600  }
  0x71   :  { %18519 = vsyncadd [#allocation7], 4294901696 }
  0x72   :  { %18520 = dma.done.wait [#allocation10], 147712  }
  0x73   :  { %18521 = vsyncadd [#allocation10], 4294819584 }
  0x74   :  { %18522 = dma.done.wait [#allocation13], 8336  }
  0x75   :  { %18523 = vsyncadd [#allocation13], 4294958960 }
  0x76   :  { %18524 = dma.done.wait [#allocation16], 32  }
  0x77   :  { %18525 = vsyncadd [#allocation16], 4294967264  ;;  %v16402_v1 = vld [vmem:[#allocation3 + $0xe4] ss:$16 sps:$4 sm:$0xff]   ;;  %v16406_v3 = vld [vmem:[#allocation3 + $0xe0] ss:$16 sps:$4 sm:$0xff]  }
  0x78   :  { %v16404_v2 = vld [vmem:[#allocation3 + $0x2e4] ss:$16 sps:$4 sm:$0xff]   ;;  %958 = vmatprep.subr.bf16.mxu0 %v16402_v1  ;;  %v16407_v4 = vld [vmem:[#allocation3 + $0x2e0] ss:$16 sps:$4 sm:$0xff]   ;;  %vm14306_vm0 = vcmask 7168   ;;  %s18545_s16 = smov [#allocation18]  }
  0x79   :  { %1001 = vmatprep.subr.bf16.mxu1 %v16404_v2  ;;  %v16408_v5 = vld [vmem:[#allocation3 + $0xc4] ss:$16 sps:$4 sm:$0xff]   ;;  %959 = vmatpush1.bf16.msra.mxu0 %v16406_v3  ;;  %v16412_v7 = vld [vmem:[#allocation3 + $0xc0] ss:$16 sps:$4 sm:$0xff]   ;;  %s14314_s17 = sshll.u32 %s18545_s16, 4  ;;  %s14315_s17 = int_to_ptr.vmem [resolvable:$true] %s14314_s17 }
  0x7a   :  { %1002 = vmatpush1.bf16.msra.mxu1 %v16407_v4  ;;  %v16410_v6 = vld [vmem:[#allocation3 + $0x2c4] ss:$16 sps:$4 sm:$0xff]   ;;  %960 = vmatprep.subr.bf16.mxu0 %v16408_v5  ;;  %v16413_v8 = vld [vmem:[#allocation3 + $0x2c0] ss:$16 sps:$4 sm:$0xff]   ;;  %p18501_p4 = scmp.lt.s32.totalorder %s14315_s17, %s14315_s17 }
  0x7b   :  { %1003 = vmatprep.subr.bf16.mxu1 %v16410_v6  ;;  %v16414_v9 = vld [vmem:[#allocation3 + $0xa4] ss:$16 sps:$4 sm:$0xff]   ;;  %v16418_v11 = vld [vmem:[#allocation3 + $0xa0] ss:$16 sps:$4 sm:$0xff]  }
  0x7c   :  { %v16416_v10 = vld [vmem:[#allocation3 + $0x2a4] ss:$16 sps:$4 sm:$0xff]   ;;  %v16419_v12 = vld [vmem:[#allocation3 + $0x2a0] ss:$16 sps:$4 sm:$0xff]  }
  0x7d   :  { %961 = vmatpush1.bf16.msra.mxu0 %v16412_v7  ;;  %v16420_v13 = vld [vmem:[#allocation3 + $0x84] ss:$16 sps:$4 sm:$0xff]   ;;  %v16424_v15 = vld [vmem:[#allocation3 + $0x80] ss:$16 sps:$4 sm:$0xff]  }
  0x7e   :  { %1004 = vmatpush1.bf16.msra.mxu1 %v16413_v8  ;;  %962 = vmatprep.subr.bf16.mxu0 %v16414_v9  ;;  %v16422_v14 = vld [vmem:[#allocation3 + $0x284] ss:$16 sps:$4 sm:$0xff]   ;;  %v16425_v16 = vld [vmem:[#allocation3 + $0x280] ss:$16 sps:$4 sm:$0xff]  }
  0x7f   :  { %1005 = vmatprep.subr.bf16.mxu1 %v16416_v10  ;;  %v16426_v17 = vld [vmem:[#allocation3 + $0x64] ss:$16 sps:$4 sm:$0xff]   ;;  %v16430_v19 = vld [vmem:[#allocation3 + $0x60] ss:$16 sps:$4 sm:$0xff]  }
  0x80   :  { %v16428_v18 = vld [vmem:[#allocation3 + $0x264] ss:$16 sps:$4 sm:$0xff]   ;;  %v16431_v20 = vld [vmem:[#allocation3 + $0x260] ss:$16 sps:$4 sm:$0xff]  }
  0x81   :  { %963 = vmatpush1.bf16.msra.mxu0 %v16418_v11  ;;  %v16432_v21 = vld [vmem:[#allocation3 + $0x44] ss:$16 sps:$4 sm:$0xff]   ;;  %v16436_v23 = vld [vmem:[#allocation3 + $0x40] ss:$16 sps:$4 sm:$0xff]   ;;  %v16500_v11 = vld [vmem:[#allocation3 + $0xec] ss:$16 sps:$4 sm:$0xff]  }
  0x82   :  { %1006 = vmatpush1.bf16.msra.mxu1 %v16419_v12  ;;  %964 = vmatprep.subr.bf16.mxu0 %v16420_v13  ;;  %v16434_v22 = vld [vmem:[#allocation3 + $0x244] ss:$16 sps:$4 sm:$0xff]   ;;  %v16437_v24 = vld [vmem:[#allocation3 + $0x240] ss:$16 sps:$4 sm:$0xff]   ;;  %v16503_v12 = vld [vmem:[#allocation3 + $0x2ec] ss:$16 sps:$4 sm:$0xff]  }
  0x83   :  { %1007 = vmatprep.subr.bf16.mxu1 %v16422_v14  ;;  %v16438_v25 = vld [vmem:[#allocation3 + $0x24] ss:$16 sps:$4 sm:$0xff]   ;;  %v16442_v27 = vld [vmem:[#allocation3 + $0x20] ss:$16 sps:$4 sm:$0xff]  }
  0x84   :  { %v16440_v26 = vld [vmem:[#allocation3 + $0x224] ss:$16 sps:$4 sm:$0xff]   ;;  %v16443_v28 = vld [vmem:[#allocation3 + $0x220] ss:$16 sps:$4 sm:$0xff]  }
  0x85   :  { %965 = vmatpush1.bf16.msra.mxu0 %v16424_v15  ;;  %v16444_v29 = vld [vmem:[#allocation3 + $0x4] ss:$16 sps:$4 sm:$0xff]   ;;  %v16448_v31 = vld [vmem:[#allocation3] ss:$16 sps:$4 sm:$0xff]   ;;  %v16498_v15 = vld [vmem:[#allocation3 + $0xe8] ss:$16 sps:$4 sm:$0xff]  }
  0x86   :  { %1008 = vmatpush1.bf16.msra.mxu1 %v16425_v16  ;;  %966 = vmatprep.subr.bf16.mxu0 %v16426_v17  ;;  %v16446_v30 = vld [vmem:[#allocation3 + $0x204] ss:$16 sps:$4 sm:$0xff]   ;;  %v16449_v32 = vld [vmem:[#allocation3 + $0x200] ss:$16 sps:$4 sm:$0xff]   ;;  %v16501_v16 = vld [vmem:[#allocation3 + $0x2e8] ss:$16 sps:$4 sm:$0xff]  }
  0x87   :  { %1009 = vmatprep.subr.bf16.mxu1 %v16428_v18  ;;  %v16450_v33 = vld [vmem:[#allocation3 + $0x1e4] ss:$16 sps:$4 sm:$0xff]   ;;  %v16454_v35 = vld [vmem:[#allocation3 + $0x1e0] ss:$16 sps:$4 sm:$0xff]   ;;  %v16506_v17 = vld [vmem:[#allocation3 + $0xcc] ss:$16 sps:$4 sm:$0xff]  }
  0x88   :  { %v16452_v34 = vld [vmem:[#allocation3 + $0x3e4] ss:$16 sps:$4 sm:$0xff]   ;;  %v16455_v36 = vld [vmem:[#allocation3 + $0x3e0] ss:$16 sps:$4 sm:$0xff]   ;;  %v16509_v18 = vld [vmem:[#allocation3 + $0x2cc] ss:$16 sps:$4 sm:$0xff]  }
  0x89   :  { %967 = vmatpush1.bf16.msra.mxu0 %v16430_v19  ;;  %v16456_v37 = vld [vmem:[#allocation3 + $0x1c4] ss:$16 sps:$4 sm:$0xff]   ;;  %v16460_v39 = vld [vmem:[#allocation3 + $0x1c0] ss:$16 sps:$4 sm:$0xff]   ;;  %v16504_v19 = vld [vmem:[#allocation3 + $0xc8] ss:$16 sps:$4 sm:$0xff]  }
  0x8a   :  { %1010 = vmatpush1.bf16.msra.mxu1 %v16431_v20  ;;  %968 = vmatprep.subr.bf16.mxu0 %v16432_v21  ;;  %v16458_v38 = vld [vmem:[#allocation3 + $0x3c4] ss:$16 sps:$4 sm:$0xff]   ;;  %v16461_v40 = vld [vmem:[#allocation3 + $0x3c0] ss:$16 sps:$4 sm:$0xff]   ;;  %v16507_v20 = vld [vmem:[#allocation3 + $0x2c8] ss:$16 sps:$4 sm:$0xff]  }
  0x8b   :  { %1011 = vmatprep.subr.bf16.mxu1 %v16434_v22  ;;  %v16462_v41 = vld [vmem:[#allocation3 + $0x1a4] ss:$16 sps:$4 sm:$0xff]   ;;  %v16466_v43 = vld [vmem:[#allocation3 + $0x1a0] ss:$16 sps:$4 sm:$0xff]   ;;  %v16512_v21 = vld [vmem:[#allocation3 + $0xac] ss:$16 sps:$4 sm:$0xff]  }
  0x8c   :  { %v16464_v42 = vld [vmem:[#allocation3 + $0x3a4] ss:$16 sps:$4 sm:$0xff]   ;;  %v16467_v44 = vld [vmem:[#allocation3 + $0x3a0] ss:$16 sps:$4 sm:$0xff]   ;;  %v16515_v22 = vld [vmem:[#allocation3 + $0x2ac] ss:$16 sps:$4 sm:$0xff]  }
  0x8d   :  { %969 = vmatpush1.bf16.msra.mxu0 %v16436_v23  ;;  %v16468_v45 = vld [vmem:[#allocation3 + $0x184] ss:$16 sps:$4 sm:$0xff]   ;;  %v16472_v51 = vld [vmem:[#allocation3 + $0x180] ss:$16 sps:$4 sm:$0xff]   ;;  %v16510_v23 = vld [vmem:[#allocation3 + $0xa8] ss:$16 sps:$4 sm:$0xff]  }
  0x8e   :  { %1012 = vmatpush1.bf16.msra.mxu1 %v16437_v24  ;;  %970 = vmatprep.subr.bf16.mxu0 %v16438_v25  ;;  %v16470_v46 = vld [vmem:[#allocation3 + $0x384] ss:$16 sps:$4 sm:$0xff]   ;;  %v16473_v52 = vld [vmem:[#allocation3 + $0x380] ss:$16 sps:$4 sm:$0xff]   ;;  %v16513_v24 = vld [vmem:[#allocation3 + $0x2a8] ss:$16 sps:$4 sm:$0xff]  }
  0x8f   :  { %1013 = vmatprep.subr.bf16.mxu1 %v16440_v26  ;;  %v157_v47 = vld [vmem:[%s19344_s0 + $0x8] sm:$0xff]  ;;  %v159_v49 = vld [vmem:[%s19344_s0 + $0x18] sm:$0xff]  ;;  %v16478_v57 = vld [vmem:[#allocation3 + $0x160] ss:$16 sps:$4 sm:$0xff]  }
  0x90   :  { %v161_v48 = vld [vmem:[%s19344_s0 + $0x28] sm:$0xff]  ;;  %v163_v50 = vld [vmem:[%s19344_s0 + $0x38] sm:$0xff]  ;;  %v16479_v58 = vld [vmem:[#allocation3 + $0x360] ss:$16 sps:$4 sm:$0xff]  }
  0x91   :  { %971 = vmatpush1.bf16.msra.mxu0 %v16442_v27  ;;  %v16474_v53 = vld [vmem:[#allocation3 + $0x164] ss:$16 sps:$4 sm:$0xff]   ;;  %v165_v54 = vpack.c.bf16 %v161_v48, %v157_v47  ;;  %v167_v55 = vpack.c.bf16 %v163_v50, %v159_v49  ;;  %v16484_v61 = vld [vmem:[#allocation3 + $0x140] ss:$16 sps:$4 sm:$0xff]   ;;  %v16518_v25 = vld [vmem:[#allocation3 + $0x8c] ss:$16 sps:$4 sm:$0xff]  }
  0x92   :  { %1014 = vmatpush1.bf16.msra.mxu1 %v16443_v28  ;;  %972 = vmatprep.subr.bf16.mxu0 %v16444_v29  ;;  %v16476_v56 = vld [vmem:[#allocation3 + $0x364] ss:$16 sps:$4 sm:$0xff]   ;;  %v16485_v62 = vld [vmem:[#allocation3 + $0x340] ss:$16 sps:$4 sm:$0xff]   ;;  %v16521_v26 = vld [vmem:[#allocation3 + $0x28c] ss:$16 sps:$4 sm:$0xff]  }
  0x93   :  { %1015 = vmatprep.subr.bf16.mxu1 %v16446_v30  ;;  %990 = vmatprep.mubr.bf16.mxu0 %v165_v54  ;;  %v16480_v59 = vld [vmem:[#allocation3 + $0x144] ss:$16 sps:$4 sm:$0xff]   ;;  %v16490_v1 = vld [vmem:[#allocation3 + $0x120] ss:$16 sps:$4 sm:$0xff]   ;;  %v16516_v27 = vld [vmem:[#allocation3 + $0x88] ss:$16 sps:$4 sm:$0xff]  }
  0x94   :  { %1033 = vmatprep.mubr.bf16.mxu1 %v167_v55  ;;  %v16482_v60 = vld [vmem:[#allocation3 + $0x344] ss:$16 sps:$4 sm:$0xff]   ;;  %v16491_v2 = vld [vmem:[#allocation3 + $0x320] ss:$16 sps:$4 sm:$0xff]   ;;  %v16519_v28 = vld [vmem:[#allocation3 + $0x288] ss:$16 sps:$4 sm:$0xff]  }
  0x95   :  { %973 = vmatpush1.bf16.msra.mxu0 %v16448_v31  ;;  %v16486_v63 = vld [vmem:[#allocation3 + $0x124] ss:$16 sps:$4 sm:$0xff]   ;;  %v16496_v5 = vld [vmem:[#allocation3 + $0x100] ss:$16 sps:$4 sm:$0xff]   ;;  %v16524_v29 = vld [vmem:[#allocation3 + $0x6c] ss:$16 sps:$4 sm:$0xff]  }
  0x96   :  { %1016 = vmatpush1.bf16.msra.mxu1 %v16449_v32  ;;  %974 = vmatprep.subr.bf16.mxu0 %v16450_v33  ;;  %v16488_v0 = vld [vmem:[#allocation3 + $0x324] ss:$16 sps:$4 sm:$0xff]   ;;  %v16497_v6 = vld [vmem:[#allocation3 + $0x300] ss:$16 sps:$4 sm:$0xff]   ;;  %v16527_v30 = vld [vmem:[#allocation3 + $0x26c] ss:$16 sps:$4 sm:$0xff]  }
  0x97   :  { %1017 = vmatprep.subr.bf16.mxu1 %v16452_v34  ;;  %v16492_v3 = vld [vmem:[#allocation3 + $0x104] ss:$16 sps:$4 sm:$0xff]   ;;  %v16522_v31 = vld [vmem:[#allocation3 + $0x68] ss:$16 sps:$4 sm:$0xff]   ;;  %v16530_v33 = vld [vmem:[#allocation3 + $0x4c] ss:$16 sps:$4 sm:$0xff]  }
  0x98   :  { %v16494_v4 = vld [vmem:[#allocation3 + $0x304] ss:$16 sps:$4 sm:$0xff]   ;;  %v16525_v32 = vld [vmem:[#allocation3 + $0x268] ss:$16 sps:$4 sm:$0xff]   ;;  %v16533_v34 = vld [vmem:[#allocation3 + $0x24c] ss:$16 sps:$4 sm:$0xff]  }
  0x99   :  { %975 = vmatpush2.bf16.msra.mxu0 %v16454_v35  ;;  %v156_v7 = vld [vmem:[%s19344_s0] sm:$0xff]  ;;  %v158_v9 = vld [vmem:[%s19344_s0 + $0x10] sm:$0xff]  ;;  %v16528_v35 = vld [vmem:[#allocation3 + $0x48] ss:$16 sps:$4 sm:$0xff]  }
  0x9a   :  { %1018 = vmatpush2.bf16.msra.mxu1 %v16455_v36  ;;  %976 = vmatprep.subr.bf16.mxu0 %v16456_v37  ;;  %v160_v8 = vld [vmem:[%s19344_s0 + $0x20] sm:$0xff]  ;;  %v162_v10 = vld [vmem:[%s19344_s0 + $0x30] sm:$0xff]  ;;  %v16531_v36 = vld [vmem:[#allocation3 + $0x248] ss:$16 sps:$4 sm:$0xff]  }
  0x9b   :  { %1019 = vmatprep.subr.bf16.mxu1 %v16458_v38  ;;  %v18667_v13 = vpack.c.bf16 %v160_v8, %v156_v7  ;;  %v18669_v14 = vpack.c.bf16 %v162_v10, %v158_v9  ;;  %v16536_v37 = vld [vmem:[#allocation3 + $0x2c] ss:$16 sps:$4 sm:$0xff]   ;;  %v16546_v47 = vld [vmem:[#allocation3 + $0x1e8] ss:$16 sps:$4 sm:$0xff]  }
  0x9c   :  { %v16539_v38 = vld [vmem:[#allocation3 + $0x22c] ss:$16 sps:$4 sm:$0xff]   ;;  %v16549_v48 = vld [vmem:[#allocation3 + $0x3e8] ss:$16 sps:$4 sm:$0xff]  }
  0x9d   :  { %977 = vmatpush2.bf16.msra.mxu0 %v16460_v39  ;;  %v16534_v39 = vld [vmem:[#allocation3 + $0x28] ss:$16 sps:$4 sm:$0xff]   ;;  %v16554_v49 = vld [vmem:[#allocation3 + $0x1cc] ss:$16 sps:$4 sm:$0xff]  }
  0x9e   :  { %1020 = vmatpush2.bf16.msra.mxu1 %v16461_v40  ;;  %978 = vmatprep.subr.bf16.mxu0 %v16462_v41  ;;  %v16537_v40 = vld [vmem:[#allocation3 + $0x228] ss:$16 sps:$4 sm:$0xff]   ;;  %v16542_v41 = vld [vmem:[#allocation3 + $0xc] ss:$16 sps:$4 sm:$0xff]  }
  0x9f   :  { %1021 = vmatprep.subr.bf16.mxu1 %v16464_v42  ;;  %v16545_v42 = vld [vmem:[#allocation3 + $0x20c] ss:$16 sps:$4 sm:$0xff]   ;;  %v16582_v7 = vld [vmem:[#allocation3 + $0x128] ss:$16 sps:$4 sm:$0xff]  }
  0xa0   :  { %v16557_v50 = vld [vmem:[#allocation3 + $0x3cc] ss:$16 sps:$4 sm:$0xff]   ;;  %v16585_v8 = vld [vmem:[#allocation3 + $0x328] ss:$16 sps:$4 sm:$0xff]  }
  0xa1   :  { %979 = vmatpush2.bf16.msra.mxu0 %v16466_v43  ;;  %v16540_v43 = vld [vmem:[#allocation3 + $0x8] ss:$16 sps:$4 sm:$0xff]   ;;  %v16590_v9 = vld [vmem:[#allocation3 + $0x10c] ss:$16 sps:$4 sm:$0xff]  }
  0xa2   :  { %1022 = vmatpush2.bf16.msra.mxu1 %v16467_v44  ;;  %980 = vmatprep.subr.bf16.mxu0 %v16468_v45  ;;  %v16543_v44 = vld [vmem:[#allocation3 + $0x208] ss:$16 sps:$4 sm:$0xff]   ;;  %v16548_v45 = vld [vmem:[#allocation3 + $0x1ec] ss:$16 sps:$4 sm:$0xff]  }
  0xa3   :  { %1023 = vmatprep.subr.bf16.mxu1 %v16470_v46  ;;  %v16551_v46 = vld [vmem:[#allocation3 + $0x3ec] ss:$16 sps:$4 sm:$0xff]  }
  0xa4   :  { %v16593_v10 = vld [vmem:[#allocation3 + $0x30c] ss:$16 sps:$4 sm:$0xff]  }
  0xa5   :  { %981 = vmatpush2.bf16.msra.mxu0 %v16472_v51  ;;  %v16552_v51 = vld [vmem:[#allocation3 + $0x1c8] ss:$16 sps:$4 sm:$0xff]  }
  0xa6   :  { %1024 = vmatpush2.bf16.msra.mxu1 %v16473_v52  ;;  %982 = vmatprep.subr.bf16.mxu0 %v16474_v53  ;;  %v16555_v52 = vld [vmem:[#allocation3 + $0x3c8] ss:$16 sps:$4 sm:$0xff]   ;;  %v16560_v53 = vld [vmem:[#allocation3 + $0x1ac] ss:$16 sps:$4 sm:$0xff]  }
  0xa7   :  { %1025 = vmatprep.subr.bf16.mxu1 %v16476_v56  ;;  %v16561_v56 = vld [vmem:[#allocation3 + $0x3a8] ss:$16 sps:$4 sm:$0xff]  }
  0xa9   :  { %983 = vmatpush2.bf16.msra.mxu0 %v16478_v57  ;;  %v16566_v57 = vld [vmem:[#allocation3 + $0x18c] ss:$16 sps:$4 sm:$0xff]  }
  0xaa   :  { %1026 = vmatpush2.bf16.msra.mxu1 %v16479_v58  ;;  %984 = vmatprep.subr.bf16.mxu0 %v16480_v59  ;;  %v16569_v58 = vld [vmem:[#allocation3 + $0x38c] ss:$16 sps:$4 sm:$0xff]   ;;  %v16564_v59 = vld [vmem:[#allocation3 + $0x188] ss:$16 sps:$4 sm:$0xff]  }
  0xab   :  { %1027 = vmatprep.subr.bf16.mxu1 %v16482_v60  ;;  %v16567_v60 = vld [vmem:[#allocation3 + $0x388] ss:$16 sps:$4 sm:$0xff]  }
  0xad   :  { %985 = vmatpush2.bf16.msra.mxu0 %v16484_v61  ;;  %v16572_v61 = vld [vmem:[#allocation3 + $0x16c] ss:$16 sps:$4 sm:$0xff]  }
  0xae   :  { %1028 = vmatpush2.bf16.msra.mxu1 %v16485_v62  ;;  %986 = vmatprep.subr.bf16.mxu0 %v16486_v63  ;;  %v16575_v62 = vld [vmem:[#allocation3 + $0x36c] ss:$16 sps:$4 sm:$0xff]   ;;  %v16570_v63 = vld [vmem:[#allocation3 + $0x168] ss:$16 sps:$4 sm:$0xff]  }
  0xaf   :  { %1029 = vmatprep.subr.bf16.mxu1 %v16488_v0  ;;  %v16573_v0 = vld [vmem:[#allocation3 + $0x368] ss:$16 sps:$4 sm:$0xff]  }
  0xb1   :  { %987 = vmatpush2.bf16.msra.mxu0 %v16490_v1  ;;  %v16578_v1 = vld [vmem:[#allocation3 + $0x14c] ss:$16 sps:$4 sm:$0xff]  }
  0xb2   :  { %1030 = vmatpush2.bf16.msra.mxu1 %v16491_v2  ;;  %988 = vmatprep.subr.bf16.mxu0 %v16492_v3  ;;  %v16581_v2 = vld [vmem:[#allocation3 + $0x34c] ss:$16 sps:$4 sm:$0xff]   ;;  %v16576_v3 = vld [vmem:[#allocation3 + $0x148] ss:$16 sps:$4 sm:$0xff]  }
  0xb3   :  { %1031 = vmatprep.subr.bf16.mxu1 %v16494_v4  ;;  %v16579_v4 = vld [vmem:[#allocation3 + $0x348] ss:$16 sps:$4 sm:$0xff]  }
  0xb5   :  { %989 = vmatpush2.bf16.msra.mxu0 %v16496_v5  ;;  %v16584_v5 = vld [vmem:[#allocation3 + $0x12c] ss:$16 sps:$4 sm:$0xff]  }
  0xb6   :  { %1032 = vmatpush2.bf16.msra.mxu1 %v16497_v6  ;;  %1044 = vmatprep.subr.bf16.mxu0 %v16500_v11  ;;  %v16587_v6 = vld [vmem:[#allocation3 + $0x32c] ss:$16 sps:$4 sm:$0xff]   ;;  %v1254_v11 = vld [vmem:[#allocation8 + $0x380] sm:$0xff] }
  0xb7   :  { %1087 = vmatprep.subr.bf16.mxu1 %v16503_v12  ;;  %v1262_v12 = vld [vmem:[#allocation8 + $0x3c0] sm:$0xff] }
  0xb8   :  { %991 = vmatmul.mubr.bf16.vlgmr.msra.gmra.mxu0 %v18667_v13 }
  0xb9   :  { %1034 = vmatmul.mubr.bf16.vlgmr.msra.gmra.mxu1 %v18669_v14  ;;  %1045 = vmatpush1.bf16.msra.mxu0 %v16498_v15  ;;  %v16588_v15 = vld [vmem:[#allocation3 + $0x108] ss:$16 sps:$4 sm:$0xff]  }
  0xba   :  { %1088 = vmatpush1.bf16.msra.mxu1 %v16501_v16  ;;  %1046 = vmatprep.subr.bf16.mxu0 %v16506_v17  ;;  %v16591_v16 = vld [vmem:[#allocation3 + $0x308] ss:$16 sps:$4 sm:$0xff]  }
  0xbb   :  { %1089 = vmatprep.subr.bf16.mxu1 %v16509_v18  ;;  %1076 = vmatprep.mubr.bf16.mxu0 %v165_v54  ;;  %v16563_v54 = vld [vmem:[#allocation3 + $0x3ac] ss:$16 sps:$4 sm:$0xff]   ;;  %v1238_v17 = vld [vmem:[#allocation8 + $0x300] sm:$0xff] }
  0xbc   :  { %1119 = vmatprep.mubr.bf16.mxu1 %v167_v55  ;;  %v16558_v55 = vld [vmem:[#allocation3 + $0x1a8] ss:$16 sps:$4 sm:$0xff]  }
  0xbd   :  { %1047 = vmatpush1.bf16.msra.mxu0 %v16504_v19  ;;  %v1246_v18 = vld [vmem:[#allocation8 + $0x340] sm:$0xff]  ;;  %v14575_v19 = vcombine.high %v1254_v11, %v1262_v12 }
  0xbe   :  { %1090 = vmatpush1.bf16.msra.mxu1 %v16507_v20  ;;  %1048 = vmatprep.subr.bf16.mxu0 %v16512_v21  ;;  %v14574_v20 = vcombine.low %v1254_v11, %v1262_v12  ;;  %v1222_v21 = vld [vmem:[#allocation8 + $0x280] sm:$0xff] }
  0xbf   :  { %1091 = vmatprep.subr.bf16.mxu1 %v16515_v22  ;;  %v1230_v22 = vld [vmem:[#allocation8 + $0x2c0] sm:$0xff] }
  0xc1   :  { %1049 = vmatpush1.bf16.msra.mxu0 %v16510_v23  ;;  %v14559_v23 = vcombine.high %v1238_v17, %v1246_v18 }
  0xc2   :  { %1092 = vmatpush1.bf16.msra.mxu1 %v16513_v24  ;;  %1050 = vmatprep.subr.bf16.mxu0 %v16518_v25  ;;  %v14558_v24 = vcombine.low %v1238_v17, %v1246_v18  ;;  %v1206_v25 = vld [vmem:[#allocation8 + $0x200] sm:$0xff] }
  0xc3   :  { %1093 = vmatprep.subr.bf16.mxu1 %v16521_v26  ;;  %v1214_v26 = vld [vmem:[#allocation8 + $0x240] sm:$0xff] }
  0xc4   :  { %v1430_v17 = vld [vmem:[#allocation8 + $0x900] sm:$0xff] }
  0xc5   :  { %1051 = vmatpush1.bf16.msra.mxu0 %v16516_v27  ;;  %v14543_v27 = vcombine.high %v1222_v21, %v1230_v22  ;;  %v1438_v18 = vld [vmem:[#allocation8 + $0x940] sm:$0xff] }
  0xc6   :  { %1094 = vmatpush1.bf16.msra.mxu1 %v16519_v28  ;;  %1052 = vmatprep.subr.bf16.mxu0 %v16524_v29  ;;  %v14542_v28 = vcombine.low %v1222_v21, %v1230_v22  ;;  %v1190_v29 = vld [vmem:[#allocation8 + $0x180] sm:$0xff]  ;;  %v14750_v21 = vcombine.low %v1430_v17, %v1438_v18  ;;  %v14751_v22 = vcombine.high %v1430_v17, %v1438_v18 }
  0xc7   :  { %1095 = vmatprep.subr.bf16.mxu1 %v16527_v30  ;;  %v1198_v30 = vld [vmem:[#allocation8 + $0x1c0] sm:$0xff] }
  0xc8   :  { %v1526_v18 = vld [vmem:[#allocation8 + $0xc00] sm:$0xff] }
  0xc9   :  { %1053 = vmatpush1.bf16.msra.mxu0 %v16522_v31  ;;  %v14527_v31 = vcombine.high %v1206_v25, %v1214_v26 }
  0xca   :  { %1096 = vmatpush1.bf16.msra.mxu1 %v16525_v32  ;;  %1054 = vmatprep.subr.bf16.mxu0 %v16530_v33  ;;  %v14526_v32 = vcombine.low %v1206_v25, %v1214_v26  ;;  %v1174_v33 = vld [vmem:[#allocation8 + $0x100] sm:$0xff] }
  0xcb   :  { %1097 = vmatprep.subr.bf16.mxu1 %v16533_v34  ;;  %v1182_v34 = vld [vmem:[#allocation8 + $0x140] sm:$0xff] }
  0xcc   :  { %v1414_v25 = vld [vmem:[#allocation8 + $0x880] sm:$0xff] }
  0xcd   :  { %1055 = vmatpush1.bf16.msra.mxu0 %v16528_v35  ;;  %v1510_v35 = vld [vmem:[#allocation8 + $0xb80] sm:$0xff] }
  0xce   :  { %1098 = vmatpush1.bf16.msra.mxu1 %v16531_v36  ;;  %1056 = vmatprep.subr.bf16.mxu0 %v16536_v37  ;;  %v18675_v36 = vld [vmem:[#allocation8 + $0x388] sm:$0xff]  ;;  %v14510_v37 = vcombine.low %v1190_v29, %v1198_v30  ;;  %v1422_v26 = vld [vmem:[#allocation8 + $0x8c0] sm:$0xff] }
  0xcf   :  { %1099 = vmatprep.subr.bf16.mxu1 %v16539_v38  ;;  %v1158_v38 = vld [vmem:[#allocation8 + $0x80] sm:$0xff] }
  0xd1   :  { %1057 = vmatpush1.bf16.msra.mxu0 %v16534_v39  ;;  %v1166_v39 = vld [vmem:[#allocation8 + $0xc0] sm:$0xff] }
  0xd2   :  { %1100 = vmatpush1.bf16.msra.mxu1 %v16537_v40  ;;  %1058 = vmatprep.subr.bf16.mxu0 %v16542_v41  ;;  %v18677_v41 = vld [vmem:[#allocation8 + $0x3c8] sm:$0xff] }
  0xd3   :  { %1101 = vmatprep.subr.bf16.mxu1 %v16545_v42  ;;  %v14495_v42 = vcombine.high %v1174_v33, %v1182_v34 }
  0xd5   :  { %1059 = vmatpush1.bf16.msra.mxu0 %v16540_v43 }
  0xd6   :  { %1102 = vmatpush1.bf16.msra.mxu1 %v16543_v44  ;;  %1060 = vmatprep.subr.bf16.mxu0 %v16548_v45  ;;  %v14576_v44 = vcombine.low %v18675_v36, %v18677_v41  ;;  %v14494_v45 = vcombine.low %v1174_v33, %v1182_v34  ;;  %v1398_v33 = vld [vmem:[#allocation8 + $0x800] sm:$0xff] }
  0xd7   :  { %1103 = vmatprep.subr.bf16.mxu1 %v16551_v46  ;;  %v1142_v46 = vld [vmem:[#allocation8] sm:$0xff] }
  0xd8   :  { %v1406_v34 = vld [vmem:[#allocation8 + $0x840] sm:$0xff] }
  0xd9   :  { %1061 = vmatpush2.bf16.msra.mxu0 %v16546_v47  ;;  %v1494_v47 = vld [vmem:[#allocation8 + $0xb00] sm:$0xff] }
  0xda   :  { %1104 = vmatpush2.bf16.msra.mxu1 %v16549_v48  ;;  %1062 = vmatprep.subr.bf16.mxu0 %v16554_v49  ;;  %v1502_v48 = vld [vmem:[#allocation8 + $0xb40] sm:$0xff]  ;;  %v14479_v49 = vcombine.high %v1158_v38, %v1166_v39 }
  0xdb   :  { %1105 = vmatprep.subr.bf16.mxu1 %v16557_v50  ;;  %v1150_v50 = vld [vmem:[#allocation8 + $0x40] sm:$0xff] }
  0xdd   :  { %1063 = vmatpush2.bf16.msra.mxu0 %v16552_v51  ;;  %v14814_v51 = vcombine.low %v1494_v47, %v1502_v48 }
  0xde   :  { %1106 = vmatpush2.bf16.msra.mxu1 %v16555_v52  ;;  %1064 = vmatprep.subr.bf16.mxu0 %v16560_v53  ;;  %v14815_v52 = vcombine.high %v1494_v47, %v1502_v48  ;;  %v14478_v53 = vcombine.low %v1158_v38, %v1166_v39  ;;  %v1286_v39 = vld [vmem:[#allocation8 + $0x480] sm:$0xff] }
  0xdf   :  { %1107 = vmatprep.subr.bf16.mxu1 %v16563_v54  ;;  %v1382_v54 = vld [vmem:[#allocation8 + $0x780] sm:$0xff] }
  0xe1   :  { %1065 = vmatpush2.bf16.msra.mxu0 %v16558_v55  ;;  %v1478_v55 = vld [vmem:[#allocation8 + $0xa80] sm:$0xff] }
  0xe2   :  { %1108 = vmatpush2.bf16.msra.mxu1 %v16561_v56  ;;  %1066 = vmatprep.subr.bf16.mxu0 %v16566_v57  ;;  %v1486_v56 = vld [vmem:[#allocation8 + $0xac0] sm:$0xff]  ;;  %v14463_v57 = vcombine.high %v1142_v46, %v1150_v50 }
  0xe3   :  { %1109 = vmatprep.subr.bf16.mxu1 %v16569_v58  ;;  %v1390_v58 = vld [vmem:[#allocation8 + $0x7c0] sm:$0xff] }
  0xe5   :  { %1067 = vmatpush2.bf16.msra.mxu0 %v16564_v59  ;;  %v14798_v59 = vcombine.low %v1478_v55, %v1486_v56 }
  0xe6   :  { %1110 = vmatpush2.bf16.msra.mxu1 %v16567_v60  ;;  %1068 = vmatprep.subr.bf16.mxu0 %v16572_v61  ;;  %v14799_v60 = vcombine.high %v1478_v55, %v1486_v56  ;;  %v14462_v61 = vcombine.low %v1142_v46, %v1150_v50  ;;  %v1622_v50 = vld [vmem:[#allocation8 + $0xf00] sm:$0xff] }
  0xe7   :  { %1111 = vmatprep.subr.bf16.mxu1 %v16575_v62  ;;  %v1366_v62 = vld [vmem:[#allocation8 + $0x700] sm:$0xff] }
  0xe9   :  { %1069 = vmatpush2.bf16.msra.mxu0 %v16570_v63  ;;  %v1462_v63 = vld [vmem:[#allocation8 + $0xa00] sm:$0xff] }
  0xea   :  { %1112 = vmatpush2.bf16.msra.mxu1 %v16573_v0  ;;  %1070 = vmatprep.subr.bf16.mxu0 %v16578_v1  ;;  %v1470_v0 = vld [vmem:[#allocation8 + $0xa40] sm:$0xff]  ;;  %v14703_v1 = vcombine.high %v1382_v54, %v1390_v58 }
  0xeb   :  { %1113 = vmatprep.subr.bf16.mxu1 %v16581_v2  ;;  %v1374_v2 = vld [vmem:[#allocation8 + $0x740] sm:$0xff] }
  0xed   :  { %1071 = vmatpush2.bf16.msra.mxu0 %v16576_v3  ;;  %v14782_v3 = vcombine.low %v1462_v63, %v1470_v0 }
  0xee   :  { %1114 = vmatpush2.bf16.msra.mxu1 %v16579_v4  ;;  %1072 = vmatprep.subr.bf16.mxu0 %v16584_v5  ;;  %v14783_v4 = vcombine.high %v1462_v63, %v1470_v0  ;;  %v14702_v5 = vcombine.low %v1382_v54, %v1390_v58  ;;  %v1614_v58 = vld [vmem:[#allocation8 + $0xec0] sm:$0xff] }
  0xef   :  { %1115 = vmatprep.subr.bf16.mxu1 %v16587_v6  ;;  %v1350_v6 = vld [vmem:[#allocation8 + $0x680] sm:$0xff] }
  0xf0   :  { %v1590_v63 = vld [vmem:[#allocation8 + $0xe00] sm:$0xff] }
  0xf1   :  { %1073 = vmatpush2.bf16.msra.mxu0 %v16582_v7  ;;  %v1446_v7 = vld [vmem:[#allocation8 + $0x980] sm:$0xff] }
  0xf2   :  { %1116 = vmatpush2.bf16.msra.mxu1 %v16585_v8  ;;  %1074 = vmatprep.subr.bf16.mxu0 %v16590_v9  ;;  %v1454_v8 = vld [vmem:[#allocation8 + $0x9c0] sm:$0xff]  ;;  %v14687_v9 = vcombine.high %v1366_v62, %v1374_v2 }
  0xf3   :  { %1117 = vmatprep.subr.bf16.mxu1 %v16593_v10  ;;  %v1358_v10 = vld [vmem:[#allocation8 + $0x6c0] sm:$0xff]  ;;  %v14766_v11 = vcombine.low %v1446_v7, %v1454_v8  ;;  %v14767_v12 = vcombine.high %v1446_v7, %v1454_v8 }
  0xf4   :  { %v1598_v0 = vld [vmem:[#allocation8 + $0xe40] sm:$0xff] }
  0xf5   :  { %1075 = vmatpush2.bf16.msra.mxu0 %v16588_v15  ;;  %v14686_v15 = vcombine.low %v1366_v62, %v1374_v2  ;;  %v14910_v2 = vcombine.low %v1590_v63, %v1598_v0  ;;  %v1558_v8 = vld [vmem:[#allocation8 + $0xd00] sm:$0xff] }
  0xf6   :  { %1118 = vmatpush2.bf16.msra.mxu1 %v16591_v16  ;;  %4298 = vmatprep.subr.bf16.mxu0 %v14575_v19  ;;  %v1334_v16 = vld [vmem:[#allocation8 + $0x600] sm:$0xff]  ;;  %v14671_v19 = vcombine.high %v1350_v6, %v1358_v10 }
  0xf8   :  { %1077 = vmatmul.mubr.bf16.vlgmr.msra.gmra.mxu0 %v18667_v13  ;;  %v14511_v13 = vcombine.high %v1190_v29, %v1198_v30  ;;  %v14734_v29 = vcombine.low %v1414_v25, %v1422_v26  ;;  %v14735_v30 = vcombine.high %v1414_v25, %v1422_v26  ;;  %v298_v26 = vlaneseq }
  0xf9   :  { %1120 = vmatmul.mubr.bf16.vlgmr.msra.gmra.mxu1 %v18669_v14  ;;  %4299 = vmatpush1.bf16.msra.mxu0 %v14574_v20  ;;  %v1518_v14 = vld [vmem:[#allocation8 + $0xbc0] sm:$0xff] }
  0xfa   :  { %4300 = vmatprep.subr.bf16.mxu0 %v14559_v23  ;;  %v14831_v40 = vcombine.high %v1510_v35, %v1518_v14  ;;  %v14830_v43 = vcombine.low %v1510_v35, %v1518_v14  ;;  %v1342_v20 = vld [vmem:[#allocation8 + $0x640] sm:$0xff]  ;;  %v14670_v23 = vcombine.low %v1350_v6, %v1358_v10  ;;  %v14718_v14 = vcombine.low %v1398_v33, %v1406_v34 }
  0xfb   :  { %v1310_v35 = vld [vmem:[#allocation8 + $0x540] sm:$0xff] }
  0xfc   :  { %4341 = vmatprep.subr.bf16.mxu1 %v14831_v40  ;;  %v1638_v40 = vld [vmem:[#allocation8 + $0xf80] sm:$0xff] }
  0xfd   :  { %4301 = vmatpush1.bf16.msra.mxu0 %v14558_v24  ;;  %4342 = vmatpush1.bf16.msra.mxu1 %v14830_v43  ;;  %v1318_v24 = vld [vmem:[#allocation8 + $0x580] sm:$0xff] }
  0xfe   :  { %4302 = vmatprep.subr.bf16.mxu0 %v14543_v27  ;;  %4343 = vmatprep.subr.bf16.mxu1 %v14815_v52  ;;  %v14655_v27 = vcombine.high %v1334_v16, %v1342_v20 }
 0x101   :  { %4303 = vmatpush1.bf16.msra.mxu0 %v14542_v28  ;;  %4344 = vmatpush1.bf16.msra.mxu1 %v14814_v51  ;;  %v1326_v28 = vld [vmem:[#allocation8 + $0x5c0] sm:$0xff] }
 0x102   :  { %4304 = vmatprep.subr.bf16.mxu0 %v14527_v31  ;;  %4345 = vmatprep.subr.bf16.mxu1 %v14799_v60  ;;  %v14654_v31 = vcombine.low %v1334_v16, %v1342_v20  ;;  %v14638_v38 = vcombine.low %v1318_v24, %v1326_v28  ;;  %v1630_v51 = vld [vmem:[#allocation8 + $0xf40] sm:$0xff] }
 0x103   :  { %v14942_v54 = vcombine.low %v1622_v50, %v1630_v51  ;;  %v14943_v55 = vcombine.high %v1622_v50, %v1630_v51  ;;  %v1239_v51 = vld [vmem:[#allocation8 + $0x308] sm:$0xff] }
 0x105   :  { %4305 = vmatpush1.bf16.msra.mxu0 %v14526_v32  ;;  %4346 = vmatpush1.bf16.msra.mxu1 %v14798_v59  ;;  %v1302_v32 = vld [vmem:[#allocation8 + $0x500] sm:$0xff] }
 0x106   :  { %4306 = vmatprep.subr.bf16.mxu0 %v14511_v13  ;;  %4347 = vmatprep.subr.bf16.mxu1 %v14783_v4  ;;  %v14639_v13 = vcombine.high %v1318_v24, %v1326_v28  ;;  %v14623_v43 = vcombine.high %v1302_v32, %v1310_v35  ;;  %v14622_v48 = vcombine.low %v1302_v32, %v1310_v35  ;;  %v1574_v4 = vld [vmem:[#allocation8 + $0xd80] sm:$0xff]  ;;  %v18693_v28 = vld [vmem:[#allocation6] sm:$0xf] }
 0x109   :  { %4307 = vmatpush1.bf16.msra.mxu0 %v14510_v37  ;;  %4348 = vmatpush1.bf16.msra.mxu1 %v14782_v3  ;;  %v14719_v37 = vcombine.high %v1398_v33, %v1406_v34  ;;  %v14911_v3 = vcombine.high %v1590_v63, %v1598_v0  ;;  %v1207_v63 = vld [vmem:[#allocation8 + $0x208] sm:$0xff] }
 0x10a   :  { %4308 = vmatprep.subr.bf16.mxu0 %v14495_v42  ;;  %4349 = vmatprep.subr.bf16.mxu1 %v14767_v12  ;;  %v1646_v42 = vld [vmem:[#allocation8 + $0xfc0] sm:$0xff]  ;;  %v1215_v0 = vld [vmem:[#allocation8 + $0x248] sm:$0xff] }
 0x10b   :  { %v14958_v46 = vcombine.low %v1638_v40, %v1646_v42  ;;  %v14959_v47 = vcombine.high %v1638_v40, %v1646_v42  ;;  %v1542_v12 = vld [vmem:[#allocation8 + $0xc80] sm:$0xff] }
 0x10d   :  { %4309 = vmatpush1.bf16.msra.mxu0 %v14494_v45  ;;  %4350 = vmatpush1.bf16.msra.mxu1 %v14766_v11  ;;  %v1294_v45 = vld [vmem:[#allocation8 + $0x4c0] sm:$0xff] }
 0x10e   :  { %4310 = vmatprep.subr.bf16.mxu0 %v14479_v49  ;;  %4351 = vmatprep.subr.bf16.mxu1 %v14751_v22  ;;  %v1270_v49 = vld [vmem:[#allocation8 + $0x400] sm:$0xff]  ;;  %v14607_v52 = vcombine.high %v1286_v39, %v1294_v45  ;;  %v14606_v56 = vcombine.low %v1286_v39, %v1294_v45  ;;  %v18683_v22 = vld [vmem:[#allocation8 + $0xb88] sm:$0xff] }
 0x111   :  { %4311 = vmatpush1.bf16.msra.mxu0 %v14478_v53  ;;  %4352 = vmatpush1.bf16.msra.mxu1 %v14750_v21  ;;  %v1278_v53 = vld [vmem:[#allocation8 + $0x440] sm:$0xff] }
 0x112   :  { %4312 = vmatprep.subr.bf16.mxu0 %v14463_v57  ;;  %4353 = vmatprep.subr.bf16.mxu1 %v14735_v30  ;;  %v1606_v57 = vld [vmem:[#allocation8 + $0xe80] sm:$0xff]  ;;  %v14591_v59 = vcombine.high %v1270_v49, %v1278_v53  ;;  %v14590_v62 = vcombine.low %v1270_v49, %v1278_v53 }
 0x113   :  { %v14926_v60 = vcombine.low %v1606_v57, %v1614_v58 }
 0x115   :  { %4313 = vmatpush1.bf16.msra.mxu0 %v14462_v61  ;;  %4354 = vmatpush1.bf16.msra.mxu1 %v14734_v29  ;;  %v14927_v61 = vcombine.high %v1606_v57, %v1614_v58 }
 0x116   :  { %4314 = vmatprep.subr.bf16.mxu0 %v14703_v1  ;;  %4355 = vmatprep.subr.bf16.mxu1 %v14719_v37  ;;  %v14577_v1 = vcombine.high %v18675_v36, %v18677_v41  ;;  %v1183_v36 = vld [vmem:[#allocation8 + $0x148] sm:$0xff] }
 0x119   :  { %4315 = vmatpush2.bf16.msra.mxu0 %v14702_v5  ;;  %4356 = vmatpush1.bf16.msra.mxu1 %v14718_v14  ;;  %v1582_v5 = vld [vmem:[#allocation8 + $0xdc0] sm:$0xff] }
 0x11a   :  { %4316 = vmatprep.subr.bf16.mxu0 %v14687_v9  ;;  %4357 = vmatprep.subr.bf16.mxu1 %v14959_v47  ;;  %v14894_v6 = vcombine.low %v1574_v4, %v1582_v5  ;;  %v14895_v7 = vcombine.high %v1574_v4, %v1582_v5  ;;  %v1566_v9 = vld [vmem:[#allocation8 + $0xd40] sm:$0xff]  ;;  %v1199_v4 = vld [vmem:[#allocation8 + $0x1c8] sm:$0xff]  ;;  %v14528_v5 = vcombine.low %v1207_v63, %v1215_v0 }
 0x11b   :  { %v14879_v10 = vcombine.high %v1558_v8, %v1566_v9  ;;  %v14878_v11 = vcombine.low %v1558_v8, %v1566_v9  ;;  %v1159_v8 = vld [vmem:[#allocation8 + $0x88] sm:$0xff] }
 0x11c   :  { %v1167_v9 = vld [vmem:[#allocation8 + $0xc8] sm:$0xff] }
 0x11d   :  { %4317 = vmatpush2.bf16.msra.mxu0 %v14686_v15  ;;  %4358 = vmatpush2.bf16.msra.mxu1 %v14958_v46  ;;  %v1550_v15 = vld [vmem:[#allocation8 + $0xcc0] sm:$0xff] }
 0x11e   :  { %4318 = vmatprep.subr.bf16.mxu0 %v14671_v19  ;;  %4359 = vmatprep.subr.bf16.mxu1 %v14943_v55  ;;  %v14863_v16 = vcombine.high %v1542_v12, %v1550_v15  ;;  %v14862_v17 = vcombine.low %v1542_v12, %v1550_v15  ;;  %v1534_v19 = vld [vmem:[#allocation8 + $0xc40] sm:$0xff]  ;;  %v1143_v12 = vld [vmem:[#allocation8 + $0x8] sm:$0xff] }
 0x11f   :  { %v14847_v20 = vcombine.high %v1526_v18, %v1534_v19  ;;  %v14846_v21 = vcombine.low %v1526_v18, %v1534_v19  ;;  %v1151_v15 = vld [vmem:[#allocation8 + $0x48] sm:$0xff] }
 0x120   :  { %v1383_v18 = vld [vmem:[#allocation8 + $0x788] sm:$0xff] }
 0x121   :  { %4319 = vmatpush2.bf16.msra.mxu0 %v14670_v23  ;;  %4360 = vmatpush2.bf16.msra.mxu1 %v14942_v54  ;;  %v18685_v23 = vld [vmem:[#allocation8 + $0xbc8] sm:$0xff] }
 0x122   :  { %4320 = vmatprep.subr.bf16.mxu0 %v14655_v27  ;;  %4361 = vmatprep.subr.bf16.mxu1 %v14927_v61  ;;  %v14833_v24 = vcombine.high %v18683_v22, %v18685_v23  ;;  %v14832_v25 = vcombine.low %v18683_v22, %v18685_v23  ;;  %v18691_v27 = vshrl.u32 %v298_v26, 7  ;;  %v1391_v19 = vld [vmem:[#allocation8 + $0x7c8] sm:$0xff] }
 0x123   :  { %v1375_v26 = vld [vmem:[#allocation8 + $0x748] sm:$0xff] }
 0x124   :  { %v18696_v29 = vsub.s32 1, %v18691_v27  ;;  %v18699_v30 = vsub.s32 0, %v18691_v27  ;;  %v1447_v23 = vld [vmem:[#allocation8 + $0x988] sm:$0xff] }
 0x125   :  { %4321 = vmatpush2.bf16.msra.mxu0 %v14654_v31  ;;  %4362 = vmatpush2.bf16.msra.mxu1 %v14926_v60  ;;  %v1231_v60 = vld [vmem:[#allocation8 + $0x2c8] sm:$0xff] }
 0x126   :  { %4322 = vmatprep.subr.bf16.mxu0 %v14639_v13  ;;  %4363 = vmatprep.subr.bf16.mxu1 %v14911_v3  ;;  %v305_v31 = vrot.slane %v18693_v28, %v18696_v29  ;;  %v301_v32 = vrot.slane %v18693_v28, %v18699_v30  ;;  %v1191_v3 = vld [vmem:[#allocation8 + $0x188] sm:$0xff] }
 0x127   :  { %v14512_v41 = vcombine.low %v1191_v3, %v1199_v4 }
 0x129   :  { %4323 = vmatpush2.bf16.msra.mxu0 %v14638_v38  ;;  %4364 = vmatpush2.bf16.msra.mxu1 %v14910_v2  ;;  %v14529_v2 = vcombine.high %v1207_v63, %v1215_v0  ;;  %v1271_v0 = vld [vmem:[#allocation8 + $0x408] sm:$0xff] }
 0x12a   :  { %4324 = vmatprep.subr.bf16.mxu0 %v14623_v43  ;;  %4365 = vmatprep.subr.bf16.mxu1 %v14895_v7  ;;  %v1175_v7 = vld [vmem:[#allocation8 + $0x108] sm:$0xff] }
 0x12d   :  { %4325 = vmatpush2.bf16.msra.mxu0 %v14622_v48  ;;  %4366 = vmatpush2.bf16.msra.mxu1 %v14894_v6  ;;  %v14513_v6 = vcombine.high %v1191_v3, %v1199_v4 }
 0x12e   :  { %4326 = vmatprep.subr.bf16.mxu0 %v14607_v52  ;;  %4367 = vmatprep.subr.bf16.mxu1 %v14879_v10  ;;  %v1247_v52 = vld [vmem:[#allocation8 + $0x348] sm:$0xff]  ;;  %v14496_v10 = vcombine.low %v1175_v7, %v1183_v36 }
 0x12f   :  { %v14561_v58 = vcombine.high %v1239_v51, %v1247_v52  ;;  %v14560_v61 = vcombine.low %v1239_v51, %v1247_v52  ;;  %v1287_v52 = vld [vmem:[#allocation8 + $0x488] sm:$0xff] }
 0x131   :  { %4327 = vmatpush2.bf16.msra.mxu0 %v14606_v56  ;;  %4368 = vmatpush2.bf16.msra.mxu1 %v14878_v11  ;;  %v14481_v11 = vcombine.high %v1159_v8, %v1167_v9 }
 0x132   :  { %4328 = vmatprep.subr.bf16.mxu0 %v14591_v59  ;;  %4369 = vmatprep.subr.bf16.mxu1 %v14863_v16  ;;  %v1223_v59 = vld [vmem:[#allocation8 + $0x288] sm:$0xff]  ;;  %v14480_v16 = vcombine.low %v1159_v8, %v1167_v9 }
 0x135   :  { %4329 = vmatpush2.bf16.msra.mxu0 %v14590_v62  ;;  %4370 = vmatpush2.bf16.msra.mxu1 %v14862_v17  ;;  %v14545_v62 = vcombine.high %v1223_v59, %v1231_v60  ;;  %v14465_v17 = vcombine.high %v1143_v12, %v1151_v15 }
 0x136   :  { %4384 = vmatprep.subr.bf16.mxu0 %v14577_v1  ;;  %4371 = vmatprep.subr.bf16.mxu1 %v14847_v20  ;;  %v14544_v1 = vcombine.low %v1223_v59, %v1231_v60  ;;  %v14464_v20 = vcombine.low %v1143_v12, %v1151_v15 }
 0x139   :  { %4372 = vmatpush2.bf16.msra.mxu1 %v14846_v21  ;;  %v14705_v21 = vcombine.high %v1383_v18, %v1391_v19 }
 0x13a   :  { %4427 = vmatprep.subr.bf16.mxu1 %v14833_v24  ;;  %v1367_v24 = vld [vmem:[#allocation8 + $0x708] sm:$0xff] }
 0x178   :  { %v992_v33 = vpop.f32.mrf.mxu0 }
 0x179   :  { %v1035_v34 = vpop.f32.mrf.mxu1  ;;  %v993_v37 = vadd.f32 %v992_v33, %v301_v32  ;;  %v1351_v33 = vld [vmem:[#allocation8 + $0x688] sm:$0xff] }
 0x17a   :  { %v994_v13 = vpop.f32.mrf.mxu0 }
 0x17b   :  { %v1037_v35 = vpop.f32.mrf.mxu1  ;;  %v995_v14 = vadd.f32 %v994_v13, %v305_v31  ;;  %v1036_v47 = vadd.f32 %v1035_v34, %v993_v37  ;;  %v1359_v34 = vld [vmem:[#allocation8 + $0x6c8] sm:$0xff]  ;;  %v14688_v13 = vcombine.low %v1367_v24, %v1375_v26 }
 0x17c   :  { %v996_v38 = vpop.f32.mrf.mxu0  ;;  %v1343_v37 = vld [vmem:[#allocation8 + $0x648] sm:$0xff] }
 0x17d   :  { %v1039_v39 = vpop.f32.mrf.mxu1  ;;  %v997_v40 = vadd.f32 %v996_v38, %v301_v32  ;;  %v1038_v43 = vadd.f32 %v1037_v35, %v995_v14  ;;  %v1130_v55 = vmax.f32 %v1036_v47, 0.0  ;;  %v14689_v32 = vcombine.high %v1367_v24, %v1375_v26  ;;  %v1335_v14 = vld [vmem:[#allocation8 + $0x608] sm:$0xff] }
 0x17e   :  { %v998_v42 = vpop.f32.mrf.mxu0  ;;  %v14673_v35 = vcombine.high %v1351_v33, %v1359_v34  ;;  %v14672_v38 = vcombine.low %v1351_v33, %v1359_v34  ;;  %v18716_v47 = vsub.s32 3, %v18691_v27 }
 0x17f   :  { %v1040_v45 = vadd.f32 %v1039_v39, %v997_v40  ;;  %v999_v46 = vadd.f32 %v998_v42, %v305_v31  ;;  %v1041_v48 = vpop.f32.mrf.mxu1  ;;  %v1131_v53 = vmax.f32 %v1038_v43, 0.0  ;;  %v14704_v31 = vcombine.low %v1383_v18, %v1391_v19  ;;  %v1319_v40 = vld [vmem:[#allocation8 + $0x588] sm:$0xff] }
 0x180   :  { %v14657_v39 = vcombine.high %v1335_v14, %v1343_v37  ;;  %v1327_v42 = vld [vmem:[#allocation8 + $0x5c8] sm:$0xff]  ;;  %v14656_v43 = vcombine.low %v1335_v14, %v1343_v37  ;;  %v1224_v37 = vld [vmem:[#allocation8 + $0x290] sm:$0xff] }
 0x181   :  { %v1042_v49 = vadd.f32 %v1041_v48, %v999_v46  ;;  %v1134_v50 = vmax.f32 %v1040_v45, 0.0  ;;  %v14641_v45 = vcombine.high %v1319_v40, %v1327_v42  ;;  %v1303_v46 = vld [vmem:[#allocation8 + $0x508] sm:$0xff] }
 0x182   :  { %v1311_v48 = vld [vmem:[#allocation8 + $0x548] sm:$0xff] }
 0x183   :  { %v1135_v54 = vmax.f32 %v1042_v49, 0.0  ;;  %v18707_v57 = vpack.c.bf16 %v1134_v50, %v1130_v55  ;;  %v18719_v49 = vsub.s32 2, %v18691_v27  ;;  %v14640_v50 = vcombine.low %v1319_v40, %v1327_v42  ;;  %v1495_v19 = vld [vmem:[#allocation8 + $0xb08] sm:$0xff]  ;;  %v1232_v40 = vld [vmem:[#allocation8 + $0x2d0] sm:$0xff] }
 0x184   :  { %v14625_v51 = vcombine.high %v1303_v46, %v1311_v48  ;;  %v14624_v60 = vcombine.low %v1303_v46, %v1311_v48  ;;  %v1487_v14 = vld [vmem:[#allocation8 + $0xac8] sm:$0xff]  ;;  %v14547_v48 = vcombine.high %v1224_v37, %v1232_v40  ;;  %v14546_v22 = vcombine.low %v1224_v37, %v1232_v40  ;;  %v1368_v40 = vld [vmem:[#allocation8 + $0x710] sm:$0xff] }
 0x185   :  { %v18705_v56 = vpack.c.bf16 %v1135_v54, %v1131_v53  ;;  %v313_v53 = vrot.slane %v18693_v28, %v18716_v47  ;;  %v1295_v54 = vld [vmem:[#allocation8 + $0x4c8] sm:$0xff]  ;;  %v309_v55 = vrot.slane %v18693_v28, %v18719_v49 }
 0x186   :  { %v14609_v63 = vcombine.high %v1287_v52, %v1295_v54 }
 0x187   :  { %4330 = vmatprep.mubr.bf16.mxu0 %v18705_v56 }
 0x188   :  { %4331 = vmatmul.mubr.bf16.vlgmr.msra.gmra.mxu0 %v18707_v57 }
 0x189   :  { %4385 = vmatpush1.bf16.msra.mxu0 %v14576_v44  ;;  %4416 = vmatprep.mubr.bf16.mxu0 %v18705_v56  ;;  %v14497_v44 = vcombine.high %v1175_v7, %v1183_v36  ;;  %v14608_v7 = vcombine.low %v1287_v52, %v1295_v54  ;;  %v1216_v52 = vld [vmem:[#allocation8 + $0x250] sm:$0xff] }
 0x18a   :  { %4386 = vmatprep.subr.bf16.mxu0 %v14561_v58 }
 0x18d   :  { %4387 = vmatpush1.bf16.msra.mxu0 %v14560_v61 }
 0x18e   :  { %4388 = vmatprep.subr.bf16.mxu0 %v14545_v62 }
 0x191   :  { %4389 = vmatpush1.bf16.msra.mxu0 %v14544_v1 }
 0x192   :  { %4390 = vmatprep.subr.bf16.mxu0 %v14529_v2  ;;  %v1279_v2 = vld [vmem:[#allocation8 + $0x448] sm:$0xff] }
 0x193   :  { %v14593_v28 = vcombine.high %v1271_v0, %v1279_v2 }
 0x195   :  { %4391 = vmatpush1.bf16.msra.mxu0 %v14528_v5 }
 0x196   :  { %4392 = vmatprep.subr.bf16.mxu0 %v14513_v6 }
 0x199   :  { %4393 = vmatpush1.bf16.msra.mxu0 %v14512_v41  ;;  %v1256_v41 = vld [vmem:[#allocation8 + $0x390] sm:$0xff] }
 0x19a   :  { %4394 = vmatprep.subr.bf16.mxu0 %v14497_v44 }
 0x19d   :  { %4395 = vmatpush1.bf16.msra.mxu0 %v14496_v10  ;;  %v1264_v10 = vld [vmem:[#allocation8 + $0x3d0] sm:$0xff] }
 0x19e   :  { %4396 = vmatprep.subr.bf16.mxu0 %v14481_v11  ;;  %v14579_v18 = vcombine.high %v1256_v41, %v1264_v10  ;;  %v14578_v34 = vcombine.low %v1256_v41, %v1264_v10  ;;  %v1160_v41 = vld [vmem:[#allocation8 + $0x90] sm:$0xff] }
 0x1a1   :  { %4397 = vmatpush1.bf16.msra.mxu0 %v14480_v16  ;;  %v14592_v16 = vcombine.low %v1271_v0, %v1279_v2  ;;  %v1431_v0 = vld [vmem:[#allocation8 + $0x908] sm:$0xff]  ;;  %v1176_v2 = vld [vmem:[#allocation8 + $0x110] sm:$0xff] }
 0x1a2   :  { %4398 = vmatprep.subr.bf16.mxu0 %v14465_v17 }
 0x1a5   :  { %4399 = vmatpush1.bf16.msra.mxu0 %v14464_v20  ;;  %v1503_v20 = vld [vmem:[#allocation8 + $0xb48] sm:$0xff] }
 0x1a6   :  { %4400 = vmatprep.subr.bf16.mxu0 %v14705_v21  ;;  %v1240_v21 = vld [vmem:[#allocation8 + $0x310] sm:$0xff]  ;;  %v14816_v42 = vcombine.low %v1495_v19, %v1503_v20 }
 0x1a9   :  { %4401 = vmatpush2.bf16.msra.mxu0 %v14704_v31  ;;  %v1248_v31 = vld [vmem:[#allocation8 + $0x350] sm:$0xff] }
 0x1aa   :  { %4402 = vmatprep.subr.bf16.mxu0 %v14689_v32 }
 0x1ad   :  { %4403 = vmatpush2.bf16.msra.mxu0 %v14688_v13 }
 0x1ae   :  { %4404 = vmatprep.subr.bf16.mxu0 %v14673_v35  ;;  %v1479_v35 = vld [vmem:[#allocation8 + $0xa88] sm:$0xff] }
 0x1af   :  { %v14801_v46 = vcombine.high %v1479_v35, %v1487_v14 }
 0x1b1   :  { %4405 = vmatpush2.bf16.msra.mxu0 %v14672_v38  ;;  %v14817_v38 = vcombine.high %v1495_v19, %v1503_v20 }
 0x1b2   :  { %4406 = vmatprep.subr.bf16.mxu0 %v14657_v39  ;;  %v14563_v39 = vcombine.high %v1240_v21, %v1248_v31 }
 0x1b5   :  { %4407 = vmatpush2.bf16.msra.mxu0 %v14656_v43  ;;  %v14562_v43 = vcombine.low %v1240_v21, %v1248_v31  ;;  %v1384_v31 = vld [vmem:[#allocation8 + $0x790] sm:$0xff] }
 0x1b6   :  { %4408 = vmatprep.subr.bf16.mxu0 %v14641_v45  ;;  %v1463_v45 = vld [vmem:[#allocation8 + $0xa08] sm:$0xff] }
 0x1b8   :  { %v1078_v58 = vpop.f32.mrf.mxu0 }
 0x1b9   :  { %v1121_v59 = vpop.f32.mrf.mxu1  ;;  %4409 = vmatpush2.bf16.msra.mxu0 %v14640_v50  ;;  %v1079_v3 = vadd.f32 %v1078_v58, %v309_v55  ;;  %v1471_v50 = vld [vmem:[#allocation8 + $0xa48] sm:$0xff]  ;;  %v1192_v58 = vld [vmem:[#allocation8 + $0x190] sm:$0xff] }
 0x1ba   :  { %v1080_v61 = vpop.f32.mrf.mxu0  ;;  %4410 = vmatprep.subr.bf16.mxu0 %v14625_v51  ;;  %v1208_v51 = vld [vmem:[#allocation8 + $0x210] sm:$0xff] }
 0x1bb   :  { %v1123_v62 = vpop.f32.mrf.mxu1  ;;  %v1081_v1 = vadd.f32 %v1080_v61, %v313_v53  ;;  %v1122_v11 = vadd.f32 %v1121_v59, %v1079_v3  ;;  %v14531_v54 = vcombine.high %v1208_v51, %v1216_v52  ;;  %v1200_v59 = vld [vmem:[#allocation8 + $0x1d0] sm:$0xff]  ;;  %v14530_v61 = vcombine.low %v1208_v51, %v1216_v52  ;;  %v1615_v51 = vld [vmem:[#allocation8 + $0xec8] sm:$0xff] }
 0x1bc   :  { %v1082_v4 = vpop.f32.mrf.mxu0  ;;  %v1184_v3 = vld [vmem:[#allocation8 + $0x150] sm:$0xff] }
 0x1bd   :  { %v1125_v5 = vpop.f32.mrf.mxu1  ;;  %v1083_v6 = vadd.f32 %v1082_v4, %v309_v55  ;;  %4411 = vmatpush2.bf16.msra.mxu0 %v14624_v60  ;;  %v1124_v44 = vadd.f32 %v1123_v62, %v1081_v1  ;;  %v1132_v32 = vmax.f32 %v1122_v11, 0.0  ;;  %v1455_v55 = vld [vmem:[#allocation8 + $0x9c8] sm:$0xff]  ;;  %v14784_v60 = vcombine.low %v1463_v45, %v1471_v50  ;;  %v1352_v52 = vld [vmem:[#allocation8 + $0x690] sm:$0xff] }
 0x1be   :  { %v1084_v36 = vpop.f32.mrf.mxu0  ;;  %4412 = vmatprep.subr.bf16.mxu0 %v14609_v63  ;;  %v14769_v62 = vcombine.high %v1447_v23, %v1455_v55  ;;  %v14515_v63 = vcombine.high %v1192_v58, %v1200_v59  ;;  %v1439_v1 = vld [vmem:[#allocation8 + $0x948] sm:$0xff]  ;;  %v14768_v4 = vcombine.low %v1447_v23, %v1455_v55 }
 0x1bf   :  { %v1126_v8 = vadd.f32 %v1125_v5, %v1083_v6  ;;  %v1085_v9 = vadd.f32 %v1084_v36, %v313_v53  ;;  %v1127_v12 = vpop.f32.mrf.mxu1  ;;  %v1133_v24 = vmax.f32 %v1124_v44, 0.0  ;;  %v14800_v53 = vcombine.low %v1479_v35, %v1487_v14  ;;  %v1415_v36 = vld [vmem:[#allocation8 + $0x888] sm:$0xff]  ;;  %v1168_v44 = vld [vmem:[#allocation8 + $0xd0] sm:$0xff] }
 0x1c0   :  { %v14514_v5 = vcombine.low %v1192_v58, %v1200_v59  ;;  %v14753_v6 = vcombine.high %v1431_v0, %v1439_v1  ;;  %v14483_v11 = vcombine.high %v1160_v41, %v1168_v44  ;;  %v14482_v19 = vcombine.low %v1160_v41, %v1168_v44  ;;  %v1591_v55 = vld [vmem:[#allocation8 + $0xe08] sm:$0xff]  ;;  %v1336_v59 = vld [vmem:[#allocation8 + $0x610] sm:$0xff] }
 0x1c1   :  { %v1128_v15 = vadd.f32 %v1127_v12, %v1085_v9  ;;  %4413 = vmatpush2.bf16.msra.mxu0 %v14608_v7  ;;  %v1136_v17 = vmax.f32 %v1126_v8, 0.0  ;;  %v14499_v7 = vcombine.high %v1176_v2, %v1184_v3  ;;  %v14752_v8 = vcombine.low %v1431_v0, %v1439_v1  ;;  %v1399_v12 = vld [vmem:[#allocation8 + $0x808] sm:$0xff]  ;;  %v1304_v44 = vld [vmem:[#allocation8 + $0x510] sm:$0xff] }
 0x1c2   :  { %4414 = vmatprep.subr.bf16.mxu0 %v14593_v28  ;;  %v1423_v28 = vld [vmem:[#allocation8 + $0x8c8] sm:$0xff]  ;;  %v14498_v9 = vcombine.low %v1176_v2, %v1184_v3  ;;  %v1320_v3 = vld [vmem:[#allocation8 + $0x590] sm:$0xff] }
 0x1c3   :  { %v1137_v26 = vmax.f32 %v1128_v15, 0.0  ;;  %v18727_v13 = vpack.c.bf16 %v1136_v17, %v1132_v32  ;;  %v14737_v10 = vcombine.high %v1415_v36, %v1423_v28  ;;  %v1407_v15 = vld [vmem:[#allocation8 + $0x848] sm:$0xff]  ;;  %v1152_v17 = vld [vmem:[#allocation8 + $0x50] sm:$0xff] }
 0x1c4   :  { %v14721_v20 = vcombine.high %v1399_v12, %v1407_v15  ;;  %v1392_v32 = vld [vmem:[#allocation8 + $0x7d0] sm:$0xff]  ;;  %v1599_v58 = vld [vmem:[#allocation8 + $0xe48] sm:$0xff] }
 0x1c5   :  { %v18725_v33 = vpack.c.bf16 %v1137_v26, %v1133_v24  ;;  %4415 = vmatpush2.bf16.msra.mxu0 %v14592_v16  ;;  %v1144_v16 = vld [vmem:[#allocation8 + $0x10] sm:$0xff]  ;;  %v1639_v24 = vld [vmem:[#allocation8 + $0xf88] sm:$0xff]  ;;  %v14707_v37 = vcombine.high %v1384_v31, %v1392_v32 }
 0x1c6   :  { %4470 = vmatprep.subr.bf16.mxu0 %v14579_v18  ;;  %v14736_v18 = vcombine.low %v1415_v36, %v1423_v28  ;;  %v14467_v21 = vcombine.high %v1144_v16, %v1152_v17  ;;  %v1647_v26 = vld [vmem:[#allocation8 + $0xfc8] sm:$0xff]  ;;  %v14466_v35 = vcombine.low %v1144_v16, %v1152_v17  ;;  %v1288_v17 = vld [vmem:[#allocation8 + $0x490] sm:$0xff] }
 0x1c7   :  { %4373 = vmatprep.mubr.bf16.mxu1 %v18725_v33  ;;  %v14961_v14 = vcombine.high %v1639_v24, %v1647_v26  ;;  %v1575_v1 = vld [vmem:[#allocation8 + $0xd88] sm:$0xff] }
 0x1c8   :  { %4417 = vmatmul.mubr.bf16.vlgmr.msra.gmra.mxu0 %v18707_v57  ;;  %4374 = vmatmul.mubr.bf16.vlgmr.msra.gmra.mxu1 %v18727_v13  ;;  %v1583_v2 = vld [vmem:[#allocation8 + $0xdc8] sm:$0xff] }
 0x1c9   :  { %4428 = vmatpush1.bf16.msra.mxu1 %v14832_v25  ;;  %4471 = vmatpush1.bf16.msra.mxu0 %v14578_v34  ;;  %v14785_v25 = vcombine.high %v1463_v45, %v1471_v50  ;;  %v14720_v34 = vcombine.low %v1399_v12, %v1407_v15  ;;  %v14706_v45 = vcombine.low %v1384_v31, %v1392_v32  ;;  %v1607_v50 = vld [vmem:[#allocation8 + $0xe88] sm:$0xff]  ;;  %v1272_v32 = vld [vmem:[#allocation8 + $0x410] sm:$0xff] }
 0x1ca   :  { %4502 = vmatprep.mubr.bf16.mxu0 %v18705_v56  ;;  %4459 = vmatprep.mubr.bf16.mxu1 %v18725_v33  ;;  %v1559_v28 = vld [vmem:[#allocation8 + $0xd08] sm:$0xff] }
 0x1cb   :  { %4429 = vmatprep.subr.bf16.mxu1 %v14817_v38  ;;  %4472 = vmatprep.subr.bf16.mxu0 %v14563_v39  ;;  %v1623_v38 = vld [vmem:[#allocation8 + $0xf08] sm:$0xff] }
 0x1cc   :  { %v1631_v39 = vld [vmem:[#allocation8 + $0xf48] sm:$0xff] }
 0x1cd   :  { %4430 = vmatpush1.bf16.msra.mxu1 %v14816_v42  ;;  %4473 = vmatpush1.bf16.msra.mxu0 %v14562_v43  ;;  %v1376_v42 = vld [vmem:[#allocation8 + $0x750] sm:$0xff]  ;;  %v14960_v43 = vcombine.low %v1639_v24, %v1647_v26  ;;  %v1567_v41 = vld [vmem:[#allocation8 + $0xd48] sm:$0xff] }
 0x1ce   :  { %4431 = vmatprep.subr.bf16.mxu1 %v14801_v46  ;;  %4474 = vmatprep.subr.bf16.mxu0 %v14547_v48  ;;  %v14945_v46 = vcombine.high %v1623_v38, %v1631_v39  ;;  %v14691_v48 = vcombine.high %v1368_v40, %v1376_v42  ;;  %v14690_v23 = vcombine.low %v1368_v40, %v1376_v42  ;;  %v1543_v15 = vld [vmem:[#allocation8 + $0xc88] sm:$0xff]  ;;  %v1520_v40 = vld [vmem:[#allocation8 + $0xbd0] sm:$0xff]  ;;  %v1257_v42 = vld [vmem:[#allocation8 + $0x398] sm:$0xff] }
 0x1cf   :  { %v1551_v16 = vld [vmem:[#allocation8 + $0xcc8] sm:$0xff] }
 0x1d0   :  { %v1527_v26 = vld [vmem:[#allocation8 + $0xc08] sm:$0xff] }
 0x1d1   :  { %4432 = vmatpush1.bf16.msra.mxu1 %v14800_v53  ;;  %4475 = vmatpush1.bf16.msra.mxu0 %v14546_v22  ;;  %v1360_v53 = vld [vmem:[#allocation8 + $0x6d0] sm:$0xff]  ;;  %v14944_v22 = vcombine.low %v1623_v38, %v1631_v39  ;;  %v1535_v31 = vld [vmem:[#allocation8 + $0xc48] sm:$0xff] }
 0x1d2   :  { %4433 = vmatprep.subr.bf16.mxu1 %v14785_v25  ;;  %4476 = vmatprep.subr.bf16.mxu0 %v14531_v54  ;;  %v14929_v25 = vcombine.high %v1607_v50, %v1615_v51  ;;  %v14675_v54 = vcombine.high %v1352_v52, %v1360_v53  ;;  %v1512_v39 = vld [vmem:[#allocation8 + $0xb90] sm:$0xff] }
 0x1d5   :  { %4434 = vmatpush1.bf16.msra.mxu1 %v14784_v60  ;;  %4477 = vmatpush1.bf16.msra.mxu0 %v14530_v61  ;;  %v1344_v60 = vld [vmem:[#allocation8 + $0x650] sm:$0xff]  ;;  %v14928_v61 = vcombine.low %v1607_v50, %v1615_v51 }
 0x1d6   :  { %4435 = vmatprep.subr.bf16.mxu1 %v14769_v62  ;;  %4478 = vmatprep.subr.bf16.mxu0 %v14515_v63  ;;  %v14674_v62 = vcombine.low %v1352_v52, %v1360_v53  ;;  %v14913_v63 = vcombine.high %v1591_v55, %v1599_v58  ;;  %v14659_v0 = vcombine.high %v1336_v59, %v1344_v60  ;;  %v1496_v51 = vld [vmem:[#allocation8 + $0xb10] sm:$0xff]  ;;  %v1241_v53 = vld [vmem:[#allocation8 + $0x318] sm:$0xff] }
 0x1d7   :  { %v1504_v52 = vld [vmem:[#allocation8 + $0xb50] sm:$0xff] }
 0x1d9   :  { %4436 = vmatpush1.bf16.msra.mxu1 %v14768_v4  ;;  %4479 = vmatpush1.bf16.msra.mxu0 %v14514_v5  ;;  %v1328_v4 = vld [vmem:[#allocation8 + $0x5d0] sm:$0xff]  ;;  %v14912_v5 = vcombine.low %v1591_v55, %v1599_v58 }
 0x1da   :  { %4437 = vmatprep.subr.bf16.mxu1 %v14753_v6  ;;  %4480 = vmatprep.subr.bf16.mxu0 %v14499_v7  ;;  %v14658_v6 = vcombine.low %v1336_v59, %v1344_v60  ;;  %v14897_v7 = vcombine.high %v1575_v1, %v1583_v2  ;;  %v14643_v36 = vcombine.high %v1320_v3, %v1328_v4  ;;  %v1480_v58 = vld [vmem:[#allocation8 + $0xa90] sm:$0xff]  ;;  %v1225_v60 = vld [vmem:[#allocation8 + $0x298] sm:$0xff] }
 0x1db   :  { %v1488_v59 = vld [vmem:[#allocation8 + $0xad0] sm:$0xff] }
 0x1dd   :  { %4438 = vmatpush1.bf16.msra.mxu1 %v14752_v8  ;;  %4481 = vmatpush1.bf16.msra.mxu0 %v14498_v9  ;;  %v1312_v8 = vld [vmem:[#allocation8 + $0x550] sm:$0xff]  ;;  %v14896_v9 = vcombine.low %v1575_v1, %v1583_v2 }
 0x1de   :  { %4439 = vmatprep.subr.bf16.mxu1 %v14737_v10  ;;  %4482 = vmatprep.subr.bf16.mxu0 %v14483_v11  ;;  %v14642_v10 = vcombine.low %v1320_v3, %v1328_v4  ;;  %v14881_v11 = vcombine.high %v1559_v28, %v1567_v41  ;;  %v14627_v12 = vcombine.high %v1304_v44, %v1312_v8  ;;  %v1464_v2 = vld [vmem:[#allocation8 + $0xa10] sm:$0xff]  ;;  %v1209_v4 = vld [vmem:[#allocation8 + $0x218] sm:$0xff] }
 0x1df   :  { %v1472_v3 = vld [vmem:[#allocation8 + $0xa50] sm:$0xff] }
 0x1e1   :  { %4440 = vmatpush1.bf16.msra.mxu1 %v14736_v18  ;;  %4483 = vmatpush1.bf16.msra.mxu0 %v14482_v19  ;;  %v1296_v18 = vld [vmem:[#allocation8 + $0x4d0] sm:$0xff]  ;;  %v14880_v19 = vcombine.low %v1559_v28, %v1567_v41 }
 0x1e2   :  { %4441 = vmatprep.subr.bf16.mxu1 %v14721_v20  ;;  %4484 = vmatprep.subr.bf16.mxu0 %v14467_v21  ;;  %v14626_v20 = vcombine.low %v1304_v44, %v1312_v8  ;;  %v14865_v21 = vcombine.high %v1543_v15, %v1551_v16  ;;  %v14611_v24 = vcombine.high %v1288_v17, %v1296_v18  ;;  %v1448_v41 = vld [vmem:[#allocation8 + $0x990] sm:$0xff]  ;;  %v1193_v8 = vld [vmem:[#allocation8 + $0x198] sm:$0xff] }
 0x1e3   :  { %v1456_v44 = vld [vmem:[#allocation8 + $0x9d0] sm:$0xff] }
 0x1e5   :  { %4442 = vmatpush1.bf16.msra.mxu1 %v14720_v34  ;;  %4485 = vmatpush1.bf16.msra.mxu0 %v14466_v35  ;;  %v1280_v34 = vld [vmem:[#allocation8 + $0x450] sm:$0xff]  ;;  %v14864_v35 = vcombine.low %v1543_v15, %v1551_v16 }
 0x1e6   :  { %4443 = vmatprep.subr.bf16.mxu1 %v14961_v14  ;;  %4486 = vmatprep.subr.bf16.mxu0 %v14707_v37  ;;  %v14610_v14 = vcombine.low %v1288_v17, %v1296_v18  ;;  %v14849_v37 = vcombine.high %v1527_v26, %v1535_v31  ;;  %v14595_v38 = vcombine.high %v1272_v32, %v1280_v34  ;;  %v1432_v15 = vld [vmem:[#allocation8 + $0x910] sm:$0xff]  ;;  %v1177_v17 = vld [vmem:[#allocation8 + $0x118] sm:$0xff] }
 0x1e7   :  { %v1440_v16 = vld [vmem:[#allocation8 + $0x950] sm:$0xff] }
 0x1e9   :  { %4444 = vmatpush2.bf16.msra.mxu1 %v14960_v43  ;;  %4487 = vmatpush2.bf16.msra.mxu0 %v14706_v45  ;;  %v1265_v43 = vld [vmem:[#allocation8 + $0x3d8] sm:$0xff]  ;;  %v14848_v45 = vcombine.low %v1527_v26, %v1535_v31  ;;  %v1416_v26 = vld [vmem:[#allocation8 + $0x890] sm:$0xff] }
 0x1ea   :  { %4445 = vmatprep.subr.bf16.mxu1 %v14945_v46  ;;  %4488 = vmatprep.subr.bf16.mxu0 %v14691_v48  ;;  %v14594_v46 = vcombine.low %v1272_v32, %v1280_v34  ;;  %v14835_v48 = vcombine.high %v1512_v39, %v1520_v40  ;;  %v14581_v50 = vcombine.high %v1257_v42, %v1265_v43  ;;  %v1424_v31 = vld [vmem:[#allocation8 + $0x8d0] sm:$0xff]  ;;  %v1161_v32 = vld [vmem:[#allocation8 + $0x98] sm:$0xff] }
 0x1ed   :  { %4446 = vmatpush2.bf16.msra.mxu1 %v14944_v22  ;;  %4489 = vmatpush2.bf16.msra.mxu0 %v14690_v23  ;;  %v1249_v22 = vld [vmem:[#allocation8 + $0x358] sm:$0xff]  ;;  %v14834_v23 = vcombine.low %v1512_v39, %v1520_v40  ;;  %v1400_v39 = vld [vmem:[#allocation8 + $0x810] sm:$0xff] }
 0x1ee   :  { %4447 = vmatprep.subr.bf16.mxu1 %v14929_v25  ;;  %4490 = vmatprep.subr.bf16.mxu0 %v14675_v54  ;;  %v14580_v25 = vcombine.low %v1257_v42, %v1265_v43  ;;  %v14819_v54 = vcombine.high %v1496_v51, %v1504_v52  ;;  %v14565_v55 = vcombine.high %v1241_v53, %v1249_v22  ;;  %v1408_v40 = vld [vmem:[#allocation8 + $0x850] sm:$0xff]  ;;  %v1145_v42 = vld [vmem:[#allocation8 + $0x18] sm:$0xff] }
 0x1f1   :  { %4448 = vmatpush2.bf16.msra.mxu1 %v14928_v61  ;;  %4491 = vmatpush2.bf16.msra.mxu0 %v14674_v62  ;;  %v1233_v61 = vld [vmem:[#allocation8 + $0x2d8] sm:$0xff]  ;;  %v14818_v62 = vcombine.low %v1496_v51, %v1504_v52  ;;  %v1640_v51 = vld [vmem:[#allocation8 + $0xf90] sm:$0xff] }
 0x1f2   :  { %4449 = vmatprep.subr.bf16.mxu1 %v14913_v63  ;;  %4492 = vmatprep.subr.bf16.mxu0 %v14659_v0  ;;  %v14564_v63 = vcombine.low %v1241_v53, %v1249_v22  ;;  %v14803_v0 = vcombine.high %v1480_v58, %v1488_v59  ;;  %v14549_v1 = vcombine.high %v1225_v60, %v1233_v61  ;;  %v1648_v52 = vld [vmem:[#allocation8 + $0xfd0] sm:$0xff]  ;;  %v1385_v53 = vld [vmem:[#allocation8 + $0x798] sm:$0xff] }
 0x1f5   :  { %4450 = vmatpush2.bf16.msra.mxu1 %v14912_v5  ;;  %4493 = vmatpush2.bf16.msra.mxu0 %v14658_v6  ;;  %v1217_v5 = vld [vmem:[#allocation8 + $0x258] sm:$0xff]  ;;  %v14802_v6 = vcombine.low %v1480_v58, %v1488_v59  ;;  %v1624_v58 = vld [vmem:[#allocation8 + $0xf10] sm:$0xff] }
 0x1f6   :  { %4451 = vmatprep.subr.bf16.mxu1 %v14897_v7  ;;  %4494 = vmatprep.subr.bf16.mxu0 %v14643_v36  ;;  %v14548_v7 = vcombine.low %v1225_v60, %v1233_v61  ;;  %v14787_v36 = vcombine.high %v1464_v2, %v1472_v3  ;;  %v14533_v28 = vcombine.high %v1209_v4, %v1217_v5  ;;  %v1632_v59 = vld [vmem:[#allocation8 + $0xf50] sm:$0xff]  ;;  %v1369_v60 = vld [vmem:[#allocation8 + $0x718] sm:$0xff] }
 0x1f9   :  { %4452 = vmatpush2.bf16.msra.mxu1 %v14896_v9  ;;  %4495 = vmatpush2.bf16.msra.mxu0 %v14642_v10  ;;  %v1201_v9 = vld [vmem:[#allocation8 + $0x1d8] sm:$0xff]  ;;  %v14786_v10 = vcombine.low %v1464_v2, %v1472_v3  ;;  %v1608_v2 = vld [vmem:[#allocation8 + $0xe90] sm:$0xff] }
 0x1fa   :  { %4453 = vmatprep.subr.bf16.mxu1 %v14881_v11  ;;  %4496 = vmatprep.subr.bf16.mxu0 %v14627_v12  ;;  %v14532_v11 = vcombine.low %v1209_v4, %v1217_v5  ;;  %v14771_v12 = vcombine.high %v1448_v41, %v1456_v44  ;;  %v14517_v18 = vcombine.high %v1193_v8, %v1201_v9  ;;  %v1616_v3 = vld [vmem:[#allocation8 + $0xed0] sm:$0xff]  ;;  %v1353_v4 = vld [vmem:[#allocation8 + $0x698] sm:$0xff] }
 0x1fd   :  { %4454 = vmatpush2.bf16.msra.mxu1 %v14880_v19  ;;  %4497 = vmatpush2.bf16.msra.mxu0 %v14626_v20  ;;  %v1185_v19 = vld [vmem:[#allocation8 + $0x158] sm:$0xff]  ;;  %v14770_v20 = vcombine.low %v1448_v41, %v1456_v44  ;;  %v1592_v41 = vld [vmem:[#allocation8 + $0xe10] sm:$0xff] }
 0x1fe   :  { %4455 = vmatprep.subr.bf16.mxu1 %v14865_v21  ;;  %4498 = vmatprep.subr.bf16.mxu0 %v14611_v24  ;;  %v14516_v21 = vcombine.low %v1193_v8, %v1201_v9  ;;  %v14755_v24 = vcombine.high %v1432_v15, %v1440_v16  ;;  %v14501_v34 = vcombine.high %v1177_v17, %v1185_v19  ;;  %v1600_v44 = vld [vmem:[#allocation8 + $0xe50] sm:$0xff]  ;;  %v1337_v8 = vld [vmem:[#allocation8 + $0x618] sm:$0xff] }
 0x201   :  { %4456 = vmatpush2.bf16.msra.mxu1 %v14864_v35  ;;  %4499 = vmatpush2.bf16.msra.mxu0 %v14610_v14  ;;  %v1169_v35 = vld [vmem:[#allocation8 + $0xd8] sm:$0xff]  ;;  %v14754_v14 = vcombine.low %v1432_v15, %v1440_v16  ;;  %v14915_v15 = vcombine.high %v1592_v41, %v1600_v44  ;;  %v1576_v16 = vld [vmem:[#allocation8 + $0xd90] sm:$0xff] }
 0x202   :  { %4457 = vmatprep.subr.bf16.mxu1 %v14849_v37  ;;  %4500 = vmatprep.subr.bf16.mxu0 %v14595_v38  ;;  %v14500_v37 = vcombine.low %v1177_v17, %v1185_v19  ;;  %v14739_v38 = vcombine.high %v1416_v26, %v1424_v31  ;;  %v14485_v43 = vcombine.high %v1161_v32, %v1169_v35  ;;  %v1584_v17 = vld [vmem:[#allocation8 + $0xdd0] sm:$0xff] }
 0x205   :  { %4458 = vmatpush2.bf16.msra.mxu1 %v14848_v45  ;;  %4501 = vmatpush2.bf16.msra.mxu0 %v14594_v46  ;;  %v1153_v45 = vld [vmem:[#allocation8 + $0x58] sm:$0xff]  ;;  %v14738_v46 = vcombine.low %v1416_v26, %v1424_v31  ;;  %v14899_v26 = vcombine.high %v1576_v16, %v1584_v17  ;;  %v1560_v31 = vld [vmem:[#allocation8 + $0xd10] sm:$0xff] }
 0x206   :  { %4513 = vmatprep.subr.bf16.mxu1 %v14835_v48  ;;  %4556 = vmatprep.subr.bf16.mxu0 %v14581_v50  ;;  %v14484_v48 = vcombine.low %v1161_v32, %v1169_v35  ;;  %v14723_v50 = vcombine.high %v1400_v39, %v1408_v40  ;;  %v14469_v22 = vcombine.high %v1145_v42, %v1153_v45  ;;  %v1568_v32 = vld [vmem:[#allocation8 + $0xd50] sm:$0xff] }
 0x208   :  { %4460 = vmatmul.mubr.bf16.vlgmr.msra.gmra.mxu1 %v18727_v13  ;;  %4503 = vmatmul.mubr.bf16.vlgmr.msra.gmra.mxu0 %v18707_v57 }
 0x209   :  { %4514 = vmatpush1.bf16.msra.mxu1 %v14834_v23  ;;  %4545 = vmatprep.mubr.bf16.mxu1 %v18725_v33  ;;  %v1393_v23 = vld [vmem:[#allocation8 + $0x7d8] sm:$0xff] }
 0x20a   :  { %4557 = vmatpush1.bf16.msra.mxu0 %v14580_v25  ;;  %4588 = vmatprep.mubr.bf16.mxu0 %v18705_v56  ;;  %v14722_v25 = vcombine.low %v1400_v39, %v1408_v40  ;;  %v14709_v61 = vcombine.high %v1385_v53, %v1393_v23  ;;  %v14883_v39 = vcombine.high %v1560_v31, %v1568_v32  ;;  %v1544_v40 = vld [vmem:[#allocation8 + $0xc90] sm:$0xff] }
 0x20b   :  { %4515 = vmatprep.subr.bf16.mxu1 %v14819_v54  ;;  %4558 = vmatprep.subr.bf16.mxu0 %v14565_v55  ;;  %v14468_v54 = vcombine.low %v1145_v42, %v1153_v45  ;;  %v14963_v55 = vcombine.high %v1640_v51, %v1648_v52  ;;  %v1552_v42 = vld [vmem:[#allocation8 + $0xcd0] sm:$0xff] }
 0x20d   :  { %4516 = vmatpush1.bf16.msra.mxu1 %v14818_v62  ;;  %v1377_v62 = vld [vmem:[#allocation8 + $0x758] sm:$0xff] }
 0x20e   :  { %4559 = vmatpush1.bf16.msra.mxu0 %v14564_v63  ;;  %4517 = vmatprep.subr.bf16.mxu1 %v14803_v0  ;;  %v14962_v63 = vcombine.low %v1640_v51, %v1648_v52  ;;  %v14708_v0 = vcombine.low %v1385_v53, %v1393_v23  ;;  %v14693_v5 = vcombine.high %v1369_v60, %v1377_v62  ;;  %v1528_v52 = vld [vmem:[#allocation8 + $0xc10] sm:$0xff] }
 0x20f   :  { %4560 = vmatprep.subr.bf16.mxu0 %v14549_v1  ;;  %v14947_v1 = vcombine.high %v1624_v58, %v1632_v59  ;;  %v14867_v51 = vcombine.high %v1544_v40, %v1552_v42  ;;  %v1536_v53 = vld [vmem:[#allocation8 + $0xc50] sm:$0xff] }
 0x211   :  { %4518 = vmatpush1.bf16.msra.mxu1 %v14802_v6  ;;  %v1361_v6 = vld [vmem:[#allocation8 + $0x6d8] sm:$0xff] }
 0x212   :  { %4561 = vmatpush1.bf16.msra.mxu0 %v14548_v7  ;;  %4519 = vmatprep.subr.bf16.mxu1 %v14787_v36  ;;  %v14946_v7 = vcombine.low %v1624_v58, %v1632_v59  ;;  %v14692_v36 = vcombine.low %v1369_v60, %v1377_v62  ;;  %v14677_v9 = vcombine.high %v1353_v4, %v1361_v6  ;;  %v1513_v59 = vld [vmem:[#allocation8 + $0xb98] sm:$0xff] }
 0x213   :  { %4562 = vmatprep.subr.bf16.mxu0 %v14533_v28  ;;  %v14931_v28 = vcombine.high %v1608_v2, %v1616_v3  ;;  %v14851_v58 = vcombine.high %v1528_v52, %v1536_v53  ;;  %v1521_v60 = vld [vmem:[#allocation8 + $0xbd8] sm:$0xff] }
 0x215   :  { %4520 = vmatpush1.bf16.msra.mxu1 %v14786_v10  ;;  %v1345_v10 = vld [vmem:[#allocation8 + $0x658] sm:$0xff] }
 0x216   :  { %4563 = vmatpush1.bf16.msra.mxu0 %v14532_v11  ;;  %4521 = vmatprep.subr.bf16.mxu1 %v14771_v12  ;;  %v14930_v11 = vcombine.low %v1608_v2, %v1616_v3  ;;  %v14676_v12 = vcombine.low %v1353_v4, %v1361_v6  ;;  %v14661_v19 = vcombine.high %v1337_v8, %v1345_v10  ;;  %v1497_v3 = vld [vmem:[#allocation8 + $0xb18] sm:$0xff]  ;;  %v1242_v6 = vld [vmem:[#allocation8 + $0x320] sm:$0xff] }
 0x217   :  { %4564 = vmatprep.subr.bf16.mxu0 %v14517_v18  ;;  %v1321_v18 = vld [vmem:[#allocation8 + $0x598] sm:$0xff]  ;;  %v14837_v2 = vcombine.high %v1513_v59, %v1521_v60 }
 0x218   :  { %v1505_v4 = vld [vmem:[#allocation8 + $0xb58] sm:$0xff] }
 0x219   :  { %4522 = vmatpush1.bf16.msra.mxu1 %v14770_v20  ;;  %v1329_v20 = vld [vmem:[#allocation8 + $0x5d8] sm:$0xff] }
 0x21a   :  { %4565 = vmatpush1.bf16.msra.mxu0 %v14516_v21  ;;  %4523 = vmatprep.subr.bf16.mxu1 %v14755_v24  ;;  %v14914_v21 = vcombine.low %v1592_v41, %v1600_v44  ;;  %v14660_v24 = vcombine.low %v1337_v8, %v1345_v10  ;;  %v14645_v35 = vcombine.high %v1321_v18, %v1329_v20  ;;  %v1481_v44 = vld [vmem:[#allocation8 + $0xa98] sm:$0xff] }
 0x21b   :  { %4566 = vmatprep.subr.bf16.mxu0 %v14501_v34  ;;  %v1305_v34 = vld [vmem:[#allocation8 + $0x518] sm:$0xff]  ;;  %v14821_v41 = vcombine.high %v1497_v3, %v1505_v4 }
 0x21c   :  { %v1489_v8 = vld [vmem:[#allocation8 + $0xad8] sm:$0xff] }
 0x21d   :  { %4524 = vmatpush1.bf16.msra.mxu1 %v14754_v14  ;;  %v1313_v14 = vld [vmem:[#allocation8 + $0x558] sm:$0xff] }
 0x21e   :  { %4567 = vmatpush1.bf16.msra.mxu0 %v14500_v37  ;;  %4525 = vmatprep.subr.bf16.mxu1 %v14739_v38  ;;  %v14898_v37 = vcombine.low %v1576_v16, %v1584_v17  ;;  %v14644_v38 = vcombine.low %v1321_v18, %v1329_v20  ;;  %v14629_v45 = vcombine.high %v1305_v34, %v1313_v14  ;;  %v1465_v18 = vld [vmem:[#allocation8 + $0xa18] sm:$0xff]  ;;  %v1210_v20 = vld [vmem:[#allocation8 + $0x220] sm:$0xff] }
 0x21f   :  { %4568 = vmatprep.subr.bf16.mxu0 %v14485_v43  ;;  %v1289_v43 = vld [vmem:[#allocation8 + $0x498] sm:$0xff]  ;;  %v14805_v16 = vcombine.high %v1481_v44, %v1489_v8 }
 0x221   :  { %4526 = vmatpush1.bf16.msra.mxu1 %v14738_v46  ;;  %v1297_v46 = vld [vmem:[#allocation8 + $0x4d8] sm:$0xff] }
 0x222   :  { %4569 = vmatpush1.bf16.msra.mxu0 %v14484_v48  ;;  %4527 = vmatprep.subr.bf16.mxu1 %v14723_v50  ;;  %v14882_v48 = vcombine.low %v1560_v31, %v1568_v32  ;;  %v14628_v50 = vcombine.low %v1305_v34, %v1313_v14  ;;  %v14613_v23 = vcombine.high %v1289_v43, %v1297_v46  ;;  %v1449_v34 = vld [vmem:[#allocation8 + $0x998] sm:$0xff]  ;;  %v1194_v14 = vld [vmem:[#allocation8 + $0x1a0] sm:$0xff] }
 0x223   :  { %4570 = vmatprep.subr.bf16.mxu0 %v14469_v22  ;;  %v1273_v22 = vld [vmem:[#allocation8 + $0x418] sm:$0xff] }
 0x225   :  { %4528 = vmatpush1.bf16.msra.mxu1 %v14722_v25  ;;  %v1281_v25 = vld [vmem:[#allocation8 + $0x458] sm:$0xff] }
 0x226   :  { %4571 = vmatpush1.bf16.msra.mxu0 %v14468_v54  ;;  %4529 = vmatprep.subr.bf16.mxu1 %v14963_v55  ;;  %v14866_v54 = vcombine.low %v1544_v40, %v1552_v42  ;;  %v14612_v55 = vcombine.low %v1289_v43, %v1297_v46  ;;  %v14597_v62 = vcombine.high %v1273_v22, %v1281_v25  ;;  %v1433_v42 = vld [vmem:[#allocation8 + $0x918] sm:$0xff] }
 0x227   :  { %4572 = vmatprep.subr.bf16.mxu0 %v14709_v61  ;;  %v1258_v61 = vld [vmem:[#allocation8 + $0x3a0] sm:$0xff]  ;;  %v1441_v43 = vld [vmem:[#allocation8 + $0x958] sm:$0xff] }
 0x229   :  { %4530 = vmatpush2.bf16.msra.mxu1 %v14962_v63  ;;  %v1266_v63 = vld [vmem:[#allocation8 + $0x3e0] sm:$0xff] }
 0x22a   :  { %4573 = vmatpush2.bf16.msra.mxu0 %v14708_v0  ;;  %4531 = vmatprep.subr.bf16.mxu1 %v14947_v1  ;;  %v14850_v0 = vcombine.low %v1528_v52, %v1536_v53  ;;  %v14596_v1 = vcombine.low %v1273_v22, %v1281_v25  ;;  %v14757_v52 = vcombine.high %v1433_v42, %v1441_v43  ;;  %v1417_v53 = vld [vmem:[#allocation8 + $0x898] sm:$0xff] }
 0x22b   :  { %4574 = vmatprep.subr.bf16.mxu0 %v14693_v5  ;;  %v14583_v5 = vcombine.high %v1258_v61, %v1266_v63  ;;  %v1425_v22 = vld [vmem:[#allocation8 + $0x8d8] sm:$0xff] }
 0x22d   :  { %4532 = vmatpush2.bf16.msra.mxu1 %v14946_v7  ;;  %v1250_v7 = vld [vmem:[#allocation8 + $0x360] sm:$0xff] }
 0x22e   :  { %4575 = vmatpush2.bf16.msra.mxu0 %v14692_v36  ;;  %4533 = vmatprep.subr.bf16.mxu1 %v14931_v28  ;;  %v14836_v36 = vcombine.low %v1513_v59, %v1521_v60  ;;  %v14582_v28 = vcombine.low %v1258_v61, %v1266_v63  ;;  %v14567_v10 = vcombine.high %v1242_v6, %v1250_v7  ;;  %v1401_v60 = vld [vmem:[#allocation8 + $0x818] sm:$0xff] }
 0x22f   :  { %4576 = vmatprep.subr.bf16.mxu0 %v14677_v9  ;;  %v1226_v9 = vld [vmem:[#allocation8 + $0x2a0] sm:$0xff]  ;;  %v14741_v59 = vcombine.high %v1417_v53, %v1425_v22  ;;  %v1409_v61 = vld [vmem:[#allocation8 + $0x858] sm:$0xff] }
 0x231   :  { %4534 = vmatpush2.bf16.msra.mxu1 %v14930_v11  ;;  %v1234_v11 = vld [vmem:[#allocation8 + $0x2e0] sm:$0xff] }
 0x232   :  { %4577 = vmatpush2.bf16.msra.mxu0 %v14676_v12  ;;  %4535 = vmatprep.subr.bf16.mxu1 %v14915_v15  ;;  %v14820_v12 = vcombine.low %v1497_v3, %v1505_v4  ;;  %v14566_v15 = vcombine.low %v1242_v6, %v1250_v7  ;;  %v14551_v17 = vcombine.high %v1226_v9, %v1234_v11  ;;  %v1641_v4 = vld [vmem:[#allocation8 + $0xf98] sm:$0xff]  ;;  %v1386_v6 = vld [vmem:[#allocation8 + $0x7a0] sm:$0xff] }
 0x233   :  { %4578 = vmatprep.subr.bf16.mxu0 %v14661_v19  ;;  %v1473_v19 = vld [vmem:[#allocation8 + $0xa58] sm:$0xff]  ;;  %v14725_v3 = vcombine.high %v1401_v60, %v1409_v61 }
 0x234   :  { %v14789_v31 = vcombine.high %v1465_v18, %v1473_v19 }
 0x235   :  { %4536 = vmatpush2.bf16.msra.mxu1 %v14914_v21  ;;  %v1218_v21 = vld [vmem:[#allocation8 + $0x260] sm:$0xff] }
 0x236   :  { %4579 = vmatpush2.bf16.msra.mxu0 %v14660_v24  ;;  %4537 = vmatprep.subr.bf16.mxu1 %v14899_v26  ;;  %v14804_v24 = vcombine.low %v1481_v44, %v1489_v8  ;;  %v14550_v26 = vcombine.low %v1226_v9, %v1234_v11  ;;  %v14535_v32 = vcombine.high %v1210_v20, %v1218_v21  ;;  %v1625_v8 = vld [vmem:[#allocation8 + $0xf18] sm:$0xff] }
 0x237   :  { %4580 = vmatprep.subr.bf16.mxu0 %v14645_v35  ;;  %v1457_v35 = vld [vmem:[#allocation8 + $0x9d8] sm:$0xff] }
 0x238   :  { %v14773_v40 = vcombine.high %v1449_v34, %v1457_v35  ;;  %v1633_v9 = vld [vmem:[#allocation8 + $0xf58] sm:$0xff] }
 0x239   :  { %4538 = vmatpush2.bf16.msra.mxu1 %v14898_v37  ;;  %v1202_v37 = vld [vmem:[#allocation8 + $0x1e0] sm:$0xff] }
 0x23a   :  { %4581 = vmatpush2.bf16.msra.mxu0 %v14644_v38  ;;  %4539 = vmatprep.subr.bf16.mxu1 %v14883_v39  ;;  %v14788_v38 = vcombine.low %v1465_v18, %v1473_v19  ;;  %v14534_v39 = vcombine.low %v1210_v20, %v1218_v21  ;;  %v14519_v46 = vcombine.high %v1194_v14, %v1202_v37  ;;  %v1609_v18 = vld [vmem:[#allocation8 + $0xe98] sm:$0xff]  ;;  %v1354_v20 = vld [vmem:[#allocation8 + $0x6a0] sm:$0xff] }
 0x23b   :  { %4582 = vmatprep.subr.bf16.mxu0 %v14629_v45  ;;  %v1178_v45 = vld [vmem:[#allocation8 + $0x120] sm:$0xff]  ;;  %v1617_v19 = vld [vmem:[#allocation8 + $0xed8] sm:$0xff] }
 0x23d   :  { %4540 = vmatpush2.bf16.msra.mxu1 %v14882_v48  ;;  %v1186_v48 = vld [vmem:[#allocation8 + $0x160] sm:$0xff] }
 0x23e   :  { %4583 = vmatpush2.bf16.msra.mxu0 %v14628_v50  ;;  %4541 = vmatprep.subr.bf16.mxu1 %v14867_v51  ;;  %v14772_v50 = vcombine.low %v1449_v34, %v1457_v35  ;;  %v14518_v51 = vcombine.low %v1194_v14, %v1202_v37  ;;  %v14503_v25 = vcombine.high %v1178_v45, %v1186_v48  ;;  %v1593_v34 = vld [vmem:[#allocation8 + $0xe18] sm:$0xff]  ;;  %v1338_v14 = vld [vmem:[#allocation8 + $0x620] sm:$0xff] }
 0x23f   :  { %4584 = vmatprep.subr.bf16.mxu0 %v14613_v23  ;;  %v1162_v23 = vld [vmem:[#allocation8 + $0xa0] sm:$0xff]  ;;  %v1601_v35 = vld [vmem:[#allocation8 + $0xe58] sm:$0xff] }
 0x241   :  { %4542 = vmatpush2.bf16.msra.mxu1 %v14866_v54  ;;  %v1170_v54 = vld [vmem:[#allocation8 + $0xe0] sm:$0xff] }
 0x242   :  { %4585 = vmatpush2.bf16.msra.mxu0 %v14612_v55  ;;  %4543 = vmatprep.subr.bf16.mxu1 %v14851_v58  ;;  %v14756_v55 = vcombine.low %v1433_v42, %v1441_v43  ;;  %v14502_v58 = vcombine.low %v1178_v45, %v1186_v48  ;;  %v14487_v63 = vcombine.high %v1162_v23, %v1170_v54  ;;  %v1577_v43 = vld [vmem:[#allocation8 + $0xd98] sm:$0xff] }
 0x243   :  { %4586 = vmatprep.subr.bf16.mxu0 %v14597_v62  ;;  %v1146_v62 = vld [vmem:[#allocation8 + $0x20] sm:$0xff]  ;;  %v14917_v42 = vcombine.high %v1593_v34, %v1601_v35  ;;  %v1585_v45 = vld [vmem:[#allocation8 + $0xdd8] sm:$0xff] }
 0x245   :  { %4544 = vmatpush2.bf16.msra.mxu1 %v14850_v0  ;;  %v1154_v0 = vld [vmem:[#allocation8 + $0x60] sm:$0xff] }
 0x246   :  { %4587 = vmatpush2.bf16.msra.mxu0 %v14596_v1  ;;  %4599 = vmatprep.subr.bf16.mxu1 %v14837_v2  ;;  %v14740_v1 = vcombine.low %v1417_v53, %v1425_v22  ;;  %v14486_v2 = vcombine.low %v1162_v23, %v1170_v54  ;;  %v14471_v7 = vcombine.high %v1146_v62, %v1154_v0  ;;  %v1561_v22 = vld [vmem:[#allocation8 + $0xd18] sm:$0xff] }
 0x247   :  { %4642 = vmatprep.subr.bf16.mxu0 %v14583_v5  ;;  %v1649_v5 = vld [vmem:[#allocation8 + $0xfd8] sm:$0xff]  ;;  %v14901_v53 = vcombine.high %v1577_v43, %v1585_v45 }
 0x248   :  { %4546 = vmatmul.mubr.bf16.vlgmr.msra.gmra.mxu1 %v18727_v13  ;;  %v14965_v44 = vcombine.high %v1641_v4, %v1649_v5  ;;  %v1569_v23 = vld [vmem:[#allocation8 + $0xd58] sm:$0xff] }
 0x249   :  { %4589 = vmatmul.mubr.bf16.vlgmr.msra.gmra.mxu0 %v18707_v57  ;;  %4600 = vmatpush1.bf16.msra.mxu1 %v14836_v36  ;;  %v1394_v36 = vld [vmem:[#allocation8 + $0x7e0] sm:$0xff] }
 0x24a   :  { %4631 = vmatprep.mubr.bf16.mxu1 %v18725_v33  ;;  %4643 = vmatpush1.bf16.msra.mxu0 %v14582_v28  ;;  %v14724_v28 = vcombine.low %v1401_v60, %v1409_v61  ;;  %v14711_v11 = vcombine.high %v1386_v6, %v1394_v36  ;;  %v14885_v60 = vcombine.high %v1561_v22, %v1569_v23  ;;  %v1545_v61 = vld [vmem:[#allocation8 + $0xc98] sm:$0xff] }
 0x24b   :  { %4674 = vmatprep.mubr.bf16.mxu0 %v18705_v56  ;;  %4601 = vmatprep.subr.bf16.mxu1 %v14821_v41  ;;  %v14470_v41 = vcombine.low %v1146_v62, %v1154_v0  ;;  %v1553_v62 = vld [vmem:[#allocation8 + $0xcd8] sm:$0xff] }
 0x24c   :  { %4644 = vmatprep.subr.bf16.mxu0 %v14567_v10  ;;  %v1370_v10 = vld [vmem:[#allocation8 + $0x720] sm:$0xff] }
 0x24d   :  { %4602 = vmatpush1.bf16.msra.mxu1 %v14820_v12  ;;  %v1378_v12 = vld [vmem:[#allocation8 + $0x760] sm:$0xff] }
 0x24e   :  { %4645 = vmatpush1.bf16.msra.mxu0 %v14566_v15  ;;  %4603 = vmatprep.subr.bf16.mxu1 %v14805_v16  ;;  %v14964_v15 = vcombine.low %v1641_v4, %v1649_v5  ;;  %v14710_v16 = vcombine.low %v1386_v6, %v1394_v36  ;;  %v14695_v21 = vcombine.high %v1370_v10, %v1378_v12  ;;  %v1529_v5 = vld [vmem:[#allocation8 + $0xc18] sm:$0xff] }
 0x24f   :  { %4646 = vmatprep.subr.bf16.mxu0 %v14551_v17  ;;  %v14949_v17 = vcombine.high %v1625_v8, %v1633_v9  ;;  %v14869_v4 = vcombine.high %v1545_v61, %v1553_v62  ;;  %v1537_v6 = vld [vmem:[#allocation8 + $0xc58] sm:$0xff] }
 0x251   :  { %4604 = vmatpush1.bf16.msra.mxu1 %v14804_v24  ;;  %v1362_v24 = vld [vmem:[#allocation8 + $0x6e0] sm:$0xff] }
 0x252   :  { %4647 = vmatpush1.bf16.msra.mxu0 %v14550_v26  ;;  %4605 = vmatprep.subr.bf16.mxu1 %v14789_v31  ;;  %v14948_v26 = vcombine.low %v1625_v8, %v1633_v9  ;;  %v14694_v31 = vcombine.low %v1370_v10, %v1378_v12  ;;  %v14679_v37 = vcombine.high %v1354_v20, %v1362_v24  ;;  %v1514_v10 = vld [vmem:[#allocation8 + $0xba0] sm:$0xff]  ;;  %v1259_v12 = vld [vmem:[#allocation8 + $0x3a8] sm:$0xff] }
 0x253   :  { %4648 = vmatprep.subr.bf16.mxu0 %v14535_v32  ;;  %v14933_v32 = vcombine.high %v1609_v18, %v1617_v19  ;;  %v14853_v9 = vcombine.high %v1529_v5, %v1537_v6 }
 0x255   :  { %4606 = vmatpush1.bf16.msra.mxu1 %v14788_v38  ;;  %v1346_v38 = vld [vmem:[#allocation8 + $0x660] sm:$0xff] }
 0x256   :  { %4649 = vmatpush1.bf16.msra.mxu0 %v14534_v39  ;;  %4607 = vmatprep.subr.bf16.mxu1 %v14773_v40  ;;  %v14932_v39 = vcombine.low %v1609_v18, %v1617_v19  ;;  %v14678_v40 = vcombine.low %v1354_v20, %v1362_v24  ;;  %v14663_v48 = vcombine.high %v1338_v14, %v1346_v38  ;;  %v1506_v24 = vld [vmem:[#allocation8 + $0xb60] sm:$0xff] }
 0x257   :  { %4650 = vmatprep.subr.bf16.mxu0 %v14519_v46  ;;  %v1322_v46 = vld [vmem:[#allocation8 + $0x5a0] sm:$0xff]  ;;  %v14852_v18 = vcombine.low %v1529_v5, %v1537_v6  ;;  %v1195_v6 = vld [vmem:[#allocation8 + $0x1a8] sm:$0xff] }
 0x258   :  { %v1458_v5 = vld [vmem:[#allocation8 + $0x9e0] sm:$0xff] }
 0x259   :  { %4608 = vmatpush1.bf16.msra.mxu1 %v14772_v50  ;;  %v1330_v50 = vld [vmem:[#allocation8 + $0x5e0] sm:$0xff] }
 0x25a   :  { %4651 = vmatpush1.bf16.msra.mxu0 %v14518_v51  ;;  %4609 = vmatprep.subr.bf16.mxu1 %v14757_v52  ;;  %v14916_v51 = vcombine.low %v1593_v34, %v1601_v35  ;;  %v14662_v52 = vcombine.low %v1338_v14, %v1346_v38  ;;  %v14647_v54 = vcombine.high %v1322_v46, %v1330_v50  ;;  %v1251_v34 = vld [vmem:[#allocation8 + $0x368] sm:$0xff] }
 0x25b   :  { %4652 = vmatprep.subr.bf16.mxu0 %v14503_v25  ;;  %v1306_v25 = vld [vmem:[#allocation8 + $0x520] sm:$0xff] }
 0x25d   :  { %4610 = vmatpush1.bf16.msra.mxu1 %v14756_v55  ;;  %v1314_v55 = vld [vmem:[#allocation8 + $0x560] sm:$0xff] }
 0x25e   :  { %4653 = vmatpush1.bf16.msra.mxu0 %v14502_v58  ;;  %4611 = vmatprep.subr.bf16.mxu1 %v14741_v59  ;;  %v14900_v58 = vcombine.low %v1577_v43, %v1585_v45  ;;  %v14646_v59 = vcombine.low %v1322_v46, %v1330_v50  ;;  %v14631_v0 = vcombine.high %v1306_v25, %v1314_v55  ;;  %v1227_v43 = vld [vmem:[#allocation8 + $0x2a8] sm:$0xff] }
 0x25f   :  { %4654 = vmatprep.subr.bf16.mxu0 %v14487_v63  ;;  %v1290_v63 = vld [vmem:[#allocation8 + $0x4a0] sm:$0xff]  ;;  %v1235_v50 = vld [vmem:[#allocation8 + $0x2e8] sm:$0xff] }
 0x261   :  { %4612 = vmatpush1.bf16.msra.mxu1 %v14740_v1  ;;  %v1298_v1 = vld [vmem:[#allocation8 + $0x4e0] sm:$0xff] }
 0x262   :  { %4655 = vmatpush1.bf16.msra.mxu0 %v14486_v2  ;;  %4613 = vmatprep.subr.bf16.mxu1 %v14725_v3  ;;  %v14884_v2 = vcombine.low %v1561_v22, %v1569_v23  ;;  %v14630_v3 = vcombine.low %v1306_v25, %v1314_v55  ;;  %v14615_v36 = vcombine.high %v1290_v63, %v1298_v1  ;;  %v1466_v55 = vld [vmem:[#allocation8 + $0xa20] sm:$0xff] }
 0x263   :  { %4656 = vmatprep.subr.bf16.mxu0 %v14471_v7  ;;  %v1274_v7 = vld [vmem:[#allocation8 + $0x420] sm:$0xff]  ;;  %v14614_v8 = vcombine.low %v1290_v63, %v1298_v1 }
 0x265   :  { %4614 = vmatpush1.bf16.msra.mxu1 %v14724_v28  ;;  %v1282_v28 = vld [vmem:[#allocation8 + $0x460] sm:$0xff] }
 0x266   :  { %4657 = vmatpush1.bf16.msra.mxu0 %v14470_v41  ;;  %4615 = vmatprep.subr.bf16.mxu1 %v14965_v44  ;;  %v14868_v41 = vcombine.low %v1545_v61, %v1553_v62  ;;  %v18745_v44 = vld [vmem:[#allocation9] sm:$0xff]  ;;  %v14598_v19 = vcombine.low %v1274_v7, %v1282_v28  ;;  %v1219_v61 = vld [vmem:[#allocation8 + $0x268] sm:$0xff] }
 0x267   :  { %4658 = vmatprep.subr.bf16.mxu0 %v14711_v11  ;;  %v1522_v11 = vld [vmem:[#allocation8 + $0xbe0] sm:$0xff] }
 0x268   :  { %v14839_v20 = vcombine.high %v1514_v10, %v1522_v11  ;;  %v14838_v14 = vcombine.low %v1514_v10, %v1522_v11  ;;  %v1179_v10 = vld [vmem:[#allocation8 + $0x128] sm:$0xff] }
 0x269   :  { %4616 = vmatpush2.bf16.msra.mxu1 %v14964_v15  ;;  %v14599_v15 = vcombine.high %v1274_v7, %v1282_v28  ;;  %v1203_v7 = vld [vmem:[#allocation8 + $0x1e8] sm:$0xff] }
 0x26a   :  { %4659 = vmatpush2.bf16.msra.mxu0 %v14710_v16  ;;  %4617 = vmatprep.subr.bf16.mxu1 %v14949_v17  ;;  %v1267_v16 = vld [vmem:[#allocation8 + $0x3e8] sm:$0xff]  ;;  %v4332_v17 = vpop.f32.mrf.mxu0  ;;  %v14521_v11 = vcombine.high %v1195_v6, %v1203_v7 }
 0x26b   :  { %4660 = vmatprep.subr.bf16.mxu0 %v14695_v21  ;;  %v1498_v21 = vld [vmem:[#allocation8 + $0xb20] sm:$0xff] }
 0x26c   :  { %v18749_v35 = vpop.f32.mrf.mxu0 }
 0x26d   :  { %4618 = vmatpush2.bf16.msra.mxu1 %v14948_v26  ;;  %v1661_v26 = vrot.slane %v18745_v44, %v18699_v30 }
 0x26e   :  { %4661 = vmatpush2.bf16.msra.mxu0 %v14694_v31  ;;  %4619 = vmatprep.subr.bf16.mxu1 %v14933_v32  ;;  %v14585_v31 = vcombine.high %v1259_v12, %v1267_v16  ;;  %v1243_v32 = vld [vmem:[#allocation8 + $0x328] sm:$0xff]  ;;  %v4336_v45 = vpop.f32.mrf.mxu0 }
 0x26f   :  { %4662 = vmatprep.subr.bf16.mxu0 %v14679_v37  ;;  %v14584_v37 = vcombine.low %v1259_v12, %v1267_v16  ;;  %v4333_v38 = vadd.f32 %v4332_v17, %v1661_v26  ;;  %v14568_v22 = vcombine.low %v1243_v32, %v1251_v34  ;;  %v4337_v25 = vadd.f32 %v4336_v45, %v1661_v26  ;;  %v1187_v12 = vld [vmem:[#allocation8 + $0x168] sm:$0xff]  ;;  %v1642_v45 = vld [vmem:[#allocation8 + $0xfa0] sm:$0xff] }
 0x270   :  { %v14520_v16 = vcombine.low %v1195_v6, %v1203_v7 }
 0x271   :  { %4620 = vmatpush2.bf16.msra.mxu1 %v14932_v39  ;;  %v14823_v39 = vcombine.high %v1498_v21, %v1506_v24 }
 0x272   :  { %4663 = vmatpush2.bf16.msra.mxu0 %v14678_v40  ;;  %4621 = vmatprep.subr.bf16.mxu1 %v14917_v42  ;;  %v1482_v40 = vld [vmem:[#allocation8 + $0xaa0] sm:$0xff] }
 0x273   :  { %4664 = vmatprep.subr.bf16.mxu0 %v14663_v48  ;;  %v1490_v42 = vld [vmem:[#allocation8 + $0xae0] sm:$0xff]  ;;  %v14569_v48 = vcombine.high %v1243_v32, %v1251_v34 }
 0x274   :  { %v14807_v23 = vcombine.high %v1482_v40, %v1490_v42  ;;  %v14806_v63 = vcombine.low %v1482_v40, %v1490_v42  ;;  %v1402_v34 = vld [vmem:[#allocation8 + $0x820] sm:$0xff] }
 0x275   :  { %4622 = vmatpush2.bf16.msra.mxu1 %v14916_v51 }
 0x276   :  { %4665 = vmatpush2.bf16.msra.mxu0 %v14662_v52  ;;  %4623 = vmatprep.subr.bf16.mxu1 %v14901_v53  ;;  %v14822_v52 = vcombine.low %v1498_v21, %v1506_v24  ;;  %v14505_v21 = vcombine.high %v1179_v10, %v1187_v12  ;;  %v1171_v24 = vld [vmem:[#allocation8 + $0xe8] sm:$0xff] }
 0x277   :  { %4666 = vmatprep.subr.bf16.mxu0 %v14647_v54  ;;  %v14553_v54 = vcombine.high %v1227_v43, %v1235_v50 }
 0x279   :  { %4624 = vmatpush2.bf16.msra.mxu1 %v14900_v58  ;;  %v1474_v58 = vld [vmem:[#allocation8 + $0xa60] sm:$0xff] }
 0x27a   :  { %4667 = vmatpush2.bf16.msra.mxu0 %v14646_v59  ;;  %4625 = vmatprep.subr.bf16.mxu1 %v14885_v60  ;;  %v1211_v59 = vld [vmem:[#allocation8 + $0x228] sm:$0xff]  ;;  %v14791_v1 = vcombine.high %v1466_v55, %v1474_v58 }
 0x27b   :  { %4668 = vmatprep.subr.bf16.mxu0 %v14631_v0  ;;  %v14552_v0 = vcombine.low %v1227_v43, %v1235_v50  ;;  %v14536_v28 = vcombine.low %v1211_v59, %v1219_v61 }
 0x27d   :  { %4626 = vmatpush2.bf16.msra.mxu1 %v14884_v2 }
 0x27e   :  { %4669 = vmatpush2.bf16.msra.mxu0 %v14630_v3  ;;  %4627 = vmatprep.subr.bf16.mxu1 %v14869_v4  ;;  %v14537_v3 = vcombine.high %v1211_v59, %v1219_v61  ;;  %v1450_v4 = vld [vmem:[#allocation8 + $0x9a0] sm:$0xff]  ;;  %v1379_v59 = vld [vmem:[#allocation8 + $0x768] sm:$0xff] }
 0x27f   :  { %4670 = vmatprep.subr.bf16.mxu0 %v14615_v36  ;;  %v14790_v36 = vcombine.low %v1466_v55, %v1474_v58  ;;  %v1371_v55 = vld [vmem:[#allocation8 + $0x728] sm:$0xff] }
 0x280   :  { %v14696_v6 = vcombine.low %v1371_v55, %v1379_v59 }
 0x281   :  { %4628 = vmatpush2.bf16.msra.mxu1 %v14868_v41  ;;  %v14775_v41 = vcombine.high %v1450_v4, %v1458_v5 }
 0x282   :  { %4671 = vmatpush2.bf16.msra.mxu0 %v14614_v8  ;;  %4629 = vmatprep.subr.bf16.mxu1 %v14853_v9  ;;  %v1434_v8 = vld [vmem:[#allocation8 + $0x920] sm:$0xff] }
 0x283   :  { %4672 = vmatprep.subr.bf16.mxu0 %v14599_v15  ;;  %v1442_v9 = vld [vmem:[#allocation8 + $0x960] sm:$0xff]  ;;  %v14774_v15 = vcombine.low %v1450_v4, %v1458_v5  ;;  %v1363_v4 = vld [vmem:[#allocation8 + $0x6e8] sm:$0xff] }
 0x284   :  { %v14759_v17 = vcombine.high %v1434_v8, %v1442_v9  ;;  %v14758_v26 = vcombine.low %v1434_v8, %v1442_v9  ;;  %v1347_v9 = vld [vmem:[#allocation8 + $0x668] sm:$0xff] }
 0x285   :  { %4630 = vmatpush2.bf16.msra.mxu1 %v14852_v18  ;;  %v1418_v18 = vld [vmem:[#allocation8 + $0x8a0] sm:$0xff] }
 0x286   :  { %4673 = vmatpush2.bf16.msra.mxu0 %v14598_v19  ;;  %4685 = vmatprep.subr.bf16.mxu1 %v14839_v20  ;;  %v1426_v19 = vld [vmem:[#allocation8 + $0x8e0] sm:$0xff]  ;;  %v1163_v20 = vld [vmem:[#allocation8 + $0xa8] sm:$0xff] }
 0x287   :  { %4728 = vmatprep.subr.bf16.mxu0 %v14585_v31  ;;  %v14504_v31 = vcombine.low %v1179_v10, %v1187_v12  ;;  %v14743_v32 = vcombine.high %v1418_v18, %v1426_v19  ;;  %v14742_v40 = vcombine.low %v1418_v18, %v1426_v19  ;;  %v14488_v42 = vcombine.low %v1163_v20, %v1171_v24  ;;  %v1331_v19 = vld [vmem:[#allocation8 + $0x5e8] sm:$0xff] }
 0x288   :  { %4632 = vmatmul.mubr.bf16.vlgmr.msra.gmra.mxu1 %v18727_v13  ;;  %v4375_v46 = vpop.f32.mrf.mxu1 }
 0x289   :  { %4675 = vmatmul.mubr.bf16.vlgmr.msra.gmra.mxu0 %v18707_v57  ;;  %v4376_v51 = vadd.f32 %v4375_v46, %v4333_v38  ;;  %4686 = vmatpush1.bf16.msra.mxu1 %v14838_v14  ;;  %v1410_v14 = vld [vmem:[#allocation8 + $0x860] sm:$0xff]  ;;  %v14489_v38 = vcombine.high %v1163_v20, %v1171_v24 }
 0x28a   :  { %4717 = vmatprep.mubr.bf16.mxu1 %v18725_v33  ;;  %4729 = vmatpush1.bf16.msra.mxu0 %v14584_v37  ;;  %v18754_v53 = vpop.f32.mrf.mxu1  ;;  %v1147_v37 = vld [vmem:[#allocation8 + $0x28] sm:$0xff]  ;;  %v14727_v43 = vcombine.high %v1402_v34, %v1410_v14  ;;  %v1650_v46 = vld [vmem:[#allocation8 + $0xfe0] sm:$0xff] }
 0x28b   :  { %4760 = vmatprep.mubr.bf16.mxu0 %v18705_v56  ;;  %4687 = vmatprep.subr.bf16.mxu1 %v14823_v39  ;;  %v1155_v39 = vld [vmem:[#allocation8 + $0x68] sm:$0xff] }
 0x28c   :  { %4730 = vmatprep.subr.bf16.mxu0 %v14569_v48  ;;  %v4379_v60 = vpop.f32.mrf.mxu1  ;;  %v1387_v48 = vld [vmem:[#allocation8 + $0x7a8] sm:$0xff]  ;;  %v14473_v50 = vcombine.high %v1147_v37, %v1155_v39 }
 0x28d   :  { %v4380_v62 = vadd.f32 %v4379_v60, %v4337_v25  ;;  %4688 = vmatpush1.bf16.msra.mxu1 %v14822_v52  ;;  %v14726_v52 = vcombine.low %v1402_v34, %v1410_v14  ;;  %v1626_v25 = vld [vmem:[#allocation8 + $0xf20] sm:$0xff]  ;;  %v14966_v60 = vcombine.low %v1642_v45, %v1650_v46  ;;  %v1315_v14 = vld [vmem:[#allocation8 + $0x568] sm:$0xff] }
 0x28e   :  { %4731 = vmatpush1.bf16.msra.mxu0 %v14568_v22  ;;  %4689 = vmatprep.subr.bf16.mxu1 %v14807_v23  ;;  %v14472_v22 = vcombine.low %v1147_v37, %v1155_v39  ;;  %v14967_v23 = vcombine.high %v1642_v45, %v1650_v46  ;;  %v1299_v46 = vld [vmem:[#allocation8 + $0x4e8] sm:$0xff] }
 0x28f   :  { %v18757_v2 = vpack.c.bf16 %v4380_v62, %v4376_v51  ;;  %4732 = vmatprep.subr.bf16.mxu0 %v14553_v54  ;;  %v1395_v51 = vld [vmem:[#allocation8 + $0x7e8] sm:$0xff]  ;;  %v1634_v54 = vld [vmem:[#allocation8 + $0xf60] sm:$0xff] }
 0x290   :  { %v14713_v58 = vcombine.high %v1387_v48, %v1395_v51  ;;  %v14712_v61 = vcombine.low %v1387_v48, %v1395_v51  ;;  %v14951_v62 = vcombine.high %v1626_v25, %v1634_v54  ;;  %v14950_v5 = vcombine.low %v1626_v25, %v1634_v54  ;;  %v1283_v54 = vld [vmem:[#allocation8 + $0x468] sm:$0xff] }
 0x291   :  { %4690 = vmatpush1.bf16.msra.mxu1 %v14806_v63  ;;  %v1610_v63 = vld [vmem:[#allocation8 + $0xea0] sm:$0xff] }
 0x292   :  { %4733 = vmatpush1.bf16.msra.mxu0 %v14552_v0  ;;  %4691 = vmatprep.subr.bf16.mxu1 %v14791_v1  ;;  %v1618_v0 = vld [vmem:[#allocation8 + $0xee0] sm:$0xff]  ;;  %v1355_v1 = vld [vmem:[#allocation8 + $0x6a8] sm:$0xff] }
 0x293   :  { %4734 = vmatprep.subr.bf16.mxu0 %v14537_v3  ;;  %v14697_v3 = vcombine.high %v1371_v55, %v1379_v59  ;;  %v14935_v7 = vcombine.high %v1610_v63, %v1618_v0  ;;  %v14681_v8 = vcombine.high %v1355_v1, %v1363_v4  ;;  %v14934_v10 = vcombine.low %v1610_v63, %v1618_v0  ;;  %v1260_v63 = vld [vmem:[#allocation8 + $0x3b0] sm:$0xff] }
 0x295   :  { %4692 = vmatpush1.bf16.msra.mxu1 %v14790_v36  ;;  %v1594_v36 = vld [vmem:[#allocation8 + $0xe20] sm:$0xff] }
 0x296   :  { %4735 = vmatpush1.bf16.msra.mxu0 %v14536_v28  ;;  %4693 = vmatprep.subr.bf16.mxu1 %v14775_v41  ;;  %v1602_v28 = vld [vmem:[#allocation8 + $0xe60] sm:$0xff]  ;;  %v1339_v41 = vld [vmem:[#allocation8 + $0x628] sm:$0xff] }
 0x297   :  { %4736 = vmatprep.subr.bf16.mxu0 %v14521_v11  ;;  %v14680_v11 = vcombine.low %v1355_v1, %v1363_v4  ;;  %v14919_v12 = vcombine.high %v1594_v36, %v1602_v28  ;;  %v14665_v18 = vcombine.high %v1339_v41, %v1347_v9  ;;  %v14918_v20 = vcombine.low %v1594_v36, %v1602_v28  ;;  %v1268_v1 = vld [vmem:[#allocation8 + $0x3f0] sm:$0xff]  ;;  %v1507_v36 = vld [vmem:[#allocation8 + $0xb68] sm:$0xff] }
 0x298   :  { %v1669_v28 = vrot.slane %v18745_v44, %v18719_v49 }
 0x299   :  { %4694 = vmatpush1.bf16.msra.mxu1 %v14774_v15  ;;  %v1578_v15 = vld [vmem:[#allocation8 + $0xda0] sm:$0xff] }
 0x29a   :  { %4737 = vmatpush1.bf16.msra.mxu0 %v14520_v16  ;;  %4695 = vmatprep.subr.bf16.mxu1 %v14759_v17  ;;  %v1586_v16 = vld [vmem:[#allocation8 + $0xde0] sm:$0xff]  ;;  %v1323_v17 = vld [vmem:[#allocation8 + $0x5a8] sm:$0xff] }
 0x29b   :  { %4738 = vmatprep.subr.bf16.mxu0 %v14505_v21  ;;  %v14664_v21 = vcombine.low %v1339_v41, %v1347_v9  ;;  %v14903_v24 = vcombine.high %v1578_v15, %v1586_v16  ;;  %v14649_v34 = vcombine.high %v1323_v17, %v1331_v19  ;;  %v14902_v37 = vcombine.low %v1578_v15, %v1586_v16  ;;  %v1252_v9 = vld [vmem:[#allocation8 + $0x370] sm:$0xff] }
 0x29c   :  { %v14587_v41 = vcombine.high %v1260_v63, %v1268_v1  ;;  %v14586_v15 = vcombine.low %v1260_v63, %v1268_v1  ;;  %v1435_v63 = vld [vmem:[#allocation8 + $0x928] sm:$0xff]  ;;  %v1180_v1 = vld [vmem:[#allocation8 + $0x130] sm:$0xff] }
 0x29d   :  { %4696 = vmatpush1.bf16.msra.mxu1 %v14758_v26  ;;  %v1562_v26 = vld [vmem:[#allocation8 + $0xd20] sm:$0xff] }
 0x29e   :  { %4739 = vmatpush1.bf16.msra.mxu0 %v14504_v31  ;;  %4697 = vmatprep.subr.bf16.mxu1 %v14743_v32  ;;  %v1570_v31 = vld [vmem:[#allocation8 + $0xd60] sm:$0xff]  ;;  %v1307_v32 = vld [vmem:[#allocation8 + $0x528] sm:$0xff] }
 0x29f   :  { %4740 = vmatprep.subr.bf16.mxu0 %v14489_v38  ;;  %v14648_v38 = vcombine.low %v1323_v17, %v1331_v19  ;;  %v14887_v39 = vcombine.high %v1562_v26, %v1570_v31  ;;  %v14633_v45 = vcombine.high %v1307_v32, %v1315_v14  ;;  %v14886_v48 = vcombine.low %v1562_v26, %v1570_v31  ;;  %v1491_v19 = vld [vmem:[#allocation8 + $0xae8] sm:$0xff]  ;;  %v1236_v26 = vld [vmem:[#allocation8 + $0x2f0] sm:$0xff] }
 0x2a1   :  { %4698 = vmatpush1.bf16.msra.mxu1 %v14742_v40  ;;  %v1546_v40 = vld [vmem:[#allocation8 + $0xca0] sm:$0xff] }
 0x2a2   :  { %4741 = vmatpush1.bf16.msra.mxu0 %v14488_v42  ;;  %4699 = vmatprep.subr.bf16.mxu1 %v14727_v43  ;;  %v1554_v42 = vld [vmem:[#allocation8 + $0xce0] sm:$0xff]  ;;  %v1291_v43 = vld [vmem:[#allocation8 + $0x4a8] sm:$0xff] }
 0x2a3   :  { %4742 = vmatprep.subr.bf16.mxu0 %v14473_v50  ;;  %v14632_v50 = vcombine.low %v1307_v32, %v1315_v14  ;;  %v14871_v51 = vcombine.high %v1546_v40, %v1554_v42  ;;  %v14617_v25 = vcombine.high %v1291_v43, %v1299_v46  ;;  %v14870_v55 = vcombine.low %v1546_v40, %v1554_v42  ;;  %v1475_v42 = vld [vmem:[#allocation8 + $0xa68] sm:$0xff] }
 0x2a4   :  { %v14616_v59 = vcombine.low %v1291_v43, %v1299_v46  ;;  %v1212_v43 = vld [vmem:[#allocation8 + $0x230] sm:$0xff] }
 0x2a5   :  { %4700 = vmatpush1.bf16.msra.mxu1 %v14726_v52  ;;  %v1530_v52 = vld [vmem:[#allocation8 + $0xc20] sm:$0xff]  ;;  %v1220_v46 = vld [vmem:[#allocation8 + $0x270] sm:$0xff] }
 0x2a6   :  { %4743 = vmatpush1.bf16.msra.mxu0 %v14472_v22  ;;  %4701 = vmatprep.subr.bf16.mxu1 %v14967_v23  ;;  %v1538_v22 = vld [vmem:[#allocation8 + $0xc60] sm:$0xff]  ;;  %v1275_v23 = vld [vmem:[#allocation8 + $0x428] sm:$0xff] }
 0x2a7   :  { %4744 = vmatprep.subr.bf16.mxu0 %v14713_v58  ;;  %v18759_v58 = vpop.f32.mrf.mxu0  ;;  %v14601_v0 = vcombine.high %v1275_v23, %v1283_v54  ;;  %v14854_v4 = vcombine.low %v1530_v52, %v1538_v22 }
 0x2a9   :  { %4702 = vmatpush2.bf16.msra.mxu1 %v14966_v60  ;;  %v14855_v60 = vcombine.high %v1530_v52, %v1538_v22 }
 0x2aa   :  { %4745 = vmatpush2.bf16.msra.mxu0 %v14712_v61  ;;  %4703 = vmatprep.subr.bf16.mxu1 %v14951_v62  ;;  %v1515_v61 = vld [vmem:[#allocation8 + $0xba8] sm:$0xff] }
 0x2ab   :  { %4746 = vmatprep.subr.bf16.mxu0 %v14697_v3  ;;  %v1523_v62 = vld [vmem:[#allocation8 + $0xbe8] sm:$0xff]  ;;  %v4418_v3 = vpop.f32.mrf.mxu0 }
 0x2ac   :  { %v4419_v16 = vadd.f32 %v4418_v3, %v1669_v28 }
 0x2ad   :  { %4704 = vmatpush2.bf16.msra.mxu1 %v14950_v5  ;;  %v14600_v5 = vcombine.low %v1275_v23, %v1283_v54  ;;  %v1459_v54 = vld [vmem:[#allocation8 + $0x9e8] sm:$0xff] }
 0x2ae   :  { %4747 = vmatpush2.bf16.msra.mxu0 %v14696_v6  ;;  %4705 = vmatprep.subr.bf16.mxu1 %v14935_v7  ;;  %v14841_v6 = vcombine.high %v1515_v61, %v1523_v62  ;;  %v1499_v7 = vld [vmem:[#allocation8 + $0xb28] sm:$0xff] }
 0x2af   :  { %4748 = vmatprep.subr.bf16.mxu0 %v14681_v8  ;;  %v1244_v8 = vld [vmem:[#allocation8 + $0x330] sm:$0xff]  ;;  %v14825_v17 = vcombine.high %v1499_v7, %v1507_v36  ;;  %v14824_v32 = vcombine.low %v1499_v7, %v1507_v36  ;;  %v1419_v36 = vld [vmem:[#allocation8 + $0x8a8] sm:$0xff] }
 0x2b1   :  { %4706 = vmatpush2.bf16.msra.mxu1 %v14934_v10  ;;  %v18763_v10 = vpop.f32.mrf.mxu0 }
 0x2b2   :  { %4749 = vmatpush2.bf16.msra.mxu0 %v14680_v11  ;;  %4707 = vmatprep.subr.bf16.mxu1 %v14919_v12  ;;  %v14840_v11 = vcombine.low %v1515_v61, %v1523_v62  ;;  %v18765_v12 = vpop.f32.mrf.mxu1  ;;  %v14538_v61 = vcombine.low %v1212_v43, %v1220_v46 }
 0x2b3   :  { %4750 = vmatprep.subr.bf16.mxu0 %v14665_v18  ;;  %v1483_v18 = vld [vmem:[#allocation8 + $0xaa8] sm:$0xff] }
 0x2b5   :  { %4708 = vmatpush2.bf16.msra.mxu1 %v14918_v20  ;;  %v4422_v20 = vpop.f32.mrf.mxu0 }
 0x2b6   :  { %4751 = vmatpush2.bf16.msra.mxu0 %v14664_v21  ;;  %4709 = vmatprep.subr.bf16.mxu1 %v14903_v24  ;;  %v14571_v21 = vcombine.high %v1244_v8, %v1252_v9  ;;  %v1228_v24 = vld [vmem:[#allocation8 + $0x2b0] sm:$0xff] }
 0x2b7   :  { %4752 = vmatprep.subr.bf16.mxu0 %v14649_v34  ;;  %v1467_v34 = vld [vmem:[#allocation8 + $0xa28] sm:$0xff]  ;;  %v14555_v40 = vcombine.high %v1228_v24, %v1236_v26  ;;  %v14554_v52 = vcombine.low %v1228_v24, %v1236_v26 }
 0x2b8   :  { %v14793_v22 = vcombine.high %v1467_v34, %v1475_v42 }
 0x2b9   :  { %4710 = vmatpush2.bf16.msra.mxu1 %v14902_v37  ;;  %v14570_v37 = vcombine.low %v1244_v8, %v1252_v9  ;;  %v1172_v9 = vld [vmem:[#allocation8 + $0xf0] sm:$0xff] }
 0x2ba   :  { %4753 = vmatpush2.bf16.msra.mxu0 %v14648_v38  ;;  %4711 = vmatprep.subr.bf16.mxu1 %v14887_v39  ;;  %v14809_v38 = vcombine.high %v1483_v18, %v1491_v19  ;;  %v4423_v39 = vadd.f32 %v4422_v20, %v1669_v28  ;;  %v1427_v28 = vld [vmem:[#allocation8 + $0x8e8] sm:$0xff] }
 0x2bb   :  { %4754 = vmatprep.subr.bf16.mxu0 %v14633_v45 }
 0x2bd   :  { %4712 = vmatpush2.bf16.msra.mxu1 %v14886_v48 }
 0x2be   :  { %4755 = vmatpush2.bf16.msra.mxu0 %v14632_v50  ;;  %4713 = vmatprep.subr.bf16.mxu1 %v14871_v51  ;;  %v14808_v50 = vcombine.low %v1483_v18, %v1491_v19  ;;  %v1451_v51 = vld [vmem:[#allocation8 + $0x9a8] sm:$0xff]  ;;  %v1148_v19 = vld [vmem:[#allocation8 + $0x30] sm:$0xff] }
 0x2bf   :  { %4756 = vmatprep.subr.bf16.mxu0 %v14617_v25  ;;  %v14539_v25 = vcombine.high %v1212_v43, %v1220_v46  ;;  %v14777_v62 = vcombine.high %v1451_v51, %v1459_v54  ;;  %v1411_v18 = vld [vmem:[#allocation8 + $0x868] sm:$0xff]  ;;  %v1372_v46 = vld [vmem:[#allocation8 + $0x730] sm:$0xff] }
 0x2c0   :  { %v1627_v43 = vld [vmem:[#allocation8 + $0xf28] sm:$0xff] }
 0x2c1   :  { %4714 = vmatpush2.bf16.msra.mxu1 %v14870_v55  ;;  %v1196_v55 = vld [vmem:[#allocation8 + $0x1b0] sm:$0xff] }
 0x2c2   :  { %4757 = vmatpush2.bf16.msra.mxu0 %v14616_v59  ;;  %4715 = vmatprep.subr.bf16.mxu1 %v14855_v60  ;;  %v1204_v59 = vld [vmem:[#allocation8 + $0x1f0] sm:$0xff]  ;;  %v14792_v60 = vcombine.low %v1467_v34, %v1475_v42 }
 0x2c3   :  { %4758 = vmatprep.subr.bf16.mxu0 %v14601_v0  ;;  %v1443_v0 = vld [vmem:[#allocation8 + $0x968] sm:$0xff]  ;;  %v14523_v3 = vcombine.high %v1196_v55, %v1204_v59  ;;  %v1388_v34 = vld [vmem:[#allocation8 + $0x7b0] sm:$0xff] }
 0x2c4   :  { %v14761_v7 = vcombine.high %v1435_v63, %v1443_v0 }
 0x2c5   :  { %4716 = vmatpush2.bf16.msra.mxu1 %v14854_v4  ;;  %v1188_v4 = vld [vmem:[#allocation8 + $0x170] sm:$0xff] }
 0x2c6   :  { %4759 = vmatpush2.bf16.msra.mxu0 %v14600_v5  ;;  %4771 = vmatprep.subr.bf16.mxu1 %v14841_v6  ;;  %v14776_v5 = vcombine.low %v1451_v51, %v1459_v54  ;;  %v14522_v6 = vcombine.low %v1196_v55, %v1204_v59  ;;  %v14507_v8 = vcombine.high %v1180_v1, %v1188_v4  ;;  %v1619_v54 = vld [vmem:[#allocation8 + $0xee8] sm:$0xff]  ;;  %v1356_v55 = vld [vmem:[#allocation8 + $0x6b0] sm:$0xff] }
 0x2c7   :  { %4814 = vmatprep.subr.bf16.mxu0 %v14587_v41  ;;  %v1164_v41 = vld [vmem:[#allocation8 + $0xb0] sm:$0xff] }
 0x2c8   :  { %v4461_v44 = vpop.f32.mrf.mxu1  ;;  %4718 = vmatmul.mubr.bf16.vlgmr.msra.gmra.mxu1 %v18727_v13  ;;  %v14491_v20 = vcombine.high %v1164_v41, %v1172_v9  ;;  %v14490_v24 = vcombine.low %v1164_v41, %v1172_v9  ;;  %v1587_v41 = vld [vmem:[#allocation8 + $0xde8] sm:$0xff] }
 0x2c9   :  { %v4462_v31 = vadd.f32 %v4461_v44, %v4419_v16  ;;  %4761 = vmatmul.mubr.bf16.vlgmr.msra.gmra.mxu0 %v18707_v57  ;;  %4772 = vmatpush1.bf16.msra.mxu1 %v14840_v11  ;;  %v14760_v11 = vcombine.low %v1435_v63, %v1443_v0  ;;  %v14745_v16 = vcombine.high %v1419_v36, %v1427_v28  ;;  %v1156_v44 = vld [vmem:[#allocation8 + $0x70] sm:$0xff]  ;;  %v1595_v0 = vld [vmem:[#allocation8 + $0xe28] sm:$0xff] }
 0x2ca   :  { %4803 = vmatprep.mubr.bf16.mxu1 %v18725_v33  ;;  %4815 = vmatpush1.bf16.msra.mxu0 %v14586_v15  ;;  %v18770_v14 = vpop.f32.mrf.mxu1  ;;  %v14506_v15 = vcombine.low %v1180_v1, %v1188_v4  ;;  %v1603_v1 = vld [vmem:[#allocation8 + $0xe68] sm:$0xff] }
 0x2cb   :  { %4846 = vmatprep.mubr.bf16.mxu0 %v18705_v56  ;;  %4773 = vmatprep.subr.bf16.mxu1 %v14825_v17  ;;  %v1403_v17 = vld [vmem:[#allocation8 + $0x828] sm:$0xff] }
 0x2cc   :  { %v4465_v45 = vpop.f32.mrf.mxu1  ;;  %4816 = vmatprep.subr.bf16.mxu0 %v14571_v21  ;;  %v14744_v21 = vcombine.low %v1419_v36, %v1427_v28  ;;  %v14729_v26 = vcombine.high %v1403_v17, %v1411_v18  ;;  %v14921_v36 = vcombine.high %v1595_v0, %v1603_v1  ;;  %v1579_v28 = vld [vmem:[#allocation8 + $0xda8] sm:$0xff] }
 0x2cd   :  { %v4466_v48 = vadd.f32 %v4465_v45, %v4423_v39  ;;  %4774 = vmatpush1.bf16.msra.mxu1 %v14824_v32  ;;  %v1651_v32 = vld [vmem:[#allocation8 + $0xfe8] sm:$0xff]  ;;  %v14728_v39 = vcombine.low %v1403_v17, %v1411_v18  ;;  %v14905_v17 = vcombine.high %v1579_v28, %v1587_v41 }
 0x2ce   :  { %4817 = vmatpush1.bf16.msra.mxu0 %v14570_v37  ;;  %4775 = vmatprep.subr.bf16.mxu1 %v14809_v38  ;;  %v14475_v37 = vcombine.high %v1148_v19, %v1156_v44  ;;  %v1396_v38 = vld [vmem:[#allocation8 + $0x7f0] sm:$0xff]  ;;  %v1635_v45 = vld [vmem:[#allocation8 + $0xf68] sm:$0xff] }
 0x2cf   :  { %v18773_v23 = vpack.c.bf16 %v4466_v48, %v4462_v31  ;;  %4818 = vmatprep.subr.bf16.mxu0 %v14555_v40  ;;  %v1643_v31 = vld [vmem:[#allocation8 + $0xfa8] sm:$0xff]  ;;  %v14474_v40 = vcombine.low %v1148_v19, %v1156_v44  ;;  %v14715_v48 = vcombine.high %v1388_v34, %v1396_v38 }
 0x2d0   :  { %v14969_v42 = vcombine.high %v1643_v31, %v1651_v32  ;;  %v14968_v51 = vcombine.low %v1643_v31, %v1651_v32  ;;  %v1563_v18 = vld [vmem:[#allocation8 + $0xd28] sm:$0xff] }
 0x2d1   :  { %4776 = vmatpush1.bf16.msra.mxu1 %v14808_v50  ;;  %v1380_v50 = vld [vmem:[#allocation8 + $0x770] sm:$0xff]  ;;  %v1571_v19 = vld [vmem:[#allocation8 + $0xd68] sm:$0xff] }
 0x2d2   :  { %4819 = vmatpush1.bf16.msra.mxu0 %v14554_v52  ;;  %4777 = vmatprep.subr.bf16.mxu1 %v14793_v22  ;;  %v14714_v52 = vcombine.low %v1388_v34, %v1396_v38  ;;  %v14953_v22 = vcombine.high %v1627_v43, %v1635_v45  ;;  %v14699_v59 = vcombine.high %v1372_v46, %v1380_v50  ;;  %v1547_v32 = vld [vmem:[#allocation8 + $0xca8] sm:$0xff] }
 0x2d3   :  { %4820 = vmatprep.subr.bf16.mxu0 %v14539_v25  ;;  %v1611_v25 = vld [vmem:[#allocation8 + $0xea8] sm:$0xff]  ;;  %v14889_v31 = vcombine.high %v1563_v18, %v1571_v19 }
 0x2d4   :  { %v14937_v63 = vcombine.high %v1611_v25, %v1619_v54  ;;  %v1555_v34 = vld [vmem:[#allocation8 + $0xce8] sm:$0xff] }
 0x2d5   :  { %4778 = vmatpush1.bf16.msra.mxu1 %v14792_v60  ;;  %v1364_v60 = vld [vmem:[#allocation8 + $0x6f0] sm:$0xff] }
 0x2d6   :  { %4821 = vmatpush1.bf16.msra.mxu0 %v14538_v61  ;;  %4779 = vmatprep.subr.bf16.mxu1 %v14777_v62  ;;  %v14952_v61 = vcombine.low %v1627_v43, %v1635_v45  ;;  %v14698_v62 = vcombine.low %v1372_v46, %v1380_v50  ;;  %v14683_v4 = vcombine.high %v1356_v55, %v1364_v60  ;;  %v1531_v45 = vld [vmem:[#allocation8 + $0xc28] sm:$0xff] }
 0x2d7   :  { %4822 = vmatprep.subr.bf16.mxu0 %v14523_v3  ;;  %v1340_v3 = vld [vmem:[#allocation8 + $0x630] sm:$0xff]  ;;  %v14873_v43 = vcombine.high %v1547_v32, %v1555_v34  ;;  %v1539_v46 = vld [vmem:[#allocation8 + $0xc68] sm:$0xff] }
 0x2d9   :  { %4780 = vmatpush1.bf16.msra.mxu1 %v14776_v5  ;;  %v1348_v5 = vld [vmem:[#allocation8 + $0x670] sm:$0xff] }
 0x2da   :  { %4823 = vmatpush1.bf16.msra.mxu0 %v14522_v6  ;;  %4781 = vmatprep.subr.bf16.mxu1 %v14761_v7  ;;  %v14936_v6 = vcombine.low %v1611_v25, %v1619_v54  ;;  %v14682_v7 = vcombine.low %v1356_v55, %v1364_v60  ;;  %v14667_v9 = vcombine.high %v1340_v3, %v1348_v5  ;;  %v1516_v55 = vld [vmem:[#allocation8 + $0xbb0] sm:$0xff]  ;;  %v1261_v60 = vld [vmem:[#allocation8 + $0x3b8] sm:$0xff] }
 0x2db   :  { %4824 = vmatprep.subr.bf16.mxu0 %v14507_v8  ;;  %v1324_v8 = vld [vmem:[#allocation8 + $0x5b0] sm:$0xff]  ;;  %v14857_v54 = vcombine.high %v1531_v45, %v1539_v46 }
 0x2dd   :  { %4782 = vmatpush1.bf16.msra.mxu1 %v14760_v11  ;;  %v1332_v11 = vld [vmem:[#allocation8 + $0x5f0] sm:$0xff] }
 0x2de   :  { %4825 = vmatpush1.bf16.msra.mxu0 %v14506_v15  ;;  %4783 = vmatprep.subr.bf16.mxu1 %v14745_v16  ;;  %v14920_v15 = vcombine.low %v1595_v0, %v1603_v1  ;;  %v14666_v16 = vcombine.low %v1340_v3, %v1348_v5  ;;  %v14651_v44 = vcombine.high %v1324_v8, %v1332_v11  ;;  %v1500_v5 = vld [vmem:[#allocation8 + $0xb30] sm:$0xff] }
 0x2df   :  { %4826 = vmatprep.subr.bf16.mxu0 %v14491_v20  ;;  %v1308_v20 = vld [vmem:[#allocation8 + $0x530] sm:$0xff]  ;;  %v14856_v1 = vcombine.low %v1531_v45, %v1539_v46 }
 0x2e1   :  { %4784 = vmatpush1.bf16.msra.mxu1 %v14744_v21  ;;  %v1316_v21 = vld [vmem:[#allocation8 + $0x570] sm:$0xff] }
 0x2e2   :  { %4827 = vmatpush1.bf16.msra.mxu0 %v14490_v24  ;;  %4785 = vmatprep.subr.bf16.mxu1 %v14729_v26  ;;  %v14904_v24 = vcombine.low %v1579_v28, %v1587_v41  ;;  %v14650_v26 = vcombine.low %v1324_v8, %v1332_v11  ;;  %v14635_v38 = vcombine.high %v1308_v20, %v1316_v21  ;;  %v1245_v41 = vld [vmem:[#allocation8 + $0x338] sm:$0xff] }
 0x2e3   :  { %4828 = vmatprep.subr.bf16.mxu0 %v14475_v37  ;;  %v1292_v37 = vld [vmem:[#allocation8 + $0x4b0] sm:$0xff]  ;;  %v1253_v8 = vld [vmem:[#allocation8 + $0x378] sm:$0xff] }
 0x2e5   :  { %4786 = vmatpush1.bf16.msra.mxu1 %v14728_v39  ;;  %v1300_v39 = vld [vmem:[#allocation8 + $0x4f0] sm:$0xff] }
 0x2e6   :  { %4829 = vmatpush1.bf16.msra.mxu0 %v14474_v40  ;;  %4787 = vmatprep.subr.bf16.mxu1 %v14969_v42  ;;  %v14888_v40 = vcombine.low %v1563_v18, %v1571_v19  ;;  %v14634_v42 = vcombine.low %v1308_v20, %v1316_v21  ;;  %v14619_v50 = vcombine.high %v1292_v37, %v1300_v39 }
 0x2e7   :  { %4830 = vmatprep.subr.bf16.mxu0 %v14715_v48  ;;  %v1276_v48 = vld [vmem:[#allocation8 + $0x430] sm:$0xff]  ;;  %v14618_v25 = vcombine.low %v1292_v37, %v1300_v39 }
 0x2e8   :  { %v1468_v37 = vld [vmem:[#allocation8 + $0xa30] sm:$0xff] }
 0x2e9   :  { %4788 = vmatpush2.bf16.msra.mxu1 %v14968_v51  ;;  %v1284_v51 = vld [vmem:[#allocation8 + $0x470] sm:$0xff] }
 0x2ea   :  { %4831 = vmatpush2.bf16.msra.mxu0 %v14714_v52  ;;  %4789 = vmatprep.subr.bf16.mxu1 %v14953_v22  ;;  %v14872_v52 = vcombine.low %v1547_v32, %v1555_v34  ;;  %v18775_v22 = vpop.f32.mrf.mxu0  ;;  %v14602_v3 = vcombine.low %v1276_v48, %v1284_v51 }
 0x2eb   :  { %4832 = vmatprep.subr.bf16.mxu0 %v14699_v59  ;;  %v1524_v59 = vld [vmem:[#allocation8 + $0xbf0] sm:$0xff] }
 0x2ec   :  { %v4504_v0 = vpop.f32.mrf.mxu0  ;;  %v14842_v11 = vcombine.low %v1516_v55, %v1524_v59 }
 0x2ed   :  { %4790 = vmatpush2.bf16.msra.mxu1 %v14952_v61  ;;  %v18778_v61 = vsub.s32 4, %v18691_v27 }
 0x2ee   :  { %4833 = vmatpush2.bf16.msra.mxu0 %v14698_v62  ;;  %4791 = vmatprep.subr.bf16.mxu1 %v14937_v63  ;;  %v14603_v62 = vcombine.high %v1276_v48, %v1284_v51  ;;  %v1269_v63 = vld [vmem:[#allocation8 + $0x3f8] sm:$0xff] }
 0x2ef   :  { %4834 = vmatprep.subr.bf16.mxu0 %v14683_v4  ;;  %v14843_v4 = vcombine.high %v1516_v55, %v1524_v59  ;;  %v14589_v28 = vcombine.high %v1261_v60, %v1269_v63  ;;  %v14588_v18 = vcombine.low %v1261_v60, %v1269_v63  ;;  %v1213_v48 = vld [vmem:[#allocation8 + $0x238] sm:$0xff] }
 0x2f0   :  { %v1205_v63 = vld [vmem:[#allocation8 + $0x1f8] sm:$0xff] }
 0x2f1   :  { %4792 = vmatpush2.bf16.msra.mxu1 %v14936_v6  ;;  %v1508_v6 = vld [vmem:[#allocation8 + $0xb70] sm:$0xff] }
 0x2f2   :  { %4835 = vmatpush2.bf16.msra.mxu0 %v14682_v7  ;;  %4793 = vmatprep.subr.bf16.mxu1 %v14921_v36  ;;  %v18780_v7 = vld [vmem:[#allocation9] sm:$0xff]  ;;  %v14827_v20 = vcombine.high %v1500_v5, %v1508_v6  ;;  %v14826_v34 = vcombine.low %v1500_v5, %v1508_v6  ;;  %v1444_v5 = vld [vmem:[#allocation8 + $0x970] sm:$0xff]  ;;  %v1181_v6 = vld [vmem:[#allocation8 + $0x138] sm:$0xff] }
 0x2f3   :  { %4836 = vmatprep.subr.bf16.mxu0 %v14667_v9  ;;  %v1677_v36 = vrot.slane %v18780_v7, %v18778_v61  ;;  %v18784_v9 = vpop.f32.mrf.mxu0 }
 0x2f5   :  { %4794 = vmatpush2.bf16.msra.mxu1 %v14920_v15  ;;  %v1484_v15 = vld [vmem:[#allocation8 + $0xab0] sm:$0xff]  ;;  %v4505_v19 = vadd.f32 %v4504_v0, %v1677_v36 }
 0x2f6   :  { %4837 = vmatpush2.bf16.msra.mxu0 %v14666_v16  ;;  %4795 = vmatprep.subr.bf16.mxu1 %v14905_v17  ;;  %v1492_v16 = vld [vmem:[#allocation8 + $0xaf0] sm:$0xff]  ;;  %v18786_v17 = vpop.f32.mrf.mxu1 }
 0x2f7   :  { %4838 = vmatprep.subr.bf16.mxu0 %v14651_v44  ;;  %v4508_v44 = vpop.f32.mrf.mxu0 }
 0x2f9   :  { %4796 = vmatpush2.bf16.msra.mxu1 %v14904_v24  ;;  %v14573_v24 = vcombine.high %v1245_v41, %v1253_v8 }
 0x2fa   :  { %4839 = vmatpush2.bf16.msra.mxu0 %v14650_v26  ;;  %4797 = vmatprep.subr.bf16.mxu1 %v14889_v31  ;;  %v1229_v26 = vld [vmem:[#allocation8 + $0x2b8] sm:$0xff] }
 0x2fb   :  { %4840 = vmatprep.subr.bf16.mxu0 %v14635_v38  ;;  %v1237_v31 = vld [vmem:[#allocation8 + $0x2f8] sm:$0xff]  ;;  %v1476_v38 = vld [vmem:[#allocation8 + $0xa70] sm:$0xff] }
 0x2fc   :  { %v14557_v45 = vcombine.high %v1229_v26, %v1237_v31  ;;  %v14556_v55 = vcombine.low %v1229_v26, %v1237_v31  ;;  %v14795_v59 = vcombine.high %v1468_v37, %v1476_v38  ;;  %v14794_v0 = vcombine.low %v1468_v37, %v1476_v38  ;;  %v1404_v26 = vld [vmem:[#allocation8 + $0x830] sm:$0xff]  ;;  %v1157_v37 = vld [vmem:[#allocation8 + $0x78] sm:$0xff] }
 0x2fd   :  { %4798 = vmatpush2.bf16.msra.mxu1 %v14888_v40  ;;  %v14572_v40 = vcombine.low %v1245_v41, %v1253_v8  ;;  %v1412_v31 = vld [vmem:[#allocation8 + $0x870] sm:$0xff] }
 0x2fe   :  { %4841 = vmatpush2.bf16.msra.mxu0 %v14634_v42  ;;  %4799 = vmatprep.subr.bf16.mxu1 %v14873_v43  ;;  %v14811_v42 = vcombine.high %v1484_v15, %v1492_v16  ;;  %v4509_v43 = vadd.f32 %v4508_v44, %v1677_v36 }
 0x2ff   :  { %4842 = vmatprep.subr.bf16.mxu0 %v14619_v50  ;;  %v1221_v50 = vld [vmem:[#allocation8 + $0x278] sm:$0xff] }
 0x301   :  { %4800 = vmatpush2.bf16.msra.mxu1 %v14872_v52  ;;  %v14810_v52 = vcombine.low %v1484_v15, %v1492_v16  ;;  %v1420_v15 = vld [vmem:[#allocation8 + $0x8b0] sm:$0xff] }
 0x302   :  { %4843 = vmatpush2.bf16.msra.mxu0 %v14618_v25  ;;  %4801 = vmatprep.subr.bf16.mxu1 %v14857_v54  ;;  %v1452_v25 = vld [vmem:[#allocation8 + $0x9b0] sm:$0xff] }
 0x303   :  { %4844 = vmatprep.subr.bf16.mxu0 %v14603_v62  ;;  %v1460_v54 = vld [vmem:[#allocation8 + $0x9f0] sm:$0xff]  ;;  %v14541_v62 = vcombine.high %v1213_v48, %v1221_v50 }
 0x304   :  { %v14778_v41 = vcombine.low %v1452_v25, %v1460_v54  ;;  %v1428_v16 = vld [vmem:[#allocation8 + $0x8f0] sm:$0xff] }
 0x305   :  { %4802 = vmatpush2.bf16.msra.mxu1 %v14856_v1  ;;  %v14540_v1 = vcombine.low %v1213_v48, %v1221_v50  ;;  %v14746_v38 = vcombine.low %v1420_v15, %v1428_v16  ;;  %v1397_v50 = vld [vmem:[#allocation8 + $0x7f8] sm:$0xff] }
 0x306   :  { %4845 = vmatpush2.bf16.msra.mxu0 %v14602_v3  ;;  %4857 = vmatprep.subr.bf16.mxu1 %v14843_v4  ;;  %v14779_v3 = vcombine.high %v1452_v25, %v1460_v54  ;;  %v1436_v4 = vld [vmem:[#allocation8 + $0x930] sm:$0xff] }
 0x307   :  { %4900 = vmatprep.subr.bf16.mxu0 %v14589_v28  ;;  %v1189_v28 = vld [vmem:[#allocation8 + $0x178] sm:$0xff]  ;;  %v14762_v44 = vcombine.low %v1436_v4, %v1444_v5  ;;  %v1628_v54 = vld [vmem:[#allocation8 + $0xf30] sm:$0xff] }
 0x308   :  { %v4547_v21 = vpop.f32.mrf.mxu1  ;;  %4804 = vmatmul.mubr.bf16.vlgmr.msra.gmra.mxu1 %v18727_v13 }
 0x309   :  { %v4548_v32 = vadd.f32 %v4547_v21, %v4505_v19  ;;  %4847 = vmatmul.mubr.bf16.vlgmr.msra.gmra.mxu0 %v18707_v57  ;;  %4858 = vmatpush1.bf16.msra.mxu1 %v14842_v11  ;;  %v14763_v11 = vcombine.high %v1436_v4, %v1444_v5  ;;  %v14509_v19 = vcombine.high %v1181_v6, %v1189_v28  ;;  %v1620_v4 = vld [vmem:[#allocation8 + $0xef0] sm:$0xff]  ;;  %v1357_v5 = vld [vmem:[#allocation8 + $0x6b8] sm:$0xff] }
 0x30a   :  { %4889 = vmatprep.mubr.bf16.mxu1 %v18725_v33  ;;  %4901 = vmatpush1.bf16.msra.mxu0 %v14588_v18  ;;  %v18791_v39 = vpop.f32.mrf.mxu1  ;;  %v1165_v18 = vld [vmem:[#allocation8 + $0xb8] sm:$0xff]  ;;  %v14508_v21 = vcombine.low %v1181_v6, %v1189_v28 }
 0x30b   :  { %4932 = vmatprep.mubr.bf16.mxu0 %v18705_v56  ;;  %4859 = vmatprep.subr.bf16.mxu1 %v14827_v20  ;;  %v1197_v56 = vld [vmem:[#allocation8 + $0x1b8] sm:$0xff] }
 0x30c   :  { %v4551_v46 = vpop.f32.mrf.mxu1  ;;  %4902 = vmatprep.subr.bf16.mxu0 %v14573_v24  ;;  %v14525_v36 = vcombine.high %v1197_v56, %v1205_v63  ;;  %v14524_v8 = vcombine.low %v1197_v56, %v1205_v63  ;;  %v1173_v20 = vld [vmem:[#allocation8 + $0xf8] sm:$0xff]  ;;  %v14747_v24 = vcombine.high %v1420_v15, %v1428_v16  ;;  %v1604_v15 = vld [vmem:[#allocation8 + $0xe70] sm:$0xff] }
 0x30d   :  { %v4552_v51 = vadd.f32 %v4551_v46, %v4509_v43  ;;  %4860 = vmatpush1.bf16.msra.mxu1 %v14826_v34  ;;  %v14493_v34 = vcombine.high %v1165_v18, %v1173_v20  ;;  %v1644_v43 = vld [vmem:[#allocation8 + $0xfb0] sm:$0xff]  ;;  %v1389_v46 = vld [vmem:[#allocation8 + $0x7b8] sm:$0xff] }
 0x30e   :  { %4903 = vmatpush1.bf16.msra.mxu0 %v14572_v40  ;;  %4861 = vmatprep.subr.bf16.mxu1 %v14811_v42  ;;  %v14492_v40 = vcombine.low %v1165_v18, %v1173_v20  ;;  %v14731_v42 = vcombine.high %v1404_v26, %v1412_v31  ;;  %v1381_v56 = vld [vmem:[#allocation8 + $0x778] sm:$0xff] }
 0x30f   :  { %v18794_v60 = vpack.c.bf16 %v4552_v51, %v4548_v32  ;;  %4904 = vmatprep.subr.bf16.mxu0 %v14557_v45  ;;  %v1149_v32 = vld [vmem:[#allocation8 + $0x38] sm:$0xff]  ;;  %v1652_v45 = vld [vmem:[#allocation8 + $0xff0] sm:$0xff]  ;;  %v14730_v51 = vcombine.low %v1404_v26, %v1412_v31 }
 0x310   :  { %v14477_v48 = vcombine.high %v1149_v32, %v1157_v37  ;;  %v14971_v25 = vcombine.high %v1644_v43, %v1652_v45  ;;  %v14970_v63 = vcombine.low %v1644_v43, %v1652_v45  ;;  %v1341_v16 = vld [vmem:[#allocation8 + $0x638] sm:$0xff]  ;;  %v1588_v26 = vld [vmem:[#allocation8 + $0xdf0] sm:$0xff] }
 0x311   :  { %4862 = vmatpush1.bf16.msra.mxu1 %v14810_v52  ;;  %v14476_v52 = vcombine.low %v1149_v32, %v1157_v37  ;;  %v1325_v31 = vld [vmem:[#allocation8 + $0x5b8] sm:$0xff]  ;;  %v1572_v43 = vld [vmem:[#allocation8 + $0xd70] sm:$0xff] }
 0x312   :  { %4905 = vmatpush1.bf16.msra.mxu0 %v14556_v55  ;;  %4863 = vmatprep.subr.bf16.mxu1 %v14795_v59  ;;  %v1636_v55 = vld [vmem:[#allocation8 + $0xf70] sm:$0xff]  ;;  %v1373_v59 = vld [vmem:[#allocation8 + $0x738] sm:$0xff] }
 0x313   :  { %4906 = vmatprep.subr.bf16.mxu0 %v14541_v62  ;;  %v14717_v62 = vcombine.high %v1389_v46, %v1397_v50  ;;  %v14701_v6 = vcombine.high %v1373_v59, %v1381_v56  ;;  %v14954_v28 = vcombine.low %v1628_v54, %v1636_v55  ;;  %v1309_v45 = vld [vmem:[#allocation8 + $0x538] sm:$0xff] }
 0x315   :  { %4864 = vmatpush1.bf16.msra.mxu1 %v14794_v0  ;;  %v14716_v0 = vcombine.low %v1389_v46, %v1397_v50 }
 0x316   :  { %4907 = vmatpush1.bf16.msra.mxu0 %v14540_v1  ;;  %4865 = vmatprep.subr.bf16.mxu1 %v14779_v3  ;;  %v14955_v1 = vcombine.high %v1628_v54, %v1636_v55  ;;  %v1612_v3 = vld [vmem:[#allocation8 + $0xeb0] sm:$0xff]  ;;  %v1293_v55 = vld [vmem:[#allocation8 + $0x4b8] sm:$0xff] }
 0x317   :  { %4908 = vmatprep.subr.bf16.mxu0 %v14525_v36  ;;  %v1365_v36 = vld [vmem:[#allocation8 + $0x6f8] sm:$0xff]  ;;  %v14938_v20 = vcombine.low %v1612_v3, %v1620_v4  ;;  %v1556_v54 = vld [vmem:[#allocation8 + $0xcf0] sm:$0xff] }
 0x318   :  { %v14685_v18 = vcombine.high %v1357_v5, %v1365_v36 }
 0x319   :  { %4866 = vmatpush1.bf16.msra.mxu1 %v14778_v41  ;;  %v14700_v41 = vcombine.low %v1373_v59, %v1381_v56 }
 0x31a   :  { %4909 = vmatpush1.bf16.msra.mxu0 %v14524_v8  ;;  %4867 = vmatprep.subr.bf16.mxu1 %v14763_v11  ;;  %v14939_v8 = vcombine.high %v1612_v3, %v1620_v4  ;;  %v1596_v11 = vld [vmem:[#allocation8 + $0xe30] sm:$0xff]  ;;  %v1277_v4 = vld [vmem:[#allocation8 + $0x438] sm:$0xff] }
 0x31b   :  { %4910 = vmatprep.subr.bf16.mxu0 %v14509_v19  ;;  %v1349_v19 = vld [vmem:[#allocation8 + $0x678] sm:$0xff]  ;;  %v14922_v37 = vcombine.low %v1596_v11, %v1604_v15  ;;  %v1540_v3 = vld [vmem:[#allocation8 + $0xc70] sm:$0xff] }
 0x31c   :  { %v14669_v32 = vcombine.high %v1341_v16, %v1349_v19 }
 0x31d   :  { %4868 = vmatpush1.bf16.msra.mxu1 %v14762_v44  ;;  %v14684_v44 = vcombine.low %v1357_v5, %v1365_v36 }
 0x31e   :  { %4911 = vmatpush1.bf16.msra.mxu0 %v14508_v21  ;;  %4869 = vmatprep.subr.bf16.mxu1 %v14747_v24  ;;  %v14923_v21 = vcombine.high %v1596_v11, %v1604_v15  ;;  %v1580_v24 = vld [vmem:[#allocation8 + $0xdb0] sm:$0xff]  ;;  %v1517_v11 = vld [vmem:[#allocation8 + $0xbb8] sm:$0xff]  ;;  %v18799_v15 = vsub.s32 6, %v18691_v27 }
 0x31f   :  { %4912 = vmatprep.subr.bf16.mxu0 %v14493_v34  ;;  %v1333_v34 = vld [vmem:[#allocation8 + $0x5f8] sm:$0xff]  ;;  %v14906_v50 = vcombine.low %v1580_v24, %v1588_v26 }
 0x320   :  { %v14653_v46 = vcombine.high %v1325_v31, %v1333_v34 }
 0x321   :  { %4870 = vmatpush1.bf16.msra.mxu1 %v14746_v38  ;;  %v14668_v38 = vcombine.low %v1341_v16, %v1349_v19 }
 0x322   :  { %4913 = vmatpush1.bf16.msra.mxu0 %v14492_v40  ;;  %4871 = vmatprep.subr.bf16.mxu1 %v14731_v42  ;;  %v14907_v40 = vcombine.high %v1580_v24, %v1588_v26  ;;  %v1564_v42 = vld [vmem:[#allocation8 + $0xd30] sm:$0xff] }
 0x323   :  { %4914 = vmatprep.subr.bf16.mxu0 %v14477_v48  ;;  %v1317_v48 = vld [vmem:[#allocation8 + $0x578] sm:$0xff]  ;;  %v14890_v56 = vcombine.low %v1564_v42, %v1572_v43 }
 0x324   :  { %v14637_v59 = vcombine.high %v1309_v45, %v1317_v48 }
 0x325   :  { %4872 = vmatpush1.bf16.msra.mxu1 %v14730_v51  ;;  %v14652_v51 = vcombine.low %v1325_v31, %v1333_v34  ;;  %v1685_v31 = vrot.slane %v18780_v7, %v18799_v15 }
 0x326   :  { %4915 = vmatpush1.bf16.msra.mxu0 %v14476_v52  ;;  %4873 = vmatprep.subr.bf16.mxu1 %v14971_v25  ;;  %v14891_v52 = vcombine.high %v1564_v42, %v1572_v43  ;;  %v1548_v25 = vld [vmem:[#allocation8 + $0xcb0] sm:$0xff] }
 0x327   :  { %4916 = vmatprep.subr.bf16.mxu0 %v14717_v62  ;;  %v1301_v62 = vld [vmem:[#allocation8 + $0x4f8] sm:$0xff]  ;;  %v14874_v36 = vcombine.low %v1548_v25, %v1556_v54 }
 0x328   :  { %v14621_v5 = vcombine.high %v1293_v55, %v1301_v62 }
 0x329   :  { %4874 = vmatpush2.bf16.msra.mxu1 %v14970_v63  ;;  %v14636_v63 = vcombine.low %v1309_v45, %v1317_v48  ;;  %v18810_v45 = vpop.f32.mrf.mxu1 }
 0x32a   :  { %4917 = vmatpush2.bf16.msra.mxu0 %v14716_v0  ;;  %4875 = vmatprep.subr.bf16.mxu1 %v14955_v1  ;;  %v14875_v0 = vcombine.high %v1548_v25, %v1556_v54  ;;  %v1532_v1 = vld [vmem:[#allocation8 + $0xc30] sm:$0xff] }
 0x32b   :  { %4918 = vmatprep.subr.bf16.mxu0 %v14701_v6  ;;  %v1285_v6 = vld [vmem:[#allocation8 + $0x478] sm:$0xff] }
 0x32c   :  { %v14605_v16 = vcombine.high %v1277_v4, %v1285_v6 }
 0x32d   :  { %4876 = vmatpush2.bf16.msra.mxu1 %v14954_v28  ;;  %v18796_v28 = vpop.f32.mrf.mxu0 }
 0x32e   :  { %4919 = vmatpush2.bf16.msra.mxu0 %v14700_v41  ;;  %4877 = vmatprep.subr.bf16.mxu1 %v14939_v8  ;;  %v14620_v41 = vcombine.low %v1293_v55, %v1301_v62  ;;  %v14859_v8 = vcombine.high %v1532_v1, %v1540_v3  ;;  %v16597_v62 = vld [vmem:[#allocation11 + $0x1b0] ss:$36 sps:$4 sm:$0xff]  }
 0x32f   :  { %4920 = vmatprep.subr.bf16.mxu0 %v14685_v18  ;;  %v1525_v18 = vld [vmem:[#allocation8 + $0xbf8] sm:$0xff]  ;;  %v4590_v19 = vpop.f32.mrf.mxu0 }
 0x330   :  { %v14845_v24 = vcombine.high %v1517_v11, %v1525_v18  ;;  %v14844_v43 = vcombine.low %v1517_v11, %v1525_v18  ;;  %v4591_v48 = vadd.f32 %v4590_v19, %v1685_v31  ;;  %v1461_v11 = vld [vmem:[#allocation8 + $0x9f8] sm:$0xff]  ;;  %v16603_v18 = vld [vmem:[#allocation11 + $0x120] ss:$36 sps:$4 sm:$0xff]  }
 0x331   :  { %4878 = vmatpush2.bf16.msra.mxu1 %v14938_v20  ;;  %v1665_v20 = vrot.slane %v18780_v7, %v18696_v29  ;;  %v18806_v34 = vpop.f32.mrf.mxu0 }
 0x332   :  { %4921 = vmatpush2.bf16.msra.mxu0 %v14684_v44  ;;  %4879 = vmatprep.subr.bf16.mxu1 %v14923_v21  ;;  %v14858_v44 = vcombine.low %v1532_v1, %v1540_v3  ;;  %v14604_v21 = vcombine.low %v1277_v4, %v1285_v6  ;;  %v1469_v1 = vld [vmem:[#allocation8 + $0xa38] sm:$0xff] }
 0x333   :  { %4922 = vmatprep.subr.bf16.mxu0 %v14669_v32  ;;  %v4339_v26 = vadd.f32 %v18759_v58, %v1665_v20  ;;  %v16596_v32 = vld [vmem:[#allocation11 + $0x1fc] ss:$36 sps:$4 sm:$0xff]   ;;  %v4594_v25 = vpop.f32.mrf.mxu0  ;;  %v1477_v3 = vld [vmem:[#allocation8 + $0xa78] sm:$0xff] }
 0x334   :  { %v16594_v58 = vld [vmem:[#allocation11 + $0x1f8] ss:$36 sps:$4 sm:$0xff]   ;;  %v14797_v6 = vcombine.high %v1469_v1, %v1477_v3 }
 0x335   :  { %4880 = vmatpush2.bf16.msra.mxu1 %v14922_v37  ;;  %v1501_v37 = vld [vmem:[#allocation8 + $0xb38] sm:$0xff]  ;;  %v4382_v42 = vadd.f32 %v18765_v12, %v4339_v26  ;;  %v16606_v26 = vld [vmem:[#allocation11 + $0xd8] ss:$36 sps:$4 sm:$0xff]  }
 0x336   :  { %4923 = vmatpush2.bf16.msra.mxu0 %v14668_v38  ;;  %4881 = vmatprep.subr.bf16.mxu1 %v14907_v40  ;;  %v1509_v38 = vld [vmem:[#allocation8 + $0xb78] sm:$0xff]  ;;  %v4335_v40 = vadd.f32 %v18749_v35, %v1665_v20  ;;  %v16599_v35 = vld [vmem:[#allocation11 + $0x1b4] ss:$36 sps:$4 sm:$0xff]   ;;  %v16608_v20 = vld [vmem:[#allocation11 + $0xdc] ss:$36 sps:$4 sm:$0xff]  }
 0x337   :  { %4924 = vmatprep.subr.bf16.mxu0 %v14653_v46 }
 0x338   :  { %v4378_v46 = vadd.f32 %v18754_v53, %v4335_v40 }
 0x339   :  { %4882 = vmatpush2.bf16.msra.mxu1 %v14906_v50  ;;  %v14829_v50 = vcombine.high %v1501_v37, %v1509_v38 }
 0x33a   :  { %4925 = vmatpush2.bf16.msra.mxu0 %v14652_v51  ;;  %4883 = vmatprep.subr.bf16.mxu1 %v14891_v52  ;;  %v1485_v51 = vld [vmem:[#allocation8 + $0xab8] sm:$0xff]  ;;  %v18814_v12 = vpack.c.bf16 %v4382_v42, %v4378_v46  ;;  %v16609_v42 = vld [vmem:[#allocation11 + $0x90] ss:$36 sps:$4 sm:$0xff]  }
 0x33b   :  { %4926 = vmatprep.subr.bf16.mxu0 %v14637_v59  ;;  %v1493_v52 = vld [vmem:[#allocation8 + $0xaf8] sm:$0xff]  ;;  %v14828_v59 = vcombine.low %v1501_v37, %v1509_v38 }
 0x33c   :  { %v1421_v37 = vld [vmem:[#allocation8 + $0x8b8] sm:$0xff] }
 0x33d   :  { %4884 = vmatpush2.bf16.msra.mxu1 %v14890_v56  ;;  %v14813_v56 = vcombine.high %v1485_v51, %v1493_v52  ;;  %v1429_v38 = vld [vmem:[#allocation8 + $0x8f8] sm:$0xff] }
 0x33e   :  { %4927 = vmatpush2.bf16.msra.mxu0 %v14636_v63  ;;  %4885 = vmatprep.subr.bf16.mxu1 %v14875_v0  ;;  %v4595_v63 = vadd.f32 %v4594_v25, %v1685_v31  ;;  %v16602_v0 = vld [vmem:[#allocation11 + $0x16c] ss:$36 sps:$4 sm:$0xff]   ;;  %v16617_v25 = vld [vmem:[#allocation11 + $0x4] ss:$36 sps:$4 sm:$0xff]  }
 0x33f   :  { %4928 = vmatprep.subr.bf16.mxu0 %v14621_v5  ;;  %v1405_v46 = vld [vmem:[#allocation8 + $0x838] sm:$0xff] }
 0x341   :  { %4886 = vmatpush2.bf16.msra.mxu1 %v14874_v36 }
 0x342   :  { %4929 = vmatpush2.bf16.msra.mxu0 %v14620_v41  ;;  %4887 = vmatprep.subr.bf16.mxu1 %v14859_v8  ;;  %v16605_v41 = vld [vmem:[#allocation11 + $0x124] ss:$36 sps:$4 sm:$0xff]  }
 0x343   :  { %4930 = vmatprep.subr.bf16.mxu0 %v14605_v16  ;;  %v1453_v8 = vld [vmem:[#allocation8 + $0x9b8] sm:$0xff]  ;;  %v14796_v16 = vcombine.low %v1469_v1, %v1477_v3  ;;  %v16618_v3 = vld [vmem:[#allocation11 + $0x438] ss:$36 sps:$4 sm:$0xff]  }
 0x344   :  { %v14781_v19 = vcombine.high %v1453_v8, %v1461_v11 }
 0x345   :  { %4888 = vmatpush2.bf16.msra.mxu1 %v14858_v44  ;;  %v1437_v44 = vld [vmem:[#allocation8 + $0x938] sm:$0xff] }
 0x346   :  { %4931 = vmatpush2.bf16.msra.mxu0 %v14604_v21  ;;  %4943 = vmatprep.subr.bf16.mxu1 %v14845_v24  ;;  %v1445_v21 = vld [vmem:[#allocation8 + $0x978] sm:$0xff]  ;;  %v14780_v24 = vcombine.low %v1453_v8, %v1461_v11 }
 0x347   :  { %12219 = vmatprep.subr.bf16.mxu0 %v16596_v32  ;;  %v14765_v31 = vcombine.high %v1437_v44, %v1445_v21  ;;  %v16611_v32 = vld [vmem:[#allocation11 + $0x94] ss:$36 sps:$4 sm:$0xff]   ;;  %v14764_v40 = vcombine.low %v1437_v44, %v1445_v21  ;;  %v16626_v11 = vld [vmem:[#allocation11 + $0x3ac] ss:$36 sps:$4 sm:$0xff]   ;;  %v16629_v21 = vld [vmem:[#allocation11 + $0x364] ss:$36 sps:$4 sm:$0xff]  }
 0x348   :  { %v4633_v54 = vpop.f32.mrf.mxu1  ;;  %4890 = vmatmul.mubr.bf16.vlgmr.msra.gmra.mxu1 %v18727_v13 }
 0x349   :  { %v4634_v55 = vadd.f32 %v4633_v54, %v4591_v48  ;;  %4933 = vmatmul.mubr.bf16.vlgmr.msra.gmra.mxu0 %v18707_v57  ;;  %4944 = vmatpush1.bf16.msra.mxu1 %v14844_v43  ;;  %v14812_v57 = vcombine.low %v1485_v51, %v1493_v52  ;;  %v14749_v43 = vcombine.high %v1421_v37, %v1429_v38  ;;  %v1413_v48 = vld [vmem:[#allocation8 + $0x878] sm:$0xff] }
 0x34a   :  { %4975 = vmatprep.mubr.bf16.mxu1 %v18725_v33  ;;  %12220 = vmatpush1.bf16.msra.mxu0 %v16594_v58  ;;  %v18818_v53 = vpop.f32.mrf.mxu1  ;;  %v16600_v33 = vld [vmem:[#allocation11 + $0x168] ss:$36 sps:$4 sm:$0xff]   ;;  %v14733_v52 = vcombine.high %v1405_v46, %v1413_v48 }
 0x34b   :  { %12251 = vmatprep.mubr.bf16.mxu0 %v18814_v12  ;;  %4945 = vmatprep.subr.bf16.mxu1 %v14829_v50  ;;  %v16614_v58 = vld [vmem:[#allocation11 + $0x4c] ss:$36 sps:$4 sm:$0xff]   ;;  %v14748_v50 = vcombine.low %v1421_v37, %v1429_v38  ;;  %v16632_v38 = vld [vmem:[#allocation11 + $0x31c] ss:$36 sps:$4 sm:$0xff]  }
 0x34c   :  { %v4637_v4 = vpop.f32.mrf.mxu1  ;;  %12221 = vmatprep.subr.bf16.mxu0 %v16599_v35  ;;  %v16612_v51 = vld [vmem:[#allocation11 + $0x48] ss:$36 sps:$4 sm:$0xff]  }
 0x34d   :  { %v4638_v5 = vadd.f32 %v4637_v4, %v4595_v63  ;;  %4946 = vmatpush1.bf16.msra.mxu1 %v14828_v59  ;;  %v1645_v54 = vld [vmem:[#allocation8 + $0xfb8] sm:$0xff]  ;;  %v16615_v59 = vld [vmem:[#allocation11] ss:$36 sps:$4 sm:$0xff]  }
 0x34e   :  { %12222 = vmatpush1.bf16.msra.mxu0 %v16597_v62  ;;  %4947 = vmatprep.subr.bf16.mxu1 %v14813_v56  ;;  %v1653_v35 = vld [vmem:[#allocation8 + $0xff8] sm:$0xff]  ;;  %v16620_v56 = vld [vmem:[#allocation11 + $0x43c] ss:$36 sps:$4 sm:$0xff]  }
 0x34f   :  { %v18821_v36 = vpack.c.bf16 %v4638_v5, %v4634_v55  ;;  %12223 = vmatprep.subr.bf16.mxu0 %v16602_v0  ;;  %v14732_v55 = vcombine.low %v1405_v46, %v1413_v48  ;;  %v14973_v62 = vcombine.high %v1645_v54, %v1653_v35  ;;  %v1629_v63 = vld [vmem:[#allocation8 + $0xf38] sm:$0xff]  ;;  %v14972_v1 = vcombine.low %v1645_v54, %v1653_v35  ;;  %v16623_v5 = vld [vmem:[#allocation11 + $0x3f4] ss:$36 sps:$4 sm:$0xff]  }
 0x350   :  { %v1637_v0 = vld [vmem:[#allocation8 + $0xf78] sm:$0xff]  ;;  %v16635_v48 = vld [vmem:[#allocation11 + $0x2d4] ss:$36 sps:$4 sm:$0xff]  }
 0x351   :  { %4948 = vmatpush1.bf16.msra.mxu1 %v14812_v57  ;;  %v14957_v4 = vcombine.high %v1629_v63, %v1637_v0  ;;  %v1613_v57 = vld [vmem:[#allocation8 + $0xeb8] sm:$0xff] }
 0x352   :  { %12224 = vmatpush1.bf16.msra.mxu0 %v16600_v33  ;;  %4949 = vmatprep.subr.bf16.mxu1 %v14797_v6  ;;  %v1621_v33 = vld [vmem:[#allocation8 + $0xef8] sm:$0xff]  ;;  %v14956_v6 = vcombine.low %v1629_v63, %v1637_v0  ;;  %v18826_v63 = vpop.f32.mrf.mxu0 }
 0x353   :  { %12225 = vmatprep.subr.bf16.mxu0 %v16605_v41  ;;  %v16621_v41 = vld [vmem:[#allocation11 + $0x3f0] ss:$36 sps:$4 sm:$0xff]   ;;  %v14941_v8 = vcombine.high %v1613_v57, %v1621_v33  ;;  %v16636_v0 = vld [vmem:[#allocation11 + $0x288] ss:$36 sps:$4 sm:$0xff]  }
 0x354   :  { %v16638_v35 = vld [vmem:[#allocation11 + $0x28c] ss:$36 sps:$4 sm:$0xff]  }
 0x355   :  { %4950 = vmatpush1.bf16.msra.mxu1 %v14796_v16  ;;  %v1597_v16 = vld [vmem:[#allocation8 + $0xe38] sm:$0xff] }
 0x356   :  { %12226 = vmatpush1.bf16.msra.mxu0 %v16603_v18  ;;  %4951 = vmatprep.subr.bf16.mxu1 %v14781_v19  ;;  %v1605_v18 = vld [vmem:[#allocation8 + $0xe78] sm:$0xff]  ;;  %v14940_v19 = vcombine.low %v1613_v57, %v1621_v33  ;;  %v4676_v57 = vpop.f32.mrf.mxu0  ;;  %v18832_v33 = vld [vmem:[#allocation9] sm:$0xff] }
 0x357   :  { %12227 = vmatprep.subr.bf16.mxu0 %v16608_v20  ;;  %v16624_v20 = vld [vmem:[#allocation11 + $0x3a8] ss:$36 sps:$4 sm:$0xff]   ;;  %v14925_v44 = vcombine.high %v1597_v16, %v1605_v18 }
 0x359   :  { %4952 = vmatpush1.bf16.msra.mxu1 %v14780_v24  ;;  %v1581_v24 = vld [vmem:[#allocation8 + $0xdb8] sm:$0xff] }
 0x35a   :  { %12228 = vmatpush1.bf16.msra.mxu0 %v16606_v26  ;;  %4953 = vmatprep.subr.bf16.mxu1 %v14765_v31  ;;  %v1589_v26 = vld [vmem:[#allocation8 + $0xdf8] sm:$0xff]  ;;  %v14924_v31 = vcombine.low %v1597_v16, %v1605_v18  ;;  %v16644_v16 = vld [vmem:[#allocation11 + $0x67c] ss:$36 sps:$4 sm:$0xff]  }
 0x35b   :  { %12229 = vmatprep.subr.bf16.mxu0 %v16611_v32  ;;  %v16627_v32 = vld [vmem:[#allocation11 + $0x360] ss:$36 sps:$4 sm:$0xff]   ;;  %v14909_v37 = vcombine.high %v1581_v24, %v1589_v26 }
 0x35d   :  { %4954 = vmatpush1.bf16.msra.mxu1 %v14764_v40  ;;  %v1565_v40 = vld [vmem:[#allocation8 + $0xd38] sm:$0xff] }
 0x35e   :  { %12230 = vmatpush1.bf16.msra.mxu0 %v16609_v42  ;;  %4955 = vmatprep.subr.bf16.mxu1 %v14749_v43  ;;  %v1573_v42 = vld [vmem:[#allocation8 + $0xd78] sm:$0xff]  ;;  %v14908_v43 = vcombine.low %v1581_v24, %v1589_v26  ;;  %v16642_v26 = vld [vmem:[#allocation11 + $0x678] ss:$36 sps:$4 sm:$0xff]  }
 0x35f   :  { %12231 = vmatprep.subr.bf16.mxu0 %v16614_v58  ;;  %v16630_v58 = vld [vmem:[#allocation11 + $0x318] ss:$36 sps:$4 sm:$0xff]   ;;  %v14893_v46 = vcombine.high %v1565_v40, %v1573_v42 }
 0x361   :  { %4956 = vmatpush1.bf16.msra.mxu1 %v14748_v50  ;;  %v1549_v50 = vld [vmem:[#allocation8 + $0xcb8] sm:$0xff] }
 0x362   :  { %12232 = vmatpush1.bf16.msra.mxu0 %v16612_v51  ;;  %4957 = vmatprep.subr.bf16.mxu1 %v14733_v52  ;;  %v1557_v51 = vld [vmem:[#allocation8 + $0xcf8] sm:$0xff]  ;;  %v14892_v52 = vcombine.low %v1565_v40, %v1573_v42 }
 0x363   :  { %12233 = vmatprep.subr.bf16.mxu0 %v16617_v25  ;;  %v16633_v25 = vld [vmem:[#allocation11 + $0x2d0] ss:$36 sps:$4 sm:$0xff]   ;;  %v14877_v54 = vcombine.high %v1549_v50, %v1557_v51 }
 0x365   :  { %4958 = vmatpush1.bf16.msra.mxu1 %v14732_v55  ;;  %v1533_v55 = vld [vmem:[#allocation8 + $0xc38] sm:$0xff] }
 0x366   :  { %12234 = vmatpush1.bf16.msra.mxu0 %v16615_v59  ;;  %4959 = vmatprep.subr.bf16.mxu1 %v14973_v62  ;;  %v1541_v59 = vld [vmem:[#allocation8 + $0xc78] sm:$0xff]  ;;  %v18824_v62 = vsub.s32 5, %v18691_v27 }
 0x367   :  { %12235 = vmatprep.subr.bf16.mxu0 %v16620_v56  ;;  %v14876_v56 = vcombine.low %v1549_v50, %v1557_v51 }
 0x369   :  { %4960 = vmatpush2.bf16.msra.mxu1 %v14972_v1  ;;  %v14861_v1 = vcombine.high %v1533_v55, %v1541_v59 }
 0x36a   :  { %12236 = vmatpush2.bf16.msra.mxu0 %v16618_v3  ;;  %4961 = vmatprep.subr.bf16.mxu1 %v14957_v4  ;;  %v16641_v3 = vld [vmem:[#allocation11 + $0x244] ss:$36 sps:$4 sm:$0xff]   ;;  %v1673_v4 = vrot.slane %v18780_v7, %v18716_v47 }
 0x36b   :  { %12237 = vmatprep.subr.bf16.mxu0 %v16623_v5  ;;  %v18830_v5 = vld [vmem:[#allocation9 + $0x8] sm:$0xff] }
 0x36c   :  { %v1693_v7 = vrot.slane %v18830_v5, %v18699_v30 }
 0x36d   :  { %4962 = vmatpush2.bf16.msra.mxu1 %v14956_v6  ;;  %v1681_v6 = vrot.slane %v18832_v33, %v18824_v62 }
 0x36e   :  { %12238 = vmatpush2.bf16.msra.mxu0 %v16621_v41  ;;  %4963 = vmatprep.subr.bf16.mxu1 %v14941_v8  ;;  %v14860_v41 = vcombine.low %v1533_v55, %v1541_v59  ;;  %v4425_v8 = vadd.f32 %v18775_v22, %v1673_v4  ;;  %v16665_v55 = vld [vmem:[#allocation11 + $0xa24] ss:$36 sps:$4 sm:$0xff]  }
 0x36f   :  { %12239 = vmatprep.subr.bf16.mxu0 %v16626_v11  ;;  %v16639_v11 = vld [vmem:[#allocation11 + $0x240] ss:$36 sps:$4 sm:$0xff]   ;;  %v4511_v18 = vadd.f32 %v18796_v28, %v1681_v6  ;;  %v4507_v24 = vadd.f32 %v18784_v9, %v1681_v6  ;;  %v18847_v28 = vpop.f32.mrf.mxu1  ;;  %v16677_v6 = vld [vmem:[#allocation11 + $0x994] ss:$36 sps:$4 sm:$0xff]  }
 0x370   :  { %v16660_v59 = vld [vmem:[#allocation11 + $0x5a0] ss:$36 sps:$4 sm:$0xff]  }
 0x371   :  { %4964 = vmatpush2.bf16.msra.mxu1 %v14940_v19  ;;  %v16647_v19 = vld [vmem:[#allocation11 + $0xafc] ss:$36 sps:$4 sm:$0xff]   ;;  %v4554_v22 = vadd.f32 %v18810_v45, %v4511_v18  ;;  %v16653_v45 = vld [vmem:[#allocation11 + $0xab4] ss:$36 sps:$4 sm:$0xff]   ;;  %v16678_v18 = vld [vmem:[#allocation11 + $0x4c8] ss:$36 sps:$4 sm:$0xff]  }
 0x372   :  { %12240 = vmatpush2.bf16.msra.mxu0 %v16624_v20  ;;  %4965 = vmatprep.subr.bf16.mxu1 %v14925_v44  ;;  %v4421_v20 = vadd.f32 %v18763_v10, %v1673_v4  ;;  %v4468_v44 = vadd.f32 %v18786_v17, %v4425_v8  ;;  %v4677_v10 = vadd.f32 %v4676_v57, %v1693_v7  ;;  %v16650_v17 = vld [vmem:[#allocation11 + $0x634] ss:$36 sps:$4 sm:$0xff]  }
 0x373   :  { %12241 = vmatprep.subr.bf16.mxu0 %v16629_v21  ;;  %v18842_v21 = vpop.f32.mrf.mxu0  ;;  %v16669_v4 = vld [vmem:[#allocation11 + $0x9d8] ss:$36 sps:$4 sm:$0xff]   ;;  %v16675_v8 = vld [vmem:[#allocation11 + $0x990] ss:$36 sps:$4 sm:$0xff]  }
 0x374   :  { %v16674_v57 = vld [vmem:[#allocation11 + $0x514] ss:$36 sps:$4 sm:$0xff]  }
 0x375   :  { %4966 = vmatpush2.bf16.msra.mxu1 %v14924_v31  ;;  %v4464_v31 = vadd.f32 %v18770_v14, %v4421_v20  ;;  %v4680_v40 = vpop.f32.mrf.mxu0  ;;  %v16689_v20 = vld [vmem:[#allocation11 + $0x904] ss:$36 sps:$4 sm:$0xff]  }
 0x376   :  { %12242 = vmatpush2.bf16.msra.mxu0 %v16627_v32  ;;  %4967 = vmatprep.subr.bf16.mxu1 %v14909_v37  ;;  %v16645_v32 = vld [vmem:[#allocation11 + $0xaf8] ss:$36 sps:$4 sm:$0xff]   ;;  %v4550_v37 = vadd.f32 %v18791_v39, %v4507_v24  ;;  %v16687_v24 = vld [vmem:[#allocation11 + $0x900] ss:$36 sps:$4 sm:$0xff]  }
 0x377   :  { %12243 = vmatprep.subr.bf16.mxu0 %v16632_v38  ;;  %v18850_v38 = vpack.c.bf16 %v4468_v44, %v4464_v31  ;;  %v16684_v44 = vld [vmem:[#allocation11 + $0x480] ss:$36 sps:$4 sm:$0xff]   ;;  %v16690_v31 = vld [vmem:[#allocation11 + $0x8b8] ss:$36 sps:$4 sm:$0xff]  }
 0x378   :  { %v18853_v42 = vpack.c.bf16 %v4554_v22, %v4550_v37  ;;  %v16692_v22 = vld [vmem:[#allocation11 + $0x8bc] ss:$36 sps:$4 sm:$0xff]   ;;  %v16698_v37 = vld [vmem:[#allocation11 + $0x874] ss:$36 sps:$4 sm:$0xff]  }
 0x379   :  { %4968 = vmatpush2.bf16.msra.mxu1 %v14908_v43  ;;  %v16648_v43 = vld [vmem:[#allocation11 + $0x630] ss:$36 sps:$4 sm:$0xff]  }
 0x37a   :  { %12244 = vmatpush2.bf16.msra.mxu0 %v16630_v58  ;;  %4969 = vmatprep.subr.bf16.mxu1 %v14893_v46  ;;  %v16651_v58 = vld [vmem:[#allocation11 + $0xab0] ss:$36 sps:$4 sm:$0xff]  }
 0x37b   :  { %12245 = vmatprep.subr.bf16.mxu0 %v16635_v48  ;;  %v16656_v46 = vld [vmem:[#allocation11 + $0x5ec] ss:$36 sps:$4 sm:$0xff]   ;;  %v4681_v48 = vadd.f32 %v4680_v40, %v1693_v7 }
 0x37c   :  { %v16681_v7 = vld [vmem:[#allocation11 + $0x948] ss:$36 sps:$4 sm:$0xff]   ;;  %v16699_v40 = vld [vmem:[#allocation11 + $0xcf0] ss:$36 sps:$4 sm:$0xff]  }
 0x37d   :  { %4970 = vmatpush2.bf16.msra.mxu1 %v14892_v52  ;;  %v16654_v52 = vld [vmem:[#allocation11 + $0x5e8] ss:$36 sps:$4 sm:$0xff]  }
 0x37e   :  { %12246 = vmatpush2.bf16.msra.mxu0 %v16633_v25  ;;  %4971 = vmatprep.subr.bf16.mxu1 %v14877_v54  ;;  %v16657_v25 = vld [vmem:[#allocation11 + $0xa68] ss:$36 sps:$4 sm:$0xff]  }
 0x37f   :  { %12247 = vmatprep.subr.bf16.mxu0 %v16638_v35  ;;  %v16662_v54 = vld [vmem:[#allocation11 + $0x5a4] ss:$36 sps:$4 sm:$0xff]  }
 0x381   :  { %4972 = vmatpush2.bf16.msra.mxu1 %v14876_v56  ;;  %v16663_v56 = vld [vmem:[#allocation11 + $0xa20] ss:$36 sps:$4 sm:$0xff]  }
 0x382   :  { %12248 = vmatpush2.bf16.msra.mxu0 %v16636_v0  ;;  %4973 = vmatprep.subr.bf16.mxu1 %v14861_v1  ;;  %v16668_v0 = vld [vmem:[#allocation11 + $0x55c] ss:$36 sps:$4 sm:$0xff]  }
 0x383   :  { %12249 = vmatprep.subr.bf16.mxu0 %v16641_v3  ;;  %v16671_v1 = vld [vmem:[#allocation11 + $0x9dc] ss:$36 sps:$4 sm:$0xff]  }
 0x384   :  { %v16666_v3 = vld [vmem:[#allocation11 + $0x558] ss:$36 sps:$4 sm:$0xff]  }
 0x385   :  { %4974 = vmatpush2.bf16.msra.mxu1 %v14860_v41  ;;  %v16672_v41 = vld [vmem:[#allocation11 + $0x510] ss:$36 sps:$4 sm:$0xff]  }
 0x386   :  { %12250 = vmatpush2.bf16.msra.mxu0 %v16639_v11  ;;  %12262 = vmatprep.subr.bf16.mxu1 %v16644_v16  ;;  %v16680_v11 = vld [vmem:[#allocation11 + $0x4cc] ss:$36 sps:$4 sm:$0xff]  }
 0x387   :  { %12305 = vmatprep.subr.bf16.mxu0 %v16647_v19  ;;  %v16683_v16 = vld [vmem:[#allocation11 + $0x94c] ss:$36 sps:$4 sm:$0xff]   ;;  %v16686_v19 = vld [vmem:[#allocation11 + $0x484] ss:$36 sps:$4 sm:$0xff]  }
 0x388   :  { %v4719_v9 = vpop.f32.mrf.mxu1  ;;  %4976 = vmatmul.mubr.bf16.vlgmr.msra.gmra.mxu1 %v18727_v13  ;;  %v16659_v13 = vld [vmem:[#allocation11 + $0xa6c] ss:$36 sps:$4 sm:$0xff]  }
 0x389   :  { %v4720_v14 = vadd.f32 %v4719_v9, %v4677_v10  ;;  %12252 = vmatmul.mubr.bf16.vlgmr.msra.gmra.mxu0 %v18757_v2  ;;  %12263 = vmatpush1.bf16.msra.mxu1 %v16642_v26  ;;  %v16695_v26 = vld [vmem:[#allocation11 + $0xd3c] ss:$36 sps:$4 sm:$0xff]   ;;  %v16701_v10 = vld [vmem:[#allocation11 + $0xcf4] ss:$36 sps:$4 sm:$0xff]   ;;  %v16704_v9 = vld [vmem:[#allocation11 + $0x82c] ss:$36 sps:$4 sm:$0xff]  }
 0x38a   :  { %12294 = vmatprep.mubr.bf16.mxu1 %v18850_v38  ;;  %12306 = vmatpush1.bf16.msra.mxu0 %v16645_v32  ;;  %v18857_v39 = vpop.f32.mrf.mxu1  ;;  %v16693_v32 = vld [vmem:[#allocation11 + $0xd38] ss:$36 sps:$4 sm:$0xff]  }
 0x38b   :  { %12337 = vmatprep.mubr.bf16.mxu0 %v18853_v42  ;;  %12264 = vmatprep.subr.bf16.mxu1 %v16650_v17  ;;  %v16696_v17 = vld [vmem:[#allocation11 + $0x870] ss:$36 sps:$4 sm:$0xff]  }
 0x38c   :  { %v4723_v50 = vpop.f32.mrf.mxu1  ;;  %12307 = vmatprep.subr.bf16.mxu0 %v16653_v45  ;;  %v16707_v45 = vld [vmem:[#allocation11 + $0xcac] ss:$36 sps:$4 sm:$0xff]  }
 0x38d   :  { %v4724_v51 = vadd.f32 %v4723_v50, %v4681_v48  ;;  %12265 = vmatpush1.bf16.msra.mxu1 %v16648_v43  ;;  %v16705_v43 = vld [vmem:[#allocation11 + $0xca8] ss:$36 sps:$4 sm:$0xff]   ;;  %v16708_v48 = vld [vmem:[#allocation11 + $0x7e0] ss:$36 sps:$4 sm:$0xff]  }
 0x38e   :  { %12308 = vmatpush1.bf16.msra.mxu0 %v16651_v58  ;;  %12266 = vmatprep.subr.bf16.mxu1 %v16656_v46  ;;  %v16710_v58 = vld [vmem:[#allocation11 + $0x7e4] ss:$36 sps:$4 sm:$0xff]   ;;  %v16716_v50 = vld [vmem:[#allocation11 + $0x79c] ss:$36 sps:$4 sm:$0xff]  }
 0x38f   :  { %v18860_v35 = vpack.c.bf16 %v4724_v51, %v4720_v14  ;;  %12309 = vmatprep.subr.bf16.mxu0 %v16659_v13  ;;  %v16702_v14 = vld [vmem:[#allocation11 + $0x828] ss:$36 sps:$4 sm:$0xff]   ;;  %v16711_v13 = vld [vmem:[#allocation11 + $0xc60] ss:$36 sps:$4 sm:$0xff]  }
 0x390   :  { %v16713_v46 = vld [vmem:[#allocation11 + $0xc64] ss:$36 sps:$4 sm:$0xff]   ;;  %v16719_v51 = vld [vmem:[#allocation11 + $0xc1c] ss:$36 sps:$4 sm:$0xff]  }
 0x391   :  { %12267 = vmatpush1.bf16.msra.mxu1 %v16654_v52  ;;  %v16714_v52 = vld [vmem:[#allocation11 + $0x798] ss:$36 sps:$4 sm:$0xff]  }
 0x392   :  { %12310 = vmatpush1.bf16.msra.mxu0 %v16657_v25  ;;  %12268 = vmatprep.subr.bf16.mxu1 %v16662_v54  ;;  %v16717_v25 = vld [vmem:[#allocation11 + $0xc18] ss:$36 sps:$4 sm:$0xff]  }
 0x393   :  { %12311 = vmatprep.subr.bf16.mxu0 %v16665_v55  ;;  %v16722_v54 = vld [vmem:[#allocation11 + $0x754] ss:$36 sps:$4 sm:$0xff]  }
 0x394   :  { %v16725_v55 = vld [vmem:[#allocation11 + $0xbd4] ss:$36 sps:$4 sm:$0xff]  }
 0x395   :  { %12269 = vmatpush1.bf16.msra.mxu1 %v16660_v59  ;;  %v16720_v59 = vld [vmem:[#allocation11 + $0x750] ss:$36 sps:$4 sm:$0xff]  }
 0x396   :  { %12312 = vmatpush1.bf16.msra.mxu0 %v16663_v56  ;;  %12270 = vmatprep.subr.bf16.mxu1 %v16668_v0  ;;  %v16723_v56 = vld [vmem:[#allocation11 + $0xbd0] ss:$36 sps:$4 sm:$0xff]  }
 0x397   :  { %12313 = vmatprep.subr.bf16.mxu0 %v16671_v1  ;;  %v16728_v0 = vld [vmem:[#allocation11 + $0x70c] ss:$36 sps:$4 sm:$0xff]  }
 0x398   :  { %v16731_v1 = vld [vmem:[#allocation11 + $0xb8c] ss:$36 sps:$4 sm:$0xff]  }
 0x399   :  { %12271 = vmatpush1.bf16.msra.mxu1 %v16666_v3  ;;  %v18863_v3 = vsub.s32 7, %v18691_v27 }
 0x39a   :  { %12314 = vmatpush1.bf16.msra.mxu0 %v16669_v4  ;;  %12272 = vmatprep.subr.bf16.mxu1 %v16674_v57  ;;  %v16726_v4 = vld [vmem:[#allocation11 + $0x708] ss:$36 sps:$4 sm:$0xff]   ;;  %v4682_v57 = vpop.f32.mrf.mxu0 }
 0x39b   :  { %12315 = vmatprep.subr.bf16.mxu0 %v16677_v6  ;;  %v16729_v6 = vld [vmem:[#allocation11 + $0xb88] ss:$36 sps:$4 sm:$0xff]  }
 0x39d   :  { %12273 = vmatpush1.bf16.msra.mxu1 %v16672_v41  ;;  %v16734_v41 = vld [vmem:[#allocation11 + $0x6c4] ss:$36 sps:$4 sm:$0xff]  }
 0x39e   :  { %12316 = vmatpush1.bf16.msra.mxu0 %v16675_v8  ;;  %12274 = vmatprep.subr.bf16.mxu1 %v16680_v11  ;;  %v16737_v8 = vld [vmem:[#allocation11 + $0xb44] ss:$36 sps:$4 sm:$0xff]   ;;  %v1689_v11 = vrot.slane %v18832_v33, %v18863_v3 }
 0x39f   :  { %12317 = vmatprep.subr.bf16.mxu0 %v16683_v16  ;;  %v4762_v16 = vpop.f32.mrf.mxu0 }
 0x3a0   :  { %v4597_v27 = vadd.f32 %v18826_v63, %v1689_v11  ;;  %v4593_v33 = vadd.f32 %v18806_v34, %v1689_v11  ;;  %v16770_v11 = vld [vmem:[#allocation11 + $0xe14] ss:$36 sps:$4 sm:$0xff]  }
 0x3a1   :  { %12275 = vmatpush1.bf16.msra.mxu1 %v16678_v18  ;;  %v1697_v18 = vrot.slane %v18830_v5, %v18696_v29 }
 0x3a2   :  { %12318 = vmatpush1.bf16.msra.mxu0 %v16681_v7  ;;  %12276 = vmatprep.subr.bf16.mxu1 %v16686_v19  ;;  %v16732_v7 = vld [vmem:[#allocation11 + $0x6c0] ss:$36 sps:$4 sm:$0xff]   ;;  %v4725_v19 = vpop.f32.mrf.mxu1 }
 0x3a3   :  { %12319 = vmatprep.subr.bf16.mxu0 %v16689_v20  ;;  %v16735_v20 = vld [vmem:[#allocation11 + $0xb40] ss:$36 sps:$4 sm:$0xff]  }
 0x3a5   :  { %12277 = vmatpush1.bf16.msra.mxu1 %v16684_v44  ;;  %v16740_v44 = vld [vmem:[#allocation11 + $0xf7c] ss:$36 sps:$4 sm:$0xff]  }
 0x3a6   :  { %12320 = vmatpush1.bf16.msra.mxu0 %v16687_v24  ;;  %12278 = vmatprep.subr.bf16.mxu1 %v16692_v22  ;;  %v4683_v24 = vadd.f32 %v4682_v57, %v1697_v18  ;;  %v1701_v22 = vrot.slane %v18830_v5, %v18719_v49  ;;  %v16764_v57 = vld [vmem:[#allocation11 + $0xe5c] ss:$36 sps:$4 sm:$0xff]  }
 0x3a7   :  { %12321 = vmatprep.subr.bf16.mxu0 %v16695_v26  ;;  %v16743_v26 = vld [vmem:[#allocation11 + $0x13fc] ss:$36 sps:$4 sm:$0xff]  }
 0x3a8   :  { %v4726_v63 = vadd.f32 %v4725_v19, %v4683_v24  ;;  %v16779_v19 = vld [vmem:[#allocation11 + $0x124c] ss:$36 sps:$4 sm:$0xff]   ;;  %v16782_v24 = vld [vmem:[#allocation11 + $0xd84] ss:$36 sps:$4 sm:$0xff]  }
 0x3a9   :  { %12279 = vmatpush2.bf16.msra.mxu1 %v16690_v31  ;;  %v4640_v31 = vadd.f32 %v18847_v28, %v4597_v27  ;;  %v16776_v27 = vld [vmem:[#allocation11 + $0xdcc] ss:$36 sps:$4 sm:$0xff]  }
 0x3aa   :  { %12322 = vmatpush2.bf16.msra.mxu0 %v16693_v32  ;;  %12280 = vmatprep.subr.bf16.mxu1 %v16698_v37  ;;  %v18874_v32 = vpop.f32.mrf.mxu0  ;;  %v4679_v37 = vadd.f32 %v18842_v21, %v1697_v18  ;;  %v16749_v21 = vld [vmem:[#allocation11 + $0x13b4] ss:$36 sps:$4 sm:$0xff]  }
 0x3ab   :  { %12323 = vmatprep.subr.bf16.mxu0 %v16701_v10  ;;  %v16738_v10 = vld [vmem:[#allocation11 + $0xf78] ss:$36 sps:$4 sm:$0xff]   ;;  %v16768_v18 = vld [vmem:[#allocation11 + $0xe10] ss:$36 sps:$4 sm:$0xff]  }
 0x3ac   :  { %v4766_v28 = vpop.f32.mrf.mxu0 }
 0x3ad   :  { %12281 = vmatpush2.bf16.msra.mxu1 %v16696_v17  ;;  %v4636_v17 = vadd.f32 %v18818_v53, %v4593_v33  ;;  %v16744_v53 = vld [vmem:[#allocation11 + $0xf30] ss:$36 sps:$4 sm:$0xff]   ;;  %v16783_v33 = vld [vmem:[#allocation11 + $0x1200] ss:$36 sps:$4 sm:$0xff]  }
 0x3ae   :  { %12324 = vmatpush2.bf16.msra.mxu0 %v16699_v40  ;;  %12282 = vmatprep.subr.bf16.mxu1 %v16704_v9  ;;  %v16741_v40 = vld [vmem:[#allocation11 + $0x13f8] ss:$36 sps:$4 sm:$0xff]   ;;  %v4763_v9 = vadd.f32 %v4762_v16, %v1701_v22 }
 0x3af   :  { %12325 = vmatprep.subr.bf16.mxu0 %v16707_v45  ;;  %v4722_v45 = vadd.f32 %v18857_v39, %v4679_v37  ;;  %v18879_v34 = vpack.c.bf16 %v4640_v31, %v4636_v17  ;;  %v16773_v16 = vld [vmem:[#allocation11 + $0x1294] ss:$36 sps:$4 sm:$0xff]   ;;  %v16788_v31 = vld [vmem:[#allocation11 + $0x11bc] ss:$36 sps:$4 sm:$0xff]  }
 0x3b0   :  { %v16791_v37 = vld [vmem:[#allocation11 + $0x163c] ss:$36 sps:$4 sm:$0xff]   ;;  %v16794_v17 = vld [vmem:[#allocation11 + $0x1174] ss:$36 sps:$4 sm:$0xff]  }
 0x3b1   :  { %12283 = vmatpush2.bf16.msra.mxu1 %v16702_v14  ;;  %v16746_v14 = vld [vmem:[#allocation11 + $0xf34] ss:$36 sps:$4 sm:$0xff]  }
 0x3b2   :  { %12326 = vmatpush2.bf16.msra.mxu0 %v16705_v43  ;;  %12284 = vmatprep.subr.bf16.mxu1 %v16710_v58  ;;  %v18882_v58 = vpack.c.bf16 %v4726_v63, %v4722_v45  ;;  %v16786_v63 = vld [vmem:[#allocation11 + $0x11b8] ss:$36 sps:$4 sm:$0xff]   ;;  %v16795_v45 = vld [vmem:[#allocation11 + $0x15f0] ss:$36 sps:$4 sm:$0xff]  }
 0x3b3   :  { %12327 = vmatprep.subr.bf16.mxu0 %v16713_v46 }
 0x3b5   :  { %12285 = vmatpush2.bf16.msra.mxu1 %v16708_v48  ;;  %v16747_v48 = vld [vmem:[#allocation11 + $0x13b0] ss:$36 sps:$4 sm:$0xff]  }
 0x3b6   :  { %12328 = vmatpush2.bf16.msra.mxu0 %v16711_v13  ;;  %12286 = vmatprep.subr.bf16.mxu1 %v16716_v50  ;;  %v16752_v13 = vld [vmem:[#allocation11 + $0xeec] ss:$36 sps:$4 sm:$0xff]   ;;  %v4767_v50 = vadd.f32 %v4766_v28, %v1701_v22  ;;  %v16785_v22 = vld [vmem:[#allocation11 + $0x1204] ss:$36 sps:$4 sm:$0xff]  }
 0x3b7   :  { %12329 = vmatprep.subr.bf16.mxu0 %v16719_v51  ;;  %v16755_v51 = vld [vmem:[#allocation11 + $0x136c] ss:$36 sps:$4 sm:$0xff]  }
 0x3b8   :  { %v16803_v28 = vld [vmem:[#allocation11 + $0x15ac] ss:$36 sps:$4 sm:$0xff]  }
 0x3b9   :  { %12287 = vmatpush2.bf16.msra.mxu1 %v16714_v52 }
 0x3ba   :  { %12330 = vmatpush2.bf16.msra.mxu0 %v16717_v25  ;;  %12288 = vmatprep.subr.bf16.mxu1 %v16722_v54  ;;  %v16750_v54 = vld [vmem:[#allocation11 + $0xee8] ss:$36 sps:$4 sm:$0xff]  }
 0x3bb   :  { %12331 = vmatprep.subr.bf16.mxu0 %v16725_v55  ;;  %v16753_v55 = vld [vmem:[#allocation11 + $0x1368] ss:$36 sps:$4 sm:$0xff]  }
 0x3bd   :  { %12289 = vmatpush2.bf16.msra.mxu1 %v16720_v59  ;;  %v16758_v59 = vld [vmem:[#allocation11 + $0xea4] ss:$36 sps:$4 sm:$0xff]  }
 0x3be   :  { %12332 = vmatpush2.bf16.msra.mxu0 %v16723_v56  ;;  %12290 = vmatprep.subr.bf16.mxu1 %v16728_v0  ;;  %v16761_v0 = vld [vmem:[#allocation11 + $0x1324] ss:$36 sps:$4 sm:$0xff]  }
 0x3bf   :  { %12333 = vmatprep.subr.bf16.mxu0 %v16731_v1  ;;  %v16756_v1 = vld [vmem:[#allocation11 + $0xea0] ss:$36 sps:$4 sm:$0xff]  }
 0x3c1   :  { %12291 = vmatpush2.bf16.msra.mxu1 %v16726_v4  ;;  %v16759_v4 = vld [vmem:[#allocation11 + $0x1320] ss:$36 sps:$4 sm:$0xff]  }
 0x3c2   :  { %12334 = vmatpush2.bf16.msra.mxu0 %v16729_v6  ;;  %12292 = vmatprep.subr.bf16.mxu1 %v16734_v41  ;;  %v16767_v6 = vld [vmem:[#allocation11 + $0x12dc] ss:$36 sps:$4 sm:$0xff]  }
 0x3c3   :  { %12335 = vmatprep.subr.bf16.mxu0 %v16737_v8  ;;  %v16762_v41 = vld [vmem:[#allocation11 + $0xe58] ss:$36 sps:$4 sm:$0xff]  }
 0x3c4   :  { %v16765_v8 = vld [vmem:[#allocation11 + $0x12d8] ss:$36 sps:$4 sm:$0xff]  }
 0x3c5   :  { %12293 = vmatpush2.bf16.msra.mxu1 %v16732_v7  ;;  %v16771_v7 = vld [vmem:[#allocation11 + $0x1290] ss:$36 sps:$4 sm:$0xff]  }
 0x3c6   :  { %12336 = vmatpush2.bf16.msra.mxu0 %v16735_v20  ;;  %12348 = vmatprep.subr.bf16.mxu1 %v16740_v44  ;;  %v16774_v20 = vld [vmem:[#allocation11 + $0xdc8] ss:$36 sps:$4 sm:$0xff]  }
 0x3c7   :  { %12391 = vmatprep.subr.bf16.mxu0 %v16743_v26  ;;  %v16777_v44 = vld [vmem:[#allocation11 + $0x1248] ss:$36 sps:$4 sm:$0xff]   ;;  %v16780_v26 = vld [vmem:[#allocation11 + $0xd80] ss:$36 sps:$4 sm:$0xff]  }
 0x3c8   :  { %v4805_v43 = vpop.f32.mrf.mxu1  ;;  %12295 = vmatmul.mubr.bf16.vlgmr.msra.gmra.mxu1 %v18773_v23 }
 0x3c9   :  { %v4806_v46 = vadd.f32 %v4805_v43, %v4763_v9  ;;  %12338 = vmatmul.mubr.bf16.vlgmr.msra.gmra.mxu0 %v18794_v60  ;;  %12349 = vmatpush1.bf16.msra.mxu1 %v16738_v10  ;;  %v16789_v10 = vld [vmem:[#allocation11 + $0x1638] ss:$36 sps:$4 sm:$0xff]   ;;  %v16792_v9 = vld [vmem:[#allocation11 + $0x1170] ss:$36 sps:$4 sm:$0xff]   ;;  %v16798_v43 = vld [vmem:[#allocation11 + $0x1128] ss:$36 sps:$4 sm:$0xff]  }
 0x3ca   :  { %12380 = vmatprep.mubr.bf16.mxu1 %v18879_v34  ;;  %12392 = vmatpush1.bf16.msra.mxu0 %v16741_v40  ;;  %v18886_v39 = vpop.f32.mrf.mxu1  ;;  %v16797_v40 = vld [vmem:[#allocation11 + $0x15f4] ss:$36 sps:$4 sm:$0xff]  }
 0x3cb   :  { %12423 = vmatprep.mubr.bf16.mxu0 %v18882_v58  ;;  %12350 = vmatprep.subr.bf16.mxu1 %v16746_v14  ;;  %v16800_v14 = vld [vmem:[#allocation11 + $0x112c] ss:$36 sps:$4 sm:$0xff]  }
 0x3cc   :  { %v4809_v52 = vpop.f32.mrf.mxu1  ;;  %12393 = vmatprep.subr.bf16.mxu0 %v16749_v21  ;;  %v16801_v21 = vld [vmem:[#allocation11 + $0x15a8] ss:$36 sps:$4 sm:$0xff]  }
 0x3cd   :  { %v4810_v25 = vadd.f32 %v4809_v52, %v4767_v50  ;;  %12351 = vmatpush1.bf16.msra.mxu1 %v16744_v53  ;;  %v16809_v53 = vld [vmem:[#allocation11 + $0x1564] ss:$36 sps:$4 sm:$0xff]   ;;  %v16812_v50 = vld [vmem:[#allocation11 + $0x109c] ss:$36 sps:$4 sm:$0xff]  }
 0x3ce   :  { %12394 = vmatpush1.bf16.msra.mxu0 %v16747_v48  ;;  %12352 = vmatprep.subr.bf16.mxu1 %v16752_v13  ;;  %v16804_v48 = vld [vmem:[#allocation11 + $0x10e0] ss:$36 sps:$4 sm:$0xff]   ;;  %v16810_v52 = vld [vmem:[#allocation11 + $0x1098] ss:$36 sps:$4 sm:$0xff]  }
 0x3cf   :  { %v18889_v56 = vpack.c.bf16 %v4810_v25, %v4806_v46  ;;  %12395 = vmatprep.subr.bf16.mxu0 %v16755_v51  ;;  %v16806_v46 = vld [vmem:[#allocation11 + $0x10e4] ss:$36 sps:$4 sm:$0xff]   ;;  %v16815_v51 = vld [vmem:[#allocation11 + $0x151c] ss:$36 sps:$4 sm:$0xff]  }
 0x3d0   :  { %v16807_v13 = vld [vmem:[#allocation11 + $0x1560] ss:$36 sps:$4 sm:$0xff]   ;;  %v16813_v25 = vld [vmem:[#allocation11 + $0x1518] ss:$36 sps:$4 sm:$0xff]  }
 0x3d1   :  { %12353 = vmatpush1.bf16.msra.mxu1 %v16750_v54  ;;  %v16818_v54 = vld [vmem:[#allocation11 + $0x1054] ss:$36 sps:$4 sm:$0xff]  }
 0x3d2   :  { %12396 = vmatpush1.bf16.msra.mxu0 %v16753_v55  ;;  %12354 = vmatprep.subr.bf16.mxu1 %v16758_v59  ;;  %v16821_v55 = vld [vmem:[#allocation11 + $0x14d4] ss:$36 sps:$4 sm:$0xff]  }
 0x3d3   :  { %12397 = vmatprep.subr.bf16.mxu0 %v16761_v0  ;;  %v16816_v59 = vld [vmem:[#allocation11 + $0x1050] ss:$36 sps:$4 sm:$0xff]  }
 0x3d4   :  { %v16819_v0 = vld [vmem:[#allocation11 + $0x14d0] ss:$36 sps:$4 sm:$0xff]  }
 0x3d5   :  { %12355 = vmatpush1.bf16.msra.mxu1 %v16756_v1  ;;  %v16824_v1 = vld [vmem:[#allocation11 + $0x100c] ss:$36 sps:$4 sm:$0xff]  }
 0x3d6   :  { %12398 = vmatpush1.bf16.msra.mxu0 %v16759_v4  ;;  %12356 = vmatprep.subr.bf16.mxu1 %v16764_v57  ;;  %v16827_v4 = vld [vmem:[#allocation11 + $0x148c] ss:$36 sps:$4 sm:$0xff]   ;;  %v4768_v57 = vpop.f32.mrf.mxu0 }
 0x3d7   :  { %12399 = vmatprep.subr.bf16.mxu0 %v16767_v6  ;;  %v16822_v6 = vld [vmem:[#allocation11 + $0x1008] ss:$36 sps:$4 sm:$0xff]  }
 0x3d9   :  { %12357 = vmatpush1.bf16.msra.mxu1 %v16762_v41  ;;  %v18891_v41 = vpop.f32.mrf.mxu0 }
 0x3da   :  { %12400 = vmatpush1.bf16.msra.mxu0 %v16765_v8  ;;  %12358 = vmatprep.subr.bf16.mxu1 %v16770_v11  ;;  %v16825_v8 = vld [vmem:[#allocation11 + $0x1488] ss:$36 sps:$4 sm:$0xff]  }
 0x3db   :  { %12401 = vmatprep.subr.bf16.mxu0 %v16773_v16  ;;  %v16830_v11 = vld [vmem:[#allocation11 + $0xfc4] ss:$36 sps:$4 sm:$0xff]  }
 0x3dc   :  { %v16833_v16 = vld [vmem:[#allocation11 + $0x1444] ss:$36 sps:$4 sm:$0xff]  }
 0x3dd   :  { %12359 = vmatpush1.bf16.msra.mxu1 %v16768_v18  ;;  %v1705_v18 = vrot.slane %v18830_v5, %v18716_v47 }
 0x3de   :  { %12402 = vmatpush1.bf16.msra.mxu0 %v16771_v7  ;;  %12360 = vmatprep.subr.bf16.mxu1 %v16776_v27  ;;  %v4811_v7 = vpop.f32.mrf.mxu1  ;;  %v16828_v27 = vld [vmem:[#allocation11 + $0xfc0] ss:$36 sps:$4 sm:$0xff]  }
 0x3df   :  { %12403 = vmatprep.subr.bf16.mxu0 %v16779_v19  ;;  %v4769_v19 = vadd.f32 %v4768_v57, %v1705_v18  ;;  %v16860_v57 = vld [vmem:[#allocation11 + $0x175c] ss:$36 sps:$4 sm:$0xff]  }
 0x3e1   :  { %12361 = vmatpush1.bf16.msra.mxu1 %v16774_v20  ;;  %v4850_v20 = vpop.f32.mrf.mxu0 }
 0x3e2   :  { %12404 = vmatpush1.bf16.msra.mxu0 %v16777_v44  ;;  %12362 = vmatprep.subr.bf16.mxu1 %v16782_v24  ;;  %v16831_v44 = vld [vmem:[#allocation11 + $0x1440] ss:$36 sps:$4 sm:$0xff]  }
 0x3e3   :  { %12405 = vmatprep.subr.bf16.mxu0 %v16785_v22  ;;  %v16836_v24 = vld [vmem:[#allocation11 + $0x187c] ss:$36 sps:$4 sm:$0xff]  }
 0x3e4   :  { %v16839_v22 = vld [vmem:[#allocation11 + $0x1cfc] ss:$36 sps:$4 sm:$0xff]  }
 0x3e5   :  { %12363 = vmatpush1.bf16.msra.mxu1 %v16780_v26  ;;  %v4765_v26 = vadd.f32 %v18874_v32, %v1705_v18  ;;  %v1713_v32 = vrot.slane %v18830_v5, %v18824_v62  ;;  %v16869_v18 = vld [vmem:[#allocation11 + $0x1b94] ss:$36 sps:$4 sm:$0xff]  }
 0x3e6   :  { %12406 = vmatpush1.bf16.msra.mxu0 %v16783_v33  ;;  %12364 = vmatprep.subr.bf16.mxu1 %v16788_v31  ;;  %v4812_v33 = vadd.f32 %v4811_v7, %v4769_v19  ;;  %v16834_v31 = vld [vmem:[#allocation11 + $0x1878] ss:$36 sps:$4 sm:$0xff]   ;;  %v16864_v7 = vld [vmem:[#allocation11 + $0x1710] ss:$36 sps:$4 sm:$0xff]  }
 0x3e7   :  { %12407 = vmatprep.subr.bf16.mxu0 %v16791_v37  ;;  %v4808_v37 = vadd.f32 %v18886_v39, %v4765_v26  ;;  %v16840_v39 = vld [vmem:[#allocation11 + $0x1830] ss:$36 sps:$4 sm:$0xff]   ;;  %v16881_v26 = vld [vmem:[#allocation11 + $0x1b04] ss:$36 sps:$4 sm:$0xff]  }
 0x3e8   :  { %v16872_v19 = vld [vmem:[#allocation11 + $0x16cc] ss:$36 sps:$4 sm:$0xff]  }
 0x3e9   :  { %12365 = vmatpush2.bf16.msra.mxu1 %v16786_v63  ;;  %v18897_v63 = vpop.f32.mrf.mxu0 }
 0x3ea   :  { %12408 = vmatpush2.bf16.msra.mxu0 %v16789_v10  ;;  %12366 = vmatprep.subr.bf16.mxu1 %v16794_v17  ;;  %v16837_v10 = vld [vmem:[#allocation11 + $0x1cf8] ss:$36 sps:$4 sm:$0xff]  }
 0x3eb   :  { %12409 = vmatprep.subr.bf16.mxu0 %v16797_v40  ;;  %v16842_v17 = vld [vmem:[#allocation11 + $0x1834] ss:$36 sps:$4 sm:$0xff]  }
 0x3ec   :  { %v16845_v40 = vld [vmem:[#allocation11 + $0x1cb4] ss:$36 sps:$4 sm:$0xff]  }
 0x3ed   :  { %12367 = vmatpush2.bf16.msra.mxu1 %v16792_v9  ;;  %v18899_v9 = vpack.c.bf16 %v4812_v33, %v4808_v37  ;;  %v16876_v33 = vld [vmem:[#allocation11 + $0x1680] ss:$36 sps:$4 sm:$0xff]  }
 0x3ee   :  { %12410 = vmatpush2.bf16.msra.mxu0 %v16795_v45  ;;  %12368 = vmatprep.subr.bf16.mxu1 %v16800_v14  ;;  %v4854_v14 = vpop.f32.mrf.mxu0  ;;  %v16884_v37 = vld [vmem:[#allocation11 + $0x1abc] ss:$36 sps:$4 sm:$0xff]  }
 0x3ef   :  { %12411 = vmatprep.subr.bf16.mxu0 %v16803_v28 }
 0x3f1   :  { %12369 = vmatpush2.bf16.msra.mxu1 %v16798_v43  ;;  %v16843_v43 = vld [vmem:[#allocation11 + $0x1cb0] ss:$36 sps:$4 sm:$0xff]  }
 0x3f2   :  { %12412 = vmatpush2.bf16.msra.mxu0 %v16801_v21  ;;  %12370 = vmatprep.subr.bf16.mxu1 %v16806_v46  ;;  %v16848_v21 = vld [vmem:[#allocation11 + $0x17ec] ss:$36 sps:$4 sm:$0xff]  }
 0x3f3   :  { %12413 = vmatprep.subr.bf16.mxu0 %v16809_v53  ;;  %v16851_v46 = vld [vmem:[#allocation11 + $0x1c6c] ss:$36 sps:$4 sm:$0xff]  }
 0x3f5   :  { %12371 = vmatpush2.bf16.msra.mxu1 %v16804_v48  ;;  %v4851_v48 = vadd.f32 %v4850_v20, %v1713_v32  ;;  %v16875_v20 = vld [vmem:[#allocation11 + $0x1b4c] ss:$36 sps:$4 sm:$0xff]  }
 0x3f6   :  { %12414 = vmatpush2.bf16.msra.mxu0 %v16807_v13  ;;  %12372 = vmatprep.subr.bf16.mxu1 %v16812_v50  ;;  %v4855_v13 = vadd.f32 %v4854_v14, %v1713_v32  ;;  %v16846_v50 = vld [vmem:[#allocation11 + $0x17e8] ss:$36 sps:$4 sm:$0xff]   ;;  %v16890_v32 = vld [vmem:[#allocation11 + $0x1a74] ss:$36 sps:$4 sm:$0xff]  }
 0x3f7   :  { %12415 = vmatprep.subr.bf16.mxu0 %v16815_v51  ;;  %v16888_v14 = vld [vmem:[#allocation11 + $0x1a70] ss:$36 sps:$4 sm:$0xff]  }
 0x3f9   :  { %12373 = vmatpush2.bf16.msra.mxu1 %v16810_v52  ;;  %v16849_v52 = vld [vmem:[#allocation11 + $0x1c68] ss:$36 sps:$4 sm:$0xff]  }
 0x3fa   :  { %12416 = vmatpush2.bf16.msra.mxu0 %v16813_v25  ;;  %12374 = vmatprep.subr.bf16.mxu1 %v16818_v54  ;;  %v16854_v25 = vld [vmem:[#allocation11 + $0x17a4] ss:$36 sps:$4 sm:$0xff]  }
 0x3fb   :  { %12417 = vmatprep.subr.bf16.mxu0 %v16821_v55 }
 0x3fd   :  { %12375 = vmatpush2.bf16.msra.mxu1 %v16816_v59  ;;  %v16857_v59 = vld [vmem:[#allocation11 + $0x1c24] ss:$36 sps:$4 sm:$0xff]  }
 0x3fe   :  { %12418 = vmatpush2.bf16.msra.mxu0 %v16819_v0  ;;  %12376 = vmatprep.subr.bf16.mxu1 %v16824_v1  ;;  %v16852_v1 = vld [vmem:[#allocation11 + $0x17a0] ss:$36 sps:$4 sm:$0xff]  }
 0x3ff   :  { %12419 = vmatprep.subr.bf16.mxu0 %v16827_v4  ;;  %v16855_v4 = vld [vmem:[#allocation11 + $0x1c20] ss:$36 sps:$4 sm:$0xff]  }
 0x401   :  { %12377 = vmatpush2.bf16.msra.mxu1 %v16822_v6  ;;  %v16863_v6 = vld [vmem:[#allocation11 + $0x1bdc] ss:$36 sps:$4 sm:$0xff]  }
 0x402   :  { %12420 = vmatpush2.bf16.msra.mxu0 %v16825_v8  ;;  %12378 = vmatprep.subr.bf16.mxu1 %v16830_v11  ;;  %v16858_v8 = vld [vmem:[#allocation11 + $0x1758] ss:$36 sps:$4 sm:$0xff]  }
 0x403   :  { %12421 = vmatprep.subr.bf16.mxu0 %v16833_v16  ;;  %v16861_v11 = vld [vmem:[#allocation11 + $0x1bd8] ss:$36 sps:$4 sm:$0xff]  }
 0x404   :  { %v16866_v16 = vld [vmem:[#allocation11 + $0x1714] ss:$36 sps:$4 sm:$0xff]  }
 0x405   :  { %12379 = vmatpush2.bf16.msra.mxu1 %v16828_v27  ;;  %v16867_v27 = vld [vmem:[#allocation11 + $0x1b90] ss:$36 sps:$4 sm:$0xff]  }
 0x406   :  { %12422 = vmatpush2.bf16.msra.mxu0 %v16831_v44  ;;  %12434 = vmatprep.subr.bf16.mxu1 %v16836_v24  ;;  %v16870_v44 = vld [vmem:[#allocation11 + $0x16c8] ss:$36 sps:$4 sm:$0xff]  }
 0x407   :  { %12477 = vmatprep.subr.bf16.mxu0 %v16839_v22  ;;  %v16873_v24 = vld [vmem:[#allocation11 + $0x1b48] ss:$36 sps:$4 sm:$0xff]  }
 0x408   :  { %v18901_v45 = vpop.f32.mrf.mxu1  ;;  %12381 = vmatmul.mubr.bf16.vlgmr.msra.gmra.mxu1 %v18821_v36  ;;  %v16878_v22 = vld [vmem:[#allocation11 + $0x1684] ss:$36 sps:$4 sm:$0xff]  }
 0x409   :  { %12424 = vmatmul.mubr.bf16.vlgmr.msra.gmra.mxu0 %v18860_v35  ;;  %12435 = vmatpush1.bf16.msra.mxu1 %v16834_v31  ;;  %v16879_v31 = vld [vmem:[#allocation11 + $0x1b00] ss:$36 sps:$4 sm:$0xff]  }
 0x40a   :  { %12466 = vmatprep.mubr.bf16.mxu1 %v18899_v9  ;;  %12478 = vmatpush1.bf16.msra.mxu0 %v16837_v10  ;;  %v4893_v28 = vpop.f32.mrf.mxu1  ;;  %v16887_v10 = vld [vmem:[#allocation11 + $0x1f3c] ss:$36 sps:$4 sm:$0xff]  }
 0x40b   :  { %12436 = vmatprep.subr.bf16.mxu1 %v16842_v17  ;;  %12479 = vmatprep.subr.bf16.mxu0 %v16845_v40  ;;  %v4894_v54 = vadd.f32 %v4893_v28, %v4851_v48  ;;  %v16882_v17 = vld [vmem:[#allocation11 + $0x1ab8] ss:$36 sps:$4 sm:$0xff]   ;;  %v16891_v28 = vld [vmem:[#allocation11 + $0x1ef0] ss:$36 sps:$4 sm:$0xff]   ;;  %v16897_v48 = vld [vmem:[#allocation11 + $0x1ea8] ss:$36 sps:$4 sm:$0xff]  }
 0x40c   :  { %v18908_v53 = vpop.f32.mrf.mxu1  ;;  %v16885_v40 = vld [vmem:[#allocation11 + $0x1f38] ss:$36 sps:$4 sm:$0xff]  }
 0x40d   :  { %12437 = vmatpush1.bf16.msra.mxu1 %v16840_v39  ;;  %v16893_v39 = vld [vmem:[#allocation11 + $0x1ef4] ss:$36 sps:$4 sm:$0xff]  }
 0x40e   :  { %12480 = vmatpush1.bf16.msra.mxu0 %v16843_v43  ;;  %v4897_v51 = vpop.f32.mrf.mxu1  ;;  %12438 = vmatprep.subr.bf16.mxu1 %v16848_v21  ;;  %v16896_v43 = vld [vmem:[#allocation11 + $0x1a2c] ss:$36 sps:$4 sm:$0xff]  }
 0x40f   :  { %v4898_v55 = vadd.f32 %v4897_v51, %v4855_v13  ;;  %12481 = vmatprep.subr.bf16.mxu0 %v16851_v46  ;;  %v16899_v21 = vld [vmem:[#allocation11 + $0x1eac] ss:$36 sps:$4 sm:$0xff]   ;;  %v16902_v13 = vld [vmem:[#allocation11 + $0x19e4] ss:$36 sps:$4 sm:$0xff]  }
 0x410   :  { %v16894_v46 = vld [vmem:[#allocation11 + $0x1a28] ss:$36 sps:$4 sm:$0xff]   ;;  %v16900_v51 = vld [vmem:[#allocation11 + $0x19e0] ss:$36 sps:$4 sm:$0xff]  }
 0x411   :  { %v18910_v0 = vpack.c.bf16 %v4898_v55, %v4894_v54  ;;  %12439 = vmatpush1.bf16.msra.mxu1 %v16846_v50  ;;  %v16905_v50 = vld [vmem:[#allocation11 + $0x1e64] ss:$36 sps:$4 sm:$0xff]   ;;  %v16911_v54 = vld [vmem:[#allocation11 + $0x1e1c] ss:$36 sps:$4 sm:$0xff]  }
 0x412   :  { %12482 = vmatpush1.bf16.msra.mxu0 %v16849_v52  ;;  %12440 = vmatprep.subr.bf16.mxu1 %v16854_v25  ;;  %v16903_v52 = vld [vmem:[#allocation11 + $0x1e60] ss:$36 sps:$4 sm:$0xff]   ;;  %v16906_v55 = vld [vmem:[#allocation11 + $0x1998] ss:$36 sps:$4 sm:$0xff]  }
 0x413   :  { %12509 = vmatprep.mubr.bf16.mxu0 %v18910_v0  ;;  %12483 = vmatprep.subr.bf16.mxu0 %v16857_v59  ;;  %v16908_v25 = vld [vmem:[#allocation11 + $0x199c] ss:$36 sps:$4 sm:$0xff]  }
 0x414   :  { %v16909_v59 = vld [vmem:[#allocation11 + $0x1e18] ss:$36 sps:$4 sm:$0xff]  }
 0x415   :  { %12441 = vmatpush1.bf16.msra.mxu1 %v16852_v1  ;;  %v16914_v1 = vld [vmem:[#allocation11 + $0x1954] ss:$36 sps:$4 sm:$0xff]  }
 0x416   :  { %12484 = vmatpush1.bf16.msra.mxu0 %v16855_v4  ;;  %12442 = vmatprep.subr.bf16.mxu1 %v16860_v57  ;;  %v16917_v4 = vld [vmem:[#allocation11 + $0x1dd4] ss:$36 sps:$4 sm:$0xff]  }
 0x417   :  { %12485 = vmatprep.subr.bf16.mxu0 %v16863_v6  ;;  %v16912_v57 = vld [vmem:[#allocation11 + $0x1950] ss:$36 sps:$4 sm:$0xff]  }
 0x418   :  { %v16915_v6 = vld [vmem:[#allocation11 + $0x1dd0] ss:$36 sps:$4 sm:$0xff]  }
 0x419   :  { %12443 = vmatpush1.bf16.msra.mxu1 %v16858_v8  ;;  %v16920_v8 = vld [vmem:[#allocation11 + $0x190c] ss:$36 sps:$4 sm:$0xff]  }
 0x41a   :  { %12486 = vmatpush1.bf16.msra.mxu0 %v16861_v11  ;;  %12444 = vmatprep.subr.bf16.mxu1 %v16866_v16  ;;  %v16923_v11 = vld [vmem:[#allocation11 + $0x1d8c] ss:$36 sps:$4 sm:$0xff]  }
 0x41b   :  { %12487 = vmatprep.subr.bf16.mxu0 %v16869_v18  ;;  %v16918_v16 = vld [vmem:[#allocation11 + $0x1908] ss:$36 sps:$4 sm:$0xff]   ;;  %v18913_v18 = vpop.f32.mrf.mxu0 }
 0x41d   :  { %12445 = vmatpush1.bf16.msra.mxu1 %v16864_v7  ;;  %v16921_v7 = vld [vmem:[#allocation11 + $0x1d88] ss:$36 sps:$4 sm:$0xff]  }
 0x41e   :  { %12488 = vmatpush1.bf16.msra.mxu0 %v16867_v27  ;;  %12446 = vmatprep.subr.bf16.mxu1 %v16872_v19  ;;  %v16926_v27 = vld [vmem:[#allocation11 + $0x18c4] ss:$36 sps:$4 sm:$0xff]   ;;  %v1709_v19 = vrot.slane %v18830_v5, %v18778_v61 }
 0x41f   :  { %12489 = vmatprep.subr.bf16.mxu0 %v16875_v20  ;;  %v16929_v20 = vld [vmem:[#allocation11 + $0x1d44] ss:$36 sps:$4 sm:$0xff]  }
 0x421   :  { %12447 = vmatpush1.bf16.msra.mxu1 %v16870_v44  ;;  %v4853_v44 = vadd.f32 %v18897_v63, %v1709_v19  ;;  %v16933_v63 = vld [vmem:[#allocation11 + $0x200] ss:$36 sps:$4 sm:$0xff]  }
 0x422   :  { %12490 = vmatpush1.bf16.msra.mxu0 %v16873_v24  ;;  %12448 = vmatprep.subr.bf16.mxu1 %v16878_v22  ;;  %v16924_v24 = vld [vmem:[#allocation11 + $0x18c0] ss:$36 sps:$4 sm:$0xff]   ;;  %v4936_v22 = vpop.f32.mrf.mxu0 }
 0x423   :  { %12491 = vmatprep.subr.bf16.mxu0 %v16881_v26  ;;  %v16927_v26 = vld [vmem:[#allocation11 + $0x1d40] ss:$36 sps:$4 sm:$0xff]  }
 0x425   :  { %12449 = vmatpush1.bf16.msra.mxu1 %v16876_v33  ;;  %v16932_v33 = vld [vmem:[#allocation11 + $0x217c] ss:$36 sps:$4 sm:$0xff]  }
 0x426   :  { %12492 = vmatpush1.bf16.msra.mxu0 %v16879_v31  ;;  %12450 = vmatprep.subr.bf16.mxu1 %v16884_v37  ;;  %v4849_v31 = vadd.f32 %v18891_v41, %v1709_v19  ;;  %v4896_v37 = vadd.f32 %v18908_v53, %v4853_v44  ;;  %v1721_v41 = vrot.slane %v18830_v5, %v18863_v3  ;;  %v16942_v5 = vld [vmem:[#allocation11 + $0x20e8] ss:$36 sps:$4 sm:$0xff]   ;;  %v16962_v19 = vld [vmem:[#allocation11 + $0x2014] ss:$36 sps:$4 sm:$0xff]  }
 0x427   :  { %12493 = vmatprep.subr.bf16.mxu0 %v16887_v10  ;;  %v16935_v10 = vld [vmem:[#allocation11 + $0x204] ss:$36 sps:$4 sm:$0xff]   ;;  %v16960_v44 = vld [vmem:[#allocation11 + $0x2010] ss:$36 sps:$4 sm:$0xff]  }
 0x429   :  { %12451 = vmatpush2.bf16.msra.mxu1 %v16882_v17  ;;  %v4892_v17 = vadd.f32 %v18901_v45, %v4849_v31  ;;  %v16936_v45 = vld [vmem:[#allocation11 + $0x2130] ss:$36 sps:$4 sm:$0xff]  }
 0x42a   :  { %12494 = vmatpush2.bf16.msra.mxu0 %v16885_v40  ;;  %12452 = vmatprep.subr.bf16.mxu1 %v16890_v32  ;;  %v16930_v40 = vld [vmem:[#allocation11 + $0x2178] ss:$36 sps:$4 sm:$0xff]   ;;  %v18921_v32 = vpop.f32.mrf.mxu0  ;;  %v16969_v31 = vld [vmem:[#allocation11 + $0x50] ss:$36 sps:$4 sm:$0xff]  }
 0x42b   :  { %12495 = vmatprep.subr.bf16.mxu0 %v16893_v39  ;;  %v18923_v39 = vpack.c.bf16 %v4896_v37, %v4892_v17  ;;  %v16974_v37 = vld [vmem:[#allocation11 + $0x1f84] ss:$36 sps:$4 sm:$0xff]  }
 0x42c   :  { %v4940_v53 = vpop.f32.mrf.mxu0  ;;  %v16972_v17 = vld [vmem:[#allocation11 + $0x1f80] ss:$36 sps:$4 sm:$0xff]  }
 0x42d   :  { %12453 = vmatpush2.bf16.msra.mxu1 %v16888_v14  ;;  %v16938_v14 = vld [vmem:[#allocation11 + $0x2134] ss:$36 sps:$4 sm:$0xff]  }
 0x42e   :  { %12496 = vmatpush2.bf16.msra.mxu0 %v16891_v28  ;;  %12454 = vmatprep.subr.bf16.mxu1 %v16896_v43  ;;  %v16941_v28 = vld [vmem:[#allocation11 + $0x1bc] ss:$36 sps:$4 sm:$0xff]  }
 0x42f   :  { %12497 = vmatprep.subr.bf16.mxu0 %v16899_v21 }
 0x431   :  { %12455 = vmatpush2.bf16.msra.mxu1 %v16894_v46  ;;  %v16939_v46 = vld [vmem:[#allocation11 + $0x1b8] ss:$36 sps:$4 sm:$0xff]  }
 0x432   :  { %12498 = vmatpush2.bf16.msra.mxu0 %v16897_v48  ;;  %12456 = vmatprep.subr.bf16.mxu1 %v16902_v13  ;;  %v16944_v48 = vld [vmem:[#allocation11 + $0x20ec] ss:$36 sps:$4 sm:$0xff]   ;;  %v16947_v13 = vld [vmem:[#allocation11 + $0x174] ss:$36 sps:$4 sm:$0xff]  }
 0x433   :  { %12499 = vmatprep.subr.bf16.mxu0 %v16905_v50 }
 0x435   :  { %12457 = vmatpush2.bf16.msra.mxu1 %v16900_v51  ;;  %v4937_v51 = vadd.f32 %v4936_v22, %v1721_v41  ;;  %v16968_v22 = vld [vmem:[#allocation11 + $0x1fcc] ss:$36 sps:$4 sm:$0xff]  }
 0x436   :  { %12500 = vmatpush2.bf16.msra.mxu0 %v16903_v52  ;;  %12458 = vmatprep.subr.bf16.mxu1 %v16908_v25  ;;  %v4941_v52 = vadd.f32 %v4940_v53, %v1721_v41  ;;  %v16981_v41 = vld [vmem:[#allocation11 + $0x440] ss:$36 sps:$4 sm:$0xff]  }
 0x437   :  { %12501 = vmatprep.subr.bf16.mxu0 %v16911_v54  ;;  %v16945_v54 = vld [vmem:[#allocation11 + $0x170] ss:$36 sps:$4 sm:$0xff]   ;;  %v16989_v53 = vld [vmem:[#allocation11 + $0x3fc] ss:$36 sps:$4 sm:$0xff]  }
 0x439   :  { %12459 = vmatpush2.bf16.msra.mxu1 %v16906_v55  ;;  %v16950_v55 = vld [vmem:[#allocation11 + $0x20a4] ss:$36 sps:$4 sm:$0xff]  }
 0x43a   :  { %12502 = vmatpush2.bf16.msra.mxu0 %v16909_v59  ;;  %12460 = vmatprep.subr.bf16.mxu1 %v16914_v1 }
 0x43b   :  { %12503 = vmatprep.subr.bf16.mxu0 %v16917_v4  ;;  %v16953_v4 = vld [vmem:[#allocation11 + $0x12c] ss:$36 sps:$4 sm:$0xff]  }
 0x43d   :  { %12461 = vmatpush2.bf16.msra.mxu1 %v16912_v57 }
 0x43e   :  { %12504 = vmatpush2.bf16.msra.mxu0 %v16915_v6  ;;  %12462 = vmatprep.subr.bf16.mxu1 %v16920_v8  ;;  %v16948_v6 = vld [vmem:[#allocation11 + $0x20a0] ss:$36 sps:$4 sm:$0xff]   ;;  %v16951_v8 = vld [vmem:[#allocation11 + $0x128] ss:$36 sps:$4 sm:$0xff]  }
 0x43f   :  { %12505 = vmatprep.subr.bf16.mxu0 %v16923_v11  ;;  %v16956_v11 = vld [vmem:[#allocation11 + $0x205c] ss:$36 sps:$4 sm:$0xff]  }
 0x441   :  { %12463 = vmatpush2.bf16.msra.mxu1 %v16918_v16  ;;  %v16959_v16 = vld [vmem:[#allocation11 + $0xe4] ss:$36 sps:$4 sm:$0xff]  }
 0x442   :  { %12506 = vmatpush2.bf16.msra.mxu0 %v16921_v7  ;;  %12464 = vmatprep.subr.bf16.mxu1 %v16926_v27  ;;  %v16954_v7 = vld [vmem:[#allocation11 + $0x2058] ss:$36 sps:$4 sm:$0xff]   ;;  %v16957_v27 = vld [vmem:[#allocation11 + $0xe0] ss:$36 sps:$4 sm:$0xff]  }
 0x443   :  { %12507 = vmatprep.subr.bf16.mxu0 %v16929_v20  ;;  %v16965_v20 = vld [vmem:[#allocation11 + $0x9c] ss:$36 sps:$4 sm:$0xff]  }
 0x445   :  { %12465 = vmatpush2.bf16.msra.mxu1 %v16924_v24  ;;  %v16963_v24 = vld [vmem:[#allocation11 + $0x98] ss:$36 sps:$4 sm:$0xff]  }
 0x446   :  { %12508 = vmatpush2.bf16.msra.mxu0 %v16927_v26  ;;  %12520 = vmatprep.subr.bf16.mxu1 %v16932_v33  ;;  %v16971_v26 = vld [vmem:[#allocation11 + $0x54] ss:$36 sps:$4 sm:$0xff]   ;;  %v16966_v33 = vld [vmem:[#allocation11 + $0x1fc8] ss:$36 sps:$4 sm:$0xff]  }
 0x447   :  { %12563 = vmatprep.subr.bf16.mxu0 %v16935_v10  ;;  %v16977_v10 = vld [vmem:[#allocation11 + $0xc] ss:$36 sps:$4 sm:$0xff]  }
 0x448   :  { %v18925_v43 = vpop.f32.mrf.mxu1  ;;  %12467 = vmatmul.mubr.bf16.vlgmr.msra.gmra.mxu1 %v18889_v56 }
 0x449   :  { %12510 = vmatmul.mubr.bf16.vlgmr.msra.gmra.mxu0 %v18923_v39  ;;  %12521 = vmatpush1.bf16.msra.mxu1 %v16930_v40  ;;  %v16975_v40 = vld [vmem:[#allocation11 + $0x8] ss:$36 sps:$4 sm:$0xff]  }
 0x44a   :  { %12564 = vmatpush1.bf16.msra.mxu0 %v16933_v63  ;;  %12595 = vmatprep.mubr.bf16.mxu0 %v18814_v12  ;;  %v4979_v21 = vpop.f32.mrf.mxu1  ;;  %v16980_v63 = vld [vmem:[#allocation11 + $0x23bc] ss:$36 sps:$4 sm:$0xff]  }
 0x44b   :  { %12522 = vmatprep.subr.bf16.mxu1 %v16938_v14  ;;  %12565 = vmatprep.subr.bf16.mxu0 %v16941_v28  ;;  %v4980_v59 = vadd.f32 %v4979_v21, %v4937_v51  ;;  %v16983_v14 = vld [vmem:[#allocation11 + $0x444] ss:$36 sps:$4 sm:$0xff]   ;;  %v16978_v28 = vld [vmem:[#allocation11 + $0x23b8] ss:$36 sps:$4 sm:$0xff]   ;;  %v16984_v21 = vld [vmem:[#allocation11 + $0x2370] ss:$36 sps:$4 sm:$0xff]  }
 0x44c   :  { %v18932_v50 = vpop.f32.mrf.mxu1  ;;  %v16990_v51 = vld [vmem:[#allocation11 + $0x2328] ss:$36 sps:$4 sm:$0xff]  }
 0x44d   :  { %12523 = vmatpush1.bf16.msra.mxu1 %v16936_v45  ;;  %v16986_v45 = vld [vmem:[#allocation11 + $0x2374] ss:$36 sps:$4 sm:$0xff]  }
 0x44e   :  { %12566 = vmatpush1.bf16.msra.mxu0 %v16939_v46  ;;  %v4983_v25 = vpop.f32.mrf.mxu1  ;;  %12524 = vmatprep.subr.bf16.mxu1 %v16944_v48  ;;  %v16987_v46 = vld [vmem:[#allocation11 + $0x3f8] ss:$36 sps:$4 sm:$0xff]   ;;  %v16992_v48 = vld [vmem:[#allocation11 + $0x232c] ss:$36 sps:$4 sm:$0xff]  }
 0x44f   :  { %v4984_v1 = vadd.f32 %v4983_v25, %v4941_v52  ;;  %12567 = vmatprep.subr.bf16.mxu0 %v16947_v13  ;;  %v16995_v13 = vld [vmem:[#allocation11 + $0x3b4] ss:$36 sps:$4 sm:$0xff]   ;;  %v17001_v25 = vld [vmem:[#allocation11 + $0x36c] ss:$36 sps:$4 sm:$0xff]  }
 0x450   :  { %v16993_v52 = vld [vmem:[#allocation11 + $0x3b0] ss:$36 sps:$4 sm:$0xff]  }
 0x451   :  { %v18934_v57 = vpack.c.bf16 %v4984_v1, %v4980_v59  ;;  %12525 = vmatpush1.bf16.msra.mxu1 %v16942_v5  ;;  %v16998_v5 = vld [vmem:[#allocation11 + $0x22e4] ss:$36 sps:$4 sm:$0xff]   ;;  %v17004_v59 = vld [vmem:[#allocation11 + $0x229c] ss:$36 sps:$4 sm:$0xff]  }
 0x452   :  { %12568 = vmatpush1.bf16.msra.mxu0 %v16945_v54  ;;  %12526 = vmatprep.subr.bf16.mxu1 %v16950_v55  ;;  %v16996_v54 = vld [vmem:[#allocation11 + $0x22e0] ss:$36 sps:$4 sm:$0xff]   ;;  %v16999_v55 = vld [vmem:[#allocation11 + $0x368] ss:$36 sps:$4 sm:$0xff]  }
 0x453   :  { %12552 = vmatprep.mubr.bf16.mxu1 %v18934_v57  ;;  %12569 = vmatprep.subr.bf16.mxu0 %v16953_v4  ;;  %v17007_v1 = vld [vmem:[#allocation11 + $0x324] ss:$36 sps:$4 sm:$0xff]   ;;  %v17002_v4 = vld [vmem:[#allocation11 + $0x2298] ss:$36 sps:$4 sm:$0xff]  }
 0x455   :  { %12527 = vmatpush1.bf16.msra.mxu1 %v16948_v6  ;;  %v17005_v6 = vld [vmem:[#allocation11 + $0x320] ss:$36 sps:$4 sm:$0xff]  }
 0x456   :  { %12570 = vmatpush1.bf16.msra.mxu0 %v16951_v8  ;;  %12528 = vmatprep.subr.bf16.mxu1 %v16956_v11  ;;  %v17010_v8 = vld [vmem:[#allocation11 + $0x2254] ss:$36 sps:$4 sm:$0xff]   ;;  %v17013_v11 = vld [vmem:[#allocation11 + $0x2dc] ss:$36 sps:$4 sm:$0xff]  }
 0x457   :  { %12571 = vmatprep.subr.bf16.mxu0 %v16959_v16  ;;  %v17008_v16 = vld [vmem:[#allocation11 + $0x2250] ss:$36 sps:$4 sm:$0xff]  }
 0x459   :  { %12529 = vmatpush1.bf16.msra.mxu1 %v16954_v7  ;;  %v17011_v7 = vld [vmem:[#allocation11 + $0x2d8] ss:$36 sps:$4 sm:$0xff]  }
 0x45a   :  { %12572 = vmatpush1.bf16.msra.mxu0 %v16957_v27  ;;  %12530 = vmatprep.subr.bf16.mxu1 %v16962_v19  ;;  %v17016_v27 = vld [vmem:[#allocation11 + $0x220c] ss:$36 sps:$4 sm:$0xff]   ;;  %v12253_v19 = vpop.f32.mrf.mxu0 }
 0x45b   :  { %12573 = vmatprep.subr.bf16.mxu0 %v16965_v20  ;;  %v17019_v20 = vld [vmem:[#allocation11 + $0x294] ss:$36 sps:$4 sm:$0xff]  }
 0x45d   :  { %12531 = vmatpush1.bf16.msra.mxu1 %v16960_v44  ;;  %v17014_v44 = vld [vmem:[#allocation11 + $0x2208] ss:$36 sps:$4 sm:$0xff]  }
 0x45e   :  { %12574 = vmatpush1.bf16.msra.mxu0 %v16963_v24  ;;  %12532 = vmatprep.subr.bf16.mxu1 %v16968_v22  ;;  %v18304_v24 = vld [vmem:[#allocation9 + $0x8] sm:$0xff] }
 0x45f   :  { %12575 = vmatprep.subr.bf16.mxu0 %v16971_v26  ;;  %v1717_v22 = vrot.slane %v18304_v24, %v18799_v15  ;;  %v17017_v26 = vld [vmem:[#allocation11 + $0x290] ss:$36 sps:$4 sm:$0xff]  }
 0x460   :  { %v17038_v24 = vld [vmem:[#allocation11 + $0x5f0] ss:$36 sps:$4 sm:$0xff]  }
 0x461   :  { %12533 = vmatpush1.bf16.msra.mxu1 %v16966_v33  ;;  %v17022_v33 = vld [vmem:[#allocation11 + $0x21c4] ss:$36 sps:$4 sm:$0xff]  }
 0x462   :  { %12576 = vmatpush1.bf16.msra.mxu0 %v16969_v31  ;;  %12534 = vmatprep.subr.bf16.mxu1 %v16974_v37  ;;  %v12255_v31 = vpop.f32.mrf.mxu0  ;;  %v17025_v37 = vld [vmem:[#allocation11 + $0x24c] ss:$36 sps:$4 sm:$0xff]  }
 0x463   :  { %12577 = vmatprep.subr.bf16.mxu0 %v16977_v10  ;;  %v4939_v10 = vadd.f32 %v18921_v32, %v1717_v22 }
 0x465   :  { %12535 = vmatpush1.bf16.msra.mxu1 %v16972_v17  ;;  %v6282_v17 = vld [vmem:[#allocation12] sm:$0xff] }
 0x466   :  { %12578 = vmatpush1.bf16.msra.mxu0 %v16975_v40  ;;  %12536 = vmatprep.subr.bf16.mxu1 %v16980_v63  ;;  %v17020_v40 = vld [vmem:[#allocation11 + $0x21c0] ss:$36 sps:$4 sm:$0xff]   ;;  %v4935_v63 = vadd.f32 %v18913_v18, %v1717_v22  ;;  %v6293_v32 = vrot.slane %v6282_v17, %v18696_v29  ;;  %v17032_v29 = vld [vmem:[#allocation11 + $0x638] ss:$36 sps:$4 sm:$0xff]  }
 0x467   :  { %12579 = vmatprep.subr.bf16.mxu0 %v16983_v14  ;;  %v4982_v14 = vadd.f32 %v18932_v50, %v4939_v10  ;;  %v17029_v18 = vld [vmem:[#allocation11 + $0xb00] ss:$36 sps:$4 sm:$0xff]   ;;  %v17049_v10 = vld [vmem:[#allocation11 + $0xa2c] ss:$36 sps:$4 sm:$0xff]  }
 0x469   :  { %12537 = vmatpush2.bf16.msra.mxu1 %v16978_v28  ;;  %v17023_v28 = vld [vmem:[#allocation11 + $0x248] ss:$36 sps:$4 sm:$0xff]  }
 0x46a   :  { %12580 = vmatpush2.bf16.msra.mxu0 %v16981_v41  ;;  %12538 = vmatprep.subr.bf16.mxu1 %v16986_v45  ;;  %v17028_v41 = vld [vmem:[#allocation11 + $0x684] ss:$36 sps:$4 sm:$0xff]   ;;  %v6289_v45 = vrot.slane %v6282_v17, %v18699_v30  ;;  %v17037_v30 = vld [vmem:[#allocation11 + $0xabc] ss:$36 sps:$4 sm:$0xff]  }
 0x46b   :  { %12581 = vmatprep.subr.bf16.mxu0 %v16989_v53  ;;  %v12257_v53 = vpop.f32.mrf.mxu0 }
 0x46c   :  { %v12254_v50 = vadd.f32 %v12253_v19, %v6289_v45 }
 0x46d   :  { %12539 = vmatpush2.bf16.msra.mxu1 %v16984_v21  ;;  %v17031_v21 = vld [vmem:[#allocation11 + $0xb04] ss:$36 sps:$4 sm:$0xff]  }
 0x46e   :  { %12582 = vmatpush2.bf16.msra.mxu0 %v16987_v46  ;;  %12540 = vmatprep.subr.bf16.mxu1 %v16992_v48  ;;  %v4978_v46 = vadd.f32 %v18925_v43, %v4935_v63  ;;  %v17026_v48 = vld [vmem:[#allocation11 + $0x680] ss:$36 sps:$4 sm:$0xff]   ;;  %v17044_v63 = vld [vmem:[#allocation11 + $0x5a8] ss:$36 sps:$4 sm:$0xff]  }
 0x46f   :  { %12583 = vmatprep.subr.bf16.mxu0 %v16995_v13 }
 0x470   :  { %v18944_v13 = vpack.c.bf16 %v4982_v14, %v4978_v46  ;;  %v17047_v14 = vld [vmem:[#allocation11 + $0xa28] ss:$36 sps:$4 sm:$0xff]   ;;  %v17061_v46 = vld [vmem:[#allocation11 + $0x99c] ss:$36 sps:$4 sm:$0xff]  }
 0x471   :  { %12541 = vmatpush2.bf16.msra.mxu1 %v16990_v51  ;;  %v12259_v51 = vpop.f32.mrf.mxu0 }
 0x472   :  { %12584 = vmatpush2.bf16.msra.mxu0 %v16993_v52  ;;  %12542 = vmatprep.subr.bf16.mxu1 %v16998_v5  ;;  %v17034_v52 = vld [vmem:[#allocation11 + $0x63c] ss:$36 sps:$4 sm:$0xff]  }
 0x473   :  { %12585 = vmatprep.subr.bf16.mxu0 %v17001_v25  ;;  %v12256_v25 = vadd.f32 %v12255_v31, %v6293_v32 }
 0x475   :  { %12543 = vmatpush2.bf16.msra.mxu1 %v16996_v54 }
 0x476   :  { %12586 = vmatpush2.bf16.msra.mxu0 %v16999_v55  ;;  %12544 = vmatprep.subr.bf16.mxu1 %v17004_v59  ;;  %v17035_v59 = vld [vmem:[#allocation11 + $0xab8] ss:$36 sps:$4 sm:$0xff]  }
 0x477   :  { %12587 = vmatprep.subr.bf16.mxu0 %v17007_v1  ;;  %v17040_v1 = vld [vmem:[#allocation11 + $0x5f4] ss:$36 sps:$4 sm:$0xff]  }
 0x479   :  { %12545 = vmatpush2.bf16.msra.mxu1 %v17002_v4  ;;  %v12258_v4 = vadd.f32 %v12257_v53, %v6289_v45  ;;  %v17050_v45 = vld [vmem:[#allocation11 + $0x560] ss:$36 sps:$4 sm:$0xff]  }
 0x47a   :  { %12588 = vmatpush2.bf16.msra.mxu0 %v17005_v6  ;;  %12546 = vmatprep.subr.bf16.mxu1 %v17010_v8  ;;  %v17053_v53 = vld [vmem:[#allocation11 + $0x9e0] ss:$36 sps:$4 sm:$0xff]  }
 0x47b   :  { %12589 = vmatprep.subr.bf16.mxu0 %v17013_v11 }
 0x47d   :  { %12547 = vmatpush2.bf16.msra.mxu1 %v17008_v16  ;;  %v17043_v16 = vld [vmem:[#allocation11 + $0xa74] ss:$36 sps:$4 sm:$0xff]  }
 0x47e   :  { %12590 = vmatpush2.bf16.msra.mxu0 %v17011_v7  ;;  %12548 = vmatprep.subr.bf16.mxu1 %v17016_v27  ;;  %v12260_v27 = vadd.f32 %v12259_v51, %v6293_v32  ;;  %v17056_v32 = vld [vmem:[#allocation11 + $0x518] ss:$36 sps:$4 sm:$0xff]   ;;  %v17062_v51 = vld [vmem:[#allocation11 + $0x4d0] ss:$36 sps:$4 sm:$0xff]  }
 0x47f   :  { %12591 = vmatprep.subr.bf16.mxu0 %v17019_v20 }
 0x481   :  { %12549 = vmatpush2.bf16.msra.mxu1 %v17014_v44 }
 0x482   :  { %12592 = vmatpush2.bf16.msra.mxu0 %v17017_v26  ;;  %12550 = vmatprep.subr.bf16.mxu1 %v17022_v33  ;;  %v17041_v26 = vld [vmem:[#allocation11 + $0xa70] ss:$36 sps:$4 sm:$0xff]  }
 0x483   :  { %12593 = vmatprep.subr.bf16.mxu0 %v17025_v37  ;;  %v17046_v33 = vld [vmem:[#allocation11 + $0x5ac] ss:$36 sps:$4 sm:$0xff]  }
 0x485   :  { %12551 = vmatpush2.bf16.msra.mxu1 %v17020_v40 }
 0x486   :  { %12594 = vmatpush2.bf16.msra.mxu0 %v17023_v28  ;;  %12606 = vmatprep.subr.bf16.mxu1 %v17028_v41  ;;  %v17052_v28 = vld [vmem:[#allocation11 + $0x564] ss:$36 sps:$4 sm:$0xff]  }
 0x487   :  { %12649 = vmatprep.subr.bf16.mxu0 %v17031_v21  ;;  %v17055_v41 = vld [vmem:[#allocation11 + $0x9e4] ss:$36 sps:$4 sm:$0xff]   ;;  %v17058_v21 = vld [vmem:[#allocation11 + $0x51c] ss:$36 sps:$4 sm:$0xff]  }
 0x488   :  { %v12296_v5 = vpop.f32.mrf.mxu1  ;;  %12553 = vmatmul.mubr.bf16.vlgmr.msra.gmra.mxu1 %v18944_v13 }
 0x489   :  { %v12297_v54 = vadd.f32 %v12296_v5, %v12254_v50  ;;  %v12339_v43 = vpop.f32.mrf.mxu0  ;;  %12596 = vmatmul.mubr.bf16.vlgmr.msra.gmra.mxu0 %v18757_v2  ;;  %12607 = vmatpush1.bf16.msra.mxu1 %v17026_v48  ;;  %v17059_v48 = vld [vmem:[#allocation11 + $0x998] ss:$36 sps:$4 sm:$0xff]   ;;  %v17070_v5 = vld [vmem:[#allocation11 + $0x48c] ss:$36 sps:$4 sm:$0xff]  }
 0x48a   :  { %12638 = vmatprep.mubr.bf16.mxu1 %v18850_v38  ;;  %12650 = vmatpush1.bf16.msra.mxu0 %v17029_v18  ;;  %v12298_v55 = vpop.f32.mrf.mxu1  ;;  %v17064_v18 = vld [vmem:[#allocation11 + $0x4d4] ss:$36 sps:$4 sm:$0xff]  }
 0x48b   :  { %v18949_v6 = vadd.f32 %v12339_v43, %v12297_v54  ;;  %12681 = vmatprep.mubr.bf16.mxu0 %v18853_v42  ;;  %v12299_v8 = vadd.f32 %v12298_v55, %v12256_v25  ;;  %v12341_v11 = vpop.f32.mrf.mxu0  ;;  %12608 = vmatprep.subr.bf16.mxu1 %v17034_v52  ;;  %v17067_v50 = vld [vmem:[#allocation11 + $0x954] ss:$36 sps:$4 sm:$0xff]   ;;  %v17068_v25 = vld [vmem:[#allocation11 + $0x488] ss:$36 sps:$4 sm:$0xff]   ;;  %v17074_v55 = vld [vmem:[#allocation11 + $0x8c0] ss:$36 sps:$4 sm:$0xff]  }
 0x48c   :  { %v12300_v7 = vpop.f32.mrf.mxu1  ;;  %12651 = vmatprep.subr.bf16.mxu0 %v17037_v30  ;;  %v17065_v52 = vld [vmem:[#allocation11 + $0x950] ss:$36 sps:$4 sm:$0xff]   ;;  %v17071_v54 = vld [vmem:[#allocation11 + $0x908] ss:$36 sps:$4 sm:$0xff]  }
 0x48d   :  { %v18952_v19 = vadd.f32 %v12341_v11, %v12299_v8  ;;  %v12301_v20 = vadd.f32 %v12300_v7, %v12258_v4  ;;  %v12343_v44 = vpop.f32.mrf.mxu0  ;;  %12609 = vmatpush1.bf16.msra.mxu1 %v17032_v29  ;;  %v17073_v30 = vld [vmem:[#allocation11 + $0x90c] ss:$36 sps:$4 sm:$0xff]   ;;  %v17076_v43 = vld [vmem:[#allocation11 + $0x8c4] ss:$36 sps:$4 sm:$0xff]   ;;  %v17085_v4 = vld [vmem:[#allocation11 + $0xcfc] ss:$36 sps:$4 sm:$0xff]  }
 0x48e   :  { %12652 = vmatpush1.bf16.msra.mxu0 %v17035_v59  ;;  %v12302_v22 = vpop.f32.mrf.mxu1  ;;  %12610 = vmatprep.subr.bf16.mxu1 %v17040_v1  ;;  %v17079_v29 = vld [vmem:[#allocation11 + $0xd44] ss:$36 sps:$4 sm:$0xff]   ;;  %v17082_v1 = vld [vmem:[#allocation11 + $0x87c] ss:$36 sps:$4 sm:$0xff]   ;;  %v17091_v7 = vld [vmem:[#allocation11 + $0xcb4] ss:$36 sps:$4 sm:$0xff]  }
 0x48f   :  { %v18954_v31 = vadd.f32 %v12343_v44, %v12301_v20  ;;  %v12303_v37 = vadd.f32 %v12302_v22, %v12260_v27  ;;  %12653 = vmatprep.subr.bf16.mxu0 %v17043_v16  ;;  %v12345_v17 = vpop.f32.mrf.mxu0  ;;  %v17077_v59 = vld [vmem:[#allocation11 + $0xd40] ss:$36 sps:$4 sm:$0xff]   ;;  %v17080_v8 = vld [vmem:[#allocation11 + $0x878] ss:$36 sps:$4 sm:$0xff]   ;;  %v17086_v27 = vld [vmem:[#allocation11 + $0x830] ss:$36 sps:$4 sm:$0xff]  }
 0x490   :  { %v17083_v11 = vld [vmem:[#allocation11 + $0xcf8] ss:$36 sps:$4 sm:$0xff]   ;;  %v17089_v20 = vld [vmem:[#allocation11 + $0xcb0] ss:$36 sps:$4 sm:$0xff]   ;;  %v17092_v22 = vld [vmem:[#allocation11 + $0x7e8] ss:$36 sps:$4 sm:$0xff]  }
 0x491   :  { %v18956_v40 = vadd.f32 %v12345_v17, %v12303_v37  ;;  %12611 = vmatpush1.bf16.msra.mxu1 %v17038_v24  ;;  %v17088_v16 = vld [vmem:[#allocation11 + $0x834] ss:$36 sps:$4 sm:$0xff]   ;;  %v17094_v44 = vld [vmem:[#allocation11 + $0x7ec] ss:$36 sps:$4 sm:$0xff]   ;;  %v17103_v37 = vld [vmem:[#allocation11 + $0xc24] ss:$36 sps:$4 sm:$0xff]  }
 0x492   :  { %12654 = vmatpush1.bf16.msra.mxu0 %v17041_v26  ;;  %12612 = vmatprep.subr.bf16.mxu1 %v17046_v33  ;;  %v17097_v24 = vld [vmem:[#allocation11 + $0xc6c] ss:$36 sps:$4 sm:$0xff]   ;;  %v17100_v33 = vld [vmem:[#allocation11 + $0x7a4] ss:$36 sps:$4 sm:$0xff]  }
 0x493   :  { %12655 = vmatprep.subr.bf16.mxu0 %v17049_v10  ;;  %v17095_v26 = vld [vmem:[#allocation11 + $0xc68] ss:$36 sps:$4 sm:$0xff]   ;;  %v17098_v10 = vld [vmem:[#allocation11 + $0x7a0] ss:$36 sps:$4 sm:$0xff]  }
 0x494   :  { %v17101_v17 = vld [vmem:[#allocation11 + $0xc20] ss:$36 sps:$4 sm:$0xff]  }
 0x495   :  { %12613 = vmatpush1.bf16.msra.mxu1 %v17044_v63  ;;  %v17106_v63 = vld [vmem:[#allocation11 + $0x75c] ss:$36 sps:$4 sm:$0xff]  }
 0x496   :  { %12656 = vmatpush1.bf16.msra.mxu0 %v17047_v14  ;;  %12614 = vmatprep.subr.bf16.mxu1 %v17052_v28  ;;  %v17109_v14 = vld [vmem:[#allocation11 + $0xbdc] ss:$36 sps:$4 sm:$0xff]  }
 0x497   :  { %12657 = vmatprep.subr.bf16.mxu0 %v17055_v41  ;;  %v17104_v28 = vld [vmem:[#allocation11 + $0x758] ss:$36 sps:$4 sm:$0xff]  }
 0x498   :  { %v17107_v41 = vld [vmem:[#allocation11 + $0xbd8] ss:$36 sps:$4 sm:$0xff]  }
 0x499   :  { %12615 = vmatpush1.bf16.msra.mxu1 %v17050_v45  ;;  %v17112_v45 = vld [vmem:[#allocation11 + $0x714] ss:$36 sps:$4 sm:$0xff]  }
 0x49a   :  { %12658 = vmatpush1.bf16.msra.mxu0 %v17053_v53  ;;  %12616 = vmatprep.subr.bf16.mxu1 %v17058_v21  ;;  %v17115_v53 = vld [vmem:[#allocation11 + $0xb94] ss:$36 sps:$4 sm:$0xff]  }
 0x49b   :  { %12659 = vmatprep.subr.bf16.mxu0 %v17061_v46  ;;  %v17110_v21 = vld [vmem:[#allocation11 + $0x710] ss:$36 sps:$4 sm:$0xff]  }
 0x49c   :  { %v17113_v46 = vld [vmem:[#allocation11 + $0xb90] ss:$36 sps:$4 sm:$0xff]  }
 0x49d   :  { %12617 = vmatpush1.bf16.msra.mxu1 %v17056_v32  ;;  %v17118_v32 = vld [vmem:[#allocation11 + $0x6cc] ss:$36 sps:$4 sm:$0xff]  }
 0x49e   :  { %12660 = vmatpush1.bf16.msra.mxu0 %v17059_v48  ;;  %12618 = vmatprep.subr.bf16.mxu1 %v17064_v18  ;;  %v17121_v48 = vld [vmem:[#allocation11 + $0xb4c] ss:$36 sps:$4 sm:$0xff]  }
 0x49f   :  { %12661 = vmatprep.subr.bf16.mxu0 %v17067_v50  ;;  %v17116_v18 = vld [vmem:[#allocation11 + $0x6c8] ss:$36 sps:$4 sm:$0xff]  }
 0x4a0   :  { %v17119_v50 = vld [vmem:[#allocation11 + $0xb48] ss:$36 sps:$4 sm:$0xff]  }
 0x4a1   :  { %12619 = vmatpush1.bf16.msra.mxu1 %v17062_v51  ;;  %v17124_v51 = vld [vmem:[#allocation11 + $0xf84] ss:$36 sps:$4 sm:$0xff]  }
 0x4a2   :  { %12662 = vmatpush1.bf16.msra.mxu0 %v17065_v52  ;;  %12620 = vmatprep.subr.bf16.mxu1 %v17070_v5  ;;  %v17127_v52 = vld [vmem:[#allocation11 + $0x1404] ss:$36 sps:$4 sm:$0xff]  }
 0x4a3   :  { %12663 = vmatprep.subr.bf16.mxu0 %v17073_v30  ;;  %v17122_v5 = vld [vmem:[#allocation11 + $0xf80] ss:$36 sps:$4 sm:$0xff]  }
 0x4a4   :  { %v17125_v30 = vld [vmem:[#allocation11 + $0x1400] ss:$36 sps:$4 sm:$0xff]  }
 0x4a5   :  { %12621 = vmatpush1.bf16.msra.mxu1 %v17068_v25  ;;  %v17130_v25 = vld [vmem:[#allocation11 + $0xf3c] ss:$36 sps:$4 sm:$0xff]  }
 0x4a6   :  { %12664 = vmatpush1.bf16.msra.mxu0 %v17071_v54  ;;  %12622 = vmatprep.subr.bf16.mxu1 %v17076_v43  ;;  %v17133_v43 = vld [vmem:[#allocation11 + $0x13bc] ss:$36 sps:$4 sm:$0xff]  }
 0x4a7   :  { %12665 = vmatprep.subr.bf16.mxu0 %v17079_v29 }
 0x4a9   :  { %12623 = vmatpush2.bf16.msra.mxu1 %v17074_v55 }
 0x4aa   :  { %12666 = vmatpush2.bf16.msra.mxu0 %v17077_v59  ;;  %12624 = vmatprep.subr.bf16.mxu1 %v17082_v1  ;;  %v17128_v59 = vld [vmem:[#allocation11 + $0xf38] ss:$36 sps:$4 sm:$0xff]  }
 0x4ab   :  { %12667 = vmatprep.subr.bf16.mxu0 %v17085_v4  ;;  %v17131_v4 = vld [vmem:[#allocation11 + $0x13b8] ss:$36 sps:$4 sm:$0xff]  }
 0x4ad   :  { %12625 = vmatpush2.bf16.msra.mxu1 %v17080_v8  ;;  %v17136_v8 = vld [vmem:[#allocation11 + $0xef4] ss:$36 sps:$4 sm:$0xff]  }
 0x4ae   :  { %12668 = vmatpush2.bf16.msra.mxu0 %v17083_v11  ;;  %12626 = vmatprep.subr.bf16.mxu1 %v17088_v16 }
 0x4af   :  { %12669 = vmatprep.subr.bf16.mxu0 %v17091_v7 }
 0x4b1   :  { %12627 = vmatpush2.bf16.msra.mxu1 %v17086_v27 }
 0x4b2   :  { %12670 = vmatpush2.bf16.msra.mxu0 %v17089_v20  ;;  %12628 = vmatprep.subr.bf16.mxu1 %v17094_v44 }
 0x4b3   :  { %12671 = vmatprep.subr.bf16.mxu0 %v17097_v24 }
 0x4b5   :  { %12629 = vmatpush2.bf16.msra.mxu1 %v17092_v22  ;;  %v17134_v22 = vld [vmem:[#allocation11 + $0xef0] ss:$36 sps:$4 sm:$0xff]  }
 0x4b6   :  { %12672 = vmatpush2.bf16.msra.mxu0 %v17095_v26  ;;  %12630 = vmatprep.subr.bf16.mxu1 %v17100_v33  ;;  %v17137_v33 = vld [vmem:[#allocation11 + $0x1370] ss:$36 sps:$4 sm:$0xff]  }
 0x4b7   :  { %12673 = vmatprep.subr.bf16.mxu0 %v17103_v37  ;;  %v17142_v37 = vld [vmem:[#allocation11 + $0xeac] ss:$36 sps:$4 sm:$0xff]  }
 0x4b9   :  { %12631 = vmatpush2.bf16.msra.mxu1 %v17098_v10 }
 0x4ba   :  { %12674 = vmatpush2.bf16.msra.mxu0 %v17101_v17  ;;  %12632 = vmatprep.subr.bf16.mxu1 %v17106_v63  ;;  %v17145_v17 = vld [vmem:[#allocation11 + $0x132c] ss:$36 sps:$4 sm:$0xff]  }
 0x4bb   :  { %12675 = vmatprep.subr.bf16.mxu0 %v17109_v14 }
 0x4bd   :  { %12633 = vmatpush2.bf16.msra.mxu1 %v17104_v28  ;;  %v17140_v28 = vld [vmem:[#allocation11 + $0xea8] ss:$36 sps:$4 sm:$0xff]  }
 0x4be   :  { %12676 = vmatpush2.bf16.msra.mxu0 %v17107_v41  ;;  %12634 = vmatprep.subr.bf16.mxu1 %v17112_v45  ;;  %v17148_v41 = vld [vmem:[#allocation11 + $0xe64] ss:$36 sps:$4 sm:$0xff]  }
 0x4bf   :  { %12677 = vmatprep.subr.bf16.mxu0 %v17115_v53  ;;  %v17151_v45 = vld [vmem:[#allocation11 + $0x12e4] ss:$36 sps:$4 sm:$0xff]  }
 0x4c0   :  { %v17146_v53 = vld [vmem:[#allocation11 + $0xe60] ss:$36 sps:$4 sm:$0xff]  }
 0x4c1   :  { %12635 = vmatpush2.bf16.msra.mxu1 %v17110_v21  ;;  %v17149_v21 = vld [vmem:[#allocation11 + $0x12e0] ss:$36 sps:$4 sm:$0xff]  }
 0x4c2   :  { %12678 = vmatpush2.bf16.msra.mxu0 %v17113_v46  ;;  %12636 = vmatprep.subr.bf16.mxu1 %v17118_v32  ;;  %v17154_v46 = vld [vmem:[#allocation11 + $0xe1c] ss:$36 sps:$4 sm:$0xff]  }
 0x4c3   :  { %12679 = vmatprep.subr.bf16.mxu0 %v17121_v48  ;;  %v17152_v32 = vld [vmem:[#allocation11 + $0xe18] ss:$36 sps:$4 sm:$0xff]  }
 0x4c4   :  { %v17155_v48 = vld [vmem:[#allocation11 + $0x1298] ss:$36 sps:$4 sm:$0xff]  }
 0x4c5   :  { %12637 = vmatpush2.bf16.msra.mxu1 %v17116_v18  ;;  %v17160_v18 = vld [vmem:[#allocation11 + $0xdd4] ss:$36 sps:$4 sm:$0xff]  }
 0x4c6   :  { %12680 = vmatpush2.bf16.msra.mxu0 %v17119_v50  ;;  %12692 = vmatprep.subr.bf16.mxu1 %v17124_v51  ;;  %v17163_v50 = vld [vmem:[#allocation11 + $0x1254] ss:$36 sps:$4 sm:$0xff]  }
 0x4c7   :  { %12735 = vmatprep.subr.bf16.mxu0 %v17127_v52  ;;  %v17158_v51 = vld [vmem:[#allocation11 + $0xdd0] ss:$36 sps:$4 sm:$0xff]  }
 0x4c8   :  { %v12382_v54 = vpop.f32.mrf.mxu1  ;;  %12639 = vmatmul.mubr.bf16.vlgmr.msra.gmra.mxu1 %v18773_v23  ;;  %v17161_v52 = vld [vmem:[#allocation11 + $0x1250] ss:$36 sps:$4 sm:$0xff]  }
 0x4c9   :  { %v12383_v29 = vadd.f32 %v12382_v54, %v18949_v6  ;;  %v12425_v55 = vpop.f32.mrf.mxu0  ;;  %12682 = vmatmul.mubr.bf16.vlgmr.msra.gmra.mxu0 %v18794_v60  ;;  %12693 = vmatpush1.bf16.msra.mxu1 %v17122_v5  ;;  %v17139_v6 = vld [vmem:[#allocation11 + $0x1374] ss:$36 sps:$4 sm:$0xff]   ;;  %v17166_v5 = vld [vmem:[#allocation11 + $0xd8c] ss:$36 sps:$4 sm:$0xff]  }
 0x4ca   :  { %12724 = vmatprep.mubr.bf16.mxu1 %v18879_v34  ;;  %12736 = vmatpush1.bf16.msra.mxu0 %v17125_v30  ;;  %v12384_v1 = vpop.f32.mrf.mxu1  ;;  %v17169_v30 = vld [vmem:[#allocation11 + $0x120c] ss:$36 sps:$4 sm:$0xff]  }
 0x4cb   :  { %v18962_v11 = vadd.f32 %v12425_v55, %v12383_v29  ;;  %12767 = vmatprep.mubr.bf16.mxu0 %v18882_v58  ;;  %v12385_v16 = vadd.f32 %v12384_v1, %v18952_v19  ;;  %v12427_v7 = vpop.f32.mrf.mxu0  ;;  %12694 = vmatprep.subr.bf16.mxu1 %v17130_v25  ;;  %v17164_v25 = vld [vmem:[#allocation11 + $0xd88] ss:$36 sps:$4 sm:$0xff]   ;;  %v17170_v55 = vld [vmem:[#allocation11 + $0x11c0] ss:$36 sps:$4 sm:$0xff]  }
 0x4cc   :  { %v12386_v27 = vpop.f32.mrf.mxu1  ;;  %12737 = vmatprep.subr.bf16.mxu0 %v17133_v43  ;;  %v17167_v54 = vld [vmem:[#allocation11 + $0x1208] ss:$36 sps:$4 sm:$0xff]   ;;  %v17178_v1 = vld [vmem:[#allocation11 + $0x117c] ss:$36 sps:$4 sm:$0xff]  }
 0x4cd   :  { %v18966_v20 = vadd.f32 %v12427_v7, %v12385_v16  ;;  %v12387_v44 = vadd.f32 %v12386_v27, %v18954_v31  ;;  %v12429_v24 = vpop.f32.mrf.mxu0  ;;  %12695 = vmatpush1.bf16.msra.mxu1 %v17128_v59  ;;  %v17143_v31 = vld [vmem:[#allocation11 + $0x1328] ss:$36 sps:$4 sm:$0xff]   ;;  %v17173_v59 = vld [vmem:[#allocation11 + $0x1640] ss:$36 sps:$4 sm:$0xff]   ;;  %v17179_v16 = vld [vmem:[#allocation11 + $0x15f8] ss:$36 sps:$4 sm:$0xff]  }
 0x4ce   :  { %12738 = vmatpush1.bf16.msra.mxu0 %v17131_v4  ;;  %v12388_v26 = vpop.f32.mrf.mxu1  ;;  %12696 = vmatprep.subr.bf16.mxu1 %v17136_v8  ;;  %v17172_v43 = vld [vmem:[#allocation11 + $0x11c4] ss:$36 sps:$4 sm:$0xff]   ;;  %v17181_v4 = vld [vmem:[#allocation11 + $0x15fc] ss:$36 sps:$4 sm:$0xff]   ;;  %v17184_v7 = vld [vmem:[#allocation11 + $0x1134] ss:$36 sps:$4 sm:$0xff]  }
 0x4cf   :  { %v18969_v10 = vadd.f32 %v12429_v24, %v12387_v44  ;;  %v12389_v19 = vadd.f32 %v12388_v26, %v18956_v40  ;;  %12739 = vmatprep.subr.bf16.mxu0 %v17139_v6  ;;  %v12431_v63 = vpop.f32.mrf.mxu0  ;;  %v17157_v40 = vld [vmem:[#allocation11 + $0x129c] ss:$36 sps:$4 sm:$0xff]   ;;  %v17175_v29 = vld [vmem:[#allocation11 + $0x1644] ss:$36 sps:$4 sm:$0xff]   ;;  %v17187_v6 = vld [vmem:[#allocation11 + $0x15b4] ss:$36 sps:$4 sm:$0xff]  }
 0x4d0   :  { %v17176_v8 = vld [vmem:[#allocation11 + $0x1178] ss:$36 sps:$4 sm:$0xff]   ;;  %v17182_v27 = vld [vmem:[#allocation11 + $0x1130] ss:$36 sps:$4 sm:$0xff]   ;;  %v17188_v26 = vld [vmem:[#allocation11 + $0x10e8] ss:$36 sps:$4 sm:$0xff]  }
 0x4d1   :  { %v18972_v14 = vadd.f32 %v12431_v63, %v12389_v19  ;;  %12697 = vmatpush1.bf16.msra.mxu1 %v17134_v22  ;;  %v17185_v44 = vld [vmem:[#allocation11 + $0x15b0] ss:$36 sps:$4 sm:$0xff]   ;;  %v17199_v19 = vld [vmem:[#allocation11 + $0x1524] ss:$36 sps:$4 sm:$0xff]  }
 0x4d2   :  { %12740 = vmatpush1.bf16.msra.mxu0 %v17137_v33  ;;  %12698 = vmatprep.subr.bf16.mxu1 %v17142_v37  ;;  %v17190_v24 = vld [vmem:[#allocation11 + $0x10ec] ss:$36 sps:$4 sm:$0xff]   ;;  %v17196_v37 = vld [vmem:[#allocation11 + $0x10a4] ss:$36 sps:$4 sm:$0xff]  }
 0x4d3   :  { %12741 = vmatprep.subr.bf16.mxu0 %v17145_v17  ;;  %v17193_v22 = vld [vmem:[#allocation11 + $0x156c] ss:$36 sps:$4 sm:$0xff]   ;;  %v17194_v17 = vld [vmem:[#allocation11 + $0x10a0] ss:$36 sps:$4 sm:$0xff]  }
 0x4d4   :  { %v17191_v33 = vld [vmem:[#allocation11 + $0x1568] ss:$36 sps:$4 sm:$0xff]   ;;  %v17197_v63 = vld [vmem:[#allocation11 + $0x1520] ss:$36 sps:$4 sm:$0xff]  }
 0x4d5   :  { %12699 = vmatpush1.bf16.msra.mxu1 %v17140_v28  ;;  %v17202_v28 = vld [vmem:[#allocation11 + $0x105c] ss:$36 sps:$4 sm:$0xff]  }
 0x4d6   :  { %12742 = vmatpush1.bf16.msra.mxu0 %v17143_v31  ;;  %12700 = vmatprep.subr.bf16.mxu1 %v17148_v41  ;;  %v17205_v31 = vld [vmem:[#allocation11 + $0x14dc] ss:$36 sps:$4 sm:$0xff]  }
 0x4d7   :  { %12743 = vmatprep.subr.bf16.mxu0 %v17151_v45  ;;  %v17200_v41 = vld [vmem:[#allocation11 + $0x1058] ss:$36 sps:$4 sm:$0xff]  }
 0x4d8   :  { %v17203_v45 = vld [vmem:[#allocation11 + $0x14d8] ss:$36 sps:$4 sm:$0xff]  }
 0x4d9   :  { %12701 = vmatpush1.bf16.msra.mxu1 %v17146_v53  ;;  %v17208_v53 = vld [vmem:[#allocation11 + $0x1014] ss:$36 sps:$4 sm:$0xff]  }
 0x4da   :  { %12744 = vmatpush1.bf16.msra.mxu0 %v17149_v21  ;;  %12702 = vmatprep.subr.bf16.mxu1 %v17154_v46  ;;  %v17211_v21 = vld [vmem:[#allocation11 + $0x1494] ss:$36 sps:$4 sm:$0xff]  }
 0x4db   :  { %12745 = vmatprep.subr.bf16.mxu0 %v17157_v40  ;;  %v17206_v46 = vld [vmem:[#allocation11 + $0x1010] ss:$36 sps:$4 sm:$0xff]  }
 0x4dc   :  { %v17209_v40 = vld [vmem:[#allocation11 + $0x1490] ss:$36 sps:$4 sm:$0xff]  }
 0x4dd   :  { %12703 = vmatpush1.bf16.msra.mxu1 %v17152_v32  ;;  %v17214_v32 = vld [vmem:[#allocation11 + $0xfcc] ss:$36 sps:$4 sm:$0xff]  }
 0x4de   :  { %12746 = vmatpush1.bf16.msra.mxu0 %v17155_v48  ;;  %12704 = vmatprep.subr.bf16.mxu1 %v17160_v18  ;;  %v17217_v48 = vld [vmem:[#allocation11 + $0x144c] ss:$36 sps:$4 sm:$0xff]  }
 0x4df   :  { %12747 = vmatprep.subr.bf16.mxu0 %v17163_v50  ;;  %v17212_v18 = vld [vmem:[#allocation11 + $0xfc8] ss:$36 sps:$4 sm:$0xff]  }
 0x4e0   :  { %v17215_v50 = vld [vmem:[#allocation11 + $0x1448] ss:$36 sps:$4 sm:$0xff]  }
 0x4e1   :  { %12705 = vmatpush1.bf16.msra.mxu1 %v17158_v51  ;;  %v17220_v51 = vld [vmem:[#allocation11 + $0x1884] ss:$36 sps:$4 sm:$0xff]  }
 0x4e2   :  { %12748 = vmatpush1.bf16.msra.mxu0 %v17161_v52  ;;  %12706 = vmatprep.subr.bf16.mxu1 %v17166_v5  ;;  %v17223_v52 = vld [vmem:[#allocation11 + $0x1d04] ss:$36 sps:$4 sm:$0xff]  }
 0x4e3   :  { %12749 = vmatprep.subr.bf16.mxu0 %v17169_v30  ;;  %v17218_v5 = vld [vmem:[#allocation11 + $0x1880] ss:$36 sps:$4 sm:$0xff]  }
 0x4e4   :  { %v17221_v30 = vld [vmem:[#allocation11 + $0x1d00] ss:$36 sps:$4 sm:$0xff]  }
 0x4e5   :  { %12707 = vmatpush1.bf16.msra.mxu1 %v17164_v25  ;;  %v17226_v25 = vld [vmem:[#allocation11 + $0x183c] ss:$36 sps:$4 sm:$0xff]  }
 0x4e6   :  { %12750 = vmatpush1.bf16.msra.mxu0 %v17167_v54  ;;  %12708 = vmatprep.subr.bf16.mxu1 %v17172_v43  ;;  %v17229_v43 = vld [vmem:[#allocation11 + $0x1cbc] ss:$36 sps:$4 sm:$0xff]  }
 0x4e7   :  { %12751 = vmatprep.subr.bf16.mxu0 %v17175_v29 }
 0x4e9   :  { %12709 = vmatpush2.bf16.msra.mxu1 %v17170_v55 }
 0x4ea   :  { %12752 = vmatpush2.bf16.msra.mxu0 %v17173_v59  ;;  %12710 = vmatprep.subr.bf16.mxu1 %v17178_v1  ;;  %v17224_v59 = vld [vmem:[#allocation11 + $0x1838] ss:$36 sps:$4 sm:$0xff]  }
 0x4eb   :  { %12753 = vmatprep.subr.bf16.mxu0 %v17181_v4  ;;  %v17227_v4 = vld [vmem:[#allocation11 + $0x1cb8] ss:$36 sps:$4 sm:$0xff]  }
 0x4ed   :  { %12711 = vmatpush2.bf16.msra.mxu1 %v17176_v8  ;;  %v17232_v8 = vld [vmem:[#allocation11 + $0x17f4] ss:$36 sps:$4 sm:$0xff]  }
 0x4ee   :  { %12754 = vmatpush2.bf16.msra.mxu0 %v17179_v16  ;;  %12712 = vmatprep.subr.bf16.mxu1 %v17184_v7 }
 0x4ef   :  { %12755 = vmatprep.subr.bf16.mxu0 %v17187_v6 }
 0x4f1   :  { %12713 = vmatpush2.bf16.msra.mxu1 %v17182_v27 }
 0x4f2   :  { %12756 = vmatpush2.bf16.msra.mxu0 %v17185_v44  ;;  %12714 = vmatprep.subr.bf16.mxu1 %v17190_v24 }
 0x4f3   :  { %12757 = vmatprep.subr.bf16.mxu0 %v17193_v22 }
 0x4f5   :  { %12715 = vmatpush2.bf16.msra.mxu1 %v17188_v26  ;;  %v17230_v26 = vld [vmem:[#allocation11 + $0x17f0] ss:$36 sps:$4 sm:$0xff]  }
 0x4f6   :  { %12758 = vmatpush2.bf16.msra.mxu0 %v17191_v33  ;;  %12716 = vmatprep.subr.bf16.mxu1 %v17196_v37  ;;  %v17233_v37 = vld [vmem:[#allocation11 + $0x1c70] ss:$36 sps:$4 sm:$0xff]  }
 0x4f7   :  { %12759 = vmatprep.subr.bf16.mxu0 %v17199_v19  ;;  %v17238_v19 = vld [vmem:[#allocation11 + $0x17ac] ss:$36 sps:$4 sm:$0xff]  }
 0x4f9   :  { %12717 = vmatpush2.bf16.msra.mxu1 %v17194_v17 }
 0x4fa   :  { %12760 = vmatpush2.bf16.msra.mxu0 %v17197_v63  ;;  %12718 = vmatprep.subr.bf16.mxu1 %v17202_v28  ;;  %v17241_v63 = vld [vmem:[#allocation11 + $0x1c2c] ss:$36 sps:$4 sm:$0xff]  }
 0x4fb   :  { %12761 = vmatprep.subr.bf16.mxu0 %v17205_v31 }
 0x4fd   :  { %12719 = vmatpush2.bf16.msra.mxu1 %v17200_v41  ;;  %v17236_v41 = vld [vmem:[#allocation11 + $0x17a8] ss:$36 sps:$4 sm:$0xff]  }
 0x4fe   :  { %12762 = vmatpush2.bf16.msra.mxu0 %v17203_v45  ;;  %12720 = vmatprep.subr.bf16.mxu1 %v17208_v53  ;;  %v17244_v45 = vld [vmem:[#allocation11 + $0x1764] ss:$36 sps:$4 sm:$0xff]  }
 0x4ff   :  { %12763 = vmatprep.subr.bf16.mxu0 %v17211_v21  ;;  %v17247_v53 = vld [vmem:[#allocation11 + $0x1be4] ss:$36 sps:$4 sm:$0xff]  }
 0x500   :  { %v17242_v21 = vld [vmem:[#allocation11 + $0x1760] ss:$36 sps:$4 sm:$0xff]  }
 0x501   :  { %12721 = vmatpush2.bf16.msra.mxu1 %v17206_v46  ;;  %v17245_v46 = vld [vmem:[#allocation11 + $0x1be0] ss:$36 sps:$4 sm:$0xff]  }
 0x502   :  { %12764 = vmatpush2.bf16.msra.mxu0 %v17209_v40  ;;  %12722 = vmatprep.subr.bf16.mxu1 %v17214_v32  ;;  %v17250_v40 = vld [vmem:[#allocation11 + $0x171c] ss:$36 sps:$4 sm:$0xff]  }
 0x503   :  { %12765 = vmatprep.subr.bf16.mxu0 %v17217_v48  ;;  %v17248_v32 = vld [vmem:[#allocation11 + $0x1718] ss:$36 sps:$4 sm:$0xff]  }
 0x504   :  { %v17251_v48 = vld [vmem:[#allocation11 + $0x1b98] ss:$36 sps:$4 sm:$0xff]  }
 0x505   :  { %12723 = vmatpush2.bf16.msra.mxu1 %v17212_v18  ;;  %v17256_v18 = vld [vmem:[#allocation11 + $0x16d4] ss:$36 sps:$4 sm:$0xff]  }
 0x506   :  { %12766 = vmatpush2.bf16.msra.mxu0 %v17215_v50  ;;  %12778 = vmatprep.subr.bf16.mxu1 %v17220_v51  ;;  %v17259_v50 = vld [vmem:[#allocation11 + $0x1b54] ss:$36 sps:$4 sm:$0xff]  }
 0x507   :  { %12821 = vmatprep.subr.bf16.mxu0 %v17223_v52  ;;  %v17254_v51 = vld [vmem:[#allocation11 + $0x16d0] ss:$36 sps:$4 sm:$0xff]  }
 0x508   :  { %v12468_v54 = vpop.f32.mrf.mxu1  ;;  %12725 = vmatmul.mubr.bf16.vlgmr.msra.gmra.mxu1 %v18821_v36  ;;  %v17257_v52 = vld [vmem:[#allocation11 + $0x1b50] ss:$36 sps:$4 sm:$0xff]  }
 0x509   :  { %v12469_v29 = vadd.f32 %v12468_v54, %v18962_v11  ;;  %v12511_v55 = vpop.f32.mrf.mxu0  ;;  %12768 = vmatmul.mubr.bf16.vlgmr.msra.gmra.mxu0 %v18860_v35  ;;  %12779 = vmatpush1.bf16.msra.mxu1 %v17218_v5  ;;  %v17235_v11 = vld [vmem:[#allocation11 + $0x1c74] ss:$36 sps:$4 sm:$0xff]   ;;  %v17262_v5 = vld [vmem:[#allocation11 + $0x168c] ss:$36 sps:$4 sm:$0xff]  }
 0x50a   :  { %12810 = vmatprep.mubr.bf16.mxu1 %v18899_v9  ;;  %12822 = vmatpush1.bf16.msra.mxu0 %v17221_v30  ;;  %v12470_v1 = vpop.f32.mrf.mxu1  ;;  %v17265_v30 = vld [vmem:[#allocation11 + $0x1b0c] ss:$36 sps:$4 sm:$0xff]  }
 0x50b   :  { %v18978_v16 = vadd.f32 %v12511_v55, %v12469_v29  ;;  %12853 = vmatprep.mubr.bf16.mxu0 %v18910_v0  ;;  %v12471_v7 = vadd.f32 %v12470_v1, %v18966_v20  ;;  %v12513_v6 = vpop.f32.mrf.mxu0  ;;  %12780 = vmatprep.subr.bf16.mxu1 %v17226_v25  ;;  %v17260_v25 = vld [vmem:[#allocation11 + $0x1688] ss:$36 sps:$4 sm:$0xff]   ;;  %v17266_v55 = vld [vmem:[#allocation11 + $0x1ac0] ss:$36 sps:$4 sm:$0xff]  }
 0x50c   :  { %v12472_v27 = vpop.f32.mrf.mxu1  ;;  %12823 = vmatprep.subr.bf16.mxu0 %v17229_v43  ;;  %v17263_v54 = vld [vmem:[#allocation11 + $0x1b08] ss:$36 sps:$4 sm:$0xff]   ;;  %v17274_v1 = vld [vmem:[#allocation11 + $0x1a7c] ss:$36 sps:$4 sm:$0xff]  }
 0x50d   :  { %v18982_v44 = vadd.f32 %v12513_v6, %v12471_v7  ;;  %v12473_v24 = vadd.f32 %v12472_v27, %v18969_v10  ;;  %v12515_v22 = vpop.f32.mrf.mxu0  ;;  %12781 = vmatpush1.bf16.msra.mxu1 %v17224_v59  ;;  %v17239_v10 = vld [vmem:[#allocation11 + $0x1c28] ss:$36 sps:$4 sm:$0xff]   ;;  %v17269_v59 = vld [vmem:[#allocation11 + $0x1f40] ss:$36 sps:$4 sm:$0xff]   ;;  %v17275_v7 = vld [vmem:[#allocation11 + $0x1ef8] ss:$36 sps:$4 sm:$0xff]  }
 0x50e   :  { %12824 = vmatpush1.bf16.msra.mxu0 %v17227_v4  ;;  %v12474_v33 = vpop.f32.mrf.mxu1  ;;  %12782 = vmatprep.subr.bf16.mxu1 %v17232_v8  ;;  %v17268_v43 = vld [vmem:[#allocation11 + $0x1ac4] ss:$36 sps:$4 sm:$0xff]   ;;  %v17277_v4 = vld [vmem:[#allocation11 + $0x1efc] ss:$36 sps:$4 sm:$0xff]   ;;  %v17280_v6 = vld [vmem:[#allocation11 + $0x1a34] ss:$36 sps:$4 sm:$0xff]  }
 0x50f   :  { %v18985_v17 = vadd.f32 %v12515_v22, %v12473_v24  ;;  %v12475_v20 = vadd.f32 %v12474_v33, %v18972_v14  ;;  %12825 = vmatprep.subr.bf16.mxu0 %v17235_v11  ;;  %v12517_v28 = vpop.f32.mrf.mxu0  ;;  %v17253_v14 = vld [vmem:[#allocation11 + $0x1b9c] ss:$36 sps:$4 sm:$0xff]   ;;  %v17271_v29 = vld [vmem:[#allocation11 + $0x1f44] ss:$36 sps:$4 sm:$0xff]   ;;  %v17283_v11 = vld [vmem:[#allocation11 + $0x1eb4] ss:$36 sps:$4 sm:$0xff]  }
 0x510   :  { %v17272_v8 = vld [vmem:[#allocation11 + $0x1a78] ss:$36 sps:$4 sm:$0xff]   ;;  %v17278_v27 = vld [vmem:[#allocation11 + $0x1a30] ss:$36 sps:$4 sm:$0xff]   ;;  %v17284_v33 = vld [vmem:[#allocation11 + $0x19e8] ss:$36 sps:$4 sm:$0xff]  }
 0x511   :  { %v18988_v31 = vadd.f32 %v12517_v28, %v12475_v20  ;;  %12783 = vmatpush1.bf16.msra.mxu1 %v17230_v26  ;;  %v17281_v24 = vld [vmem:[#allocation11 + $0x1eb0] ss:$36 sps:$4 sm:$0xff]   ;;  %v17295_v20 = vld [vmem:[#allocation11 + $0x1e24] ss:$36 sps:$4 sm:$0xff]  }
 0x512   :  { %12826 = vmatpush1.bf16.msra.mxu0 %v17233_v37  ;;  %12784 = vmatprep.subr.bf16.mxu1 %v17238_v19  ;;  %v17286_v22 = vld [vmem:[#allocation11 + $0x19ec] ss:$36 sps:$4 sm:$0xff]   ;;  %v17292_v19 = vld [vmem:[#allocation11 + $0x19a4] ss:$36 sps:$4 sm:$0xff]  }
 0x513   :  { %12827 = vmatprep.subr.bf16.mxu0 %v17241_v63  ;;  %v17289_v26 = vld [vmem:[#allocation11 + $0x1e6c] ss:$36 sps:$4 sm:$0xff]   ;;  %v17290_v63 = vld [vmem:[#allocation11 + $0x19a0] ss:$36 sps:$4 sm:$0xff]  }
 0x514   :  { %v17287_v37 = vld [vmem:[#allocation11 + $0x1e68] ss:$36 sps:$4 sm:$0xff]   ;;  %v17293_v28 = vld [vmem:[#allocation11 + $0x1e20] ss:$36 sps:$4 sm:$0xff]  }
 0x515   :  { %12785 = vmatpush1.bf16.msra.mxu1 %v17236_v41  ;;  %v17298_v41 = vld [vmem:[#allocation11 + $0x195c] ss:$36 sps:$4 sm:$0xff]  }
 0x516   :  { %12828 = vmatpush1.bf16.msra.mxu0 %v17239_v10  ;;  %12786 = vmatprep.subr.bf16.mxu1 %v17244_v45  ;;  %v17301_v10 = vld [vmem:[#allocation11 + $0x1ddc] ss:$36 sps:$4 sm:$0xff]  }
 0x517   :  { %12829 = vmatprep.subr.bf16.mxu0 %v17247_v53  ;;  %v17296_v45 = vld [vmem:[#allocation11 + $0x1958] ss:$36 sps:$4 sm:$0xff]  }
 0x518   :  { %v17299_v53 = vld [vmem:[#allocation11 + $0x1dd8] ss:$36 sps:$4 sm:$0xff]  }
 0x519   :  { %12787 = vmatpush1.bf16.msra.mxu1 %v17242_v21  ;;  %v17304_v21 = vld [vmem:[#allocation11 + $0x1914] ss:$36 sps:$4 sm:$0xff]  }
 0x51a   :  { %12830 = vmatpush1.bf16.msra.mxu0 %v17245_v46  ;;  %12788 = vmatprep.subr.bf16.mxu1 %v17250_v40  ;;  %v17307_v46 = vld [vmem:[#allocation11 + $0x1d94] ss:$36 sps:$4 sm:$0xff]  }
 0x51b   :  { %12831 = vmatprep.subr.bf16.mxu0 %v17253_v14  ;;  %v17302_v40 = vld [vmem:[#allocation11 + $0x1910] ss:$36 sps:$4 sm:$0xff]  }
 0x51c   :  { %v17305_v14 = vld [vmem:[#allocation11 + $0x1d90] ss:$36 sps:$4 sm:$0xff]  }
 0x51d   :  { %12789 = vmatpush1.bf16.msra.mxu1 %v17248_v32  ;;  %v17310_v32 = vld [vmem:[#allocation11 + $0x18cc] ss:$36 sps:$4 sm:$0xff]  }
 0x51e   :  { %12832 = vmatpush1.bf16.msra.mxu0 %v17251_v48  ;;  %12790 = vmatprep.subr.bf16.mxu1 %v17256_v18  ;;  %v17313_v48 = vld [vmem:[#allocation11 + $0x1d4c] ss:$36 sps:$4 sm:$0xff]  }
 0x51f   :  { %12833 = vmatprep.subr.bf16.mxu0 %v17259_v50  ;;  %v17308_v18 = vld [vmem:[#allocation11 + $0x18c8] ss:$36 sps:$4 sm:$0xff]  }
 0x520   :  { %v17311_v50 = vld [vmem:[#allocation11 + $0x1d48] ss:$36 sps:$4 sm:$0xff]  }
 0x521   :  { %12791 = vmatpush1.bf16.msra.mxu1 %v17254_v51  ;;  %v17316_v51 = vld [vmem:[#allocation11 + $0x2184] ss:$36 sps:$4 sm:$0xff]  }
 0x522   :  { %12834 = vmatpush1.bf16.msra.mxu0 %v17257_v52  ;;  %12792 = vmatprep.subr.bf16.mxu1 %v17262_v5  ;;  %v17319_v52 = vld [vmem:[#allocation11 + $0x20c] ss:$36 sps:$4 sm:$0xff]   ;;  %v17314_v5 = vld [vmem:[#allocation11 + $0x2180] ss:$36 sps:$4 sm:$0xff]  }
 0x523   :  { %12835 = vmatprep.subr.bf16.mxu0 %v17265_v30  ;;  %v17317_v30 = vld [vmem:[#allocation11 + $0x208] ss:$36 sps:$4 sm:$0xff]  }
 0x525   :  { %12793 = vmatpush1.bf16.msra.mxu1 %v17260_v25  ;;  %v17322_v25 = vld [vmem:[#allocation11 + $0x213c] ss:$36 sps:$4 sm:$0xff]  }
 0x526   :  { %12836 = vmatpush1.bf16.msra.mxu0 %v17263_v54  ;;  %12794 = vmatprep.subr.bf16.mxu1 %v17268_v43  ;;  %v17325_v43 = vld [vmem:[#allocation11 + $0x1c4] ss:$36 sps:$4 sm:$0xff]  }
 0x527   :  { %12837 = vmatprep.subr.bf16.mxu0 %v17271_v29 }
 0x529   :  { %12795 = vmatpush2.bf16.msra.mxu1 %v17266_v55  ;;  %v17320_v55 = vld [vmem:[#allocation11 + $0x2138] ss:$36 sps:$4 sm:$0xff]  }
 0x52a   :  { %12838 = vmatpush2.bf16.msra.mxu0 %v17269_v59  ;;  %12796 = vmatprep.subr.bf16.mxu1 %v17274_v1  ;;  %v17323_v1 = vld [vmem:[#allocation11 + $0x1c0] ss:$36 sps:$4 sm:$0xff]  }
 0x52b   :  { %12839 = vmatprep.subr.bf16.mxu0 %v17277_v4  ;;  %v17328_v4 = vld [vmem:[#allocation11 + $0x20f4] ss:$36 sps:$4 sm:$0xff]  }
 0x52d   :  { %12797 = vmatpush2.bf16.msra.mxu1 %v17272_v8 }
 0x52e   :  { %12840 = vmatpush2.bf16.msra.mxu0 %v17275_v7  ;;  %12798 = vmatprep.subr.bf16.mxu1 %v17280_v6  ;;  %v17331_v7 = vld [vmem:[#allocation11 + $0x17c] ss:$36 sps:$4 sm:$0xff]  }
 0x52f   :  { %12841 = vmatprep.subr.bf16.mxu0 %v17283_v11  ;;  %v17326_v11 = vld [vmem:[#allocation11 + $0x20f0] ss:$36 sps:$4 sm:$0xff]  }
 0x531   :  { %12799 = vmatpush2.bf16.msra.mxu1 %v17278_v27 }
 0x532   :  { %12842 = vmatpush2.bf16.msra.mxu0 %v17281_v24  ;;  %12800 = vmatprep.subr.bf16.mxu1 %v17286_v22  ;;  %v17329_v24 = vld [vmem:[#allocation11 + $0x178] ss:$36 sps:$4 sm:$0xff]   ;;  %v17334_v22 = vld [vmem:[#allocation11 + $0x20ac] ss:$36 sps:$4 sm:$0xff]  }
 0x533   :  { %12843 = vmatprep.subr.bf16.mxu0 %v17289_v26 }
 0x535   :  { %12801 = vmatpush2.bf16.msra.mxu1 %v17284_v33  ;;  %v17332_v33 = vld [vmem:[#allocation11 + $0x20a8] ss:$36 sps:$4 sm:$0xff]  }
 0x536   :  { %12844 = vmatpush2.bf16.msra.mxu0 %v17287_v37  ;;  %12802 = vmatprep.subr.bf16.mxu1 %v17292_v19  ;;  %v17335_v37 = vld [vmem:[#allocation11 + $0x130] ss:$36 sps:$4 sm:$0xff]   ;;  %v17340_v19 = vld [vmem:[#allocation11 + $0x2064] ss:$36 sps:$4 sm:$0xff]  }
 0x537   :  { %12845 = vmatprep.subr.bf16.mxu0 %v17295_v20  ;;  %v17338_v20 = vld [vmem:[#allocation11 + $0x2060] ss:$36 sps:$4 sm:$0xff]  }
 0x539   :  { %12803 = vmatpush2.bf16.msra.mxu1 %v17290_v63  ;;  %v17341_v63 = vld [vmem:[#allocation11 + $0xe8] ss:$36 sps:$4 sm:$0xff]  }
 0x53a   :  { %12846 = vmatpush2.bf16.msra.mxu0 %v17293_v28  ;;  %12804 = vmatprep.subr.bf16.mxu1 %v17298_v41  ;;  %v17346_v28 = vld [vmem:[#allocation11 + $0x201c] ss:$36 sps:$4 sm:$0xff]   ;;  %v17349_v41 = vld [vmem:[#allocation11 + $0xa4] ss:$36 sps:$4 sm:$0xff]  }
 0x53b   :  { %12847 = vmatprep.subr.bf16.mxu0 %v17301_v10  ;;  %v17347_v10 = vld [vmem:[#allocation11 + $0xa0] ss:$36 sps:$4 sm:$0xff]  }
 0x53d   :  { %12805 = vmatpush2.bf16.msra.mxu1 %v17296_v45  ;;  %v17352_v45 = vld [vmem:[#allocation11 + $0x1fd4] ss:$36 sps:$4 sm:$0xff]  }
 0x53e   :  { %12848 = vmatpush2.bf16.msra.mxu0 %v17299_v53  ;;  %12806 = vmatprep.subr.bf16.mxu1 %v17304_v21  ;;  %v17355_v53 = vld [vmem:[#allocation11 + $0x5c] ss:$36 sps:$4 sm:$0xff]   ;;  %v17350_v21 = vld [vmem:[#allocation11 + $0x1fd0] ss:$36 sps:$4 sm:$0xff]  }
 0x53f   :  { %12849 = vmatprep.subr.bf16.mxu0 %v17307_v46  ;;  %v17353_v46 = vld [vmem:[#allocation11 + $0x58] ss:$36 sps:$4 sm:$0xff]  }
 0x541   :  { %12807 = vmatpush2.bf16.msra.mxu1 %v17302_v40  ;;  %v17358_v40 = vld [vmem:[#allocation11 + $0x1f8c] ss:$36 sps:$4 sm:$0xff]  }
 0x542   :  { %12850 = vmatpush2.bf16.msra.mxu0 %v17305_v14  ;;  %12808 = vmatprep.subr.bf16.mxu1 %v17310_v32  ;;  %v17361_v14 = vld [vmem:[#allocation11 + $0x14] ss:$36 sps:$4 sm:$0xff]   ;;  %v17356_v32 = vld [vmem:[#allocation11 + $0x1f88] ss:$36 sps:$4 sm:$0xff]  }
 0x543   :  { %12851 = vmatprep.subr.bf16.mxu0 %v17313_v48  ;;  %v17359_v48 = vld [vmem:[#allocation11 + $0x10] ss:$36 sps:$4 sm:$0xff]  }
 0x545   :  { %12809 = vmatpush2.bf16.msra.mxu1 %v17308_v18  ;;  %v17364_v18 = vld [vmem:[#allocation11 + $0x23c4] ss:$36 sps:$4 sm:$0xff]  }
 0x546   :  { %12852 = vmatpush2.bf16.msra.mxu0 %v17311_v50  ;;  %12864 = vmatprep.subr.bf16.mxu1 %v17316_v51  ;;  %v17367_v50 = vld [vmem:[#allocation11 + $0x44c] ss:$36 sps:$4 sm:$0xff]   ;;  %v17362_v51 = vld [vmem:[#allocation11 + $0x23c0] ss:$36 sps:$4 sm:$0xff]  }
 0x547   :  { %12907 = vmatprep.subr.bf16.mxu0 %v17319_v52  ;;  %v17365_v52 = vld [vmem:[#allocation11 + $0x448] ss:$36 sps:$4 sm:$0xff]  }
 0x548   :  { %v12554_v54 = vpop.f32.mrf.mxu1  ;;  %12811 = vmatmul.mubr.bf16.vlgmr.msra.gmra.mxu1 %v18889_v56 }
 0x549   :  { %v18992_v29 = vadd.f32 %v12554_v54, %v18978_v16  ;;  %12854 = vmatmul.mubr.bf16.vlgmr.msra.gmra.mxu0 %v18923_v39  ;;  %12865 = vmatpush1.bf16.msra.mxu1 %v17314_v5  ;;  %v17370_v5 = vld [vmem:[#allocation11 + $0x237c] ss:$36 sps:$4 sm:$0xff]  }
 0x54a   :  { %12896 = vmatprep.mubr.bf16.mxu1 %v18934_v57  ;;  %12908 = vmatpush1.bf16.msra.mxu0 %v17317_v30  ;;  %v12556_v59 = vpop.f32.mrf.mxu1  ;;  %v17373_v30 = vld [vmem:[#allocation11 + $0x404] ss:$36 sps:$4 sm:$0xff]  }
 0x54b   :  { %19364 = vst [vmem:[#allocation25_spill] sm:$0xff] %v18992_v29  ;;  %12939 = vmatprep.mubr.bf16.mxu0 %v18814_v12  ;;  %v18998_v8 = vadd.f32 %v12556_v59, %v18982_v44  ;;  %12866 = vmatprep.subr.bf16.mxu1 %v17322_v25  ;;  %v17337_v44 = vld [vmem:[#allocation11 + $0x134] ss:$36 sps:$4 sm:$0xff]   ;;  %v17371_v54 = vld [vmem:[#allocation11 + $0x400] ss:$36 sps:$4 sm:$0xff]  }
 0x54c   :  { %v12558_v6 = vpop.f32.mrf.mxu1  ;;  %12909 = vmatprep.subr.bf16.mxu0 %v17325_v43  ;;  %v17368_v25 = vld [vmem:[#allocation11 + $0x2378] ss:$36 sps:$4 sm:$0xff]   ;;  %v17374_v59 = vld [vmem:[#allocation11 + $0x2330] ss:$36 sps:$4 sm:$0xff]  }
 0x54d   :  { %19365 = vst [vmem:[#allocation26_spill] sm:$0xff] %v18998_v8  ;;  %v19001_v16 = vadd.f32 %v12558_v6, %v18985_v17  ;;  %12867 = vmatpush1.bf16.msra.mxu1 %v17320_v55  ;;  %v17343_v17 = vld [vmem:[#allocation11 + $0xec] ss:$36 sps:$4 sm:$0xff]   ;;  %v17376_v43 = vld [vmem:[#allocation11 + $0x2334] ss:$36 sps:$4 sm:$0xff]  }
 0x54e   :  { %12910 = vmatpush1.bf16.msra.mxu0 %v17323_v1  ;;  %v12560_v27 = vpop.f32.mrf.mxu1  ;;  %12868 = vmatprep.subr.bf16.mxu1 %v17328_v4  ;;  %v17379_v55 = vld [vmem:[#allocation11 + $0x3bc] ss:$36 sps:$4 sm:$0xff]   ;;  %v17382_v4 = vld [vmem:[#allocation11 + $0x22ec] ss:$36 sps:$4 sm:$0xff]  }
 0x54f   :  { %v19004_v26 = vadd.f32 %v12560_v27, %v18988_v31  ;;  %12911 = vmatprep.subr.bf16.mxu0 %v17331_v7  ;;  %v17344_v31 = vld [vmem:[#allocation11 + $0x2018] ss:$36 sps:$4 sm:$0xff]   ;;  %v17380_v6 = vld [vmem:[#allocation11 + $0x22e8] ss:$36 sps:$4 sm:$0xff]  }
 0x550   :  { %v17377_v1 = vld [vmem:[#allocation11 + $0x3b8] ss:$36 sps:$4 sm:$0xff]   ;;  %v17388_v27 = vld [vmem:[#allocation11 + $0x22a4] ss:$36 sps:$4 sm:$0xff]  }
 0x551   :  { %12869 = vmatpush1.bf16.msra.mxu1 %v17326_v11  ;;  %v17385_v7 = vld [vmem:[#allocation11 + $0x374] ss:$36 sps:$4 sm:$0xff]  }
 0x552   :  { %12912 = vmatpush1.bf16.msra.mxu0 %v17329_v24  ;;  %12870 = vmatprep.subr.bf16.mxu1 %v17334_v22  ;;  %v17383_v11 = vld [vmem:[#allocation11 + $0x370] ss:$36 sps:$4 sm:$0xff]   ;;  %v17386_v22 = vld [vmem:[#allocation11 + $0x22a0] ss:$36 sps:$4 sm:$0xff]  }
 0x553   :  { %12913 = vmatprep.subr.bf16.mxu0 %v17337_v44  ;;  %v17391_v24 = vld [vmem:[#allocation11 + $0x32c] ss:$36 sps:$4 sm:$0xff]  }
 0x554   :  { %v17389_v44 = vld [vmem:[#allocation11 + $0x328] ss:$36 sps:$4 sm:$0xff]  }
 0x555   :  { %12871 = vmatpush1.bf16.msra.mxu1 %v17332_v33  ;;  %v17394_v33 = vld [vmem:[#allocation11 + $0x225c] ss:$36 sps:$4 sm:$0xff]  }
 0x556   :  { %12914 = vmatpush1.bf16.msra.mxu0 %v17335_v37  ;;  %12872 = vmatprep.subr.bf16.mxu1 %v17340_v19  ;;  %v17397_v37 = vld [vmem:[#allocation11 + $0x2e4] ss:$36 sps:$4 sm:$0xff]   ;;  %v17392_v19 = vld [vmem:[#allocation11 + $0x2258] ss:$36 sps:$4 sm:$0xff]  }
 0x557   :  { %12915 = vmatprep.subr.bf16.mxu0 %v17343_v17  ;;  %v17395_v17 = vld [vmem:[#allocation11 + $0x2e0] ss:$36 sps:$4 sm:$0xff]  }
 0x559   :  { %12873 = vmatpush1.bf16.msra.mxu1 %v17338_v20  ;;  %v17400_v20 = vld [vmem:[#allocation11 + $0x2214] ss:$36 sps:$4 sm:$0xff]  }
 0x55a   :  { %12916 = vmatpush1.bf16.msra.mxu0 %v17341_v63  ;;  %12874 = vmatprep.subr.bf16.mxu1 %v17346_v28  ;;  %v12597_v63 = vpop.f32.mrf.mxu0  ;;  %v17403_v28 = vld [vmem:[#allocation11 + $0x29c] ss:$36 sps:$4 sm:$0xff]  }
 0x55b   :  { %12917 = vmatprep.subr.bf16.mxu0 %v17349_v41  ;;  %v17398_v41 = vld [vmem:[#allocation11 + $0x2210] ss:$36 sps:$4 sm:$0xff]  }
 0x55d   :  { %12875 = vmatpush1.bf16.msra.mxu1 %v17344_v31  ;;  %v17401_v31 = vld [vmem:[#allocation11 + $0x298] ss:$36 sps:$4 sm:$0xff]  }
 0x55e   :  { %12918 = vmatpush1.bf16.msra.mxu0 %v17347_v10  ;;  %12876 = vmatprep.subr.bf16.mxu1 %v17352_v45  ;;  %v17406_v10 = vld [vmem:[#allocation11 + $0x21cc] ss:$36 sps:$4 sm:$0xff]   ;;  %v12599_v45 = vpop.f32.mrf.mxu0 }
 0x55f   :  { %12919 = vmatprep.subr.bf16.mxu0 %v17355_v53  ;;  %v17409_v53 = vld [vmem:[#allocation11 + $0x254] ss:$36 sps:$4 sm:$0xff]  }
 0x561   :  { %12877 = vmatpush1.bf16.msra.mxu1 %v17350_v21  ;;  %v17404_v21 = vld [vmem:[#allocation11 + $0x21c8] ss:$36 sps:$4 sm:$0xff]  }
 0x562   :  { %12920 = vmatpush1.bf16.msra.mxu0 %v17353_v46  ;;  %12878 = vmatprep.subr.bf16.mxu1 %v17358_v40  ;;  %v17407_v46 = vld [vmem:[#allocation11 + $0x250] ss:$36 sps:$4 sm:$0xff]  }
 0x563   :  { %12921 = vmatprep.subr.bf16.mxu0 %v17361_v14  ;;  %v17412_v40 = vld [vmem:[#allocation11 + $0x68c] ss:$36 sps:$4 sm:$0xff]   ;;  %v18305_v14 = vld [vmem:[#allocation12] sm:$0xff] }
 0x565   :  { %12879 = vmatpush1.bf16.msra.mxu1 %v17356_v32  ;;  %v6297_v32 = vrot.slane %v18305_v14, %v18719_v49 }
 0x566   :  { %12922 = vmatpush1.bf16.msra.mxu0 %v17359_v48  ;;  %12880 = vmatprep.subr.bf16.mxu1 %v17364_v18  ;;  %v12601_v48 = vpop.f32.mrf.mxu0  ;;  %v17415_v18 = vld [vmem:[#allocation11 + $0xb0c] ss:$36 sps:$4 sm:$0xff]  }
 0x567   :  { %12923 = vmatprep.subr.bf16.mxu0 %v17367_v50  ;;  %v6301_v50 = vrot.slane %v18305_v14, %v18716_v47  ;;  %v17416_v47 = vld [vmem:[#allocation11 + $0x640] ss:$36 sps:$4 sm:$0xff]   ;;  %v17436_v14 = vld [vmem:[#allocation11 + $0x56c] ss:$36 sps:$4 sm:$0xff]  }
 0x569   :  { %12881 = vmatpush2.bf16.msra.mxu1 %v17362_v51  ;;  %v17410_v51 = vld [vmem:[#allocation11 + $0x688] ss:$36 sps:$4 sm:$0xff]  }
 0x56a   :  { %12924 = vmatpush2.bf16.msra.mxu0 %v17365_v52  ;;  %12882 = vmatprep.subr.bf16.mxu1 %v17370_v5  ;;  %v17413_v52 = vld [vmem:[#allocation11 + $0xb08] ss:$36 sps:$4 sm:$0xff]   ;;  %v12598_v5 = vadd.f32 %v12597_v63, %v6297_v32 }
 0x56b   :  { %12925 = vmatprep.subr.bf16.mxu0 %v17373_v30  ;;  %v12603_v30 = vpop.f32.mrf.mxu0 }
 0x56d   :  { %12883 = vmatpush2.bf16.msra.mxu1 %v17368_v25  ;;  %v17418_v25 = vld [vmem:[#allocation11 + $0x644] ss:$36 sps:$4 sm:$0xff]  }
 0x56e   :  { %12926 = vmatpush2.bf16.msra.mxu0 %v17371_v54  ;;  %12884 = vmatprep.subr.bf16.mxu1 %v17376_v43  ;;  %v17421_v43 = vld [vmem:[#allocation11 + $0xac4] ss:$36 sps:$4 sm:$0xff]  }
 0x56f   :  { %12927 = vmatprep.subr.bf16.mxu0 %v17379_v55  ;;  %v12600_v55 = vadd.f32 %v12599_v45, %v6301_v50  ;;  %v17433_v45 = vld [vmem:[#allocation11 + $0xa34] ss:$36 sps:$4 sm:$0xff]  }
 0x571   :  { %12885 = vmatpush2.bf16.msra.mxu1 %v17374_v59 }
 0x572   :  { %12928 = vmatpush2.bf16.msra.mxu0 %v17377_v1  ;;  %12886 = vmatprep.subr.bf16.mxu1 %v17382_v4  ;;  %v17419_v4 = vld [vmem:[#allocation11 + $0xac0] ss:$36 sps:$4 sm:$0xff]  }
 0x573   :  { %12929 = vmatprep.subr.bf16.mxu0 %v17385_v7  ;;  %v17424_v7 = vld [vmem:[#allocation11 + $0x5fc] ss:$36 sps:$4 sm:$0xff]  }
 0x575   :  { %12887 = vmatpush2.bf16.msra.mxu1 %v17380_v6  ;;  %v12602_v6 = vadd.f32 %v12601_v48, %v6297_v32  ;;  %v17439_v32 = vld [vmem:[#allocation11 + $0x9ec] ss:$36 sps:$4 sm:$0xff]  }
 0x576   :  { %12930 = vmatpush2.bf16.msra.mxu0 %v17383_v11  ;;  %12888 = vmatprep.subr.bf16.mxu1 %v17388_v27  ;;  %v17434_v48 = vld [vmem:[#allocation11 + $0x568] ss:$36 sps:$4 sm:$0xff]  }
 0x577   :  { %12931 = vmatprep.subr.bf16.mxu0 %v17391_v24 }
 0x579   :  { %12889 = vmatpush2.bf16.msra.mxu1 %v17386_v22  ;;  %v17427_v22 = vld [vmem:[#allocation11 + $0xa7c] ss:$36 sps:$4 sm:$0xff]  }
 0x57a   :  { %12932 = vmatpush2.bf16.msra.mxu0 %v17389_v44  ;;  %12890 = vmatprep.subr.bf16.mxu1 %v17394_v33  ;;  %v12604_v33 = vadd.f32 %v12603_v30, %v6301_v50  ;;  %v17442_v50 = vld [vmem:[#allocation11 + $0x524] ss:$36 sps:$4 sm:$0xff]   ;;  %v17448_v30 = vld [vmem:[#allocation11 + $0x4dc] ss:$36 sps:$4 sm:$0xff]  }
 0x57b   :  { %12933 = vmatprep.subr.bf16.mxu0 %v17397_v37 }
 0x57d   :  { %12891 = vmatpush2.bf16.msra.mxu1 %v17392_v19 }
 0x57e   :  { %12934 = vmatpush2.bf16.msra.mxu0 %v17395_v17  ;;  %12892 = vmatprep.subr.bf16.mxu1 %v17400_v20  ;;  %v17422_v20 = vld [vmem:[#allocation11 + $0x5f8] ss:$36 sps:$4 sm:$0xff]  }
 0x57f   :  { %12935 = vmatprep.subr.bf16.mxu0 %v17403_v28  ;;  %v17425_v28 = vld [vmem:[#allocation11 + $0xa78] ss:$36 sps:$4 sm:$0xff]  }
 0x581   :  { %12893 = vmatpush2.bf16.msra.mxu1 %v17398_v41  ;;  %v17430_v41 = vld [vmem:[#allocation11 + $0x5b4] ss:$36 sps:$4 sm:$0xff]  }
 0x582   :  { %12936 = vmatpush2.bf16.msra.mxu0 %v17401_v31  ;;  %12894 = vmatprep.subr.bf16.mxu1 %v17406_v10 }
 0x583   :  { %12937 = vmatprep.subr.bf16.mxu0 %v17409_v53 }
 0x585   :  { %12895 = vmatpush2.bf16.msra.mxu1 %v17404_v21 }
 0x586   :  { %12938 = vmatpush2.bf16.msra.mxu0 %v17407_v46  ;;  %12950 = vmatprep.subr.bf16.mxu1 %v17412_v40  ;;  %v17428_v46 = vld [vmem:[#allocation11 + $0x5b0] ss:$36 sps:$4 sm:$0xff]  }
 0x587   :  { %12993 = vmatprep.subr.bf16.mxu0 %v17415_v18  ;;  %v17431_v40 = vld [vmem:[#allocation11 + $0xa30] ss:$36 sps:$4 sm:$0xff]   ;;  %v17437_v18 = vld [vmem:[#allocation11 + $0x9e8] ss:$36 sps:$4 sm:$0xff]  }
 0x588   :  { %v12640_v54 = vpop.f32.mrf.mxu1  ;;  %12897 = vmatmul.mubr.bf16.vlgmr.msra.gmra.mxu1 %v18944_v13 }
 0x589   :  { %v12641_v49 = vadd.f32 %v12640_v54, %v12598_v5  ;;  %v12683_v59 = vpop.f32.mrf.mxu0  ;;  %12940 = vmatmul.mubr.bf16.vlgmr.msra.gmra.mxu0 %v18757_v2  ;;  %12951 = vmatpush1.bf16.msra.mxu1 %v17410_v51  ;;  %v17445_v51 = vld [vmem:[#allocation11 + $0x9a4] ss:$36 sps:$4 sm:$0xff]   ;;  %v17446_v54 = vld [vmem:[#allocation11 + $0x4d8] ss:$36 sps:$4 sm:$0xff]  }
 0x58a   :  { %12982 = vmatprep.mubr.bf16.mxu1 %v18850_v38  ;;  %12994 = vmatpush1.bf16.msra.mxu0 %v17413_v52  ;;  %v12642_v1 = vpop.f32.mrf.mxu1  ;;  %v17440_v52 = vld [vmem:[#allocation11 + $0x520] ss:$36 sps:$4 sm:$0xff]  }
 0x58b   :  { %v19011_v11 = vadd.f32 %v12683_v59, %v12641_v49  ;;  %13025 = vmatprep.mubr.bf16.mxu0 %v18853_v42  ;;  %v12643_v27 = vadd.f32 %v12642_v1, %v12600_v55  ;;  %v12685_v24 = vpop.f32.mrf.mxu0  ;;  %12952 = vmatprep.subr.bf16.mxu1 %v17418_v25  ;;  %v17443_v5 = vld [vmem:[#allocation11 + $0x9a0] ss:$36 sps:$4 sm:$0xff]   ;;  %v17454_v55 = vld [vmem:[#allocation11 + $0x494] ss:$36 sps:$4 sm:$0xff]   ;;  %v17460_v1 = vld [vmem:[#allocation11 + $0x8cc] ss:$36 sps:$4 sm:$0xff]  }
 0x58c   :  { %v12644_v44 = vpop.f32.mrf.mxu1  ;;  %12995 = vmatprep.subr.bf16.mxu0 %v17421_v43  ;;  %v17451_v25 = vld [vmem:[#allocation11 + $0x95c] ss:$36 sps:$4 sm:$0xff]   ;;  %v17457_v49 = vld [vmem:[#allocation11 + $0x914] ss:$36 sps:$4 sm:$0xff]  }
 0x58d   :  { %v19014_v37 = vadd.f32 %v12685_v24, %v12643_v27  ;;  %v12645_v19 = vadd.f32 %v12644_v44, %v12602_v6  ;;  %v12687_v17 = vpop.f32.mrf.mxu0  ;;  %12953 = vmatpush1.bf16.msra.mxu1 %v17416_v47  ;;  %v17449_v43 = vld [vmem:[#allocation11 + $0x958] ss:$36 sps:$4 sm:$0xff]   ;;  %v17452_v59 = vld [vmem:[#allocation11 + $0x490] ss:$36 sps:$4 sm:$0xff]   ;;  %v17461_v6 = vld [vmem:[#allocation11 + $0xd48] ss:$36 sps:$4 sm:$0xff]  }
 0x58e   :  { %12996 = vmatpush1.bf16.msra.mxu0 %v17419_v4  ;;  %v12646_v63 = vpop.f32.mrf.mxu1  ;;  %12954 = vmatprep.subr.bf16.mxu1 %v17424_v7  ;;  %v17455_v47 = vld [vmem:[#allocation11 + $0x910] ss:$36 sps:$4 sm:$0xff]   ;;  %v17458_v7 = vld [vmem:[#allocation11 + $0x8c8] ss:$36 sps:$4 sm:$0xff]   ;;  %v17467_v44 = vld [vmem:[#allocation11 + $0xd00] ss:$36 sps:$4 sm:$0xff]  }
 0x58f   :  { %v19016_v31 = vadd.f32 %v12687_v17, %v12645_v19  ;;  %v12647_v10 = vadd.f32 %v12646_v63, %v12604_v33  ;;  %12997 = vmatprep.subr.bf16.mxu0 %v17427_v22  ;;  %v12689_v53 = vpop.f32.mrf.mxu0  ;;  %v17463_v4 = vld [vmem:[#allocation11 + $0xd4c] ss:$36 sps:$4 sm:$0xff]   ;;  %v17466_v27 = vld [vmem:[#allocation11 + $0x884] ss:$36 sps:$4 sm:$0xff]   ;;  %v17472_v33 = vld [vmem:[#allocation11 + $0x83c] ss:$36 sps:$4 sm:$0xff]  }
 0x590   :  { %v17469_v24 = vld [vmem:[#allocation11 + $0xd04] ss:$36 sps:$4 sm:$0xff]   ;;  %v17475_v19 = vld [vmem:[#allocation11 + $0xcbc] ss:$36 sps:$4 sm:$0xff]   ;;  %v17478_v63 = vld [vmem:[#allocation11 + $0x7f4] ss:$36 sps:$4 sm:$0xff]  }
 0x591   :  { %v19018_v21 = vadd.f32 %v12689_v53, %v12647_v10  ;;  %12955 = vmatpush1.bf16.msra.mxu1 %v17422_v20  ;;  %v17464_v22 = vld [vmem:[#allocation11 + $0x880] ss:$36 sps:$4 sm:$0xff]   ;;  %v17470_v17 = vld [vmem:[#allocation11 + $0x838] ss:$36 sps:$4 sm:$0xff]   ;;  %v17479_v10 = vld [vmem:[#allocation11 + $0xc70] ss:$36 sps:$4 sm:$0xff]  }
 0x592   :  { %12998 = vmatpush1.bf16.msra.mxu0 %v17425_v28  ;;  %12956 = vmatprep.subr.bf16.mxu1 %v17430_v41  ;;  %v17473_v20 = vld [vmem:[#allocation11 + $0xcb8] ss:$36 sps:$4 sm:$0xff]   ;;  %v17476_v41 = vld [vmem:[#allocation11 + $0x7f0] ss:$36 sps:$4 sm:$0xff]  }
 0x593   :  { %12999 = vmatprep.subr.bf16.mxu0 %v17433_v45  ;;  %v17481_v28 = vld [vmem:[#allocation11 + $0xc74] ss:$36 sps:$4 sm:$0xff]   ;;  %v17484_v45 = vld [vmem:[#allocation11 + $0x7ac] ss:$36 sps:$4 sm:$0xff]  }
 0x594   :  { %v17487_v53 = vld [vmem:[#allocation11 + $0xc2c] ss:$36 sps:$4 sm:$0xff]  }
 0x595   :  { %12957 = vmatpush1.bf16.msra.mxu1 %v17428_v46  ;;  %v17482_v46 = vld [vmem:[#allocation11 + $0x7a8] ss:$36 sps:$4 sm:$0xff]  }
 0x596   :  { %13000 = vmatpush1.bf16.msra.mxu0 %v17431_v40  ;;  %12958 = vmatprep.subr.bf16.mxu1 %v17436_v14  ;;  %v17485_v40 = vld [vmem:[#allocation11 + $0xc28] ss:$36 sps:$4 sm:$0xff]  }
 0x597   :  { %13001 = vmatprep.subr.bf16.mxu0 %v17439_v32  ;;  %v17490_v14 = vld [vmem:[#allocation11 + $0x764] ss:$36 sps:$4 sm:$0xff]  }
 0x598   :  { %v17493_v32 = vld [vmem:[#allocation11 + $0xbe4] ss:$36 sps:$4 sm:$0xff]  }
 0x599   :  { %12959 = vmatpush1.bf16.msra.mxu1 %v17434_v48  ;;  %v17488_v48 = vld [vmem:[#allocation11 + $0x760] ss:$36 sps:$4 sm:$0xff]  }
 0x59a   :  { %13002 = vmatpush1.bf16.msra.mxu0 %v17437_v18  ;;  %12960 = vmatprep.subr.bf16.mxu1 %v17442_v50  ;;  %v17491_v18 = vld [vmem:[#allocation11 + $0xbe0] ss:$36 sps:$4 sm:$0xff]  }
 0x59b   :  { %13003 = vmatprep.subr.bf16.mxu0 %v17445_v51  ;;  %v17496_v50 = vld [vmem:[#allocation11 + $0x71c] ss:$36 sps:$4 sm:$0xff]  }
 0x59c   :  { %v17499_v51 = vld [vmem:[#allocation11 + $0xb9c] ss:$36 sps:$4 sm:$0xff]  }
 0x59d   :  { %12961 = vmatpush1.bf16.msra.mxu1 %v17440_v52  ;;  %v17494_v52 = vld [vmem:[#allocation11 + $0x718] ss:$36 sps:$4 sm:$0xff]  }
 0x59e   :  { %13004 = vmatpush1.bf16.msra.mxu0 %v17443_v5  ;;  %12962 = vmatprep.subr.bf16.mxu1 %v17448_v30  ;;  %v17497_v5 = vld [vmem:[#allocation11 + $0xb98] ss:$36 sps:$4 sm:$0xff]  }
 0x59f   :  { %13005 = vmatprep.subr.bf16.mxu0 %v17451_v25  ;;  %v17502_v30 = vld [vmem:[#allocation11 + $0x6d4] ss:$36 sps:$4 sm:$0xff]  }
 0x5a0   :  { %v17505_v25 = vld [vmem:[#allocation11 + $0xb54] ss:$36 sps:$4 sm:$0xff]  }
 0x5a1   :  { %12963 = vmatpush1.bf16.msra.mxu1 %v17446_v54  ;;  %v17500_v54 = vld [vmem:[#allocation11 + $0x6d0] ss:$36 sps:$4 sm:$0xff]  }
 0x5a2   :  { %13006 = vmatpush1.bf16.msra.mxu0 %v17449_v43  ;;  %12964 = vmatprep.subr.bf16.mxu1 %v17454_v55  ;;  %v17503_v43 = vld [vmem:[#allocation11 + $0xb50] ss:$36 sps:$4 sm:$0xff]  }
 0x5a3   :  { %13007 = vmatprep.subr.bf16.mxu0 %v17457_v49  ;;  %v17508_v55 = vld [vmem:[#allocation11 + $0xf8c] ss:$36 sps:$4 sm:$0xff]  }
 0x5a4   :  { %v17511_v49 = vld [vmem:[#allocation11 + $0x140c] ss:$36 sps:$4 sm:$0xff]  }
 0x5a5   :  { %12965 = vmatpush1.bf16.msra.mxu1 %v17452_v59  ;;  %v17506_v59 = vld [vmem:[#allocation11 + $0xf88] ss:$36 sps:$4 sm:$0xff]  }
 0x5a6   :  { %13008 = vmatpush1.bf16.msra.mxu0 %v17455_v47  ;;  %12966 = vmatprep.subr.bf16.mxu1 %v17460_v1  ;;  %v17509_v47 = vld [vmem:[#allocation11 + $0x1408] ss:$36 sps:$4 sm:$0xff]  }
 0x5a7   :  { %13009 = vmatprep.subr.bf16.mxu0 %v17463_v4  ;;  %v17514_v1 = vld [vmem:[#allocation11 + $0xf44] ss:$36 sps:$4 sm:$0xff]  }
 0x5a9   :  { %12967 = vmatpush2.bf16.msra.mxu1 %v17458_v7  ;;  %v17517_v7 = vld [vmem:[#allocation11 + $0x13c4] ss:$36 sps:$4 sm:$0xff]  }
 0x5aa   :  { %13010 = vmatpush2.bf16.msra.mxu0 %v17461_v6  ;;  %12968 = vmatprep.subr.bf16.mxu1 %v17466_v27 }
 0x5ab   :  { %13011 = vmatprep.subr.bf16.mxu0 %v17469_v24  ;;  %v17512_v24 = vld [vmem:[#allocation11 + $0xf40] ss:$36 sps:$4 sm:$0xff]  }
 0x5ad   :  { %12969 = vmatpush2.bf16.msra.mxu1 %v17464_v22 }
 0x5ae   :  { %13012 = vmatpush2.bf16.msra.mxu0 %v17467_v44  ;;  %12970 = vmatprep.subr.bf16.mxu1 %v17472_v33  ;;  %v17515_v44 = vld [vmem:[#allocation11 + $0x13c0] ss:$36 sps:$4 sm:$0xff]  }
 0x5af   :  { %13013 = vmatprep.subr.bf16.mxu0 %v17475_v19  ;;  %v17520_v33 = vld [vmem:[#allocation11 + $0xefc] ss:$36 sps:$4 sm:$0xff]  }
 0x5b1   :  { %12971 = vmatpush2.bf16.msra.mxu1 %v17470_v17 }
 0x5b2   :  { %13014 = vmatpush2.bf16.msra.mxu0 %v17473_v20  ;;  %12972 = vmatprep.subr.bf16.mxu1 %v17478_v63 }
 0x5b3   :  { %13015 = vmatprep.subr.bf16.mxu0 %v17481_v28 }
 0x5b5   :  { %12973 = vmatpush2.bf16.msra.mxu1 %v17476_v41 }
 0x5b6   :  { %13016 = vmatpush2.bf16.msra.mxu0 %v17479_v10  ;;  %12974 = vmatprep.subr.bf16.mxu1 %v17484_v45  ;;  %v17518_v45 = vld [vmem:[#allocation11 + $0xef8] ss:$36 sps:$4 sm:$0xff]  }
 0x5b7   :  { %13017 = vmatprep.subr.bf16.mxu0 %v17487_v53 }
 0x5b9   :  { %12975 = vmatpush2.bf16.msra.mxu1 %v17482_v46  ;;  %v17521_v46 = vld [vmem:[#allocation11 + $0x1378] ss:$36 sps:$4 sm:$0xff]  }
 0x5ba   :  { %13018 = vmatpush2.bf16.msra.mxu0 %v17485_v40  ;;  %12976 = vmatprep.subr.bf16.mxu1 %v17490_v14  ;;  %v17526_v40 = vld [vmem:[#allocation11 + $0xeb4] ss:$36 sps:$4 sm:$0xff]  }
 0x5bb   :  { %13019 = vmatprep.subr.bf16.mxu0 %v17493_v32  ;;  %v17529_v32 = vld [vmem:[#allocation11 + $0x1334] ss:$36 sps:$4 sm:$0xff]  }
 0x5bd   :  { %12977 = vmatpush2.bf16.msra.mxu1 %v17488_v48 }
 0x5be   :  { %13020 = vmatpush2.bf16.msra.mxu0 %v17491_v18  ;;  %12978 = vmatprep.subr.bf16.mxu1 %v17496_v50  ;;  %v17524_v50 = vld [vmem:[#allocation11 + $0xeb0] ss:$36 sps:$4 sm:$0xff]  }
 0x5bf   :  { %13021 = vmatprep.subr.bf16.mxu0 %v17499_v51  ;;  %v17532_v51 = vld [vmem:[#allocation11 + $0xe6c] ss:$36 sps:$4 sm:$0xff]  }
 0x5c1   :  { %12979 = vmatpush2.bf16.msra.mxu1 %v17494_v52  ;;  %v17535_v52 = vld [vmem:[#allocation11 + $0x12ec] ss:$36 sps:$4 sm:$0xff]  }
 0x5c2   :  { %13022 = vmatpush2.bf16.msra.mxu0 %v17497_v5  ;;  %12980 = vmatprep.subr.bf16.mxu1 %v17502_v30  ;;  %v17530_v5 = vld [vmem:[#allocation11 + $0xe68] ss:$36 sps:$4 sm:$0xff]  }
 0x5c3   :  { %13023 = vmatprep.subr.bf16.mxu0 %v17505_v25  ;;  %v17533_v30 = vld [vmem:[#allocation11 + $0x12e8] ss:$36 sps:$4 sm:$0xff]  }
 0x5c4   :  { %v17538_v25 = vld [vmem:[#allocation11 + $0xe24] ss:$36 sps:$4 sm:$0xff]  }
 0x5c5   :  { %12981 = vmatpush2.bf16.msra.mxu1 %v17500_v54  ;;  %v17536_v54 = vld [vmem:[#allocation11 + $0xe20] ss:$36 sps:$4 sm:$0xff]  }
 0x5c6   :  { %13024 = vmatpush2.bf16.msra.mxu0 %v17503_v43  ;;  %13036 = vmatprep.subr.bf16.mxu1 %v17508_v55  ;;  %v17539_v43 = vld [vmem:[#allocation11 + $0x12a0] ss:$36 sps:$4 sm:$0xff]  }
 0x5c7   :  { %13079 = vmatprep.subr.bf16.mxu0 %v17511_v49  ;;  %v17544_v55 = vld [vmem:[#allocation11 + $0xddc] ss:$36 sps:$4 sm:$0xff]  }
 0x5c8   :  { %v12726_v4 = vpop.f32.mrf.mxu1  ;;  %12983 = vmatmul.mubr.bf16.vlgmr.msra.gmra.mxu1 %v18773_v23  ;;  %v17547_v49 = vld [vmem:[#allocation11 + $0x125c] ss:$36 sps:$4 sm:$0xff]  }
 0x5c9   :  { %v12727_v6 = vadd.f32 %v12726_v4, %v19011_v11  ;;  %v12769_v27 = vpop.f32.mrf.mxu0  ;;  %13026 = vmatmul.mubr.bf16.vlgmr.msra.gmra.mxu0 %v18794_v60  ;;  %13037 = vmatpush1.bf16.msra.mxu1 %v17506_v59  ;;  %v17523_v11 = vld [vmem:[#allocation11 + $0x137c] ss:$36 sps:$4 sm:$0xff]   ;;  %v17553_v4 = vld [vmem:[#allocation11 + $0x1214] ss:$36 sps:$4 sm:$0xff]  }
 0x5ca   :  { %13068 = vmatprep.mubr.bf16.mxu1 %v18879_v34  ;;  %13080 = vmatpush1.bf16.msra.mxu0 %v17509_v47  ;;  %v12728_v22 = vpop.f32.mrf.mxu1  ;;  %v17542_v59 = vld [vmem:[#allocation11 + $0xdd8] ss:$36 sps:$4 sm:$0xff]  }
 0x5cb   :  { %v19024_v19 = vadd.f32 %v12769_v27, %v12727_v6  ;;  %13111 = vmatprep.mubr.bf16.mxu0 %v18882_v58  ;;  %v12729_v17 = vadd.f32 %v12728_v22, %v19014_v37  ;;  %v12771_v20 = vpop.f32.mrf.mxu0  ;;  %13038 = vmatprep.subr.bf16.mxu1 %v17514_v1  ;;  %v17545_v47 = vld [vmem:[#allocation11 + $0x1258] ss:$36 sps:$4 sm:$0xff]   ;;  %v17551_v6 = vld [vmem:[#allocation11 + $0x1210] ss:$36 sps:$4 sm:$0xff]   ;;  %v17554_v22 = vld [vmem:[#allocation11 + $0x11c8] ss:$36 sps:$4 sm:$0xff]  }
 0x5cc   :  { %v12730_v63 = vpop.f32.mrf.mxu1  ;;  %13081 = vmatprep.subr.bf16.mxu0 %v17517_v7  ;;  %v17550_v1 = vld [vmem:[#allocation11 + $0xd94] ss:$36 sps:$4 sm:$0xff]   ;;  %v17556_v27 = vld [vmem:[#allocation11 + $0x11cc] ss:$36 sps:$4 sm:$0xff]  }
 0x5cd   :  { %v19028_v28 = vadd.f32 %v12771_v20, %v12729_v17  ;;  %v12731_v41 = vadd.f32 %v12730_v63, %v19016_v31  ;;  %v12773_v10 = vpop.f32.mrf.mxu0  ;;  %13039 = vmatpush1.bf16.msra.mxu1 %v17512_v24  ;;  %v17527_v31 = vld [vmem:[#allocation11 + $0x1330] ss:$36 sps:$4 sm:$0xff]   ;;  %v17565_v17 = vld [vmem:[#allocation11 + $0x1604] ss:$36 sps:$4 sm:$0xff]   ;;  %v17568_v63 = vld [vmem:[#allocation11 + $0x113c] ss:$36 sps:$4 sm:$0xff]  }
 0x5ce   :  { %13082 = vmatpush1.bf16.msra.mxu0 %v17515_v44  ;;  %v12732_v53 = vpop.f32.mrf.mxu1  ;;  %13040 = vmatprep.subr.bf16.mxu1 %v17520_v33  ;;  %v17548_v7 = vld [vmem:[#allocation11 + $0xd90] ss:$36 sps:$4 sm:$0xff]   ;;  %v17557_v44 = vld [vmem:[#allocation11 + $0x1648] ss:$36 sps:$4 sm:$0xff]   ;;  %v17560_v20 = vld [vmem:[#allocation11 + $0x1180] ss:$36 sps:$4 sm:$0xff]  }
 0x5cf   :  { %v19031_v14 = vadd.f32 %v12773_v10, %v12731_v41  ;;  %v12733_v37 = vadd.f32 %v12732_v53, %v19018_v21  ;;  %13083 = vmatprep.subr.bf16.mxu0 %v17523_v11  ;;  %v12775_v48 = vpop.f32.mrf.mxu0  ;;  %v17541_v21 = vld [vmem:[#allocation11 + $0x12a4] ss:$36 sps:$4 sm:$0xff]   ;;  %v17559_v24 = vld [vmem:[#allocation11 + $0x164c] ss:$36 sps:$4 sm:$0xff]   ;;  %v17571_v41 = vld [vmem:[#allocation11 + $0x15bc] ss:$36 sps:$4 sm:$0xff]  }
 0x5d0   :  { %v17562_v33 = vld [vmem:[#allocation11 + $0x1184] ss:$36 sps:$4 sm:$0xff]   ;;  %v17566_v10 = vld [vmem:[#allocation11 + $0x1138] ss:$36 sps:$4 sm:$0xff]  }
 0x5d1   :  { %v19034_v18 = vadd.f32 %v12775_v48, %v12733_v37  ;;  %13041 = vmatpush1.bf16.msra.mxu1 %v17518_v45  ;;  %v17563_v11 = vld [vmem:[#allocation11 + $0x1600] ss:$36 sps:$4 sm:$0xff]   ;;  %v17569_v45 = vld [vmem:[#allocation11 + $0x15b8] ss:$36 sps:$4 sm:$0xff]   ;;  %v17575_v37 = vld [vmem:[#allocation11 + $0x1570] ss:$36 sps:$4 sm:$0xff]  }
 0x5d2   :  { %13084 = vmatpush1.bf16.msra.mxu0 %v17521_v46  ;;  %13042 = vmatprep.subr.bf16.mxu1 %v17526_v40  ;;  %v17574_v53 = vld [vmem:[#allocation11 + $0x10f4] ss:$36 sps:$4 sm:$0xff]   ;;  %v17583_v48 = vld [vmem:[#allocation11 + $0x152c] ss:$36 sps:$4 sm:$0xff]  }
 0x5d3   :  { %13085 = vmatprep.subr.bf16.mxu0 %v17529_v32  ;;  %v17577_v46 = vld [vmem:[#allocation11 + $0x1574] ss:$36 sps:$4 sm:$0xff]   ;;  %v17580_v32 = vld [vmem:[#allocation11 + $0x10ac] ss:$36 sps:$4 sm:$0xff]  }
 0x5d4   :  { %v17572_v40 = vld [vmem:[#allocation11 + $0x10f0] ss:$36 sps:$4 sm:$0xff]  }
 0x5d5   :  { %13043 = vmatpush1.bf16.msra.mxu1 %v17524_v50  ;;  %v17578_v50 = vld [vmem:[#allocation11 + $0x10a8] ss:$36 sps:$4 sm:$0xff]  }
 0x5d6   :  { %13086 = vmatpush1.bf16.msra.mxu0 %v17527_v31  ;;  %13044 = vmatprep.subr.bf16.mxu1 %v17532_v51  ;;  %v17581_v31 = vld [vmem:[#allocation11 + $0x1528] ss:$36 sps:$4 sm:$0xff]  }
 0x5d7   :  { %13087 = vmatprep.subr.bf16.mxu0 %v17535_v52  ;;  %v17586_v51 = vld [vmem:[#allocation11 + $0x1064] ss:$36 sps:$4 sm:$0xff]  }
 0x5d8   :  { %v17589_v52 = vld [vmem:[#allocation11 + $0x14e4] ss:$36 sps:$4 sm:$0xff]  }
 0x5d9   :  { %13045 = vmatpush1.bf16.msra.mxu1 %v17530_v5  ;;  %v17584_v5 = vld [vmem:[#allocation11 + $0x1060] ss:$36 sps:$4 sm:$0xff]  }
 0x5da   :  { %13088 = vmatpush1.bf16.msra.mxu0 %v17533_v30  ;;  %13046 = vmatprep.subr.bf16.mxu1 %v17538_v25  ;;  %v17587_v30 = vld [vmem:[#allocation11 + $0x14e0] ss:$36 sps:$4 sm:$0xff]  }
 0x5db   :  { %13089 = vmatprep.subr.bf16.mxu0 %v17541_v21  ;;  %v17592_v25 = vld [vmem:[#allocation11 + $0x101c] ss:$36 sps:$4 sm:$0xff]  }
 0x5dc   :  { %v17595_v21 = vld [vmem:[#allocation11 + $0x149c] ss:$36 sps:$4 sm:$0xff]  }
 0x5dd   :  { %13047 = vmatpush1.bf16.msra.mxu1 %v17536_v54  ;;  %v17590_v54 = vld [vmem:[#allocation11 + $0x1018] ss:$36 sps:$4 sm:$0xff]  }
 0x5de   :  { %13090 = vmatpush1.bf16.msra.mxu0 %v17539_v43  ;;  %13048 = vmatprep.subr.bf16.mxu1 %v17544_v55  ;;  %v17593_v43 = vld [vmem:[#allocation11 + $0x1498] ss:$36 sps:$4 sm:$0xff]  }
 0x5df   :  { %13091 = vmatprep.subr.bf16.mxu0 %v17547_v49  ;;  %v17598_v55 = vld [vmem:[#allocation11 + $0xfd4] ss:$36 sps:$4 sm:$0xff]  }
 0x5e0   :  { %v17601_v49 = vld [vmem:[#allocation11 + $0x1454] ss:$36 sps:$4 sm:$0xff]  }
 0x5e1   :  { %13049 = vmatpush1.bf16.msra.mxu1 %v17542_v59  ;;  %v17596_v59 = vld [vmem:[#allocation11 + $0xfd0] ss:$36 sps:$4 sm:$0xff]  }
 0x5e2   :  { %13092 = vmatpush1.bf16.msra.mxu0 %v17545_v47  ;;  %13050 = vmatprep.subr.bf16.mxu1 %v17550_v1  ;;  %v17599_v47 = vld [vmem:[#allocation11 + $0x1450] ss:$36 sps:$4 sm:$0xff]  }
 0x5e3   :  { %13093 = vmatprep.subr.bf16.mxu0 %v17553_v4  ;;  %v17604_v1 = vld [vmem:[#allocation11 + $0x188c] ss:$36 sps:$4 sm:$0xff]  }
 0x5e4   :  { %v17607_v4 = vld [vmem:[#allocation11 + $0x1d0c] ss:$36 sps:$4 sm:$0xff]  }
 0x5e5   :  { %13051 = vmatpush1.bf16.msra.mxu1 %v17548_v7  ;;  %v17602_v7 = vld [vmem:[#allocation11 + $0x1888] ss:$36 sps:$4 sm:$0xff]  }
 0x5e6   :  { %13094 = vmatpush1.bf16.msra.mxu0 %v17551_v6  ;;  %13052 = vmatprep.subr.bf16.mxu1 %v17556_v27  ;;  %v17605_v6 = vld [vmem:[#allocation11 + $0x1d08] ss:$36 sps:$4 sm:$0xff]  }
 0x5e7   :  { %13095 = vmatprep.subr.bf16.mxu0 %v17559_v24  ;;  %v17610_v27 = vld [vmem:[#allocation11 + $0x1844] ss:$36 sps:$4 sm:$0xff]  }
 0x5e9   :  { %13053 = vmatpush2.bf16.msra.mxu1 %v17554_v22  ;;  %v17613_v22 = vld [vmem:[#allocation11 + $0x1cc4] ss:$36 sps:$4 sm:$0xff]  }
 0x5ea   :  { %13096 = vmatpush2.bf16.msra.mxu0 %v17557_v44  ;;  %13054 = vmatprep.subr.bf16.mxu1 %v17562_v33 }
 0x5eb   :  { %13097 = vmatprep.subr.bf16.mxu0 %v17565_v17  ;;  %v17608_v17 = vld [vmem:[#allocation11 + $0x1840] ss:$36 sps:$4 sm:$0xff]  }
 0x5ed   :  { %13055 = vmatpush2.bf16.msra.mxu1 %v17560_v20 }
 0x5ee   :  { %13098 = vmatpush2.bf16.msra.mxu0 %v17563_v11  ;;  %13056 = vmatprep.subr.bf16.mxu1 %v17568_v63  ;;  %v17611_v11 = vld [vmem:[#allocation11 + $0x1cc0] ss:$36 sps:$4 sm:$0xff]  }
 0x5ef   :  { %13099 = vmatprep.subr.bf16.mxu0 %v17571_v41  ;;  %v17616_v63 = vld [vmem:[#allocation11 + $0x17fc] ss:$36 sps:$4 sm:$0xff]  }
 0x5f1   :  { %13057 = vmatpush2.bf16.msra.mxu1 %v17566_v10 }
 0x5f2   :  { %13100 = vmatpush2.bf16.msra.mxu0 %v17569_v45  ;;  %13058 = vmatprep.subr.bf16.mxu1 %v17574_v53 }
 0x5f3   :  { %13101 = vmatprep.subr.bf16.mxu0 %v17577_v46 }
 0x5f5   :  { %13059 = vmatpush2.bf16.msra.mxu1 %v17572_v40 }
 0x5f6   :  { %13102 = vmatpush2.bf16.msra.mxu0 %v17575_v37  ;;  %13060 = vmatprep.subr.bf16.mxu1 %v17580_v32  ;;  %v17614_v32 = vld [vmem:[#allocation11 + $0x17f8] ss:$36 sps:$4 sm:$0xff]  }
 0x5f7   :  { %13103 = vmatprep.subr.bf16.mxu0 %v17583_v48 }
 0x5f9   :  { %13061 = vmatpush2.bf16.msra.mxu1 %v17578_v50  ;;  %v17617_v50 = vld [vmem:[#allocation11 + $0x1c78] ss:$36 sps:$4 sm:$0xff]  }
 0x5fa   :  { %13104 = vmatpush2.bf16.msra.mxu0 %v17581_v31  ;;  %13062 = vmatprep.subr.bf16.mxu1 %v17586_v51  ;;  %v17622_v31 = vld [vmem:[#allocation11 + $0x17b4] ss:$36 sps:$4 sm:$0xff]  }
 0x5fb   :  { %13105 = vmatprep.subr.bf16.mxu0 %v17589_v52  ;;  %v17625_v52 = vld [vmem:[#allocation11 + $0x1c34] ss:$36 sps:$4 sm:$0xff]  }
 0x5fd   :  { %13063 = vmatpush2.bf16.msra.mxu1 %v17584_v5 }
 0x5fe   :  { %13106 = vmatpush2.bf16.msra.mxu0 %v17587_v30  ;;  %13064 = vmatprep.subr.bf16.mxu1 %v17592_v25  ;;  %v17620_v25 = vld [vmem:[#allocation11 + $0x17b0] ss:$36 sps:$4 sm:$0xff]  }
 0x5ff   :  { %13107 = vmatprep.subr.bf16.mxu0 %v17595_v21  ;;  %v17628_v21 = vld [vmem:[#allocation11 + $0x176c] ss:$36 sps:$4 sm:$0xff]  }
 0x601   :  { %13065 = vmatpush2.bf16.msra.mxu1 %v17590_v54  ;;  %v17631_v54 = vld [vmem:[#allocation11 + $0x1bec] ss:$36 sps:$4 sm:$0xff]  }
 0x602   :  { %13108 = vmatpush2.bf16.msra.mxu0 %v17593_v43  ;;  %13066 = vmatprep.subr.bf16.mxu1 %v17598_v55  ;;  %v17626_v43 = vld [vmem:[#allocation11 + $0x1768] ss:$36 sps:$4 sm:$0xff]  }
 0x603   :  { %13109 = vmatprep.subr.bf16.mxu0 %v17601_v49  ;;  %v17629_v55 = vld [vmem:[#allocation11 + $0x1be8] ss:$36 sps:$4 sm:$0xff]  }
 0x604   :  { %v17634_v49 = vld [vmem:[#allocation11 + $0x1724] ss:$36 sps:$4 sm:$0xff]  }
 0x605   :  { %13067 = vmatpush2.bf16.msra.mxu1 %v17596_v59  ;;  %v17632_v59 = vld [vmem:[#allocation11 + $0x1720] ss:$36 sps:$4 sm:$0xff]  }
 0x606   :  { %13110 = vmatpush2.bf16.msra.mxu0 %v17599_v47  ;;  %13122 = vmatprep.subr.bf16.mxu1 %v17604_v1  ;;  %v17635_v47 = vld [vmem:[#allocation11 + $0x1ba0] ss:$36 sps:$4 sm:$0xff]  }
 0x607   :  { %13165 = vmatprep.subr.bf16.mxu0 %v17607_v4  ;;  %v17640_v1 = vld [vmem:[#allocation11 + $0x16dc] ss:$36 sps:$4 sm:$0xff]  }
 0x608   :  { %v12812_v24 = vpop.f32.mrf.mxu1  ;;  %13069 = vmatmul.mubr.bf16.vlgmr.msra.gmra.mxu1 %v18821_v36  ;;  %v17643_v4 = vld [vmem:[#allocation11 + $0x1b5c] ss:$36 sps:$4 sm:$0xff]  }
 0x609   :  { %v12813_v44 = vadd.f32 %v12812_v24, %v19024_v19  ;;  %v12855_v33 = vpop.f32.mrf.mxu0  ;;  %13112 = vmatmul.mubr.bf16.vlgmr.msra.gmra.mxu0 %v18860_v35  ;;  %13123 = vmatpush1.bf16.msra.mxu1 %v17602_v7  ;;  %v17619_v19 = vld [vmem:[#allocation11 + $0x1c7c] ss:$36 sps:$4 sm:$0xff]   ;;  %v17649_v24 = vld [vmem:[#allocation11 + $0x1b14] ss:$36 sps:$4 sm:$0xff]  }
 0x60a   :  { %13154 = vmatprep.mubr.bf16.mxu1 %v18899_v9  ;;  %13166 = vmatpush1.bf16.msra.mxu0 %v17605_v6  ;;  %v12814_v20 = vpop.f32.mrf.mxu1  ;;  %v17638_v7 = vld [vmem:[#allocation11 + $0x16d8] ss:$36 sps:$4 sm:$0xff]  }
 0x60b   :  { %v19040_v41 = vadd.f32 %v12855_v33, %v12813_v44  ;;  %13197 = vmatprep.mubr.bf16.mxu0 %v18910_v0  ;;  %v12815_v10 = vadd.f32 %v12814_v20, %v19028_v28  ;;  %v12857_v45 = vpop.f32.mrf.mxu0  ;;  %13124 = vmatprep.subr.bf16.mxu1 %v17610_v27  ;;  %v17641_v6 = vld [vmem:[#allocation11 + $0x1b58] ss:$36 sps:$4 sm:$0xff]   ;;  %v17647_v44 = vld [vmem:[#allocation11 + $0x1b10] ss:$36 sps:$4 sm:$0xff]   ;;  %v17650_v20 = vld [vmem:[#allocation11 + $0x1ac8] ss:$36 sps:$4 sm:$0xff]  }
 0x60c   :  { %v12816_v53 = vpop.f32.mrf.mxu1  ;;  %13167 = vmatprep.subr.bf16.mxu0 %v17613_v22  ;;  %v17646_v27 = vld [vmem:[#allocation11 + $0x1694] ss:$36 sps:$4 sm:$0xff]   ;;  %v17652_v33 = vld [vmem:[#allocation11 + $0x1acc] ss:$36 sps:$4 sm:$0xff]  }
 0x60d   :  { %v19044_v46 = vadd.f32 %v12857_v45, %v12815_v10  ;;  %v12817_v40 = vadd.f32 %v12816_v53, %v19031_v14  ;;  %v12859_v37 = vpop.f32.mrf.mxu0  ;;  %13125 = vmatpush1.bf16.msra.mxu1 %v17608_v17  ;;  %v17623_v14 = vld [vmem:[#allocation11 + $0x1c30] ss:$36 sps:$4 sm:$0xff]   ;;  %v17661_v10 = vld [vmem:[#allocation11 + $0x1f04] ss:$36 sps:$4 sm:$0xff]   ;;  %v17664_v53 = vld [vmem:[#allocation11 + $0x1a3c] ss:$36 sps:$4 sm:$0xff]  }
 0x60e   :  { %13168 = vmatpush1.bf16.msra.mxu0 %v17611_v11  ;;  %v12818_v48 = vpop.f32.mrf.mxu1  ;;  %13126 = vmatprep.subr.bf16.mxu1 %v17616_v63  ;;  %v17644_v22 = vld [vmem:[#allocation11 + $0x1690] ss:$36 sps:$4 sm:$0xff]   ;;  %v17653_v11 = vld [vmem:[#allocation11 + $0x1f48] ss:$36 sps:$4 sm:$0xff]   ;;  %v17656_v45 = vld [vmem:[#allocation11 + $0x1a80] ss:$36 sps:$4 sm:$0xff]  }
 0x60f   :  { %v19047_v51 = vadd.f32 %v12859_v37, %v12817_v40  ;;  %v12819_v28 = vadd.f32 %v12818_v48, %v19034_v18  ;;  %13169 = vmatprep.subr.bf16.mxu0 %v17619_v19  ;;  %v12861_v5 = vpop.f32.mrf.mxu0  ;;  %v17637_v18 = vld [vmem:[#allocation11 + $0x1ba4] ss:$36 sps:$4 sm:$0xff]   ;;  %v17655_v17 = vld [vmem:[#allocation11 + $0x1f4c] ss:$36 sps:$4 sm:$0xff]   ;;  %v17667_v40 = vld [vmem:[#allocation11 + $0x1ebc] ss:$36 sps:$4 sm:$0xff]  }
 0x610   :  { %v17658_v63 = vld [vmem:[#allocation11 + $0x1a84] ss:$36 sps:$4 sm:$0xff]   ;;  %v17662_v37 = vld [vmem:[#allocation11 + $0x1a38] ss:$36 sps:$4 sm:$0xff]  }
 0x611   :  { %v19050_v30 = vadd.f32 %v12861_v5, %v12819_v28  ;;  %13127 = vmatpush1.bf16.msra.mxu1 %v17614_v32  ;;  %v17659_v19 = vld [vmem:[#allocation11 + $0x1f00] ss:$36 sps:$4 sm:$0xff]   ;;  %v17665_v32 = vld [vmem:[#allocation11 + $0x1eb8] ss:$36 sps:$4 sm:$0xff]   ;;  %v17671_v28 = vld [vmem:[#allocation11 + $0x1e70] ss:$36 sps:$4 sm:$0xff]  }
 0x612   :  { %13170 = vmatpush1.bf16.msra.mxu0 %v17617_v50  ;;  %13128 = vmatprep.subr.bf16.mxu1 %v17622_v31  ;;  %v17670_v48 = vld [vmem:[#allocation11 + $0x19f4] ss:$36 sps:$4 sm:$0xff]   ;;  %v17679_v5 = vld [vmem:[#allocation11 + $0x1e2c] ss:$36 sps:$4 sm:$0xff]  }
 0x613   :  { %13171 = vmatprep.subr.bf16.mxu0 %v17625_v52  ;;  %v17673_v50 = vld [vmem:[#allocation11 + $0x1e74] ss:$36 sps:$4 sm:$0xff]   ;;  %v17676_v52 = vld [vmem:[#allocation11 + $0x19ac] ss:$36 sps:$4 sm:$0xff]  }
 0x614   :  { %v17668_v31 = vld [vmem:[#allocation11 + $0x19f0] ss:$36 sps:$4 sm:$0xff]  }
 0x615   :  { %13129 = vmatpush1.bf16.msra.mxu1 %v17620_v25  ;;  %v17674_v25 = vld [vmem:[#allocation11 + $0x19a8] ss:$36 sps:$4 sm:$0xff]  }
 0x616   :  { %13172 = vmatpush1.bf16.msra.mxu0 %v17623_v14  ;;  %13130 = vmatprep.subr.bf16.mxu1 %v17628_v21  ;;  %v17677_v14 = vld [vmem:[#allocation11 + $0x1e28] ss:$36 sps:$4 sm:$0xff]  }
 0x617   :  { %13173 = vmatprep.subr.bf16.mxu0 %v17631_v54  ;;  %v17682_v21 = vld [vmem:[#allocation11 + $0x1964] ss:$36 sps:$4 sm:$0xff]  }
 0x618   :  { %v17685_v54 = vld [vmem:[#allocation11 + $0x1de4] ss:$36 sps:$4 sm:$0xff]  }
 0x619   :  { %13131 = vmatpush1.bf16.msra.mxu1 %v17626_v43  ;;  %v17680_v43 = vld [vmem:[#allocation11 + $0x1960] ss:$36 sps:$4 sm:$0xff]  }
 0x61a   :  { %13174 = vmatpush1.bf16.msra.mxu0 %v17629_v55  ;;  %13132 = vmatprep.subr.bf16.mxu1 %v17634_v49  ;;  %v17683_v55 = vld [vmem:[#allocation11 + $0x1de0] ss:$36 sps:$4 sm:$0xff]  }
 0x61b   :  { %13175 = vmatprep.subr.bf16.mxu0 %v17637_v18  ;;  %v17688_v49 = vld [vmem:[#allocation11 + $0x191c] ss:$36 sps:$4 sm:$0xff]  }
 0x61c   :  { %v17691_v18 = vld [vmem:[#allocation11 + $0x1d9c] ss:$36 sps:$4 sm:$0xff]  }
 0x61d   :  { %13133 = vmatpush1.bf16.msra.mxu1 %v17632_v59  ;;  %v17686_v59 = vld [vmem:[#allocation11 + $0x1918] ss:$36 sps:$4 sm:$0xff]  }
 0x61e   :  { %13176 = vmatpush1.bf16.msra.mxu0 %v17635_v47  ;;  %13134 = vmatprep.subr.bf16.mxu1 %v17640_v1  ;;  %v17689_v47 = vld [vmem:[#allocation11 + $0x1d98] ss:$36 sps:$4 sm:$0xff]  }
 0x61f   :  { %13177 = vmatprep.subr.bf16.mxu0 %v17643_v4  ;;  %v17694_v1 = vld [vmem:[#allocation11 + $0x18d4] ss:$36 sps:$4 sm:$0xff]  }
 0x620   :  { %v17697_v4 = vld [vmem:[#allocation11 + $0x1d54] ss:$36 sps:$4 sm:$0xff]  }
 0x621   :  { %13135 = vmatpush1.bf16.msra.mxu1 %v17638_v7  ;;  %v17692_v7 = vld [vmem:[#allocation11 + $0x18d0] ss:$36 sps:$4 sm:$0xff]  }
 0x622   :  { %13178 = vmatpush1.bf16.msra.mxu0 %v17641_v6  ;;  %13136 = vmatprep.subr.bf16.mxu1 %v17646_v27  ;;  %v17695_v6 = vld [vmem:[#allocation11 + $0x1d50] ss:$36 sps:$4 sm:$0xff]  }
 0x623   :  { %13179 = vmatprep.subr.bf16.mxu0 %v17649_v24  ;;  %v17700_v27 = vld [vmem:[#allocation11 + $0x218c] ss:$36 sps:$4 sm:$0xff]   ;;  %v17703_v24 = vld [vmem:[#allocation11 + $0x214] ss:$36 sps:$4 sm:$0xff]  }
 0x625   :  { %13137 = vmatpush1.bf16.msra.mxu1 %v17644_v22  ;;  %v17698_v22 = vld [vmem:[#allocation11 + $0x2188] ss:$36 sps:$4 sm:$0xff]  }
 0x626   :  { %13180 = vmatpush1.bf16.msra.mxu0 %v17647_v44  ;;  %13138 = vmatprep.subr.bf16.mxu1 %v17652_v33  ;;  %v17701_v44 = vld [vmem:[#allocation11 + $0x210] ss:$36 sps:$4 sm:$0xff]   ;;  %v17706_v33 = vld [vmem:[#allocation11 + $0x2144] ss:$36 sps:$4 sm:$0xff]  }
 0x627   :  { %13181 = vmatprep.subr.bf16.mxu0 %v17655_v17 }
 0x629   :  { %13139 = vmatpush2.bf16.msra.mxu1 %v17650_v20  ;;  %v17709_v20 = vld [vmem:[#allocation11 + $0x1cc] ss:$36 sps:$4 sm:$0xff]  }
 0x62a   :  { %13182 = vmatpush2.bf16.msra.mxu0 %v17653_v11  ;;  %13140 = vmatprep.subr.bf16.mxu1 %v17658_v63  ;;  %v17704_v63 = vld [vmem:[#allocation11 + $0x2140] ss:$36 sps:$4 sm:$0xff]  }
 0x62b   :  { %13183 = vmatprep.subr.bf16.mxu0 %v17661_v10 }
 0x62d   :  { %13141 = vmatpush2.bf16.msra.mxu1 %v17656_v45  ;;  %v17707_v45 = vld [vmem:[#allocation11 + $0x1c8] ss:$36 sps:$4 sm:$0xff]  }
 0x62e   :  { %13184 = vmatpush2.bf16.msra.mxu0 %v17659_v19  ;;  %13142 = vmatprep.subr.bf16.mxu1 %v17664_v53  ;;  %v17712_v19 = vld [vmem:[#allocation11 + $0x20fc] ss:$36 sps:$4 sm:$0xff]  }
 0x62f   :  { %13185 = vmatprep.subr.bf16.mxu0 %v17667_v40  ;;  %v17715_v40 = vld [vmem:[#allocation11 + $0x184] ss:$36 sps:$4 sm:$0xff]  }
 0x631   :  { %13143 = vmatpush2.bf16.msra.mxu1 %v17662_v37 }
 0x632   :  { %13186 = vmatpush2.bf16.msra.mxu0 %v17665_v32  ;;  %13144 = vmatprep.subr.bf16.mxu1 %v17670_v48  ;;  %v17710_v32 = vld [vmem:[#allocation11 + $0x20f8] ss:$36 sps:$4 sm:$0xff]  }
 0x633   :  { %13187 = vmatprep.subr.bf16.mxu0 %v17673_v50  ;;  %v17713_v50 = vld [vmem:[#allocation11 + $0x180] ss:$36 sps:$4 sm:$0xff]  }
 0x635   :  { %13145 = vmatpush2.bf16.msra.mxu1 %v17668_v31  ;;  %v17718_v31 = vld [vmem:[#allocation11 + $0x20b4] ss:$36 sps:$4 sm:$0xff]  }
 0x636   :  { %13188 = vmatpush2.bf16.msra.mxu0 %v17671_v28  ;;  %13146 = vmatprep.subr.bf16.mxu1 %v17676_v52  ;;  %v17716_v52 = vld [vmem:[#allocation11 + $0x20b0] ss:$36 sps:$4 sm:$0xff]  }
 0x637   :  { %13189 = vmatprep.subr.bf16.mxu0 %v17679_v5  ;;  %v17719_v5 = vld [vmem:[#allocation11 + $0x138] ss:$36 sps:$4 sm:$0xff]  }
 0x639   :  { %13147 = vmatpush2.bf16.msra.mxu1 %v17674_v25  ;;  %v17724_v25 = vld [vmem:[#allocation11 + $0x206c] ss:$36 sps:$4 sm:$0xff]  }
 0x63a   :  { %13190 = vmatpush2.bf16.msra.mxu0 %v17677_v14  ;;  %13148 = vmatprep.subr.bf16.mxu1 %v17682_v21  ;;  %v17722_v14 = vld [vmem:[#allocation11 + $0x2068] ss:$36 sps:$4 sm:$0xff]   ;;  %v17725_v21 = vld [vmem:[#allocation11 + $0xf0] ss:$36 sps:$4 sm:$0xff]  }
 0x63b   :  { %13191 = vmatprep.subr.bf16.mxu0 %v17685_v54  ;;  %v17730_v54 = vld [vmem:[#allocation11 + $0x2024] ss:$36 sps:$4 sm:$0xff]  }
 0x63d   :  { %13149 = vmatpush2.bf16.msra.mxu1 %v17680_v43  ;;  %v17733_v43 = vld [vmem:[#allocation11 + $0xac] ss:$36 sps:$4 sm:$0xff]  }
 0x63e   :  { %13192 = vmatpush2.bf16.msra.mxu0 %v17683_v55  ;;  %13150 = vmatprep.subr.bf16.mxu1 %v17688_v49  ;;  %v17731_v55 = vld [vmem:[#allocation11 + $0xa8] ss:$36 sps:$4 sm:$0xff]   ;;  %v17736_v49 = vld [vmem:[#allocation11 + $0x1fdc] ss:$36 sps:$4 sm:$0xff]  }
 0x63f   :  { %13193 = vmatprep.subr.bf16.mxu0 %v17691_v18  ;;  %v17739_v18 = vld [vmem:[#allocation11 + $0x64] ss:$36 sps:$4 sm:$0xff]  }
 0x641   :  { %13151 = vmatpush2.bf16.msra.mxu1 %v17686_v59  ;;  %v17734_v59 = vld [vmem:[#allocation11 + $0x1fd8] ss:$36 sps:$4 sm:$0xff]  }
 0x642   :  { %13194 = vmatpush2.bf16.msra.mxu0 %v17689_v47  ;;  %13152 = vmatprep.subr.bf16.mxu1 %v17694_v1  ;;  %v17737_v47 = vld [vmem:[#allocation11 + $0x60] ss:$36 sps:$4 sm:$0xff]   ;;  %v17742_v1 = vld [vmem:[#allocation11 + $0x1f94] ss:$36 sps:$4 sm:$0xff]  }
 0x643   :  { %13195 = vmatprep.subr.bf16.mxu0 %v17697_v4  ;;  %v17745_v4 = vld [vmem:[#allocation11 + $0x1c] ss:$36 sps:$4 sm:$0xff]  }
 0x645   :  { %13153 = vmatpush2.bf16.msra.mxu1 %v17692_v7  ;;  %v17740_v7 = vld [vmem:[#allocation11 + $0x1f90] ss:$36 sps:$4 sm:$0xff]  }
 0x646   :  { %13196 = vmatpush2.bf16.msra.mxu0 %v17695_v6  ;;  %13208 = vmatprep.subr.bf16.mxu1 %v17700_v27  ;;  %v17743_v6 = vld [vmem:[#allocation11 + $0x18] ss:$36 sps:$4 sm:$0xff]   ;;  %v17748_v27 = vld [vmem:[#allocation11 + $0x23cc] ss:$36 sps:$4 sm:$0xff]  }
 0x647   :  { %13251 = vmatprep.subr.bf16.mxu0 %v17703_v24  ;;  %v17751_v24 = vld [vmem:[#allocation11 + $0x454] ss:$36 sps:$4 sm:$0xff]  }
 0x648   :  { %v12898_v17 = vpop.f32.mrf.mxu1  ;;  %13155 = vmatmul.mubr.bf16.vlgmr.msra.gmra.mxu1 %v18889_v56 }
 0x649   :  { %v19054_v11 = vadd.f32 %v12898_v17, %v19040_v41  ;;  %13198 = vmatmul.mubr.bf16.vlgmr.msra.gmra.mxu0 %v18923_v39  ;;  %13209 = vmatpush1.bf16.msra.mxu1 %v17698_v22  ;;  %v17746_v22 = vld [vmem:[#allocation11 + $0x23c8] ss:$36 sps:$4 sm:$0xff]  }
 0x64a   :  { %13240 = vmatprep.mubr.bf16.mxu1 %v18934_v57  ;;  %13252 = vmatpush1.bf16.msra.mxu0 %v17701_v44  ;;  %v12900_v10 = vpop.f32.mrf.mxu1  ;;  %v17749_v44 = vld [vmem:[#allocation11 + $0x450] ss:$36 sps:$4 sm:$0xff]  }
 0x64b   :  { %19366 = vst [vmem:[#allocation27_spill] sm:$0xff] %v19054_v11  ;;  %13283 = vmatprep.mubr.bf16.mxu0 %v18814_v12  ;;  %v19060_v53 = vadd.f32 %v12900_v10, %v19044_v46  ;;  %13210 = vmatprep.subr.bf16.mxu1 %v17706_v33  ;;  %v17721_v46 = vld [vmem:[#allocation11 + $0x13c] ss:$36 sps:$4 sm:$0xff]   ;;  %v17754_v33 = vld [vmem:[#allocation11 + $0x2384] ss:$36 sps:$4 sm:$0xff]  }
 0x64c   :  { %v12902_v37 = vpop.f32.mrf.mxu1  ;;  %13253 = vmatprep.subr.bf16.mxu0 %v17709_v20  ;;  %v17757_v17 = vld [vmem:[#allocation11 + $0x40c] ss:$36 sps:$4 sm:$0xff]   ;;  %v17752_v20 = vld [vmem:[#allocation11 + $0x2380] ss:$36 sps:$4 sm:$0xff]  }
 0x64d   :  { %19367 = vst [vmem:[#allocation28_spill] sm:$0xff] %v19060_v53  ;;  %v19063_v41 = vadd.f32 %v12902_v37, %v19047_v51  ;;  %13211 = vmatpush1.bf16.msra.mxu1 %v17704_v63  ;;  %v17727_v51 = vld [vmem:[#allocation11 + $0xf4] ss:$36 sps:$4 sm:$0xff]   ;;  %v17755_v63 = vld [vmem:[#allocation11 + $0x408] ss:$36 sps:$4 sm:$0xff]  }
 0x64e   :  { %13254 = vmatpush1.bf16.msra.mxu0 %v17707_v45  ;;  %v12904_v48 = vpop.f32.mrf.mxu1  ;;  %13212 = vmatprep.subr.bf16.mxu1 %v17712_v19  ;;  %v17760_v10 = vld [vmem:[#allocation11 + $0x233c] ss:$36 sps:$4 sm:$0xff]   ;;  %v17763_v45 = vld [vmem:[#allocation11 + $0x3c4] ss:$36 sps:$4 sm:$0xff]   ;;  %v17766_v37 = vld [vmem:[#allocation11 + $0x22f4] ss:$36 sps:$4 sm:$0xff]  }
 0x64f   :  { %v19066_v28 = vadd.f32 %v12904_v48, %v19050_v30  ;;  %13255 = vmatprep.subr.bf16.mxu0 %v17715_v40  ;;  %v17728_v30 = vld [vmem:[#allocation11 + $0x2020] ss:$36 sps:$4 sm:$0xff]   ;;  %v17758_v19 = vld [vmem:[#allocation11 + $0x2338] ss:$36 sps:$4 sm:$0xff]   ;;  %v17764_v48 = vld [vmem:[#allocation11 + $0x22f0] ss:$36 sps:$4 sm:$0xff]  }
 0x650   :  { %v17761_v40 = vld [vmem:[#allocation11 + $0x3c0] ss:$36 sps:$4 sm:$0xff]  }
 0x651   :  { %19368 = vst [vmem:[#allocation29_spill] sm:$0xff] %v19066_v28  ;;  %13213 = vmatpush1.bf16.msra.mxu1 %v17710_v32  ;;  %v17769_v32 = vld [vmem:[#allocation11 + $0x37c] ss:$36 sps:$4 sm:$0xff]  }
 0x652   :  { %13256 = vmatpush1.bf16.msra.mxu0 %v17713_v50  ;;  %13214 = vmatprep.subr.bf16.mxu1 %v17718_v31  ;;  %v17767_v50 = vld [vmem:[#allocation11 + $0x378] ss:$36 sps:$4 sm:$0xff]   ;;  %v17772_v31 = vld [vmem:[#allocation11 + $0x22ac] ss:$36 sps:$4 sm:$0xff]  }
 0x653   :  { %13257 = vmatprep.subr.bf16.mxu0 %v17721_v46  ;;  %v17775_v46 = vld [vmem:[#allocation11 + $0x334] ss:$36 sps:$4 sm:$0xff]  }
 0x655   :  { %13215 = vmatpush1.bf16.msra.mxu1 %v17716_v52  ;;  %v17770_v52 = vld [vmem:[#allocation11 + $0x22a8] ss:$36 sps:$4 sm:$0xff]  }
 0x656   :  { %13258 = vmatpush1.bf16.msra.mxu0 %v17719_v5  ;;  %13216 = vmatprep.subr.bf16.mxu1 %v17724_v25  ;;  %v17773_v5 = vld [vmem:[#allocation11 + $0x330] ss:$36 sps:$4 sm:$0xff]   ;;  %v17778_v25 = vld [vmem:[#allocation11 + $0x2264] ss:$36 sps:$4 sm:$0xff]  }
 0x657   :  { %13259 = vmatprep.subr.bf16.mxu0 %v17727_v51  ;;  %v17781_v51 = vld [vmem:[#allocation11 + $0x2ec] ss:$36 sps:$4 sm:$0xff]  }
 0x659   :  { %13217 = vmatpush1.bf16.msra.mxu1 %v17722_v14  ;;  %v17776_v14 = vld [vmem:[#allocation11 + $0x2260] ss:$36 sps:$4 sm:$0xff]  }
 0x65a   :  { %13260 = vmatpush1.bf16.msra.mxu0 %v17725_v21  ;;  %13218 = vmatprep.subr.bf16.mxu1 %v17730_v54  ;;  %v17779_v21 = vld [vmem:[#allocation11 + $0x2e8] ss:$36 sps:$4 sm:$0xff]   ;;  %v17784_v54 = vld [vmem:[#allocation11 + $0x221c] ss:$36 sps:$4 sm:$0xff]  }
 0x65b   :  { %13261 = vmatprep.subr.bf16.mxu0 %v17733_v43  ;;  %v12941_v43 = vpop.f32.mrf.mxu0 }
 0x65d   :  { %13219 = vmatpush1.bf16.msra.mxu1 %v17728_v30  ;;  %v17787_v30 = vld [vmem:[#allocation11 + $0x2a4] ss:$36 sps:$4 sm:$0xff]  }
 0x65e   :  { %13262 = vmatpush1.bf16.msra.mxu0 %v17731_v55  ;;  %13220 = vmatprep.subr.bf16.mxu1 %v17736_v49  ;;  %v17782_v55 = vld [vmem:[#allocation11 + $0x2218] ss:$36 sps:$4 sm:$0xff]   ;;  %v17785_v49 = vld [vmem:[#allocation11 + $0x2a0] ss:$36 sps:$4 sm:$0xff]  }
 0x65f   :  { %13263 = vmatprep.subr.bf16.mxu0 %v17739_v18  ;;  %v17790_v18 = vld [vmem:[#allocation11 + $0x21d4] ss:$36 sps:$4 sm:$0xff]  }
 0x661   :  { %13221 = vmatpush1.bf16.msra.mxu1 %v17734_v59  ;;  %v12943_v59 = vpop.f32.mrf.mxu0 }
 0x662   :  { %13264 = vmatpush1.bf16.msra.mxu0 %v17737_v47  ;;  %13222 = vmatprep.subr.bf16.mxu1 %v17742_v1  ;;  %v17793_v47 = vld [vmem:[#allocation11 + $0x25c] ss:$36 sps:$4 sm:$0xff]   ;;  %v17788_v1 = vld [vmem:[#allocation11 + $0x21d0] ss:$36 sps:$4 sm:$0xff]  }
 0x663   :  { %13265 = vmatprep.subr.bf16.mxu0 %v17745_v4  ;;  %v17791_v4 = vld [vmem:[#allocation11 + $0x258] ss:$36 sps:$4 sm:$0xff]  }
 0x665   :  { %13223 = vmatpush1.bf16.msra.mxu1 %v17740_v7  ;;  %v17796_v7 = vld [vmem:[#allocation11 + $0x694] ss:$36 sps:$4 sm:$0xff]  }
 0x666   :  { %13266 = vmatpush1.bf16.msra.mxu0 %v17743_v6  ;;  %13224 = vmatprep.subr.bf16.mxu1 %v17748_v27  ;;  %v18306_v6 = vld [vmem:[#allocation12] sm:$0xff] }
 0x667   :  { %13267 = vmatprep.subr.bf16.mxu0 %v17751_v24  ;;  %v6305_v27 = vrot.slane %v18306_v6, %v18778_v61  ;;  %v12945_v24 = vpop.f32.mrf.mxu0 }
 0x669   :  { %13225 = vmatpush2.bf16.msra.mxu1 %v17746_v22  ;;  %v17799_v22 = vld [vmem:[#allocation11 + $0xb14] ss:$36 sps:$4 sm:$0xff]  }
 0x66a   :  { %13268 = vmatpush2.bf16.msra.mxu0 %v17749_v44  ;;  %13226 = vmatprep.subr.bf16.mxu1 %v17754_v33  ;;  %v6309_v44 = vrot.slane %v18306_v6, %v18824_v62  ;;  %v17794_v33 = vld [vmem:[#allocation11 + $0x690] ss:$36 sps:$4 sm:$0xff]   ;;  %v17800_v62 = vld [vmem:[#allocation11 + $0x648] ss:$36 sps:$4 sm:$0xff]   ;;  %v17812_v6 = vld [vmem:[#allocation11 + $0x5b8] ss:$36 sps:$4 sm:$0xff]  }
 0x66b   :  { %13269 = vmatprep.subr.bf16.mxu0 %v17757_v17  ;;  %v17797_v17 = vld [vmem:[#allocation11 + $0xb10] ss:$36 sps:$4 sm:$0xff]  }
 0x66d   :  { %13227 = vmatpush2.bf16.msra.mxu1 %v17752_v20  ;;  %v12942_v20 = vadd.f32 %v12941_v43, %v6305_v27 }
 0x66e   :  { %13270 = vmatpush2.bf16.msra.mxu0 %v17755_v63  ;;  %13228 = vmatprep.subr.bf16.mxu1 %v17760_v10  ;;  %v12947_v63 = vpop.f32.mrf.mxu0  ;;  %v17802_v10 = vld [vmem:[#allocation11 + $0x64c] ss:$36 sps:$4 sm:$0xff]  }
 0x66f   :  { %13271 = vmatprep.subr.bf16.mxu0 %v17763_v45 }
 0x671   :  { %13229 = vmatpush2.bf16.msra.mxu1 %v17758_v19  ;;  %v17805_v19 = vld [vmem:[#allocation11 + $0xacc] ss:$36 sps:$4 sm:$0xff]  }
 0x672   :  { %13272 = vmatpush2.bf16.msra.mxu0 %v17761_v40  ;;  %13230 = vmatprep.subr.bf16.mxu1 %v17766_v37  ;;  %v12944_v40 = vadd.f32 %v12943_v59, %v6309_v44 }
 0x673   :  { %13273 = vmatprep.subr.bf16.mxu0 %v17769_v32 }
 0x675   :  { %13231 = vmatpush2.bf16.msra.mxu1 %v17764_v48  ;;  %v17803_v48 = vld [vmem:[#allocation11 + $0xac8] ss:$36 sps:$4 sm:$0xff]  }
 0x676   :  { %13274 = vmatpush2.bf16.msra.mxu0 %v17767_v50  ;;  %13232 = vmatprep.subr.bf16.mxu1 %v17772_v31  ;;  %v17808_v50 = vld [vmem:[#allocation11 + $0x604] ss:$36 sps:$4 sm:$0xff]   ;;  %v12946_v31 = vadd.f32 %v12945_v24, %v6305_v27  ;;  %v17815_v27 = vld [vmem:[#allocation11 + $0xa38] ss:$36 sps:$4 sm:$0xff]  }
 0x677   :  { %13275 = vmatprep.subr.bf16.mxu0 %v17775_v46  ;;  %v17820_v24 = vld [vmem:[#allocation11 + $0x574] ss:$36 sps:$4 sm:$0xff]  }
 0x679   :  { %13233 = vmatpush2.bf16.msra.mxu1 %v17770_v52 }
 0x67a   :  { %13276 = vmatpush2.bf16.msra.mxu0 %v17773_v5  ;;  %13234 = vmatprep.subr.bf16.mxu1 %v17778_v25  ;;  %v17811_v25 = vld [vmem:[#allocation11 + $0xa84] ss:$36 sps:$4 sm:$0xff]  }
 0x67b   :  { %13277 = vmatprep.subr.bf16.mxu0 %v17781_v51 }
 0x67d   :  { %13235 = vmatpush2.bf16.msra.mxu1 %v17776_v14  ;;  %v12948_v14 = vadd.f32 %v12947_v63, %v6309_v44  ;;  %v17818_v44 = vld [vmem:[#allocation11 + $0x570] ss:$36 sps:$4 sm:$0xff]   ;;  %v17824_v63 = vld [vmem:[#allocation11 + $0x528] ss:$36 sps:$4 sm:$0xff]  }
 0x67e   :  { %13278 = vmatpush2.bf16.msra.mxu0 %v17779_v21  ;;  %13236 = vmatprep.subr.bf16.mxu1 %v17784_v54 }
 0x67f   :  { %13279 = vmatprep.subr.bf16.mxu0 %v17787_v30  ;;  %v17806_v30 = vld [vmem:[#allocation11 + $0x600] ss:$36 sps:$4 sm:$0xff]  }
 0x681   :  { %13237 = vmatpush2.bf16.msra.mxu1 %v17782_v55 }
 0x682   :  { %13280 = vmatpush2.bf16.msra.mxu0 %v17785_v49  ;;  %13238 = vmatprep.subr.bf16.mxu1 %v17790_v18  ;;  %v17809_v49 = vld [vmem:[#allocation11 + $0xa80] ss:$36 sps:$4 sm:$0xff]  }
 0x683   :  { %13281 = vmatprep.subr.bf16.mxu0 %v17793_v47  ;;  %v17814_v18 = vld [vmem:[#allocation11 + $0x5bc] ss:$36 sps:$4 sm:$0xff]  }
 0x685   :  { %13239 = vmatpush2.bf16.msra.mxu1 %v17788_v1  ;;  %v17817_v1 = vld [vmem:[#allocation11 + $0xa3c] ss:$36 sps:$4 sm:$0xff]  }
 0x686   :  { %13282 = vmatpush2.bf16.msra.mxu0 %v17791_v4  ;;  %13294 = vmatprep.subr.bf16.mxu1 %v17796_v7 }
 0x687   :  { %13337 = vmatprep.subr.bf16.mxu0 %v17799_v22  ;;  %v17823_v22 = vld [vmem:[#allocation11 + $0x9f4] ss:$36 sps:$4 sm:$0xff]  }
 0x688   :  { %v12984_v45 = vpop.f32.mrf.mxu1  ;;  %13241 = vmatmul.mubr.bf16.vlgmr.msra.gmra.mxu1 %v18944_v13 }
 0x689   :  { %v12985_v61 = vadd.f32 %v12984_v45, %v12942_v20  ;;  %v13027_v37 = vpop.f32.mrf.mxu0  ;;  %13284 = vmatmul.mubr.bf16.vlgmr.msra.gmra.mxu0 %v18757_v2  ;;  %13295 = vmatpush1.bf16.msra.mxu1 %v17794_v33  ;;  %v17821_v33 = vld [vmem:[#allocation11 + $0x9f0] ss:$36 sps:$4 sm:$0xff]   ;;  %v17832_v45 = vld [vmem:[#allocation11 + $0x4e4] ss:$36 sps:$4 sm:$0xff]  }
 0x68a   :  { %13326 = vmatprep.mubr.bf16.mxu1 %v18850_v38  ;;  %13338 = vmatpush1.bf16.msra.mxu0 %v17797_v17  ;;  %v12986_v32 = vpop.f32.mrf.mxu1  ;;  %v17826_v17 = vld [vmem:[#allocation11 + $0x52c] ss:$36 sps:$4 sm:$0xff]  }
 0x68b   :  { %v19073_v46 = vadd.f32 %v13027_v37, %v12985_v61  ;;  %13369 = vmatprep.mubr.bf16.mxu0 %v18853_v42  ;;  %v12987_v52 = vadd.f32 %v12986_v32, %v12944_v40  ;;  %v13029_v5 = vpop.f32.mrf.mxu0  ;;  %13296 = vmatprep.subr.bf16.mxu1 %v17802_v10  ;;  %v17829_v20 = vld [vmem:[#allocation11 + $0x9ac] ss:$36 sps:$4 sm:$0xff]   ;;  %v17830_v40 = vld [vmem:[#allocation11 + $0x4e0] ss:$36 sps:$4 sm:$0xff]   ;;  %v17836_v32 = vld [vmem:[#allocation11 + $0x498] ss:$36 sps:$4 sm:$0xff]  }
 0x68c   :  { %v12988_v51 = vpop.f32.mrf.mxu1  ;;  %13339 = vmatprep.subr.bf16.mxu0 %v17805_v19  ;;  %v17827_v10 = vld [vmem:[#allocation11 + $0x9a8] ss:$36 sps:$4 sm:$0xff]   ;;  %v17833_v61 = vld [vmem:[#allocation11 + $0x960] ss:$36 sps:$4 sm:$0xff]  }
 0x68d   :  { %v19076_v21 = vadd.f32 %v13029_v5, %v12987_v52  ;;  %v12989_v54 = vadd.f32 %v12988_v51, %v12946_v31  ;;  %v13031_v43 = vpop.f32.mrf.mxu0  ;;  %13297 = vmatpush1.bf16.msra.mxu1 %v17800_v62  ;;  %v17835_v19 = vld [vmem:[#allocation11 + $0x964] ss:$36 sps:$4 sm:$0xff]   ;;  %v17838_v37 = vld [vmem:[#allocation11 + $0x49c] ss:$36 sps:$4 sm:$0xff]   ;;  %v17847_v31 = vld [vmem:[#allocation11 + $0xd54] ss:$36 sps:$4 sm:$0xff]  }
 0x68e   :  { %13340 = vmatpush1.bf16.msra.mxu0 %v17803_v48  ;;  %v12990_v55 = vpop.f32.mrf.mxu1  ;;  %13298 = vmatprep.subr.bf16.mxu1 %v17808_v50  ;;  %v17841_v62 = vld [vmem:[#allocation11 + $0x91c] ss:$36 sps:$4 sm:$0xff]   ;;  %v17844_v50 = vld [vmem:[#allocation11 + $0x8d4] ss:$36 sps:$4 sm:$0xff]   ;;  %v17853_v51 = vld [vmem:[#allocation11 + $0xd0c] ss:$36 sps:$4 sm:$0xff]  }
 0x68f   :  { %v19078_v59 = vadd.f32 %v13031_v43, %v12989_v54  ;;  %v12991_v47 = vadd.f32 %v12990_v55, %v12948_v14  ;;  %13341 = vmatprep.subr.bf16.mxu0 %v17811_v25  ;;  %v13033_v4 = vpop.f32.mrf.mxu0  ;;  %v17839_v48 = vld [vmem:[#allocation11 + $0x918] ss:$36 sps:$4 sm:$0xff]   ;;  %v17842_v52 = vld [vmem:[#allocation11 + $0x8d0] ss:$36 sps:$4 sm:$0xff]   ;;  %v17848_v14 = vld [vmem:[#allocation11 + $0x888] ss:$36 sps:$4 sm:$0xff]  }
 0x690   :  { %v17845_v5 = vld [vmem:[#allocation11 + $0xd50] ss:$36 sps:$4 sm:$0xff]   ;;  %v17851_v54 = vld [vmem:[#allocation11 + $0xd08] ss:$36 sps:$4 sm:$0xff]   ;;  %v17854_v55 = vld [vmem:[#allocation11 + $0x840] ss:$36 sps:$4 sm:$0xff]  }
 0x691   :  { %v19080_v7 = vadd.f32 %v13033_v4, %v12991_v47  ;;  %13299 = vmatpush1.bf16.msra.mxu1 %v17806_v30  ;;  %v17850_v25 = vld [vmem:[#allocation11 + $0x88c] ss:$36 sps:$4 sm:$0xff]   ;;  %v17856_v43 = vld [vmem:[#allocation11 + $0x844] ss:$36 sps:$4 sm:$0xff]   ;;  %v17865_v47 = vld [vmem:[#allocation11 + $0xc7c] ss:$36 sps:$4 sm:$0xff]  }
 0x692   :  { %13342 = vmatpush1.bf16.msra.mxu0 %v17809_v49  ;;  %13300 = vmatprep.subr.bf16.mxu1 %v17814_v18  ;;  %v17859_v30 = vld [vmem:[#allocation11 + $0xcc4] ss:$36 sps:$4 sm:$0xff]   ;;  %v17862_v18 = vld [vmem:[#allocation11 + $0x7fc] ss:$36 sps:$4 sm:$0xff]  }
 0x693   :  { %13343 = vmatprep.subr.bf16.mxu0 %v17817_v1  ;;  %v17857_v49 = vld [vmem:[#allocation11 + $0xcc0] ss:$36 sps:$4 sm:$0xff]   ;;  %v17860_v1 = vld [vmem:[#allocation11 + $0x7f8] ss:$36 sps:$4 sm:$0xff]  }
 0x694   :  { %v17863_v4 = vld [vmem:[#allocation11 + $0xc78] ss:$36 sps:$4 sm:$0xff]  }
 0x695   :  { %13301 = vmatpush1.bf16.msra.mxu1 %v17812_v6  ;;  %v17868_v6 = vld [vmem:[#allocation11 + $0x7b4] ss:$36 sps:$4 sm:$0xff]  }
 0x696   :  { %13344 = vmatpush1.bf16.msra.mxu0 %v17815_v27  ;;  %13302 = vmatprep.subr.bf16.mxu1 %v17820_v24  ;;  %v17871_v27 = vld [vmem:[#allocation11 + $0xc34] ss:$36 sps:$4 sm:$0xff]  }
 0x697   :  { %13345 = vmatprep.subr.bf16.mxu0 %v17823_v22  ;;  %v17866_v24 = vld [vmem:[#allocation11 + $0x7b0] ss:$36 sps:$4 sm:$0xff]  }
 0x698   :  { %v17869_v22 = vld [vmem:[#allocation11 + $0xc30] ss:$36 sps:$4 sm:$0xff]  }
 0x699   :  { %13303 = vmatpush1.bf16.msra.mxu1 %v17818_v44  ;;  %v17874_v44 = vld [vmem:[#allocation11 + $0x76c] ss:$36 sps:$4 sm:$0xff]  }
 0x69a   :  { %13346 = vmatpush1.bf16.msra.mxu0 %v17821_v33  ;;  %13304 = vmatprep.subr.bf16.mxu1 %v17826_v17  ;;  %v17877_v33 = vld [vmem:[#allocation11 + $0xbec] ss:$36 sps:$4 sm:$0xff]  }
 0x69b   :  { %13347 = vmatprep.subr.bf16.mxu0 %v17829_v20  ;;  %v17872_v17 = vld [vmem:[#allocation11 + $0x768] ss:$36 sps:$4 sm:$0xff]  }
 0x69c   :  { %v17875_v20 = vld [vmem:[#allocation11 + $0xbe8] ss:$36 sps:$4 sm:$0xff]  }
 0x69d   :  { %13305 = vmatpush1.bf16.msra.mxu1 %v17824_v63  ;;  %v17880_v63 = vld [vmem:[#allocation11 + $0x724] ss:$36 sps:$4 sm:$0xff]  }
 0x69e   :  { %13348 = vmatpush1.bf16.msra.mxu0 %v17827_v10  ;;  %13306 = vmatprep.subr.bf16.mxu1 %v17832_v45  ;;  %v17883_v10 = vld [vmem:[#allocation11 + $0xba4] ss:$36 sps:$4 sm:$0xff]  }
 0x69f   :  { %13349 = vmatprep.subr.bf16.mxu0 %v17835_v19  ;;  %v17878_v45 = vld [vmem:[#allocation11 + $0x720] ss:$36 sps:$4 sm:$0xff]  }
 0x6a0   :  { %v17881_v19 = vld [vmem:[#allocation11 + $0xba0] ss:$36 sps:$4 sm:$0xff]  }
 0x6a1   :  { %13307 = vmatpush1.bf16.msra.mxu1 %v17830_v40  ;;  %v17886_v40 = vld [vmem:[#allocation11 + $0x6dc] ss:$36 sps:$4 sm:$0xff]  }
 0x6a2   :  { %13350 = vmatpush1.bf16.msra.mxu0 %v17833_v61  ;;  %13308 = vmatprep.subr.bf16.mxu1 %v17838_v37  ;;  %v17889_v61 = vld [vmem:[#allocation11 + $0xb5c] ss:$36 sps:$4 sm:$0xff]  }
 0x6a3   :  { %13351 = vmatprep.subr.bf16.mxu0 %v17841_v62  ;;  %v17884_v37 = vld [vmem:[#allocation11 + $0x6d8] ss:$36 sps:$4 sm:$0xff]  }
 0x6a4   :  { %v17887_v62 = vld [vmem:[#allocation11 + $0xb58] ss:$36 sps:$4 sm:$0xff]  }
 0x6a5   :  { %13309 = vmatpush1.bf16.msra.mxu1 %v17836_v32  ;;  %v17892_v32 = vld [vmem:[#allocation11 + $0xf94] ss:$36 sps:$4 sm:$0xff]  }
 0x6a6   :  { %13352 = vmatpush1.bf16.msra.mxu0 %v17839_v48  ;;  %13310 = vmatprep.subr.bf16.mxu1 %v17844_v50  ;;  %v17895_v48 = vld [vmem:[#allocation11 + $0x1414] ss:$36 sps:$4 sm:$0xff]  }
 0x6a7   :  { %13353 = vmatprep.subr.bf16.mxu0 %v17847_v31  ;;  %v17890_v50 = vld [vmem:[#allocation11 + $0xf90] ss:$36 sps:$4 sm:$0xff]  }
 0x6a8   :  { %v17893_v31 = vld [vmem:[#allocation11 + $0x1410] ss:$36 sps:$4 sm:$0xff]  }
 0x6a9   :  { %13311 = vmatpush2.bf16.msra.mxu1 %v17842_v52  ;;  %v17898_v52 = vld [vmem:[#allocation11 + $0xf4c] ss:$36 sps:$4 sm:$0xff]  }
 0x6aa   :  { %13354 = vmatpush2.bf16.msra.mxu0 %v17845_v5  ;;  %13312 = vmatprep.subr.bf16.mxu1 %v17850_v25  ;;  %v17901_v25 = vld [vmem:[#allocation11 + $0x13cc] ss:$36 sps:$4 sm:$0xff]  }
 0x6ab   :  { %13355 = vmatprep.subr.bf16.mxu0 %v17853_v51 }
 0x6ad   :  { %13313 = vmatpush2.bf16.msra.mxu1 %v17848_v14 }
 0x6ae   :  { %13356 = vmatpush2.bf16.msra.mxu0 %v17851_v54  ;;  %13314 = vmatprep.subr.bf16.mxu1 %v17856_v43  ;;  %v17896_v54 = vld [vmem:[#allocation11 + $0xf48] ss:$36 sps:$4 sm:$0xff]  }
 0x6af   :  { %13357 = vmatprep.subr.bf16.mxu0 %v17859_v30  ;;  %v17899_v30 = vld [vmem:[#allocation11 + $0x13c8] ss:$36 sps:$4 sm:$0xff]  }
 0x6b1   :  { %13315 = vmatpush2.bf16.msra.mxu1 %v17854_v55  ;;  %v17904_v55 = vld [vmem:[#allocation11 + $0xf04] ss:$36 sps:$4 sm:$0xff]  }
 0x6b2   :  { %13358 = vmatpush2.bf16.msra.mxu0 %v17857_v49  ;;  %13316 = vmatprep.subr.bf16.mxu1 %v17862_v18 }
 0x6b3   :  { %13359 = vmatprep.subr.bf16.mxu0 %v17865_v47 }
 0x6b5   :  { %13317 = vmatpush2.bf16.msra.mxu1 %v17860_v1 }
 0x6b6   :  { %13360 = vmatpush2.bf16.msra.mxu0 %v17863_v4  ;;  %13318 = vmatprep.subr.bf16.mxu1 %v17868_v6 }
 0x6b7   :  { %13361 = vmatprep.subr.bf16.mxu0 %v17871_v27 }
 0x6b9   :  { %13319 = vmatpush2.bf16.msra.mxu1 %v17866_v24  ;;  %v17902_v24 = vld [vmem:[#allocation11 + $0xf00] ss:$36 sps:$4 sm:$0xff]  }
 0x6ba   :  { %13362 = vmatpush2.bf16.msra.mxu0 %v17869_v22  ;;  %13320 = vmatprep.subr.bf16.mxu1 %v17874_v44  ;;  %v17905_v44 = vld [vmem:[#allocation11 + $0x1380] ss:$36 sps:$4 sm:$0xff]  }
 0x6bb   :  { %13363 = vmatprep.subr.bf16.mxu0 %v17877_v33  ;;  %v17910_v33 = vld [vmem:[#allocation11 + $0xebc] ss:$36 sps:$4 sm:$0xff]  }
 0x6bd   :  { %13321 = vmatpush2.bf16.msra.mxu1 %v17872_v17 }
 0x6be   :  { %13364 = vmatpush2.bf16.msra.mxu0 %v17875_v20  ;;  %13322 = vmatprep.subr.bf16.mxu1 %v17880_v63  ;;  %v17913_v20 = vld [vmem:[#allocation11 + $0x133c] ss:$36 sps:$4 sm:$0xff]  }
 0x6bf   :  { %13365 = vmatprep.subr.bf16.mxu0 %v17883_v10 }
 0x6c1   :  { %13323 = vmatpush2.bf16.msra.mxu1 %v17878_v45  ;;  %v17908_v45 = vld [vmem:[#allocation11 + $0xeb8] ss:$36 sps:$4 sm:$0xff]  }
 0x6c2   :  { %13366 = vmatpush2.bf16.msra.mxu0 %v17881_v19  ;;  %13324 = vmatprep.subr.bf16.mxu1 %v17886_v40  ;;  %v17916_v19 = vld [vmem:[#allocation11 + $0xe74] ss:$36 sps:$4 sm:$0xff]  }
 0x6c3   :  { %13367 = vmatprep.subr.bf16.mxu0 %v17889_v61  ;;  %v17919_v40 = vld [vmem:[#allocation11 + $0x12f4] ss:$36 sps:$4 sm:$0xff]  }
 0x6c4   :  { %v17914_v61 = vld [vmem:[#allocation11 + $0xe70] ss:$36 sps:$4 sm:$0xff]  }
 0x6c5   :  { %13325 = vmatpush2.bf16.msra.mxu1 %v17884_v37  ;;  %v17917_v37 = vld [vmem:[#allocation11 + $0x12f0] ss:$36 sps:$4 sm:$0xff]  }
 0x6c6   :  { %13368 = vmatpush2.bf16.msra.mxu0 %v17887_v62  ;;  %13380 = vmatprep.subr.bf16.mxu1 %v17892_v32  ;;  %v17922_v62 = vld [vmem:[#allocation11 + $0xe2c] ss:$36 sps:$4 sm:$0xff]  }
 0x6c7   :  { %13423 = vmatprep.subr.bf16.mxu0 %v17895_v48  ;;  %v17920_v32 = vld [vmem:[#allocation11 + $0xe28] ss:$36 sps:$4 sm:$0xff]  }
 0x6c8   :  { %v13070_v5 = vpop.f32.mrf.mxu1  ;;  %13327 = vmatmul.mubr.bf16.vlgmr.msra.gmra.mxu1 %v18773_v23  ;;  %v17923_v48 = vld [vmem:[#allocation11 + $0x12a8] ss:$36 sps:$4 sm:$0xff]  }
 0x6c9   :  { %v13071_v51 = vadd.f32 %v13070_v5, %v19073_v46  ;;  %v13113_v14 = vpop.f32.mrf.mxu0  ;;  %13370 = vmatmul.mubr.bf16.vlgmr.msra.gmra.mxu0 %v18794_v60  ;;  %13381 = vmatpush1.bf16.msra.mxu1 %v17890_v50  ;;  %v17907_v46 = vld [vmem:[#allocation11 + $0x1384] ss:$36 sps:$4 sm:$0xff]  }
 0x6ca   :  { %13412 = vmatprep.mubr.bf16.mxu1 %v18879_v34  ;;  %13424 = vmatpush1.bf16.msra.mxu0 %v17893_v31  ;;  %v13072_v43 = vpop.f32.mrf.mxu1  ;;  %v17928_v50 = vld [vmem:[#allocation11 + $0xde4] ss:$36 sps:$4 sm:$0xff]  }
 0x6cb   :  { %v19086_v49 = vadd.f32 %v13113_v14, %v13071_v51  ;;  %13455 = vmatprep.mubr.bf16.mxu0 %v18882_v58  ;;  %v13073_v18 = vadd.f32 %v13072_v43, %v19076_v21  ;;  %v13115_v47 = vpop.f32.mrf.mxu0  ;;  %13382 = vmatprep.subr.bf16.mxu1 %v17898_v52  ;;  %v17931_v31 = vld [vmem:[#allocation11 + $0x1264] ss:$36 sps:$4 sm:$0xff]   ;;  %v17937_v51 = vld [vmem:[#allocation11 + $0x121c] ss:$36 sps:$4 sm:$0xff]   ;;  %v17940_v43 = vld [vmem:[#allocation11 + $0x11d4] ss:$36 sps:$4 sm:$0xff]  }
 0x6cc   :  { %v13074_v1 = vpop.f32.mrf.mxu1  ;;  %13425 = vmatprep.subr.bf16.mxu0 %v17901_v25  ;;  %v17926_v52 = vld [vmem:[#allocation11 + $0xde0] ss:$36 sps:$4 sm:$0xff]   ;;  %v17932_v14 = vld [vmem:[#allocation11 + $0xd98] ss:$36 sps:$4 sm:$0xff]  }
 0x6cd   :  { %v19090_v4 = vadd.f32 %v13115_v47, %v13073_v18  ;;  %v13075_v6 = vadd.f32 %v13074_v1, %v19078_v59  ;;  %v13117_v27 = vpop.f32.mrf.mxu0  ;;  %13383 = vmatpush1.bf16.msra.mxu1 %v17896_v54  ;;  %v17911_v59 = vld [vmem:[#allocation11 + $0x1338] ss:$36 sps:$4 sm:$0xff]   ;;  %v17929_v5 = vld [vmem:[#allocation11 + $0x1260] ss:$36 sps:$4 sm:$0xff]   ;;  %v17941_v18 = vld [vmem:[#allocation11 + $0x1650] ss:$36 sps:$4 sm:$0xff]  }
 0x6ce   :  { %13426 = vmatpush1.bf16.msra.mxu0 %v17899_v30  ;;  %v13076_v22 = vpop.f32.mrf.mxu1  ;;  %13384 = vmatprep.subr.bf16.mxu1 %v17904_v55  ;;  %v17934_v25 = vld [vmem:[#allocation11 + $0xd9c] ss:$36 sps:$4 sm:$0xff]   ;;  %v17943_v30 = vld [vmem:[#allocation11 + $0x1654] ss:$36 sps:$4 sm:$0xff]   ;;  %v17946_v47 = vld [vmem:[#allocation11 + $0x118c] ss:$36 sps:$4 sm:$0xff]  }
 0x6cf   :  { %v19093_v17 = vadd.f32 %v13117_v27, %v13075_v6  ;;  %v13077_v21 = vadd.f32 %v13076_v22, %v19080_v7  ;;  %13427 = vmatprep.subr.bf16.mxu0 %v17907_v46  ;;  %v13119_v63 = vpop.f32.mrf.mxu0  ;;  %v17925_v7 = vld [vmem:[#allocation11 + $0x12ac] ss:$36 sps:$4 sm:$0xff]   ;;  %v17935_v54 = vld [vmem:[#allocation11 + $0x1218] ss:$36 sps:$4 sm:$0xff]   ;;  %v17952_v27 = vld [vmem:[#allocation11 + $0x1144] ss:$36 sps:$4 sm:$0xff]  }
 0x6d0   :  { %v17938_v55 = vld [vmem:[#allocation11 + $0x11d0] ss:$36 sps:$4 sm:$0xff]   ;;  %v17944_v1 = vld [vmem:[#allocation11 + $0x1188] ss:$36 sps:$4 sm:$0xff]   ;;  %v17950_v22 = vld [vmem:[#allocation11 + $0x1140] ss:$36 sps:$4 sm:$0xff]  }
 0x6d1   :  { %v19096_v10 = vadd.f32 %v13119_v63, %v13077_v21  ;;  %13385 = vmatpush1.bf16.msra.mxu1 %v17902_v24  ;;  %v17949_v46 = vld [vmem:[#allocation11 + $0x160c] ss:$36 sps:$4 sm:$0xff]   ;;  %v17955_v24 = vld [vmem:[#allocation11 + $0x15c4] ss:$36 sps:$4 sm:$0xff]   ;;  %v17961_v21 = vld [vmem:[#allocation11 + $0x157c] ss:$36 sps:$4 sm:$0xff]  }
 0x6d2   :  { %13428 = vmatpush1.bf16.msra.mxu0 %v17905_v44  ;;  %13386 = vmatprep.subr.bf16.mxu1 %v17910_v33  ;;  %v17947_v6 = vld [vmem:[#allocation11 + $0x1608] ss:$36 sps:$4 sm:$0xff]   ;;  %v17953_v44 = vld [vmem:[#allocation11 + $0x15c0] ss:$36 sps:$4 sm:$0xff]   ;;  %v17959_v63 = vld [vmem:[#allocation11 + $0x1578] ss:$36 sps:$4 sm:$0xff]  }
 0x6d3   :  { %13429 = vmatprep.subr.bf16.mxu0 %v17913_v20  ;;  %v17958_v33 = vld [vmem:[#allocation11 + $0x10fc] ss:$36 sps:$4 sm:$0xff]  }
 0x6d4   :  { %v17956_v20 = vld [vmem:[#allocation11 + $0x10f8] ss:$36 sps:$4 sm:$0xff]  }
 0x6d5   :  { %13387 = vmatpush1.bf16.msra.mxu1 %v17908_v45  ;;  %v17964_v45 = vld [vmem:[#allocation11 + $0x10b4] ss:$36 sps:$4 sm:$0xff]  }
 0x6d6   :  { %13430 = vmatpush1.bf16.msra.mxu0 %v17911_v59  ;;  %13388 = vmatprep.subr.bf16.mxu1 %v17916_v19  ;;  %v17967_v59 = vld [vmem:[#allocation11 + $0x1534] ss:$36 sps:$4 sm:$0xff]  }
 0x6d7   :  { %13431 = vmatprep.subr.bf16.mxu0 %v17919_v40  ;;  %v17962_v19 = vld [vmem:[#allocation11 + $0x10b0] ss:$36 sps:$4 sm:$0xff]  }
 0x6d8   :  { %v17965_v40 = vld [vmem:[#allocation11 + $0x1530] ss:$36 sps:$4 sm:$0xff]  }
 0x6d9   :  { %13389 = vmatpush1.bf16.msra.mxu1 %v17914_v61  ;;  %v17970_v61 = vld [vmem:[#allocation11 + $0x106c] ss:$36 sps:$4 sm:$0xff]  }
 0x6da   :  { %13432 = vmatpush1.bf16.msra.mxu0 %v17917_v37  ;;  %13390 = vmatprep.subr.bf16.mxu1 %v17922_v62  ;;  %v17973_v37 = vld [vmem:[#allocation11 + $0x14ec] ss:$36 sps:$4 sm:$0xff]  }
 0x6db   :  { %13433 = vmatprep.subr.bf16.mxu0 %v17925_v7  ;;  %v17968_v62 = vld [vmem:[#allocation11 + $0x1068] ss:$36 sps:$4 sm:$0xff]  }
 0x6dc   :  { %v17971_v7 = vld [vmem:[#allocation11 + $0x14e8] ss:$36 sps:$4 sm:$0xff]  }
 0x6dd   :  { %13391 = vmatpush1.bf16.msra.mxu1 %v17920_v32  ;;  %v17976_v32 = vld [vmem:[#allocation11 + $0x1024] ss:$36 sps:$4 sm:$0xff]  }
 0x6de   :  { %13434 = vmatpush1.bf16.msra.mxu0 %v17923_v48  ;;  %13392 = vmatprep.subr.bf16.mxu1 %v17928_v50  ;;  %v17979_v48 = vld [vmem:[#allocation11 + $0x14a4] ss:$36 sps:$4 sm:$0xff]  }
 0x6df   :  { %13435 = vmatprep.subr.bf16.mxu0 %v17931_v31  ;;  %v17974_v50 = vld [vmem:[#allocation11 + $0x1020] ss:$36 sps:$4 sm:$0xff]  }
 0x6e0   :  { %v17977_v31 = vld [vmem:[#allocation11 + $0x14a0] ss:$36 sps:$4 sm:$0xff]  }
 0x6e1   :  { %13393 = vmatpush1.bf16.msra.mxu1 %v17926_v52  ;;  %v17982_v52 = vld [vmem:[#allocation11 + $0xfdc] ss:$36 sps:$4 sm:$0xff]  }
 0x6e2   :  { %13436 = vmatpush1.bf16.msra.mxu0 %v17929_v5  ;;  %13394 = vmatprep.subr.bf16.mxu1 %v17934_v25  ;;  %v17985_v5 = vld [vmem:[#allocation11 + $0x145c] ss:$36 sps:$4 sm:$0xff]  }
 0x6e3   :  { %13437 = vmatprep.subr.bf16.mxu0 %v17937_v51  ;;  %v17980_v25 = vld [vmem:[#allocation11 + $0xfd8] ss:$36 sps:$4 sm:$0xff]  }
 0x6e4   :  { %v17983_v51 = vld [vmem:[#allocation11 + $0x1458] ss:$36 sps:$4 sm:$0xff]  }
 0x6e5   :  { %13395 = vmatpush1.bf16.msra.mxu1 %v17932_v14  ;;  %v17988_v14 = vld [vmem:[#allocation11 + $0x1894] ss:$36 sps:$4 sm:$0xff]  }
 0x6e6   :  { %13438 = vmatpush1.bf16.msra.mxu0 %v17935_v54  ;;  %13396 = vmatprep.subr.bf16.mxu1 %v17940_v43  ;;  %v17991_v54 = vld [vmem:[#allocation11 + $0x1d14] ss:$36 sps:$4 sm:$0xff]  }
 0x6e7   :  { %13439 = vmatprep.subr.bf16.mxu0 %v17943_v30  ;;  %v17986_v43 = vld [vmem:[#allocation11 + $0x1890] ss:$36 sps:$4 sm:$0xff]  }
 0x6e8   :  { %v17989_v30 = vld [vmem:[#allocation11 + $0x1d10] ss:$36 sps:$4 sm:$0xff]  }
 0x6e9   :  { %13397 = vmatpush2.bf16.msra.mxu1 %v17938_v55  ;;  %v17994_v55 = vld [vmem:[#allocation11 + $0x184c] ss:$36 sps:$4 sm:$0xff]  }
 0x6ea   :  { %13440 = vmatpush2.bf16.msra.mxu0 %v17941_v18  ;;  %13398 = vmatprep.subr.bf16.mxu1 %v17946_v47  ;;  %v17997_v47 = vld [vmem:[#allocation11 + $0x1ccc] ss:$36 sps:$4 sm:$0xff]  }
 0x6eb   :  { %13441 = vmatprep.subr.bf16.mxu0 %v17949_v46 }
 0x6ed   :  { %13399 = vmatpush2.bf16.msra.mxu1 %v17944_v1 }
 0x6ee   :  { %13442 = vmatpush2.bf16.msra.mxu0 %v17947_v6  ;;  %13400 = vmatprep.subr.bf16.mxu1 %v17952_v27  ;;  %v17992_v6 = vld [vmem:[#allocation11 + $0x1848] ss:$36 sps:$4 sm:$0xff]  }
 0x6ef   :  { %13443 = vmatprep.subr.bf16.mxu0 %v17955_v24  ;;  %v17995_v24 = vld [vmem:[#allocation11 + $0x1cc8] ss:$36 sps:$4 sm:$0xff]  }
 0x6f1   :  { %13401 = vmatpush2.bf16.msra.mxu1 %v17950_v22  ;;  %v18000_v22 = vld [vmem:[#allocation11 + $0x1804] ss:$36 sps:$4 sm:$0xff]  }
 0x6f2   :  { %13444 = vmatpush2.bf16.msra.mxu0 %v17953_v44  ;;  %13402 = vmatprep.subr.bf16.mxu1 %v17958_v33 }
 0x6f3   :  { %13445 = vmatprep.subr.bf16.mxu0 %v17961_v21  ;;  %v18003_v21 = vld [vmem:[#allocation11 + $0x1c84] ss:$36 sps:$4 sm:$0xff]  }
 0x6f5   :  { %13403 = vmatpush2.bf16.msra.mxu1 %v17956_v20 }
 0x6f6   :  { %13446 = vmatpush2.bf16.msra.mxu0 %v17959_v63  ;;  %13404 = vmatprep.subr.bf16.mxu1 %v17964_v45 }
 0x6f7   :  { %13447 = vmatprep.subr.bf16.mxu0 %v17967_v59  ;;  %v17998_v59 = vld [vmem:[#allocation11 + $0x1800] ss:$36 sps:$4 sm:$0xff]  }
 0x6f9   :  { %13405 = vmatpush2.bf16.msra.mxu1 %v17962_v19 }
 0x6fa   :  { %13448 = vmatpush2.bf16.msra.mxu0 %v17965_v40  ;;  %13406 = vmatprep.subr.bf16.mxu1 %v17970_v61  ;;  %v18001_v40 = vld [vmem:[#allocation11 + $0x1c80] ss:$36 sps:$4 sm:$0xff]  }
 0x6fb   :  { %13449 = vmatprep.subr.bf16.mxu0 %v17973_v37  ;;  %v18006_v61 = vld [vmem:[#allocation11 + $0x17bc] ss:$36 sps:$4 sm:$0xff]  }
 0x6fd   :  { %13407 = vmatpush2.bf16.msra.mxu1 %v17968_v62  ;;  %v18004_v62 = vld [vmem:[#allocation11 + $0x17b8] ss:$36 sps:$4 sm:$0xff]  }
 0x6fe   :  { %13450 = vmatpush2.bf16.msra.mxu0 %v17971_v7  ;;  %13408 = vmatprep.subr.bf16.mxu1 %v17976_v32  ;;  %v18007_v7 = vld [vmem:[#allocation11 + $0x1c38] ss:$36 sps:$4 sm:$0xff]  }
 0x6ff   :  { %13451 = vmatprep.subr.bf16.mxu0 %v17979_v48  ;;  %v18012_v32 = vld [vmem:[#allocation11 + $0x1774] ss:$36 sps:$4 sm:$0xff]  }
 0x700   :  { %v18010_v48 = vld [vmem:[#allocation11 + $0x1770] ss:$36 sps:$4 sm:$0xff]  }
 0x701   :  { %13409 = vmatpush2.bf16.msra.mxu1 %v17974_v50  ;;  %v18013_v50 = vld [vmem:[#allocation11 + $0x1bf0] ss:$36 sps:$4 sm:$0xff]  }
 0x702   :  { %13452 = vmatpush2.bf16.msra.mxu0 %v17977_v31  ;;  %13410 = vmatprep.subr.bf16.mxu1 %v17982_v52  ;;  %v18018_v31 = vld [vmem:[#allocation11 + $0x172c] ss:$36 sps:$4 sm:$0xff]  }
 0x703   :  { %13453 = vmatprep.subr.bf16.mxu0 %v17985_v5  ;;  %v18021_v52 = vld [vmem:[#allocation11 + $0x1bac] ss:$36 sps:$4 sm:$0xff]  }
 0x704   :  { %v18019_v5 = vld [vmem:[#allocation11 + $0x1ba8] ss:$36 sps:$4 sm:$0xff]  }
 0x705   :  { %13411 = vmatpush2.bf16.msra.mxu1 %v17980_v25  ;;  %v18024_v25 = vld [vmem:[#allocation11 + $0x16e4] ss:$36 sps:$4 sm:$0xff]  }
 0x706   :  { %13454 = vmatpush2.bf16.msra.mxu0 %v17983_v51  ;;  %13466 = vmatprep.subr.bf16.mxu1 %v17988_v14  ;;  %v18027_v51 = vld [vmem:[#allocation11 + $0x1b64] ss:$36 sps:$4 sm:$0xff]  }
 0x707   :  { %13509 = vmatprep.subr.bf16.mxu0 %v17991_v54  ;;  %v18022_v14 = vld [vmem:[#allocation11 + $0x16e0] ss:$36 sps:$4 sm:$0xff]  }
 0x708   :  { %v13156_v18 = vpop.f32.mrf.mxu1  ;;  %13413 = vmatmul.mubr.bf16.vlgmr.msra.gmra.mxu1 %v18821_v36  ;;  %v18025_v54 = vld [vmem:[#allocation11 + $0x1b60] ss:$36 sps:$4 sm:$0xff]  }
 0x709   :  { %v13157_v46 = vadd.f32 %v13156_v18, %v19086_v49  ;;  %v13199_v1 = vpop.f32.mrf.mxu0  ;;  %13456 = vmatmul.mubr.bf16.vlgmr.msra.gmra.mxu0 %v18860_v35  ;;  %13467 = vmatpush1.bf16.msra.mxu1 %v17986_v43  ;;  %v18030_v43 = vld [vmem:[#allocation11 + $0x169c] ss:$36 sps:$4 sm:$0xff]  }
 0x70a   :  { %13498 = vmatprep.mubr.bf16.mxu1 %v18899_v9  ;;  %13510 = vmatpush1.bf16.msra.mxu0 %v17989_v30  ;;  %v13158_v27 = vpop.f32.mrf.mxu1  ;;  %v18033_v30 = vld [vmem:[#allocation11 + $0x1b1c] ss:$36 sps:$4 sm:$0xff]  }
 0x70b   :  { %v19102_v44 = vadd.f32 %v13199_v1, %v13157_v46  ;;  %13541 = vmatprep.mubr.bf16.mxu0 %v18910_v0  ;;  %v13159_v33 = vadd.f32 %v13158_v27, %v19090_v4  ;;  %13468 = vmatprep.subr.bf16.mxu1 %v17994_v55  ;;  %v13201_v49 = vpop.f32.mrf.mxu0  ;;  %v18009_v4 = vld [vmem:[#allocation11 + $0x1c3c] ss:$36 sps:$4 sm:$0xff]   ;;  %v18039_v46 = vld [vmem:[#allocation11 + $0x1f54] ss:$36 sps:$4 sm:$0xff]   ;;  %v18042_v27 = vld [vmem:[#allocation11 + $0x1a8c] ss:$36 sps:$4 sm:$0xff]  }
 0x70c   :  { %v13160_v20 = vpop.f32.mrf.mxu1  ;;  %13511 = vmatprep.subr.bf16.mxu0 %v17997_v47  ;;  %v18028_v55 = vld [vmem:[#allocation11 + $0x1698] ss:$36 sps:$4 sm:$0xff]   ;;  %v18034_v1 = vld [vmem:[#allocation11 + $0x1ad0] ss:$36 sps:$4 sm:$0xff]  }
 0x70d   :  { %v19106_v63 = vadd.f32 %v13201_v49, %v13159_v33  ;;  %v19109_v45 = vadd.f32 %v13160_v20, %v19093_v17  ;;  %13469 = vmatpush1.bf16.msra.mxu1 %v17992_v6  ;;  %v18015_v17 = vld [vmem:[#allocation11 + $0x1bf4] ss:$36 sps:$4 sm:$0xff]   ;;  %v18043_v33 = vld [vmem:[#allocation11 + $0x1f08] ss:$36 sps:$4 sm:$0xff]   ;;  %v18046_v20 = vld [vmem:[#allocation11 + $0x1a40] ss:$36 sps:$4 sm:$0xff]  }
 0x70e   :  { %13512 = vmatpush1.bf16.msra.mxu0 %v17995_v24  ;;  %v13162_v19 = vpop.f32.mrf.mxu1  ;;  %13470 = vmatprep.subr.bf16.mxu1 %v18000_v22  ;;  %v18031_v18 = vld [vmem:[#allocation11 + $0x1b18] ss:$36 sps:$4 sm:$0xff]   ;;  %v18037_v6 = vld [vmem:[#allocation11 + $0x1f50] ss:$36 sps:$4 sm:$0xff]   ;;  %v18040_v22 = vld [vmem:[#allocation11 + $0x1a88] ss:$36 sps:$4 sm:$0xff]  }
 0x70f   :  { %v19112_v37 = vadd.f32 %v13162_v19, %v19096_v10  ;;  %13513 = vmatprep.subr.bf16.mxu0 %v18003_v21  ;;  %v18016_v10 = vld [vmem:[#allocation11 + $0x1728] ss:$36 sps:$4 sm:$0xff]   ;;  %v18036_v47 = vld [vmem:[#allocation11 + $0x1ad4] ss:$36 sps:$4 sm:$0xff]   ;;  %v18054_v19 = vld [vmem:[#allocation11 + $0x19fc] ss:$36 sps:$4 sm:$0xff]  }
 0x710   :  { %v18045_v24 = vld [vmem:[#allocation11 + $0x1f0c] ss:$36 sps:$4 sm:$0xff]   ;;  %v18048_v21 = vld [vmem:[#allocation11 + $0x1a44] ss:$36 sps:$4 sm:$0xff]  }
 0x711   :  { %19369 = vst [vmem:[#allocation30_spill] sm:$0xff] %v19112_v37  ;;  %13471 = vmatpush1.bf16.msra.mxu1 %v17998_v59  ;;  %v18051_v49 = vld [vmem:[#allocation11 + $0x1ec4] ss:$36 sps:$4 sm:$0xff]  }
 0x712   :  { %13514 = vmatpush1.bf16.msra.mxu0 %v18001_v40  ;;  %13472 = vmatprep.subr.bf16.mxu1 %v18006_v61  ;;  %v18049_v59 = vld [vmem:[#allocation11 + $0x1ec0] ss:$36 sps:$4 sm:$0xff]   ;;  %v18052_v61 = vld [vmem:[#allocation11 + $0x19f8] ss:$36 sps:$4 sm:$0xff]  }
 0x713   :  { %13515 = vmatprep.subr.bf16.mxu0 %v18009_v4  ;;  %v18057_v40 = vld [vmem:[#allocation11 + $0x1e7c] ss:$36 sps:$4 sm:$0xff]  }
 0x714   :  { %v18055_v4 = vld [vmem:[#allocation11 + $0x1e78] ss:$36 sps:$4 sm:$0xff]  }
 0x715   :  { %13473 = vmatpush1.bf16.msra.mxu1 %v18004_v62  ;;  %v18060_v62 = vld [vmem:[#allocation11 + $0x19b4] ss:$36 sps:$4 sm:$0xff]  }
 0x716   :  { %13516 = vmatpush1.bf16.msra.mxu0 %v18007_v7  ;;  %13474 = vmatprep.subr.bf16.mxu1 %v18012_v32  ;;  %v18063_v7 = vld [vmem:[#allocation11 + $0x1e34] ss:$36 sps:$4 sm:$0xff]  }
 0x717   :  { %13517 = vmatprep.subr.bf16.mxu0 %v18015_v17  ;;  %v18058_v32 = vld [vmem:[#allocation11 + $0x19b0] ss:$36 sps:$4 sm:$0xff]  }
 0x718   :  { %v18061_v17 = vld [vmem:[#allocation11 + $0x1e30] ss:$36 sps:$4 sm:$0xff]  }
 0x719   :  { %13475 = vmatpush1.bf16.msra.mxu1 %v18010_v48  ;;  %v18066_v48 = vld [vmem:[#allocation11 + $0x196c] ss:$36 sps:$4 sm:$0xff]  }
 0x71a   :  { %13518 = vmatpush1.bf16.msra.mxu0 %v18013_v50  ;;  %13476 = vmatprep.subr.bf16.mxu1 %v18018_v31  ;;  %v18069_v50 = vld [vmem:[#allocation11 + $0x1dec] ss:$36 sps:$4 sm:$0xff]  }
 0x71b   :  { %13519 = vmatprep.subr.bf16.mxu0 %v18021_v52  ;;  %v18064_v31 = vld [vmem:[#allocation11 + $0x1968] ss:$36 sps:$4 sm:$0xff]  }
 0x71c   :  { %v18067_v52 = vld [vmem:[#allocation11 + $0x1de8] ss:$36 sps:$4 sm:$0xff]  }
 0x71d   :  { %13477 = vmatpush1.bf16.msra.mxu1 %v18016_v10  ;;  %v18072_v10 = vld [vmem:[#allocation11 + $0x1924] ss:$36 sps:$4 sm:$0xff]  }
 0x71e   :  { %13520 = vmatpush1.bf16.msra.mxu0 %v18019_v5  ;;  %13478 = vmatprep.subr.bf16.mxu1 %v18024_v25  ;;  %v18075_v5 = vld [vmem:[#allocation11 + $0x1da4] ss:$36 sps:$4 sm:$0xff]  }
 0x71f   :  { %13521 = vmatprep.subr.bf16.mxu0 %v18027_v51  ;;  %v18070_v25 = vld [vmem:[#allocation11 + $0x1920] ss:$36 sps:$4 sm:$0xff]  }
 0x720   :  { %v18073_v51 = vld [vmem:[#allocation11 + $0x1da0] ss:$36 sps:$4 sm:$0xff]  }
 0x721   :  { %13479 = vmatpush1.bf16.msra.mxu1 %v18022_v14  ;;  %v18078_v14 = vld [vmem:[#allocation11 + $0x18dc] ss:$36 sps:$4 sm:$0xff]  }
 0x722   :  { %13522 = vmatpush1.bf16.msra.mxu0 %v18025_v54  ;;  %13480 = vmatprep.subr.bf16.mxu1 %v18030_v43  ;;  %v18081_v54 = vld [vmem:[#allocation11 + $0x1d5c] ss:$36 sps:$4 sm:$0xff]  }
 0x723   :  { %13523 = vmatprep.subr.bf16.mxu0 %v18033_v30  ;;  %v18076_v43 = vld [vmem:[#allocation11 + $0x18d8] ss:$36 sps:$4 sm:$0xff]  }
 0x724   :  { %v18079_v30 = vld [vmem:[#allocation11 + $0x1d58] ss:$36 sps:$4 sm:$0xff]  }
 0x725   :  { %13481 = vmatpush1.bf16.msra.mxu1 %v18028_v55  ;;  %v18084_v55 = vld [vmem:[#allocation11 + $0x2194] ss:$36 sps:$4 sm:$0xff]  }
 0x726   :  { %13524 = vmatpush1.bf16.msra.mxu0 %v18031_v18  ;;  %13482 = vmatprep.subr.bf16.mxu1 %v18036_v47  ;;  %v18085_v18 = vld [vmem:[#allocation11 + $0x458] ss:$36 sps:$4 sm:$0xff]   ;;  %v18082_v47 = vld [vmem:[#allocation11 + $0x2190] ss:$36 sps:$4 sm:$0xff]  }
 0x727   :  { %13525 = vmatprep.subr.bf16.mxu0 %v18039_v46  ;;  %v18086_v46 = vld [vmem:[#allocation11 + $0x218] ss:$36 sps:$4 sm:$0xff]  }
 0x729   :  { %13483 = vmatpush2.bf16.msra.mxu1 %v18034_v1  ;;  %v18089_v1 = vld [vmem:[#allocation11 + $0x214c] ss:$36 sps:$4 sm:$0xff]  }
 0x72a   :  { %13526 = vmatpush2.bf16.msra.mxu0 %v18037_v6  ;;  %13484 = vmatprep.subr.bf16.mxu1 %v18042_v27  ;;  %v18090_v27 = vld [vmem:[#allocation11 + $0x410] ss:$36 sps:$4 sm:$0xff]  }
 0x72b   :  { %13527 = vmatprep.subr.bf16.mxu0 %v18045_v24 }
 0x72d   :  { %13485 = vmatpush2.bf16.msra.mxu1 %v18040_v22  ;;  %v18087_v22 = vld [vmem:[#allocation11 + $0x2148] ss:$36 sps:$4 sm:$0xff]  }
 0x72e   :  { %13528 = vmatpush2.bf16.msra.mxu0 %v18043_v33  ;;  %13486 = vmatprep.subr.bf16.mxu1 %v18048_v21  ;;  %v18091_v21 = vld [vmem:[#allocation11 + $0x1d0] ss:$36 sps:$4 sm:$0xff]  }
 0x72f   :  { %13529 = vmatprep.subr.bf16.mxu0 %v18051_v49  ;;  %v18094_v49 = vld [vmem:[#allocation11 + $0x2104] ss:$36 sps:$4 sm:$0xff]  }
 0x731   :  { %13487 = vmatpush2.bf16.msra.mxu1 %v18046_v20 }
 0x732   :  { %13530 = vmatpush2.bf16.msra.mxu0 %v18049_v59  ;;  %13488 = vmatprep.subr.bf16.mxu1 %v18054_v19  ;;  %v18095_v59 = vld [vmem:[#allocation11 + $0x3c8] ss:$36 sps:$4 sm:$0xff]  }
 0x733   :  { %13531 = vmatprep.subr.bf16.mxu0 %v18057_v40  ;;  %v18096_v19 = vld [vmem:[#allocation11 + $0x188] ss:$36 sps:$4 sm:$0xff]   ;;  %v18099_v40 = vld [vmem:[#allocation11 + $0x20bc] ss:$36 sps:$4 sm:$0xff]  }
 0x735   :  { %13489 = vmatpush2.bf16.msra.mxu1 %v18052_v61  ;;  %v18100_v61 = vld [vmem:[#allocation11 + $0x380] ss:$36 sps:$4 sm:$0xff]  }
 0x736   :  { %13532 = vmatpush2.bf16.msra.mxu0 %v18055_v4  ;;  %13490 = vmatprep.subr.bf16.mxu1 %v18060_v62  ;;  %v18097_v4 = vld [vmem:[#allocation11 + $0x20b8] ss:$36 sps:$4 sm:$0xff]   ;;  %v18101_v62 = vld [vmem:[#allocation11 + $0x140] ss:$36 sps:$4 sm:$0xff]  }
 0x737   :  { %13533 = vmatprep.subr.bf16.mxu0 %v18063_v7  ;;  %v18102_v7 = vld [vmem:[#allocation11 + $0x2070] ss:$36 sps:$4 sm:$0xff]  }
 0x739   :  { %13491 = vmatpush2.bf16.msra.mxu1 %v18058_v32  ;;  %v18106_v32 = vld [vmem:[#allocation11 + $0xf8] ss:$36 sps:$4 sm:$0xff]  }
 0x73a   :  { %13534 = vmatpush2.bf16.msra.mxu0 %v18061_v17  ;;  %13492 = vmatprep.subr.bf16.mxu1 %v18066_v48  ;;  %v18109_v17 = vld [vmem:[#allocation11 + $0x202c] ss:$36 sps:$4 sm:$0xff]  }
 0x73b   :  { %13535 = vmatprep.subr.bf16.mxu0 %v18069_v50  ;;  %v18110_v48 = vld [vmem:[#allocation11 + $0x2f0] ss:$36 sps:$4 sm:$0xff]   ;;  %v18107_v50 = vld [vmem:[#allocation11 + $0x2028] ss:$36 sps:$4 sm:$0xff]  }
 0x73d   :  { %13493 = vmatpush2.bf16.msra.mxu1 %v18064_v31  ;;  %v18111_v31 = vld [vmem:[#allocation11 + $0xb0] ss:$36 sps:$4 sm:$0xff]  }
 0x73e   :  { %13536 = vmatpush2.bf16.msra.mxu0 %v18067_v52  ;;  %13494 = vmatprep.subr.bf16.mxu1 %v18072_v10  ;;  %v18114_v52 = vld [vmem:[#allocation11 + $0x1fe4] ss:$36 sps:$4 sm:$0xff]  }
 0x73f   :  { %13537 = vmatprep.subr.bf16.mxu0 %v18075_v5  ;;  %v18115_v10 = vld [vmem:[#allocation11 + $0x2a8] ss:$36 sps:$4 sm:$0xff]   ;;  %v18112_v5 = vld [vmem:[#allocation11 + $0x1fe0] ss:$36 sps:$4 sm:$0xff]  }
 0x741   :  { %13495 = vmatpush2.bf16.msra.mxu1 %v18070_v25  ;;  %v18116_v25 = vld [vmem:[#allocation11 + $0x68] ss:$36 sps:$4 sm:$0xff]  }
 0x742   :  { %13538 = vmatpush2.bf16.msra.mxu0 %v18073_v51  ;;  %13496 = vmatprep.subr.bf16.mxu1 %v18078_v14  ;;  %v18119_v51 = vld [vmem:[#allocation11 + $0x1f9c] ss:$36 sps:$4 sm:$0xff]  }
 0x743   :  { %13539 = vmatprep.subr.bf16.mxu0 %v18081_v54  ;;  %v18120_v14 = vld [vmem:[#allocation11 + $0x260] ss:$36 sps:$4 sm:$0xff]   ;;  %v18117_v54 = vld [vmem:[#allocation11 + $0x1f98] ss:$36 sps:$4 sm:$0xff]  }
 0x745   :  { %13497 = vmatpush2.bf16.msra.mxu1 %v18076_v43  ;;  %v18121_v43 = vld [vmem:[#allocation11 + $0x20] ss:$36 sps:$4 sm:$0xff]  }
 0x746   :  { %13540 = vmatpush2.bf16.msra.mxu0 %v18079_v30  ;;  %13552 = vmatprep.subr.bf16.mxu1 %v18084_v55  ;;  %v18124_v30 = vld [vmem:[#allocation11 + $0x23d4] ss:$36 sps:$4 sm:$0xff]  }
 0x747   :  { %16130 = vmatprep.subr.bf16.mxu0 %v18085_v18  ;;  %v18125_v55 = vld [vmem:[#allocation11 + $0xd58] ss:$36 sps:$4 sm:$0xff]   ;;  %v18122_v18 = vld [vmem:[#allocation11 + $0x23d0] ss:$36 sps:$4 sm:$0xff]  }
 0x748   :  { %v13242_v6 = vpop.f32.mrf.mxu1  ;;  %13499 = vmatmul.mubr.bf16.vlgmr.msra.gmra.mxu1 %v18889_v56 }
 0x749   :  { %v19116_v24 = vadd.f32 %v13242_v6, %v19102_v44  ;;  %13542 = vmatmul.mubr.bf16.vlgmr.msra.gmra.mxu0 %v18923_v39  ;;  %13553 = vmatpush1.bf16.msra.mxu1 %v18082_v47  ;;  %v18092_v44 = vld [vmem:[#allocation11 + $0x2100] ss:$36 sps:$4 sm:$0xff]   ;;  %v18126_v47 = vld [vmem:[#allocation11 + $0xb18] ss:$36 sps:$4 sm:$0xff]   ;;  %v18127_v6 = vld [vmem:[#allocation11 + $0x2388] ss:$36 sps:$4 sm:$0xff]  }
 0x74a   :  { %13584 = vmatprep.mubr.bf16.mxu1 %v18934_v57  ;;  %16131 = vmatpush3.bf16.msra.mxu0 %v18086_v46  ;;  %v13244_v33 = vpop.f32.mrf.mxu1  ;;  %v18129_v46 = vld [vmem:[#allocation11 + $0x238c] ss:$36 sps:$4 sm:$0xff]  }
 0x74b   :  { %19370 = vst [vmem:[#allocation31_spill] sm:$0xff] %v19116_v24  ;;  %13627 = vmatprep.mubr.bf16.mxu0 %v18814_v12  ;;  %v19122_v20 = vadd.f32 %v13244_v33, %v19106_v63  ;;  %13554 = vmatprep.subr.bf16.mxu1 %v18089_v1  ;;  %v18104_v12 = vld [vmem:[#allocation11 + $0x2074] ss:$36 sps:$4 sm:$0xff]   ;;  %v18135_v33 = vld [vmem:[#allocation11 + $0xcc8] ss:$36 sps:$4 sm:$0xff]  }
 0x74c   :  { %16132 = vmatprep.subr.bf16.mxu0 %v18090_v27  ;;  %v18105_v63 = vld [vmem:[#allocation11 + $0x338] ss:$36 sps:$4 sm:$0xff]   ;;  %v18130_v1 = vld [vmem:[#allocation11 + $0xd10] ss:$36 sps:$4 sm:$0xff]  }
 0x74d   :  { %19371 = vst [vmem:[#allocation32_spill] sm:$0xff] %v19122_v20  ;;  %13555 = vmatpush1.bf16.msra.mxu1 %v18087_v22  ;;  %v18131_v27 = vld [vmem:[#allocation11 + $0xad0] ss:$36 sps:$4 sm:$0xff]   ;;  %v18134_v22 = vld [vmem:[#allocation11 + $0x2344] ss:$36 sps:$4 sm:$0xff]  }
 0x74e   :  { %16133 = vmatpush3.bf16.msra.mxu0 %v18091_v21  ;;  %13556 = vmatprep.subr.bf16.mxu1 %v18094_v49  ;;  %v18132_v21 = vld [vmem:[#allocation11 + $0x2340] ss:$36 sps:$4 sm:$0xff]   ;;  %v18136_v49 = vld [vmem:[#allocation11 + $0xa88] ss:$36 sps:$4 sm:$0xff]  }
 0x74f   :  { %16134 = vmatprep.subr.bf16.mxu0 %v18095_v59  ;;  %v18139_v59 = vld [vmem:[#allocation11 + $0x22fc] ss:$36 sps:$4 sm:$0xff]  }
 0x750   :  { %v18315_v20 = vld [vmem:[#allocation12] sm:$0xff] }
 0x751   :  { %13557 = vmatpush1.bf16.msra.mxu1 %v18092_v44  ;;  %v18140_v44 = vld [vmem:[#allocation11 + $0xc80] ss:$36 sps:$4 sm:$0xff]   ;;  %v6313_v24 = vrot.slane %v18315_v20, %v18799_v15 }
 0x752   :  { %16135 = vmatpush3.bf16.msra.mxu0 %v18096_v19  ;;  %13558 = vmatprep.subr.bf16.mxu1 %v18099_v40  ;;  %v18141_v19 = vld [vmem:[#allocation11 + $0xa40] ss:$36 sps:$4 sm:$0xff]   ;;  %v18144_v40 = vld [vmem:[#allocation11 + $0x22b4] ss:$36 sps:$4 sm:$0xff]  }
 0x753   :  { %16136 = vmatprep.subr.bf16.mxu0 %v18100_v61  ;;  %v18142_v61 = vld [vmem:[#allocation11 + $0x22b0] ss:$36 sps:$4 sm:$0xff]  }
 0x755   :  { %13559 = vmatpush1.bf16.msra.mxu1 %v18097_v4  ;;  %v18146_v4 = vld [vmem:[#allocation11 + $0x9f8] ss:$36 sps:$4 sm:$0xff]  }
 0x756   :  { %16137 = vmatpush3.bf16.msra.mxu0 %v18101_v62  ;;  %13560 = vmatprep.subr.bf16.mxu1 %v18104_v12  ;;  %v18149_v62 = vld [vmem:[#allocation11 + $0x226c] ss:$36 sps:$4 sm:$0xff]  }
 0x757   :  { %16138 = vmatprep.subr.bf16.mxu0 %v18105_v63  ;;  %v18150_v12 = vld [vmem:[#allocation11 + $0xbf0] ss:$36 sps:$4 sm:$0xff]   ;;  %v18147_v63 = vld [vmem:[#allocation11 + $0x2268] ss:$36 sps:$4 sm:$0xff]  }
 0x759   :  { %13561 = vmatpush1.bf16.msra.mxu1 %v18102_v7  ;;  %v18151_v7 = vld [vmem:[#allocation11 + $0x9b0] ss:$36 sps:$4 sm:$0xff]  }
 0x75a   :  { %16139 = vmatpush3.bf16.msra.mxu0 %v18106_v32  ;;  %13562 = vmatprep.subr.bf16.mxu1 %v18109_v17  ;;  %v18154_v32 = vld [vmem:[#allocation11 + $0x2224] ss:$36 sps:$4 sm:$0xff]  }
 0x75b   :  { %16140 = vmatprep.subr.bf16.mxu0 %v18110_v48  ;;  %v18155_v17 = vld [vmem:[#allocation11 + $0xba8] ss:$36 sps:$4 sm:$0xff]   ;;  %v18152_v48 = vld [vmem:[#allocation11 + $0x2220] ss:$36 sps:$4 sm:$0xff]  }
 0x75d   :  { %13563 = vmatpush1.bf16.msra.mxu1 %v18107_v50  ;;  %v18156_v50 = vld [vmem:[#allocation11 + $0x968] ss:$36 sps:$4 sm:$0xff]  }
 0x75e   :  { %16141 = vmatpush3.bf16.msra.mxu0 %v18111_v31  ;;  %13564 = vmatprep.subr.bf16.mxu1 %v18114_v52  ;;  %v18159_v31 = vld [vmem:[#allocation11 + $0x21dc] ss:$36 sps:$4 sm:$0xff]  }
 0x75f   :  { %16142 = vmatprep.subr.bf16.mxu0 %v18115_v10  ;;  %v18160_v52 = vld [vmem:[#allocation11 + $0xb60] ss:$36 sps:$4 sm:$0xff]   ;;  %v18157_v10 = vld [vmem:[#allocation11 + $0x21d8] ss:$36 sps:$4 sm:$0xff]  }
 0x761   :  { %13565 = vmatpush1.bf16.msra.mxu1 %v18112_v5  ;;  %v18161_v5 = vld [vmem:[#allocation11 + $0x920] ss:$36 sps:$4 sm:$0xff]  }
 0x762   :  { %16143 = vmatpush3.bf16.msra.mxu0 %v18116_v25  ;;  %13566 = vmatprep.subr.bf16.mxu1 %v18119_v51  ;;  %v18162_v25 = vld [vmem:[#allocation11 + $0x8d8] ss:$36 sps:$4 sm:$0xff]  }
 0x763   :  { %16144 = vmatprep.subr.bf16.mxu0 %v18120_v14  ;;  %v18163_v51 = vld [vmem:[#allocation11 + $0x1658] ss:$36 sps:$4 sm:$0xff]  }
 0x764   :  { %v18164_v14 = vld [vmem:[#allocation11 + $0x698] ss:$36 sps:$4 sm:$0xff]  }
 0x765   :  { %13567 = vmatpush1.bf16.msra.mxu1 %v18117_v54  ;;  %v18165_v54 = vld [vmem:[#allocation11 + $0x1418] ss:$36 sps:$4 sm:$0xff]  }
 0x766   :  { %16145 = vmatpush3.bf16.msra.mxu0 %v18121_v43  ;;  %13568 = vmatprep.subr.bf16.mxu1 %v18124_v30  ;;  %v18166_v43 = vld [vmem:[#allocation11 + $0x890] ss:$36 sps:$4 sm:$0xff]  }
 0x767   :  { %16174 = vmatprep.subr.bf16.mxu0 %v18125_v55  ;;  %v18167_v30 = vld [vmem:[#allocation11 + $0x1610] ss:$36 sps:$4 sm:$0xff]  }
 0x768   :  { %v18168_v55 = vld [vmem:[#allocation11 + $0x650] ss:$36 sps:$4 sm:$0xff]  }
 0x769   :  { %13628 = vmatmul.mubr.bf16.vlgmr.msra.gmra.mxu0 %v18757_v2  ;;  %13569 = vmatpush2.bf16.msra.mxu1 %v18122_v18  ;;  %v18137_v2 = vld [vmem:[#allocation11 + $0x22f8] ss:$36 sps:$4 sm:$0xff]   ;;  %v18169_v18 = vld [vmem:[#allocation11 + $0x13d0] ss:$36 sps:$4 sm:$0xff]  }
 0x76a   :  { %16175 = vmatpush3.bf16.msra.mxu0 %v18126_v47  ;;  %13709 = vmatprep.mubr.bf16.mxu0 %v18853_v42  ;;  %v18145_v42 = vld [vmem:[#allocation11 + $0xc38] ss:$36 sps:$4 sm:$0xff]   ;;  %v18170_v47 = vld [vmem:[#allocation11 + $0x848] ss:$36 sps:$4 sm:$0xff]  }
 0x76b   :  { %13570 = vmatprep.subr.bf16.mxu1 %v18129_v46  ;;  %16176 = vmatprep.subr.bf16.mxu0 %v18130_v1  ;;  %v18171_v46 = vld [vmem:[#allocation11 + $0x15c8] ss:$36 sps:$4 sm:$0xff]  }
 0x76c   :  { %v18172_v1 = vld [vmem:[#allocation11 + $0x608] ss:$36 sps:$4 sm:$0xff]  }
 0x76d   :  { %13571 = vmatpush2.bf16.msra.mxu1 %v18127_v6  ;;  %v18173_v6 = vld [vmem:[#allocation11 + $0x1388] ss:$36 sps:$4 sm:$0xff]  }
 0x76e   :  { %16177 = vmatpush3.bf16.msra.mxu0 %v18131_v27  ;;  %13572 = vmatprep.subr.bf16.mxu1 %v18134_v22  ;;  %v18174_v27 = vld [vmem:[#allocation11 + $0x800] ss:$36 sps:$4 sm:$0xff]  }
 0x76f   :  { %16178 = vmatprep.subr.bf16.mxu0 %v18135_v33  ;;  %v18176_v22 = vld [vmem:[#allocation11 + $0x5c0] ss:$36 sps:$4 sm:$0xff]   ;;  %v18178_v33 = vld [vmem:[#allocation11 + $0x7b8] ss:$36 sps:$4 sm:$0xff]  }
 0x771   :  { %13573 = vmatpush2.bf16.msra.mxu1 %v18132_v21  ;;  %v18179_v21 = vld [vmem:[#allocation11 + $0x1538] ss:$36 sps:$4 sm:$0xff]  }
 0x772   :  { %16179 = vmatpush3.bf16.msra.mxu0 %v18136_v49  ;;  %13574 = vmatprep.subr.bf16.mxu1 %v18139_v59  ;;  %v18181_v49 = vld [vmem:[#allocation11 + $0x12f8] ss:$36 sps:$4 sm:$0xff]   ;;  %v18182_v59 = vld [vmem:[#allocation11 + $0x770] ss:$36 sps:$4 sm:$0xff]  }
 0x773   :  { %16180 = vmatprep.subr.bf16.mxu0 %v18140_v44  ;;  %v18183_v44 = vld [vmem:[#allocation11 + $0x14f0] ss:$36 sps:$4 sm:$0xff]  }
 0x775   :  { %13575 = vmatpush2.bf16.msra.mxu1 %v18137_v2  ;;  %v18184_v2 = vld [vmem:[#allocation11 + $0x530] ss:$36 sps:$4 sm:$0xff]  }
 0x776   :  { %16181 = vmatpush3.bf16.msra.mxu0 %v18141_v19  ;;  %13576 = vmatprep.subr.bf16.mxu1 %v18144_v40  ;;  %v18185_v19 = vld [vmem:[#allocation11 + $0x12b0] ss:$36 sps:$4 sm:$0xff]   ;;  %v18186_v40 = vld [vmem:[#allocation11 + $0x728] ss:$36 sps:$4 sm:$0xff]  }
 0x777   :  { %16182 = vmatprep.subr.bf16.mxu0 %v18145_v42  ;;  %v18187_v42 = vld [vmem:[#allocation11 + $0x14a8] ss:$36 sps:$4 sm:$0xff]  }
 0x779   :  { %13577 = vmatpush2.bf16.msra.mxu1 %v18142_v61  ;;  %v18188_v61 = vld [vmem:[#allocation11 + $0x4e8] ss:$36 sps:$4 sm:$0xff]  }
 0x77a   :  { %16183 = vmatpush3.bf16.msra.mxu0 %v18146_v4  ;;  %13578 = vmatprep.subr.bf16.mxu1 %v18149_v62  ;;  %v18189_v4 = vld [vmem:[#allocation11 + $0x1268] ss:$36 sps:$4 sm:$0xff]   ;;  %v18190_v62 = vld [vmem:[#allocation11 + $0x6e0] ss:$36 sps:$4 sm:$0xff]  }
 0x77b   :  { %16184 = vmatprep.subr.bf16.mxu0 %v18150_v12  ;;  %v18191_v12 = vld [vmem:[#allocation11 + $0x1460] ss:$36 sps:$4 sm:$0xff]  }
 0x77d   :  { %13579 = vmatpush2.bf16.msra.mxu1 %v18147_v63  ;;  %v18192_v63 = vld [vmem:[#allocation11 + $0x4a0] ss:$36 sps:$4 sm:$0xff]  }
 0x77e   :  { %16185 = vmatpush3.bf16.msra.mxu0 %v18151_v7  ;;  %13580 = vmatprep.subr.bf16.mxu1 %v18154_v32  ;;  %v18193_v7 = vld [vmem:[#allocation11 + $0x1220] ss:$36 sps:$4 sm:$0xff]   ;;  %v18194_v32 = vld [vmem:[#allocation11 + $0x11d8] ss:$36 sps:$4 sm:$0xff]  }
 0x77f   :  { %16186 = vmatprep.subr.bf16.mxu0 %v18155_v17  ;;  %v18195_v17 = vld [vmem:[#allocation11 + $0x1f58] ss:$36 sps:$4 sm:$0xff]  }
 0x781   :  { %13581 = vmatpush2.bf16.msra.mxu1 %v18152_v48  ;;  %v18196_v48 = vld [vmem:[#allocation11 + $0xf98] ss:$36 sps:$4 sm:$0xff]  }
 0x782   :  { %16187 = vmatpush3.bf16.msra.mxu0 %v18156_v50  ;;  %13582 = vmatprep.subr.bf16.mxu1 %v18159_v31  ;;  %v18197_v50 = vld [vmem:[#allocation11 + $0x1d18] ss:$36 sps:$4 sm:$0xff]   ;;  %v18198_v31 = vld [vmem:[#allocation11 + $0x1190] ss:$36 sps:$4 sm:$0xff]  }
 0x783   :  { %16188 = vmatprep.subr.bf16.mxu0 %v18160_v52  ;;  %v18199_v52 = vld [vmem:[#allocation11 + $0x1f10] ss:$36 sps:$4 sm:$0xff]  }
 0x785   :  { %13583 = vmatpush2.bf16.msra.mxu1 %v18157_v10  ;;  %v18200_v10 = vld [vmem:[#allocation11 + $0xf50] ss:$36 sps:$4 sm:$0xff]  }
 0x786   :  { %16189 = vmatpush3.bf16.msra.mxu0 %v18161_v5  ;;  %16152 = vmatprep.subr.bf16.mxu1 %v18162_v25  ;;  %v18201_v5 = vld [vmem:[#allocation11 + $0x1cd0] ss:$36 sps:$4 sm:$0xff]   ;;  %v18202_v25 = vld [vmem:[#allocation11 + $0x1148] ss:$36 sps:$4 sm:$0xff]  }
 0x787   :  { %16218 = vmatprep.subr.bf16.mxu0 %v18163_v51  ;;  %v18203_v51 = vld [vmem:[#allocation11 + $0x1ec8] ss:$36 sps:$4 sm:$0xff]  }
 0x788   :  { %13585 = vmatmul.mubr.bf16.vlgmr.msra.gmra.mxu1 %v18944_v13 }
 0x789   :  { %13710 = vmatmul.mubr.bf16.vlgmr.msra.gmra.mxu0 %v18794_v60  ;;  %16153 = vmatpush3.bf16.msra.mxu1 %v18164_v14  ;;  %v18175_v60 = vld [vmem:[#allocation11 + $0x1580] ss:$36 sps:$4 sm:$0xff]   ;;  %v18204_v14 = vld [vmem:[#allocation11 + $0xf08] ss:$36 sps:$4 sm:$0xff]  }
 0x78a   :  { %13668 = vmatprep.mubr.bf16.mxu1 %v18850_v38  ;;  %16219 = vmatpush3.bf16.msra.mxu0 %v18165_v54  ;;  %v18177_v38 = vld [vmem:[#allocation11 + $0x1340] ss:$36 sps:$4 sm:$0xff]  }
 0x78b   :  { %13791 = vmatprep.mubr.bf16.mxu0 %v18882_v58  ;;  %16154 = vmatprep.subr.bf16.mxu1 %v18166_v43  ;;  %v18180_v58 = vld [vmem:[#allocation11 + $0x578] ss:$36 sps:$4 sm:$0xff]   ;;  %v18206_v54 = vld [vmem:[#allocation11 + $0x1100] ss:$36 sps:$4 sm:$0xff]  }
 0x78c   :  { %16220 = vmatprep.subr.bf16.mxu0 %v18167_v30  ;;  %v18208_v43 = vld [vmem:[#allocation11 + $0xec0] ss:$36 sps:$4 sm:$0xff]   ;;  %v18210_v30 = vld [vmem:[#allocation11 + $0x10b8] ss:$36 sps:$4 sm:$0xff]  }
 0x78d   :  { %16155 = vmatpush3.bf16.msra.mxu1 %v18168_v55  ;;  %v18211_v55 = vld [vmem:[#allocation11 + $0x1e38] ss:$36 sps:$4 sm:$0xff]  }
 0x78e   :  { %16221 = vmatpush3.bf16.msra.mxu0 %v18169_v18  ;;  %16156 = vmatprep.subr.bf16.mxu1 %v18170_v47  ;;  %v18213_v18 = vld [vmem:[#allocation11 + $0x1bf8] ss:$36 sps:$4 sm:$0xff]   ;;  %v18214_v47 = vld [vmem:[#allocation11 + $0x1070] ss:$36 sps:$4 sm:$0xff]  }
 0x78f   :  { %16222 = vmatprep.subr.bf16.mxu0 %v18171_v46  ;;  %v18215_v46 = vld [vmem:[#allocation11 + $0x1df0] ss:$36 sps:$4 sm:$0xff]  }
 0x791   :  { %16157 = vmatpush3.bf16.msra.mxu1 %v18172_v1  ;;  %v18216_v1 = vld [vmem:[#allocation11 + $0xe30] ss:$36 sps:$4 sm:$0xff]  }
 0x792   :  { %16223 = vmatpush3.bf16.msra.mxu0 %v18173_v6  ;;  %16158 = vmatprep.subr.bf16.mxu1 %v18174_v27  ;;  %v18217_v6 = vld [vmem:[#allocation11 + $0x1bb0] ss:$36 sps:$4 sm:$0xff]   ;;  %v18218_v27 = vld [vmem:[#allocation11 + $0x1028] ss:$36 sps:$4 sm:$0xff]  }
 0x793   :  { %16224 = vmatprep.subr.bf16.mxu0 %v18175_v60  ;;  %v18219_v60 = vld [vmem:[#allocation11 + $0x1da8] ss:$36 sps:$4 sm:$0xff]  }
 0x795   :  { %16159 = vmatpush3.bf16.msra.mxu1 %v18176_v22  ;;  %v18220_v22 = vld [vmem:[#allocation11 + $0xde8] ss:$36 sps:$4 sm:$0xff]  }
 0x796   :  { %16225 = vmatpush3.bf16.msra.mxu0 %v18177_v38  ;;  %16160 = vmatprep.subr.bf16.mxu1 %v18178_v33  ;;  %v18221_v38 = vld [vmem:[#allocation11 + $0x1b68] ss:$36 sps:$4 sm:$0xff]   ;;  %v18222_v33 = vld [vmem:[#allocation11 + $0xfe0] ss:$36 sps:$4 sm:$0xff]  }
 0x797   :  { %16226 = vmatprep.subr.bf16.mxu0 %v18179_v21  ;;  %v18223_v21 = vld [vmem:[#allocation11 + $0x1d60] ss:$36 sps:$4 sm:$0xff]  }
 0x799   :  { %16161 = vmatpush3.bf16.msra.mxu1 %v18180_v58  ;;  %v18224_v58 = vld [vmem:[#allocation11 + $0xda0] ss:$36 sps:$4 sm:$0xff]  }
 0x79a   :  { %16227 = vmatpush3.bf16.msra.mxu0 %v18181_v49  ;;  %16162 = vmatprep.subr.bf16.mxu1 %v18182_v59  ;;  %v18225_v49 = vld [vmem:[#allocation11 + $0x1b20] ss:$36 sps:$4 sm:$0xff]   ;;  %v18226_v59 = vld [vmem:[#allocation11 + $0x1ad8] ss:$36 sps:$4 sm:$0xff]  }
 0x79b   :  { %16228 = vmatprep.subr.bf16.mxu0 %v18183_v44  ;;  %v18227_v44 = vld [vmem:[#allocation11 + $0x1898] ss:$36 sps:$4 sm:$0xff]  }
 0x79d   :  { %16163 = vmatpush3.bf16.msra.mxu1 %v18184_v2  ;;  %v18228_v2 = vld [vmem:[#allocation11 + $0x1a90] ss:$36 sps:$4 sm:$0xff]  }
 0x79e   :  { %16229 = vmatpush3.bf16.msra.mxu0 %v18185_v19  ;;  %16164 = vmatprep.subr.bf16.mxu1 %v18186_v40  ;;  %v18229_v19 = vld [vmem:[#allocation11 + $0x1850] ss:$36 sps:$4 sm:$0xff]   ;;  %v18230_v40 = vld [vmem:[#allocation11 + $0x1a48] ss:$36 sps:$4 sm:$0xff]  }
 0x79f   :  { %16230 = vmatprep.subr.bf16.mxu0 %v18187_v42  ;;  %v18307_v42 = vld [vmem:[%s19344_s0 + $0x8] sm:$0xff] }
 0x7a1   :  { %16165 = vmatpush3.bf16.msra.mxu1 %v18188_v61  ;;  %v18231_v61 = vld [vmem:[#allocation11 + $0x1808] ss:$36 sps:$4 sm:$0xff]  }
 0x7a2   :  { %16231 = vmatpush3.bf16.msra.mxu0 %v18189_v4  ;;  %16166 = vmatprep.subr.bf16.mxu1 %v18190_v62  ;;  %v18232_v4 = vld [vmem:[#allocation11 + $0x1a00] ss:$36 sps:$4 sm:$0xff]  }
 0x7a3   :  { %16232 = vmatprep.subr.bf16.mxu0 %v18191_v12  ;;  %v18233_v62 = vld [vmem:[#allocation11 + $0x17c0] ss:$36 sps:$4 sm:$0xff]   ;;  %v18236_v12 = vld [vmem:[#allocation11 + $0x1970] ss:$36 sps:$4 sm:$0xff]  }
 0x7a5   :  { %16167 = vmatpush3.bf16.msra.mxu1 %v18192_v63  ;;  %v18238_v63 = vld [vmem:[#allocation11 + $0x1928] ss:$36 sps:$4 sm:$0xff]  }
 0x7a6   :  { %16233 = vmatpush3.bf16.msra.mxu0 %v18193_v7  ;;  %16196 = vmatprep.subr.bf16.mxu1 %v18194_v32  ;;  %v18239_v7 = vld [vmem:[#allocation11 + $0x16e8] ss:$36 sps:$4 sm:$0xff]   ;;  %v18240_v32 = vld [vmem:[#allocation11 + $0x18e0] ss:$36 sps:$4 sm:$0xff]  }
 0x7a7   :  { %16262 = vmatprep.subr.bf16.mxu0 %v18195_v17  ;;  %v18241_v17 = vld [vmem:[#allocation11 + $0x16a0] ss:$36 sps:$4 sm:$0xff]  }
 0x7a8   :  { %13669 = vmatmul.mubr.bf16.vlgmr.msra.gmra.mxu1 %v18773_v23  ;;  %v18205_v23 = vld [vmem:[#allocation11 + $0x1c88] ss:$36 sps:$4 sm:$0xff]  }
 0x7a9   :  { %13792 = vmatmul.mubr.bf16.vlgmr.msra.gmra.mxu0 %v18860_v35  ;;  %16197 = vmatpush3.bf16.msra.mxu1 %v18196_v48  ;;  %v18207_v35 = vld [vmem:[#allocation11 + $0x1e80] ss:$36 sps:$4 sm:$0xff]   ;;  %v18242_v48 = vld [vmem:[#allocation11 + $0x23d8] ss:$36 sps:$4 sm:$0xff]  }
 0x7aa   :  { %13750 = vmatprep.mubr.bf16.mxu1 %v18879_v34  ;;  %16263 = vmatpush3.bf16.msra.mxu0 %v18197_v50  ;;  %v18209_v34 = vld [vmem:[#allocation11 + $0x1c40] ss:$36 sps:$4 sm:$0xff]   ;;  %v18243_v50 = vld [vmem:[#allocation11 + $0x2198] ss:$36 sps:$4 sm:$0xff]  }
 0x7ab   :  { %13873 = vmatprep.mubr.bf16.mxu0 %v18910_v0  ;;  %16198 = vmatprep.subr.bf16.mxu1 %v18198_v31  ;;  %v18212_v0 = vld [vmem:[#allocation11 + $0xe78] ss:$36 sps:$4 sm:$0xff]   ;;  %v18244_v31 = vld [vmem:[#allocation11 + $0x2390] ss:$36 sps:$4 sm:$0xff]  }
 0x7ac   :  { %16264 = vmatprep.subr.bf16.mxu0 %v18199_v52  ;;  %v18245_v52 = vld [vmem:[#allocation11 + $0x2150] ss:$36 sps:$4 sm:$0xff]  }
 0x7ad   :  { %16199 = vmatpush3.bf16.msra.mxu1 %v18200_v10  ;;  %v18246_v10 = vld [vmem:[#allocation11 + $0x2348] ss:$36 sps:$4 sm:$0xff]  }
 0x7ae   :  { %16265 = vmatpush3.bf16.msra.mxu0 %v18201_v5  ;;  %16200 = vmatprep.subr.bf16.mxu1 %v18202_v25  ;;  %v18247_v5 = vld [vmem:[#allocation11 + $0x2108] ss:$36 sps:$4 sm:$0xff]   ;;  %v18248_v25 = vld [vmem:[#allocation11 + $0x2300] ss:$36 sps:$4 sm:$0xff]  }
 0x7af   :  { %16266 = vmatprep.subr.bf16.mxu0 %v18203_v51  ;;  %v18249_v51 = vld [vmem:[#allocation11 + $0x20c0] ss:$36 sps:$4 sm:$0xff]  }
 0x7b1   :  { %16201 = vmatpush3.bf16.msra.mxu1 %v18204_v14  ;;  %v18250_v14 = vld [vmem:[#allocation11 + $0x22b8] ss:$36 sps:$4 sm:$0xff]  }
 0x7b2   :  { %16267 = vmatpush3.bf16.msra.mxu0 %v18205_v23  ;;  %16202 = vmatprep.subr.bf16.mxu1 %v18206_v54  ;;  %v18251_v23 = vld [vmem:[#allocation11 + $0x2078] ss:$36 sps:$4 sm:$0xff]   ;;  %v18252_v54 = vld [vmem:[#allocation11 + $0x2270] ss:$36 sps:$4 sm:$0xff]  }
 0x7b3   :  { %16268 = vmatprep.subr.bf16.mxu0 %v18207_v35  ;;  %v18254_v35 = vld [vmem:[#allocation11 + $0x2228] ss:$36 sps:$4 sm:$0xff]  }
 0x7b5   :  { %16203 = vmatpush3.bf16.msra.mxu1 %v18208_v43  ;;  %v18256_v43 = vld [vmem:[#allocation11 + $0x21e0] ss:$36 sps:$4 sm:$0xff]  }
 0x7b6   :  { %16269 = vmatpush3.bf16.msra.mxu0 %v18209_v34  ;;  %16204 = vmatprep.subr.bf16.mxu1 %v18210_v30  ;;  %v18257_v34 = vld [vmem:[#allocation11 + $0x1fa0] ss:$36 sps:$4 sm:$0xff]  }
 0x7b7   :  { %16270 = vmatprep.subr.bf16.mxu0 %v18211_v55  ;;  %v18308_v30 = vld [vmem:[%s19344_s0 + $0x18] sm:$0xff] }
 0x7b8   :  { %v14092_v55 = vld [vmem:[#allocation14 + $0xf8] sm:$0xff] }
 0x7b9   :  { %16205 = vmatpush3.bf16.msra.mxu1 %v18212_v0  ;;  %v14076_v0 = vld [vmem:[#allocation14 + $0x78] sm:$0xff] }
 0x7ba   :  { %16271 = vmatpush3.bf16.msra.mxu0 %v18213_v18  ;;  %16206 = vmatprep.subr.bf16.mxu1 %v18214_v47  ;;  %v14091_v18 = vld [vmem:[#allocation14 + $0xf0] sm:$0xff]  ;;  %v14124_v47 = vld [vmem:[#allocation14 + $0x1f8] sm:$0xff] }
 0x7bb   :  { %16272 = vmatprep.subr.bf16.mxu0 %v18215_v46  ;;  %v14075_v46 = vld [vmem:[#allocation14 + $0x70] sm:$0xff] }
 0x7bd   :  { %16207 = vmatpush3.bf16.msra.mxu1 %v18216_v1  ;;  %v14108_v1 = vld [vmem:[#allocation14 + $0x178] sm:$0xff] }
 0x7be   :  { %16273 = vmatpush3.bf16.msra.mxu0 %v18217_v6  ;;  %16208 = vmatprep.subr.bf16.mxu1 %v18218_v27  ;;  %v14090_v6 = vld [vmem:[#allocation14 + $0xe8] sm:$0xff]  ;;  %v14123_v27 = vld [vmem:[#allocation14 + $0x1f0] sm:$0xff] }
 0x7bf   :  { %16274 = vmatprep.subr.bf16.mxu0 %v18219_v60  ;;  %v14074_v60 = vld [vmem:[#allocation14 + $0x68] sm:$0xff] }
 0x7c1   :  { %16209 = vmatpush3.bf16.msra.mxu1 %v18220_v22  ;;  %v14122_v22 = vld [vmem:[#allocation14 + $0x1e8] sm:$0xff] }
 0x7c2   :  { %16275 = vmatpush3.bf16.msra.mxu0 %v18221_v38  ;;  %16210 = vmatprep.subr.bf16.mxu1 %v18222_v33  ;;  %v14089_v38 = vld [vmem:[#allocation14 + $0xe0] sm:$0xff]  ;;  %v14106_v33 = vld [vmem:[#allocation14 + $0x168] sm:$0xff] }
 0x7c3   :  { %16276 = vmatprep.subr.bf16.mxu0 %v18223_v21  ;;  %v14073_v21 = vld [vmem:[#allocation14 + $0x60] sm:$0xff] }
 0x7c5   :  { %16211 = vmatpush3.bf16.msra.mxu1 %v18224_v58  ;;  %v14121_v58 = vld [vmem:[#allocation14 + $0x1e0] sm:$0xff] }
 0x7c6   :  { %16277 = vmatpush3.bf16.msra.mxu0 %v18225_v49  ;;  %16240 = vmatprep.subr.bf16.mxu1 %v18226_v59  ;;  %v14088_v49 = vld [vmem:[#allocation14 + $0xd8] sm:$0xff]  ;;  %v14105_v59 = vld [vmem:[#allocation14 + $0x160] sm:$0xff] }
 0x7c7   :  { %16306 = vmatprep.subr.mxu0 %v14092_v55  ;;  %v14079_v55 = vld [vmem:[#allocation14 + $0x90] sm:$0xff] }
 0x7c8   :  { %13751 = vmatmul.mubr.bf16.vlgmr.msra.gmra.mxu1 %v18821_v36  ;;  %v18234_v36 = vld [vmem:[#allocation11 + $0x19b8] ss:$36 sps:$4 sm:$0xff]  }
 0x7c9   :  { %13874 = vmatmul.mubr.bf16.vlgmr.msra.gmra.mxu0 %v18923_v39  ;;  %16241 = vmatpush3.bf16.msra.mxu1 %v18227_v44  ;;  %v18235_v39 = vld [vmem:[#allocation11 + $0x1778] ss:$36 sps:$4 sm:$0xff]   ;;  %v14072_v44 = vld [vmem:[#allocation14 + $0x58] sm:$0xff] }
 0x7ca   :  { %13832 = vmatprep.mubr.bf16.mxu1 %v18899_v9  ;;  %16242 = vmatprep.subr.bf16.mxu1 %v18228_v2  ;;  %v18237_v9 = vld [vmem:[#allocation11 + $0x1730] ss:$36 sps:$4 sm:$0xff]   ;;  %v14120_v2 = vld [vmem:[#allocation14 + $0x1d8] sm:$0xff] }
 0x7cb   :  { %14196 = vmatprep.mubr.f32.mxu0 %v18307_v42  ;;  %16307 = vmatpush3.msra.mxu0 %v14076_v0  ;;  %v14071_v42 = vld [vmem:[#allocation14 + $0x50] sm:$0xff]  ;;  %v14112_v0 = vld [vmem:[#allocation14 + $0x198] sm:$0xff] }
 0x7cc   :  { %16308 = vmatprep.subr.mxu0 %v14091_v18  ;;  %v14063_v18 = vld [vmem:[#allocation14 + $0x10] sm:$0xff] }
 0x7cd   :  { %16243 = vmatpush3.bf16.msra.mxu1 %v18229_v19  ;;  %16309 = vmatpush3.msra.mxu0 %v14075_v46  ;;  %v14087_v19 = vld [vmem:[#allocation14 + $0xd0] sm:$0xff]  ;;  %v14078_v46 = vld [vmem:[#allocation14 + $0x88] sm:$0xff] }
 0x7ce   :  { %16244 = vmatprep.subr.bf16.mxu1 %v18230_v40  ;;  %16310 = vmatprep.subr.mxu0 %v14090_v6  ;;  %v14104_v40 = vld [vmem:[#allocation14 + $0x158] sm:$0xff]  ;;  %v14062_v6 = vld [vmem:[#allocation14 + $0x8] sm:$0xff] }
 0x7cf   :  { %16311 = vmatpush3.msra.mxu0 %v14074_v60  ;;  %v14077_v60 = vld [vmem:[#allocation14 + $0x80] sm:$0xff] }
 0x7d0   :  { %16312 = vmatprep.subr.mxu0 %v14089_v38  ;;  %v14094_v38 = vld [vmem:[#allocation14 + $0x108] sm:$0xff] }
 0x7d1   :  { %16245 = vmatpush3.bf16.msra.mxu1 %v18231_v61  ;;  %16313 = vmatpush3.msra.mxu0 %v14073_v21  ;;  %v14119_v61 = vld [vmem:[#allocation14 + $0x1d0] sm:$0xff]  ;;  %v14093_v21 = vld [vmem:[#allocation14 + $0x100] sm:$0xff] }
 0x7d2   :  { %16246 = vmatprep.subr.bf16.mxu1 %v18232_v4  ;;  %16314 = vmatprep.subr.mxu0 %v14088_v49  ;;  %v14086_v4 = vld [vmem:[#allocation14 + $0xc8] sm:$0xff] }
 0x7d3   :  { %16315 = vmatpush3.msra.mxu0 %v14072_v44  ;;  %v18310_v49 = vld [vmem:[%s19344_s0 + $0x28] sm:$0xff]  ;;  %v18312_v44 = vld [vmem:[%s19344_s0 + $0x38] sm:$0xff] }
 0x7d4   :  { %16316 = vmatprep.subr.mxu0 %v14087_v19  ;;  %v18314_v19 = vld [vmem:[%s19344_s0 + $0x30] sm:$0xff] }
 0x7d5   :  { %16247 = vmatpush3.bf16.msra.mxu1 %v18233_v62  ;;  %v14103_v62 = vld [vmem:[#allocation14 + $0x150] sm:$0xff]  ;;  %16317 = vmatpush3.msra.mxu0 %v14071_v42 }
 0x7d6   :  { %16248 = vmatprep.subr.bf16.mxu1 %v18234_v36  ;;  %v14070_v36 = vld [vmem:[#allocation14 + $0x48] sm:$0xff]  ;;  %16318 = vmatprep.subr.mxu0 %v14086_v4  ;;  %v19168_v4 = vpop.f32.mrf.mxu1 }
 0x7d7   :  { %16319 = vmatpush3.msra.mxu0 %v14070_v36  ;;  %19373 = vst [vmem:[#allocation34_spill] sm:$0xff] %v19168_v4 }
 0x7d8   :  { %v19170_v36 = vpop.f32.mrf.mxu1 }
 0x7d9   :  { %16249 = vmatpush3.bf16.msra.mxu1 %v18235_v39  ;;  %v14118_v39 = vld [vmem:[#allocation14 + $0x1c8] sm:$0xff]  ;;  %19374 = vst [vmem:[#allocation35_spill] sm:$0xff] %v19170_v36 }
 0x7da   :  { %16250 = vmatprep.subr.bf16.mxu1 %v18236_v12  ;;  %v14085_v12 = vld [vmem:[#allocation14 + $0xc0] sm:$0xff] }
 0x7db   :  { %16320 = vmatprep.subr.mxu0 %v14085_v12  ;;  %v13328_v12 = vpop.f32.mrf.mxu1 }
 0x7dd   :  { %16251 = vmatpush3.bf16.msra.mxu1 %v18237_v9  ;;  %v14069_v9 = vld [vmem:[#allocation14 + $0x40] sm:$0xff] }
 0x7de   :  { %16252 = vmatprep.subr.bf16.mxu1 %v18238_v63  ;;  %v14102_v63 = vld [vmem:[#allocation14 + $0x148] sm:$0xff]  ;;  %16321 = vmatpush3.msra.mxu0 %v14069_v9 }
 0x7e1   :  { %16253 = vmatpush3.bf16.msra.mxu1 %v18239_v7  ;;  %v14084_v7 = vld [vmem:[#allocation14 + $0xb8] sm:$0xff] }
 0x7e2   :  { %16254 = vmatprep.subr.bf16.mxu1 %v18240_v32  ;;  %v14117_v32 = vld [vmem:[#allocation14 + $0x1c0] sm:$0xff]  ;;  %16322 = vmatprep.subr.mxu0 %v14084_v7 }
 0x7e5   :  { %16255 = vmatpush3.bf16.msra.mxu1 %v18241_v17  ;;  %v14068_v17 = vld [vmem:[#allocation14 + $0x38] sm:$0xff] }
 0x7e6   :  { %16284 = vmatprep.subr.bf16.mxu1 %v18242_v48  ;;  %v14101_v48 = vld [vmem:[#allocation14 + $0x140] sm:$0xff]  ;;  %16323 = vmatpush3.msra.mxu0 %v14068_v17 }
 0x7e8   :  { %13833 = vmatmul.mubr.bf16.vlgmr.msra.gmra.mxu1 %v18889_v56  ;;  %v18253_v56 = vld [vmem:[#allocation11 + $0x2030] ss:$36 sps:$4 sm:$0xff]  }
 0x7e9   :  { %16285 = vmatpush3.bf16.msra.mxu1 %v18243_v50  ;;  %13914 = vmatprep.mubr.bf16.mxu1 %v18934_v57  ;;  %v18255_v57 = vld [vmem:[#allocation11 + $0x1fe8] ss:$36 sps:$4 sm:$0xff]   ;;  %v14083_v50 = vld [vmem:[#allocation14 + $0xb0] sm:$0xff] }
 0x7ea   :  { %16286 = vmatprep.subr.bf16.mxu1 %v18244_v31  ;;  %v14116_v31 = vld [vmem:[#allocation14 + $0x1b8] sm:$0xff]  ;;  %16324 = vmatprep.subr.mxu0 %v14083_v50 }
 0x7ed   :  { %16287 = vmatpush3.bf16.msra.mxu1 %v18245_v52  ;;  %v14067_v52 = vld [vmem:[#allocation14 + $0x30] sm:$0xff] }
 0x7ee   :  { %16288 = vmatprep.subr.bf16.mxu1 %v18246_v10  ;;  %v14100_v10 = vld [vmem:[#allocation14 + $0x138] sm:$0xff]  ;;  %16325 = vmatpush3.msra.mxu0 %v14067_v52 }
 0x7f1   :  { %16289 = vmatpush3.bf16.msra.mxu1 %v18247_v5  ;;  %v14082_v5 = vld [vmem:[#allocation14 + $0xa8] sm:$0xff] }
 0x7f2   :  { %16290 = vmatprep.subr.bf16.mxu1 %v18248_v25  ;;  %v14115_v25 = vld [vmem:[#allocation14 + $0x1b0] sm:$0xff]  ;;  %16326 = vmatprep.subr.mxu0 %v14082_v5 }
 0x7f5   :  { %16291 = vmatpush3.bf16.msra.mxu1 %v18249_v51  ;;  %v14066_v51 = vld [vmem:[#allocation14 + $0x28] sm:$0xff] }
 0x7f6   :  { %16292 = vmatprep.subr.bf16.mxu1 %v18250_v14  ;;  %v14099_v14 = vld [vmem:[#allocation14 + $0x130] sm:$0xff]  ;;  %16327 = vmatpush3.msra.mxu0 %v14066_v51 }
 0x7f9   :  { %16293 = vmatpush3.bf16.msra.mxu1 %v18251_v23  ;;  %v14081_v23 = vld [vmem:[#allocation14 + $0xa0] sm:$0xff] }
 0x7fa   :  { %16294 = vmatprep.subr.bf16.mxu1 %v18252_v54  ;;  %v14114_v54 = vld [vmem:[#allocation14 + $0x1a8] sm:$0xff]  ;;  %16328 = vmatprep.subr.mxu0 %v14081_v23 }
 0x7fd   :  { %16295 = vmatpush3.bf16.msra.mxu1 %v18253_v56  ;;  %v14065_v56 = vld [vmem:[#allocation14 + $0x20] sm:$0xff] }
 0x7fe   :  { %16296 = vmatprep.subr.bf16.mxu1 %v18254_v35  ;;  %v14098_v35 = vld [vmem:[#allocation14 + $0x128] sm:$0xff]  ;;  %16329 = vmatpush3.msra.mxu0 %v14065_v56 }
 0x801   :  { %16297 = vmatpush3.bf16.msra.mxu1 %v18255_v57  ;;  %v14080_v57 = vld [vmem:[#allocation14 + $0x98] sm:$0xff] }
 0x802   :  { %16298 = vmatprep.subr.bf16.mxu1 %v18256_v43  ;;  %v14113_v43 = vld [vmem:[#allocation14 + $0x1a0] sm:$0xff]  ;;  %16330 = vmatprep.subr.mxu0 %v14080_v57 }
 0x805   :  { %16299 = vmatpush3.bf16.msra.mxu1 %v18257_v34  ;;  %v14064_v34 = vld [vmem:[#allocation14 + $0x18] sm:$0xff] }
 0x806   :  { %16344 = vmatprep.subr.mxu1 %v14124_v47  ;;  %16331 = vmatpush3.msra.mxu0 %v14064_v34  ;;  %v14096_v47 = vld [vmem:[#allocation14 + $0x118] sm:$0xff] }
 0x807   :  { %16332 = vmatprep.subr.mxu0 %v14079_v55 }
 0x808   :  { %13915 = vmatmul.mubr.bf16.vlgmr.msra.gmra.mxu1 %v18944_v13  ;;  %v14107_v13 = vld [vmem:[#allocation14 + $0x170] sm:$0xff]  ;;  %16333 = vmatpush3.msra.mxu0 %v14063_v18 }
 0x809   :  { %14271 = vmatprep.mubr.f32.mxu1 %v18308_v30  ;;  %16345 = vmatpush3.msra.mxu1 %v14108_v1  ;;  %v14097_v30 = vld [vmem:[#allocation14 + $0x120] sm:$0xff]  ;;  %v14111_v1 = vld [vmem:[#allocation14 + $0x190] sm:$0xff] }
 0x80a   :  { %16346 = vmatprep.subr.mxu1 %v14123_v27  ;;  %v14095_v27 = vld [vmem:[#allocation14 + $0x110] sm:$0xff]  ;;  %16334 = vmatprep.subr.mxu0 %v14078_v46 }
 0x80b   :  { %16347 = vmatpush3.msra.mxu1 %v14107_v13  ;;  %v14110_v13 = vld [vmem:[#allocation14 + $0x188] sm:$0xff]  ;;  %16335 = vmatpush3.msra.mxu0 %v14062_v6 }
 0x80c   :  { %16348 = vmatprep.subr.mxu1 %v14122_v22  ;;  %v14061_v22 = vld [vmem:[#allocation14] sm:$0xff]  ;;  %16336 = vmatprep.subr.mxu0 %v14077_v60 }
 0x80d   :  { %16349 = vmatpush3.msra.mxu1 %v14106_v33  ;;  %v14109_v33 = vld [vmem:[#allocation14 + $0x180] sm:$0xff]  ;;  %16337 = vmatpush3.msra.mxu0 %v14061_v22 }
 0x80e   :  { %16350 = vmatprep.subr.mxu1 %v14121_v58  ;;  %v18309_v58 = vld [vmem:[%s19344_s0] sm:$0xff] }
 0x80f   :  { %16351 = vmatpush3.msra.mxu1 %v14105_v59  ;;  %14197 = vmatmul.mubr.f32.vlgmr.msra.gmra.mxu0 %v18309_v58  ;;  %v18311_v59 = vld [vmem:[%s19344_s0 + $0x10] sm:$0xff] }
 0x810   :  { %16352 = vmatprep.subr.mxu1 %v14120_v2  ;;  %14201 = vmatprep.mubr.f32.mxu0 %v18310_v49  ;;  %v18313_v2 = vld [vmem:[%s19344_s0 + $0x20] sm:$0xff] }
 0x811   :  { %16353 = vmatpush3.msra.mxu1 %v14104_v40  ;;  %v19164_v40 = vpop.f32.mrf.mxu0 }
 0x812   :  { %16354 = vmatprep.subr.mxu1 %v14119_v61 }
 0x813   :  { %16355 = vmatpush3.msra.mxu1 %v14103_v62  ;;  %14202 = vmatmul.mubr.f32.gmra.mxu0 %v18313_v2  ;;  %v19166_v42 = vpop.f32.mrf.mxu0 }
 0x814   :  { %16356 = vmatprep.subr.mxu1 %v14118_v39  ;;  %19372 = vst [vmem:[#allocation33_spill] sm:$0xff] %v19166_v42 }
 0x815   :  { %16357 = vmatpush3.msra.mxu1 %v14102_v63  ;;  %v13285_v61 = vpop.f32.mrf.mxu0  ;;  %v13330_v63 = vpop.f32.mrf.mxu1 }
 0x816   :  { %16358 = vmatprep.subr.mxu1 %v14117_v32  ;;  %v13286_v8 = vadd.f32 %v13285_v61, %v6313_v24 }
 0x817   :  { %16359 = vmatpush3.msra.mxu1 %v14101_v48  ;;  %v13287_v62 = vpop.f32.mrf.mxu0  ;;  %v13332_v32 = vpop.f32.mrf.mxu1 }
 0x818   :  { %16360 = vmatprep.subr.mxu1 %v14116_v31  ;;  %v13329_v36 = vadd.f32 %v13328_v12, %v13286_v8 }
 0x819   :  { %16361 = vmatpush3.msra.mxu1 %v14100_v10  ;;  %v13289_v39 = vpop.f32.mrf.mxu0  ;;  %v19172_v48 = vpop.f32.mrf.mxu1 }
 0x81a   :  { %16362 = vmatprep.subr.mxu1 %v14115_v25 }
 0x81b   :  { %16363 = vmatpush3.msra.mxu1 %v14099_v14  ;;  %v13291_v9 = vpop.f32.mrf.mxu0  ;;  %v19174_v31 = vpop.f32.mrf.mxu1 }
 0x81c   :  { %16364 = vmatprep.subr.mxu1 %v14114_v54 }
 0x81d   :  { %16365 = vmatpush3.msra.mxu1 %v14098_v35  ;;  %v13371_v7 = vpop.f32.mrf.mxu0  ;;  %v19178_v10 = vpop.f32.mrf.mxu1 }
 0x81e   :  { %16366 = vmatprep.subr.mxu1 %v14113_v43  ;;  %v13372_v15 = vadd.f32 %v13371_v7, %v13329_v36 }
 0x81f   :  { %16367 = vmatpush3.msra.mxu1 %v14097_v30  ;;  %v13373_v17 = vpop.f32.mrf.mxu0  ;;  %v19182_v25 = vpop.f32.mrf.mxu1 }
 0x820   :  { %16368 = vmatprep.subr.mxu1 %v14112_v0 }
 0x821   :  { %16369 = vmatpush3.msra.mxu1 %v14096_v47  ;;  %v13375_v50 = vpop.f32.mrf.mxu0  ;;  %v19186_v14 = vpop.f32.mrf.mxu1 }
 0x822   :  { %16370 = vmatprep.subr.mxu1 %v14111_v1 }
 0x823   :  { %16371 = vmatpush3.msra.mxu1 %v14095_v27  ;;  %v19176_v52 = vpop.f32.mrf.mxu0  ;;  %v19190_v54 = vpop.f32.mrf.mxu1 }
 0x824   :  { %16372 = vmatprep.subr.mxu1 %v14110_v13 }
 0x825   :  { %16373 = vmatpush3.msra.mxu1 %v14094_v38  ;;  %v19180_v5 = vpop.f32.mrf.mxu0  ;;  %v19194_v35 = vpop.f32.mrf.mxu1 }
 0x826   :  { %16374 = vmatprep.subr.mxu1 %v14109_v33  ;;  %19376 = vst [vmem:[#allocation37_spill] sm:$0xff] %v19194_v35 }
 0x827   :  { %16375 = vmatpush3.msra.mxu1 %v14093_v21  ;;  %v19184_v51 = vpop.f32.mrf.mxu0  ;;  %v19198_v43 = vpop.f32.mrf.mxu1 }
 0x828   :  { %14272 = vmatmul.mubr.f32.vlgmr.msra.gmra.mxu1 %v18311_v59  ;;  %19378 = vst [vmem:[#allocation39_spill] sm:$0xff] %v19198_v43 }
 0x829   :  { %14276 = vmatprep.mubr.f32.mxu1 %v18312_v44  ;;  %v19188_v23 = vpop.f32.mrf.mxu0  ;;  %v19202_v30 = vpop.f32.mrf.mxu1 }
 0x82a   :  { %19380 = vst [vmem:[#allocation41_spill] sm:$0xff] %v19202_v30  ;;  %v13290_v30 = vadd.f32 %v13289_v39, %v6313_v24  ;;  %v13415_v39 = vadd.f32 %v19174_v31, %v13372_v15 }
 0x82b   :  { %v19192_v56 = vpop.f32.mrf.mxu0 }
 0x82c   :  { %14277 = vmatmul.mubr.f32.gmra.mxu1 %v18314_v19  ;;  %19375 = vst [vmem:[#allocation36_spill] sm:$0xff] %v19192_v56  ;;  %v13333_v42 = vadd.f32 %v13332_v32, %v13290_v30  ;;  %v13933_v32 = vmax.f32 %v19001_v16, %v19004_v26 }
 0x82d   :  { %v19196_v57 = vpop.f32.mrf.mxu0 }
 0x82e   :  { %19377 = vst [vmem:[#allocation38_spill] sm:$0xff] %v19196_v57  ;;  %v13376_v4 = vadd.f32 %v13375_v50, %v13333_v42  ;;  %v13934_v42 = vmax.f32 %v19063_v41, %v13933_v32  ;;  %v13458_v50 = vadd.f32 %v19180_v5, %v13415_v39 }
 0x82f   :  { %v19200_v34 = vpop.f32.mrf.mxu0 }
 0x830   :  { %19379 = vst [vmem:[#allocation40_spill] sm:$0xff] %v19200_v34  ;;  %v13419_v36 = vadd.f32 %v19182_v25, %v13376_v4 }
 0x831   :  { %v19204_v55 = vpop.f32.mrf.mxu0  ;;  %v19400_v39 = vld [vmem:[#allocation41_spill] sm:$0xff] }
 0x832   :  { %19381 = vst [vmem:[#allocation42_spill] sm:$0xff] %v19204_v55  ;;  %v14974_v55 = vld [vmem:[#allocation12 + $0x8] ss:$0 sm:$0xff]  ;;  %v13462_v4 = vadd.f32 %v19188_v23, %v13419_v36  ;;  %v19391_v23 = vld [vmem:[#allocation25_spill] sm:$0xff] }
 0x833   :  { %v19208_v18 = vpop.f32.mrf.mxu0 }
 0x834   :  { %19383 = vst [vmem:[#allocation44_spill] sm:$0xff] %v19208_v18 }
 0x835   :  { %v16146_v46 = vpop.f32.mrf.mxu0 }
 0x837   :  { %v16147_v6 = vpop.f32.mrf.mxu0  ;;  %v19398_v15 = vld [vmem:[#allocation40_spill] sm:$0xff] }
 0x838   :  { %v16148_v53 = vadd.f32 %v16147_v6, %v16146_v46  ;;  %v19388_v46 = vld [vmem:[#allocation37_spill] sm:$0xff]  ;;  %v19390_v6 = vld [vmem:[#allocation27_spill] sm:$0xff] }
 0x839   :  { %v16149_v60 = vpop.f32.mrf.mxu0 }
 0x83a   :  { %v13630_v29 = vadd.f32 %v16148_v53, %v14974_v55 }
 0x83b   :  { %v16150_v22 = vpop.f32.mrf.mxu0 }
 0x83c   :  { %v16151_v11 = vadd.f32 %v16150_v22, %v16149_v60  ;;  %v13923_v60 = vmax.f32 %v19391_v23, %v19390_v6  ;;  %v19393_v22 = vld [vmem:[#allocation30_spill] sm:$0xff] }
 0x83e   :  { %v13633_v8 = vadd.f32 %v16151_v11, %v14974_v55 }
 0x848   :  { %v19206_v0 = vpop.f32.mrf.mxu1 }
 0x849   :  { %19382 = vst [vmem:[#allocation43_spill] sm:$0xff] %v19206_v0  ;;  %v16190_v33 = vpop.f32.mrf.mxu0 }
 0x84a   :  { %v19210_v47 = vpop.f32.mrf.mxu1 }
 0x84b   :  { %19384 = vst [vmem:[#allocation45_spill] sm:$0xff] %v19210_v47  ;;  %v16191_v58 = vpop.f32.mrf.mxu0 }
 0x84c   :  { %v19212_v1 = vpop.f32.mrf.mxu1  ;;  %v16192_v12 = vadd.f32 %v16191_v58, %v16190_v33  ;;  %v19396_v33 = vld [vmem:[#allocation38_spill] sm:$0xff] }
 0x84d   :  { %19385 = vst [vmem:[#allocation46_spill] sm:$0xff] %v19212_v1  ;;  %v16193_v59 = vpop.f32.mrf.mxu0  ;;  %v6317_v1 = vrot.slane %v18315_v20, %v18863_v3 }
 0x84e   :  { %v19214_v27 = vpop.f32.mrf.mxu1 }
 0x84f   :  { %19386 = vst [vmem:[#allocation47_spill] sm:$0xff] %v19214_v27  ;;  %v16194_v2 = vpop.f32.mrf.mxu0  ;;  %v13288_v0 = vadd.f32 %v13287_v62, %v6317_v1  ;;  %v13292_v43 = vadd.f32 %v13291_v9, %v6317_v1 }
 0x850   :  { %v16195_v11 = vadd.f32 %v16194_v2, %v16193_v59  ;;  %v19397_v2 = vld [vmem:[#allocation35_spill] sm:$0xff] }
 0x851   :  { %v13331_v56 = vadd.f32 %v13330_v63, %v13288_v0  ;;  %v13335_v61 = vadd.f32 %v19172_v48, %v13292_v43  ;;  %v13501_v43 = vadd.f32 %v19190_v54, %v13458_v50  ;;  %v19387_v0 = vld [vmem:[#allocation34_spill] sm:$0xff]  ;;  %v19394_v54 = vld [vmem:[#allocation33_spill] sm:$0xff] }
 0x853   :  { %v13374_v20 = vadd.f32 %v13373_v17, %v13331_v56  ;;  %v13378_v17 = vadd.f32 %v19176_v52, %v13335_v61 }
 0x855   :  { %v13417_v53 = vadd.f32 %v19178_v10, %v13374_v20  ;;  %v13421_v25 = vadd.f32 %v19186_v14, %v13378_v17  ;;  %v19392_v14 = vld [vmem:[#allocation29_spill] sm:$0xff]  ;;  %v19399_v20 = vld [vmem:[#allocation42_spill] sm:$0xff] }
 0x857   :  { %v13460_v10 = vadd.f32 %v19184_v51, %v13417_v53 }
 0x868   :  { %v16168_v13 = vpop.f32.mrf.mxu1 }
 0x869   :  { %v16234_v18 = vpop.f32.mrf.mxu0 }
 0x86a   :  { %v16169_v38 = vpop.f32.mrf.mxu1 }
 0x86b   :  { %v16235_v27 = vpop.f32.mrf.mxu0  ;;  %v16170_v57 = vadd.f32 %v16169_v38, %v16168_v13  ;;  %v13935_v13 = vmax.f32 %v19392_v14, %v13934_v42  ;;  %v19405_v42 = vld [vmem:[#allocation46_spill] sm:$0xff] }
 0x86c   :  { %v16171_v21 = vpop.f32.mrf.mxu1  ;;  %v16236_v30 = vadd.f32 %v16235_v27, %v16234_v18  ;;  %v13206_v18 = vadd.f32 %v19394_v54, %v19393_v22  ;;  %v19395_v27 = vld [vmem:[#allocation36_spill] sm:$0xff] }
 0x86d   :  { %v16237_v37 = vpop.f32.mrf.mxu0  ;;  %v13671_v35 = vadd.f32 %v16170_v57, %v13630_v29  ;;  %v13204_v57 = vadd.f32 %v19164_v40, %v19109_v45 }
 0x86e   :  { %v16172_v49 = vpop.f32.mrf.mxu1 }
 0x86f   :  { %v16173_v3 = vadd.f32 %v16172_v49, %v16171_v21  ;;  %v16238_v62 = vpop.f32.mrf.mxu0  ;;  %v13712_v7 = vadd.f32 %v16192_v12, %v13671_v35  ;;  %v19234_v5 = vadd.f32 %v19387_v0, %v13204_v57  ;;  %v13544_v21 = vadd.f32 %v19396_v33, %v13501_v43  ;;  %v19401_v12 = vld [vmem:[#allocation43_spill] sm:$0xff]  ;;  %v19408_v43 = vld [vmem:[#allocation44_spill] sm:$0xff] }
 0x870   :  { %v16239_v58 = vadd.f32 %v16238_v62, %v16237_v37  ;;  %v19402_v37 = vld [vmem:[#allocation28_spill] sm:$0xff]  ;;  %v19403_v62 = vld [vmem:[#allocation26_spill] sm:$0xff] }
 0x871   :  { %v13674_v9 = vadd.f32 %v16173_v3, %v13633_v8  ;;  %v13924_v36 = vmax.f32 %v19403_v62, %v19402_v37 }
 0x873   :  { %v13715_v52 = vadd.f32 %v16195_v11, %v13674_v9  ;;  %v19404_v9 = vld [vmem:[#allocation45_spill] sm:$0xff]  ;;  %v19406_v11 = vld [vmem:[#allocation31_spill] sm:$0xff] }
 0x888   :  { %v16212_v44 = vpop.f32.mrf.mxu1 }
 0x889   :  { %v16278_v29 = vpop.f32.mrf.mxu0 }
 0x88a   :  { %v16213_v19 = vpop.f32.mrf.mxu1 }
 0x88b   :  { %v16214_v63 = vadd.f32 %v16213_v19, %v16212_v44  ;;  %v16279_v35 = vpop.f32.mrf.mxu0  ;;  %v13936_v44 = vmax.f32 %v19234_v5, %v13935_v13  ;;  %v19247_v19 = vadd.f32 %v19397_v2, %v13206_v18 }
 0x88c   :  { %v16215_v47 = vpop.f32.mrf.mxu1  ;;  %v16280_v32 = vadd.f32 %v16279_v35, %v16278_v29 }
 0x88d   :  { %v13753_v31 = vadd.f32 %v16214_v63, %v13712_v7  ;;  %v16281_v38 = vpop.f32.mrf.mxu0  ;;  %v19253_v63 = vadd.f32 %v19401_v12, %v13544_v21  ;;  %v13937_v29 = vmax.f32 %v19247_v19, %v13936_v44  ;;  %v16128_v12 = vld [vmem:[#allocation17] ss:$0 sm:$0xff] }
 0x88e   :  { %v16216_v34 = vpop.f32.mrf.mxu1 }
 0x88f   :  { %v16217_v56 = vadd.f32 %v16216_v34, %v16215_v47  ;;  %v13503_v34 = vadd.f32 %v19388_v46, %v13460_v10  ;;  %v19389_v47 = vld [vmem:[#allocation39_spill] sm:$0xff]  ;;  %v13794_v51 = vadd.f32 %v16236_v30, %v13753_v31  ;;  %v13925_v31 = vmax.f32 %v13923_v60, %v19406_v11 }
 0x890   :  { %v13505_v1 = vadd.f32 %v19389_v47, %v13462_v4  ;;  %v19407_v4 = vld [vmem:[#allocation32_spill] sm:$0xff] }
 0x891   :  { %v13756_v40 = vadd.f32 %v16217_v56, %v13715_v52  ;;  %v13546_v3 = vadd.f32 %v19398_v15, %v13503_v34  ;;  %v13927_v52 = vmax.f32 %v13925_v31, %v19253_v63 }
 0x892   :  { %v13548_v61 = vadd.f32 %v19399_v20, %v13505_v1  ;;  %v19409_v1 = vld [vmem:[#allocation47_spill] sm:$0xff] }
 0x893   :  { %v13797_v53 = vadd.f32 %v16239_v58, %v13756_v40  ;;  %v19258_v7 = vadd.f32 %v19404_v9, %v13546_v3 }
 0x894   :  { %v19261_v17 = vadd.f32 %v19405_v42, %v13548_v61 }
 0x896   :  { %v13938_v46 = vmax.f32 %v19261_v17, %v13937_v29 }
 0x8a8   :  { %v16256_v28 = vpop.f32.mrf.mxu1 }
 0x8aa   :  { %v16257_v24 = vpop.f32.mrf.mxu1 }
 0x8ab   :  { %v16258_v55 = vadd.f32 %v16257_v24, %v16256_v28  ;;  %v13464_v28 = vadd.f32 %v19395_v27, %v13421_v25  ;;  %v13926_v25 = vmax.f32 %v13924_v36, %v19407_v4 }
 0x8ac   :  { %v16259_v48 = vpop.f32.mrf.mxu1 }
 0x8ad   :  { %v13835_v49 = vadd.f32 %v16258_v55, %v13794_v51  ;;  %v13507_v8 = vadd.f32 %v19400_v39, %v13464_v28  ;;  %v13928_v47 = vmax.f32 %v13926_v25, %v19258_v7  ;;  %v16127_v28 = vld [vmem:[#allocation15] ss:$0 sm:$0xff] }
 0x8ae   :  { %v16260_v45 = vpop.f32.mrf.mxu1 }
 0x8af   :  { %v16261_v59 = vadd.f32 %v16260_v45, %v16259_v48  ;;  %v16282_v48 = vpop.f32.mrf.mxu0  ;;  %v13876_v57 = vadd.f32 %v16280_v32, %v13835_v49  ;;  %v13550_v30 = vadd.f32 %v19408_v43, %v13507_v8 }
 0x8b0   :  { %v16283_v55 = vadd.f32 %v16282_v48, %v16281_v38 }
 0x8b1   :  { %v13838_v56 = vadd.f32 %v16261_v59, %v13797_v53  ;;  %v19273_v45 = vadd.f32 %v19409_v1, %v13550_v30 }
 0x8b3   :  { %v13879_v40 = vadd.f32 %v16283_v55, %v13838_v56  ;;  %v13939_v54 = vmax.f32 %v19273_v45, %v13938_v46 }
 0x8c8   :  { %v16300_v24 = vpop.f32.mrf.mxu1 }
 0x8ca   :  { %v16301_v50 = vpop.f32.mrf.mxu1 }
 0x8cb   :  { %v16302_v10 = vadd.f32 %v16301_v50, %v16300_v24 }
 0x8cc   :  { %v16303_v35 = vpop.f32.mrf.mxu1 }
 0x8cd   :  { %v19268_v0 = vadd.f32 %v16302_v10, %v13876_v57 }
 0x8ce   :  { %v16304_v34 = vpop.f32.mrf.mxu1 }
 0x8cf   :  { %v16305_v51 = vadd.f32 %v16304_v34, %v16303_v35  ;;  %v13929_v60 = vmax.f32 %v13927_v52, %v19268_v0  ;;  %v16338_v27 = vpop.f32.mrf.mxu0 }
 0x8d1   :  { %v19276_v13 = vadd.f32 %v16305_v51, %v13879_v40  ;;  %v13930_v22 = vmax.f32 %v13929_v60, %v13928_v47  ;;  %v16339_v38 = vpop.f32.mrf.mxu0 }
 0x8d2   :  { %v16340_v21 = vadd.f32 %v16339_v38, %v16338_v27 }
 0x8d3   :  { %13931 = vmax.xlane.f32.xlu0 %v13930_v22  ;;  %v13940_v18 = vmax.f32 %v13939_v54, %v19276_v13  ;;  %v16341_v58 = vpop.f32.mrf.mxu0 }
 0x8d4   :  { %v14199_v59 = vadd.f32 %v16340_v21, %v16127_v28 }
 0x8d5   :  { %v16342_v2 = vpop.f32.mrf.mxu0 }
 0x8d6   :  { %v16343_v3 = vadd.f32 %v16342_v2, %v16341_v58 }
 0x8d7   :  { %13941 = vmax.xlane.f32.xlu0 %v13940_v18 }
 0x8d8   :  { %v14204_v24 = vadd.f32 %v16343_v3, %v16127_v28 }
 0x8e8   :  { %v16376_v33 = vpop.f32.mrf.mxu1 }
 0x8ea   :  { %v16377_v49 = vpop.f32.mrf.mxu1 }
 0x8eb   :  { %v16378_v44 = vadd.f32 %v16377_v49, %v16376_v33 }
 0x8ec   :  { %v16379_v15 = vpop.f32.mrf.mxu1 }
 0x8ed   :  { %v14274_v61 = vadd.f32 %v16378_v44, %v14199_v59 }
 0x8ee   :  { %v16380_v20 = vpop.f32.mrf.mxu1 }
 0x8ef   :  { %v16381_v39 = vadd.f32 %v16380_v20, %v16379_v15  ;;  %v14289_v32 = vmul.f32 %v16128_v12, %v14274_v61 }
 0x8f1   :  { %v14279_v8 = vadd.f32 %v16381_v39, %v14204_v24  ;;  %14291 = vadd.xlane.f32.xlu0 %v14289_v32 }
 0x8f3   :  { %v19280_v53 = vmul.f32 %v16128_v12, %v14279_v8 }
 0x95c   :  { %v13932_v36 = vpop.xlane.xlu0 %13931 }
 0x95d   :  { %v13943_v9 = vsub.f32 %v19391_v23, %v13932_v36  ;;  %v13944_v42 = vsub.f32 %v19403_v62, %v13932_v36  ;;  %v13945_v48 = vsub.f32 %v19390_v6, %v13932_v36  ;;  %v13946_v50 = vsub.f32 %v19402_v37, %v13932_v36 }
 0x95e   :  { %v13947_v25 = vsub.f32 %v19406_v11, %v13932_v36  ;;  %v13948_v62 = vsub.f32 %v19407_v4, %v13932_v36  ;;  %v13949_v30 = vsub.f32 %v19253_v63, %v13932_v36  ;;  %v13951_v46 = vsub.f32 %v19268_v0, %v13932_v36 }
 0x95f   :  { %v13961_v31 = vmul.f32 1.442695, %v13943_v9  ;;  %v13963_v56 = vmul.f32 1.442695, %v13944_v42  ;;  %v13965_v57 = vmul.f32 1.442695, %v13945_v48 }
 0x960   :  { %v13942_v10 = vpop.xlane.xlu0 %13941  ;;  %v13967_v29 = vmul.f32 1.442695, %v13946_v50  ;;  %v13969_v52 = vmul.f32 1.442695, %v13947_v25  ;;  %v13973_v4 = vmul.f32 1.442695, %v13949_v30 }
 0x961   :  { %18258 = vpow2.f32 %v13961_v31  ;;  %v13952_v35 = vsub.f32 %v19001_v16, %v13942_v10  ;;  %v13953_v43 = vsub.f32 %v19004_v26, %v13942_v10  ;;  %v13954_v23 = vsub.f32 %v19063_v41, %v13942_v10  ;;  %v16129_v25 = vld [vmem:[#allocation2] ss:$0 sm:$0xff] }
 0x962   :  { %18260 = vpow2.f32 %v13963_v56  ;;  %v13955_v11 = vsub.f32 %v19392_v14, %v13942_v10  ;;  %v13950_v16 = vsub.f32 %v19258_v7, %v13932_v36  ;;  %v13971_v26 = vmul.f32 1.442695, %v13948_v62 }
 0x963   :  { %18262 = vpow2.f32 %v13965_v57  ;;  %v13979_v6 = vmul.f32 1.442695, %v13952_v35  ;;  %v13981_v37 = vmul.f32 1.442695, %v13953_v43  ;;  %v13983_v55 = vmul.f32 1.442695, %v13954_v23 }
 0x964   :  { %18264 = vpow2.f32 %v13967_v29  ;;  %v13956_v41 = vsub.f32 %v19234_v5, %v13942_v10  ;;  %v13985_v34 = vmul.f32 1.442695, %v13955_v11  ;;  %v13957_v63 = vsub.f32 %v19247_v19, %v13942_v10 }
 0x965   :  { %18266 = vpow2.f32 %v13979_v6  ;;  %v13975_v47 = vmul.f32 1.442695, %v13950_v16  ;;  %v13958_v14 = vsub.f32 %v19261_v17, %v13942_v10  ;;  %v13977_v40 = vmul.f32 1.442695, %v13951_v46 }
 0x966   :  { %18268 = vpow2.f32 %v13981_v37  ;;  %v13987_v1 = vmul.f32 1.442695, %v13956_v41  ;;  %v13959_v7 = vsub.f32 %v19273_v45, %v13942_v10  ;;  %v13989_v51 = vmul.f32 1.442695, %v13957_v63 }
 0x967   :  { %18270 = vpow2.f32 %v13969_v52  ;;  %v13960_v60 = vsub.f32 %v19276_v13, %v13942_v10  ;;  %v13991_v19 = vmul.f32 1.442695, %v13958_v14 }
 0x968   :  { %18272 = vpow2.f32 %v13983_v55  ;;  %v13993_v45 = vmul.f32 1.442695, %v13959_v7 }
 0x969   :  { %18274 = vpow2.f32 %v13971_v26  ;;  %v13995_v38 = vmul.f32 1.442695, %v13960_v60 }
 0x96a   :  { %18276 = vpow2.f32 %v13973_v4 }
 0x96b   :  { %18278 = vpow2.f32 %v13985_v34 }
 0x96c   :  { %18280 = vpow2.f32 %v13975_v47 }
 0x96d   :  { %18282 = vpow2.f32 %v13987_v1 }
 0x96e   :  { %v19299_v5 = vpop.eup %18258  ;;  %18284 = vpow2.f32 %v13977_v40 }
 0x96f   :  { %v19301_v0 = vpop.eup %18260  ;;  %18286 = vpow2.f32 %v13989_v51 }
 0x970   :  { %v19304_v22 = vpop.eup %18262  ;;  %v13997_v17 = vadd.f32 %v19301_v0, %v19299_v5  ;;  %18288 = vpow2.f32 %v13991_v19 }
 0x971   :  { %v18265_v54 = vpop.eup %18264  ;;  %18290 = vpow2.f32 %v13993_v45 }
 0x972   :  { %v19308_v18 = vpop.eup %18266  ;;  %v13998_v27 = vadd.f32 %v19304_v22, %v13997_v17  ;;  %18292 = vpow2.f32 %v13995_v38 }
 0x973   :  { %v19311_v28 = vpop.eup %18268 }
 0x974   :  { %v13999_v13 = vadd.f32 %v18265_v54, %v13998_v27  ;;  %v14007_v33 = vadd.f32 %v19311_v28, %v19308_v18  ;;  %v18271_v21 = vpop.eup %18270 }
 0x975   :  { %v19315_v58 = vpop.eup %18272 }
 0x976   :  { %v14000_v49 = vadd.f32 %v18271_v21, %v13999_v13  ;;  %v18275_v59 = vpop.eup %18274  ;;  %v14008_v44 = vadd.f32 %v19315_v58, %v14007_v33 }
 0x977   :  { %v18277_v15 = vpop.eup %18276 }
 0x978   :  { %v14001_v2 = vadd.f32 %v18275_v59, %v14000_v49  ;;  %v19318_v3 = vpop.eup %18278 }
 0x979   :  { %v18281_v61 = vpop.eup %18280  ;;  %v14009_v24 = vadd.f32 %v19318_v3, %v14008_v44 }
 0x97a   :  { %v14002_v20 = vadd.f32 %v18277_v15, %v14001_v2  ;;  %v19321_v39 = vpop.eup %18282  ;;  %v14292_v29 = vpop.xlane.xlu0 %14291 }
 0x97b   :  { %v18285_v12 = vpop.eup %18284  ;;  %v14010_v32 = vadd.f32 %v19321_v39, %v14009_v24  ;;  %v14302_v35 = vadd.f32 %v16129_v25, %v14292_v29 }
 0x97c   :  { %v14003_v8 = vadd.f32 %v18281_v61, %v14002_v20  ;;  %v18287_v36 = vpop.eup %18286 }
 0x97d   :  { %v14011_v42 = vadd.f32 %v18287_v36, %v14010_v32  ;;  %v18289_v48 = vpop.eup %18288  ;;  %18294 = vtanh.f32 %v14302_v35 }
 0x97e   :  { %v14004_v9 = vadd.f32 %v18285_v12, %v14003_v8  ;;  %v18291_v31 = vpop.eup %18290 }
 0x97f   :  { %v14012_v50 = vadd.f32 %v18289_v48, %v14011_v42  ;;  %v18293_v57 = vpop.eup %18292 }
 0x980   :  { %14005 = vadd.xlane.f32.xlu1 %v14004_v9 }
 0x981   :  { %v14013_v56 = vadd.f32 %v18291_v31, %v14012_v50 }
 0x983   :  { %v14014_v10 = vadd.f32 %v18293_v57, %v14013_v56 }
 0x985   :  { %14015 = vadd.xlane.f32.xlu1 %v14014_v10 }
 0x989   :  { %14293 = vadd.xlane.f32.xlu1 %v19280_v53 }
 0x98a   :  { %v18295_v43 = vpop.eup %18294 }
 0x98b   :  { %14307 = vst.msk [vmem:[%s19356_s12] sm:$0xff] %vm14306_vm0, %v18295_v43 }
 0xa09   :  { %v14006_v23 = vpop.xlane.xlu1 %14005 }
 0xa0a   :  { %18296 = vrcp.f32 %v14006_v23 }
 0xa0e   :  { %v14016_v62 = vpop.xlane.xlu1 %14015 }
 0xa0f   :  { %18298 = vrcp.f32 %v14016_v62 }
 0xa12   :  { %v14294_v6 = vpop.xlane.xlu1 %14293 }
 0xa13   :  { %v14303_v37 = vadd.f32 %v16129_v25, %v14294_v6 }
 0xa15   :  { %18300 = vtanh.f32 %v14303_v37 }
 0xa17   :  { %v18297_v30 = vpop.eup %18296 }
 0xa18   :  { %v14019_v53 = vmul.f32 %v18297_v30, %v14006_v23 }
 0xa1a   :  { %v14021_v52 = vsub.f32 2.0, %v14019_v53 }
 0xa1c   :  { %v14023_v11 = vmul.f32 %v18297_v30, %v14021_v52  ;;  %v18299_v55 = vpop.eup %18298 }
 0xa1d   :  { %v14020_v1 = vmul.f32 %v18299_v55, %v14016_v62 }
 0xa1e   :  { %v14025_v16 = vmul.f32 %v19299_v5, %v14023_v11  ;;  %v14026_v26 = vmul.f32 %v19301_v0, %v14023_v11  ;;  %v14027_v41 = vmul.f32 %v19304_v22, %v14023_v11  ;;  %v14028_v46 = vmul.f32 %v18265_v54, %v14023_v11 }
 0xa1f   :  { %v14029_v4 = vmul.f32 %v18271_v21, %v14023_v11  ;;  %v14030_v34 = vmul.f32 %v18275_v59, %v14023_v11  ;;  %v14031_v63 = vmul.f32 %v18277_v15, %v14023_v11  ;;  %v14032_v47 = vmul.f32 %v18281_v61, %v14023_v11 }
 0xa20   :  { %v14033_v14 = vmul.f32 %v18285_v12, %v14023_v11  ;;  %14043 = vst [vmem:[#allocation18] sm:$0xff] %v14025_v16  ;;  %14044 = vst [vmem:[#allocation18 + $0x8] sm:$0xff] %v14026_v26  ;;  %v14022_v40 = vsub.f32 2.0, %v14020_v1 }
 0xa21   :  { %14045 = vst [vmem:[#allocation18 + $0x10] sm:$0xff] %v14027_v41  ;;  %14046 = vst [vmem:[#allocation18 + $0x18] sm:$0xff] %v14028_v46 }
 0xa22   :  { %14047 = vst [vmem:[#allocation18 + $0x20] sm:$0xff] %v14029_v4  ;;  %14048 = vst [vmem:[#allocation18 + $0x28] sm:$0xff] %v14030_v34  ;;  %v18301_v7 = vpop.eup %18300  ;;  %v14024_v51 = vmul.f32 %v18299_v55, %v14022_v40 }
 0xa23   :  { %14049 = vst [vmem:[#allocation18 + $0x30] sm:$0xff] %v14031_v63  ;;  %14050 = vst [vmem:[#allocation18 + $0x38] sm:$0xff] %v14032_v47 }
 0xa24   :  { %14051 = vst [vmem:[#allocation18 + $0x40] sm:$0xff] %v14033_v14  ;;  %14308 = vst.msk [vmem:[%s19356_s12 + $0x8] sm:$0xff] %vm14306_vm0, %v18301_v7  ;;  %v14034_v5 = vmul.f32 %v19308_v18, %v14024_v51  ;;  %v14035_v0 = vmul.f32 %v19311_v28, %v14024_v51  ;;  %v14036_v60 = vmul.f32 %v19315_v58, %v14024_v51  ;;  %s18496_s12 = scalar_lea.vmem %s14315_s17, 2304 }
 0xa25   :  { %v14037_v19 = vmul.f32 %v19318_v3, %v14024_v51  ;;  %v14038_v22 = vmul.f32 %v19321_v39, %v14024_v51  ;;  %v14039_v17 = vmul.f32 %v18287_v36, %v14024_v51  ;;  %v14040_v54 = vmul.f32 %v18289_v48, %v14024_v51  ;;  %p18497_p3 = scmp.ne.s32.totalorder %s14315_s17, %s18496_s12  ;;  %p18502_p5 = scmp.lt.s32.totalorder %s18496_s12, %s18496_s12 }
 0xa26   :  { %v14041_v45 = vmul.f32 %v18291_v31, %v14024_v51  ;;  %v14042_v27 = vmul.f32 %v18293_v57, %v14024_v51  ;;  %14052 = vst [vmem:[#allocation18 + $0x48] sm:$0xff] %v14034_v5  ;;  %14053 = vst [vmem:[#allocation18 + $0x50] sm:$0xff] %v14035_v0 }
 0xa27   :  { %14054 = vst [vmem:[#allocation18 + $0x58] sm:$0xff] %v14036_v60  ;;  %14055 = vst [vmem:[#allocation18 + $0x60] sm:$0xff] %v14037_v19  ;;  %p18503_p6 = por %p18502_p5, %p18501_p4 }
 0xa28   :  { %14056 = vst [vmem:[#allocation18 + $0x68] sm:$0xff] %v14038_v22  ;;  %14057 = vst [vmem:[#allocation18 + $0x70] sm:$0xff] %v14039_v17 }
 0xa29   :  { %14058 = vst [vmem:[#allocation18 + $0x78] sm:$0xff] %v14040_v54  ;;  %14059 = vst [vmem:[#allocation18 + $0x80] sm:$0xff] %v14041_v45  ;;  %p18504_p7 = pnand %p18503_p6, %p18497_p3 }
 0xa2a   :  { %14060 = vst [vmem:[#allocation18 + $0x88] sm:$0xff] %v14042_v27 }
 0xa2b   :  { %18507 = shalt.err (!%p18504_p7)
}
 0xa2c   :  { %s18546_s18 = smov 1152   ;;  %s18547_s1 = smov 72  }
 0xa2d   :  { %14320 = dma.vmem_to_hbm [thread:$0]  %s14315_s17, 2304, %s19355_s11, [#allocation5], %s18546_s18, %s18546_s18, %s18547_s1  }
 0xa2e   :  { %18526 = dma.done.wait [#allocation5], 2304  }
 0xa2f   :  { %18527 = vsyncadd [#allocation5], 4294964992 }
 0xa30   :  { %14328 = vsyncpa [#allocation4], 1 }
 0xa31   :  { %14329 = vsyncpa [#allocation7], 1 }
 0xa32   :  { %14330 = vsyncpa [#allocation10], 1 }
 0xa33   :  { %14331 = vsyncpa [#allocation13], 1 }
 0xa34   :  { %14332 = vsyncpa [#allocation16], 1 }
 0xa35   :  { %14333 = vsyncpa [#allocation5], 1 }

</bundles_post_ra>
